<compile_context>
chip_gen: v7x
topology: tpu7x:2x2x1
jax: 0.10.0
libtpu: 0.0.40
codegen_flags: <defaults>
</compile_context>

<pallas_src>
import numpy as np
import jax
import jax.numpy as jnp
from jax.experimental import pallas as pl
from jax.experimental.pallas import tpu as pltpu


# ----------------------------- small helpers --------------------------------

def _param_spec(arr):
    """Full-array block (weights / scales): same block index every grid step."""
    nd = arr.ndim
    return pl.BlockSpec(arr.shape, lambda i, _nd=nd: (0,) * _nd)


def _vmem_specs(n):
    return [pl.BlockSpec(memory_space=pltpu.MemorySpace.VMEM) for _ in range(n)]


def _pick_batch_tile(B, cap=8):
    """Largest divisor of B <= cap that still leaves >= 2 grid steps when B >= 2,
    so the 'parallel' batch axis can shard across v7x's two TensorCores.
    (Sweep `cap` upward on v6e's 128 MiB VMEM; keep it small on v7x's 64 MiB.)"""
    cap = max(1, min(cap, B // 2)) if B >= 2 else 1
    for d in range(cap, 0, -1):
        if B % d == 0:
            return d
    return 1


def _pick_row_tile(R, cap=512):
    """Wavelet row tile: multiple of 16 (bf16 sublane pack), divides R, and leaves
    >= 2 grid steps when R is large enough; falls back to the full extent."""
    cap = min(cap, R // 2) if R >= 32 else R
    start = cap - cap % 16
    for d in range(start, 0, -16):
        if R % d == 0:
            return d
    return R


# ------------------------------ activations ---------------------------------

def _relu(x):
    return jnp.maximum(x, 0.0)


def _leaky_relu_02(x):
    return jnp.where(x > 0, x, 0.2 * x)


# TODO(synk): PReLU slope fixed at the PyTorch init value 0.25 (single shared
# parameter); plug in the learned value if porting a trained checkpoint.
def _prelu_025(x):
    return jnp.where(x > 0, x, 0.25 * x)


def _elu_03(x):  # nn.ELU(alpha=0.3); clamp before exp so the dead branch never overflows
    return jnp.where(x > 0, x, 0.3 * (jnp.exp(jnp.minimum(x, 0.0)) - 1.0))


# --------------------------- wavelet (mWDN) kernel ---------------------------
# Both mWDN levels fused: sigmoid(Linear_H), sigmoid(Linear_L), AvgPool1d(2) per
# level.  The H|L concat and the pool's even/odd column selection are folded into
# the weights at init, so each level is two matmuls + sigmoid + one add.
# Level 2 consumes the pooled L branch of level 1 directly from VMEM.

def _wavelet2_kernel(x_ref, w1e_ref, w1o_ref, b1e_ref, b1o_ref,
                     w2e_ref, w2o_ref, b2e_ref, b2o_ref,
                     o1_ref, o2_ref):
    x = x_ref[...]                                              # (br, L) bf16
    L = x.shape[1]
    half, quart = L // 2, L // 4
    ye = jnp.dot(x, w1e_ref[...], preferred_element_type=jnp.float32)
    yo = jnp.dot(x, w1o_ref[...], preferred_element_type=jnp.float32)
    lvl1 = 0.5 * (jax.nn.sigmoid(ye + b1e_ref[...]) +
                  jax.nn.sigmoid(yo + b1o_ref[...]))            # (br, L)
    xh1 = lvl1[:, :half]
    xl1 = lvl1[:, half:]
    o1_ref[0] = xh1.astype(jnp.bfloat16)                        # pooled H, level 1
    o1_ref[1] = xl1.astype(jnp.bfloat16)                        # pooled L, level 1
    xl1b = xl1.astype(jnp.bfloat16)
    ye2 = jnp.dot(xl1b, w2e_ref[...], preferred_element_type=jnp.float32)
    yo2 = jnp.dot(xl1b, w2o_ref[...], preferred_element_type=jnp.float32)
    lvl2 = 0.5 * (jax.nn.sigmoid(ye2 + b2e_ref[...]) +
                  jax.nn.sigmoid(yo2 + b2o_ref[...]))           # (br, L/2)
    o2_ref[0] = lvl2[:, :quart].astype(jnp.bfloat16)            # pooled H, level 2
    o2_ref[1] = lvl2[:, quart:].astype(jnp.bfloat16)            # pooled L, level 2


def wavelet_stage(x_rl_bf16, wav1, wav2):
    """x: (R, L) bf16 -> ((2, R, L/2), (2, R, L/4)) bf16, [0]=H branch, [1]=L."""
    R, L = x_rl_bf16.shape
    assert L % 4 == 0, "seq_len must be divisible by 4 (two AvgPool1d(2) levels)"
    half, quart = L // 2, L // 4
    br = _pick_row_tile(R)
    assert R % br == 0
    args = [x_rl_bf16, *wav1, *wav2]
    in_specs = ([pl.BlockSpec((br, L), lambda i: (i, 0))] +
                [_param_spec(a) for a in args[1:]])
    out_shape = (jax.ShapeDtypeStruct((2, R, half), jnp.bfloat16),
                 jax.ShapeDtypeStruct((2, R, quart), jnp.bfloat16))
    out_specs = (pl.BlockSpec((2, br, half), lambda i: (0, i, 0)),
                 pl.BlockSpec((2, br, quart), lambda i: (0, i, 0)))
    return pl.pallas_call(
        _wavelet2_kernel,
        out_shape=out_shape,
        grid=(R // br,),
        in_specs=in_specs,
        out_specs=out_specs,
        compiler_params=pltpu.CompilerParams(dimension_semantics=("parallel",)),
    )(*args)


# --------------------------- fused ResCNN kernel ------------------------------

def _conv_taps(x, w_ref, k):
    """'same' zero-padded conv1d (stride 1) as k tap matmuls (no im2col concat).

    x: (bb, L, cin) bf16; w_ref: Ref[(k, cin, cout)] bf16 -> (bb, L, cout) f32.
    """
    bb, L, cin = x.shape
    dn = (((2,), (0,)), ((), ()))
    if k == 1:
        return jax.lax.dot_general(x, w_ref[0], dn, preferred_element_type=jnp.float32)
    pad_l, pad_r = (k - 1) // 2, k // 2
    # TODO(synk): a persistent VMEM scratch halo buffer would avoid re-building the
    # padded copy per layer; with tap-accumulation the remaining copy is small.
    xp = jnp.concatenate(
        [jnp.zeros((bb, pad_l, cin), x.dtype), x,
         jnp.zeros((bb, pad_r, cin), x.dtype)], axis=1)          # (bb, L+k-1, cin)
    acc = jax.lax.dot_general(xp[:, 0:L, :], w_ref[0], dn,
                              preferred_element_type=jnp.float32)
    for t in range(1, k):
        acc = acc + jax.lax.dot_general(xp[:, t:t + L, :], w_ref[t], dn,
                                        preferred_element_type=jnp.float32)
    return acc


def _rescnn_kernel(x_ref,
                   wA_ref, wB_ref, wC_ref, sc_shift_ref,
                   b2w_ref, b2s_ref, b2t_ref,
                   b3w_ref, b3s_ref, b3t_ref,
                   b4w_ref, b4s_ref, b4t_ref,
                   o_ref):
    bf = jnp.bfloat16
    # (bb, C, L) -> (bb, L, C) channels-last inside the kernel: the transpose rides
    # the otherwise-idle XLU slot (routed through f32 for the most robust lowering).
    x = jnp.transpose(x_ref[...].astype(jnp.float32), (0, 2, 1)).astype(bf)

    # block1 fully fused:
    #   cols 0:64   carry the c1 -> c2 -> c3 conv chain (no BN, matching PyTorch),
    #   cols 64:128 carry the BN-scaled 1x1 shortcut via identity center-taps,
    #   wC folds the shortcut back into c3's 64 output columns -> no lane splits.
    h = _conv_taps(x, wA_ref, 7)                                 # (bb, L, 128) f32
    h = _conv_taps(h.astype(bf), wB_ref, 5)                      # (bb, L, 128)
    h = _conv_taps(h.astype(bf), wC_ref, 3)                      # (bb, L, 64) = c3 + sc*scale
    h = _relu(h + sc_shift_ref[...])

    # block2..4: conv + folded BN + activation (f32), fed onward as bf16.
    h = _leaky_relu_02(_conv_taps(h.astype(bf), b2w_ref, 3) * b2s_ref[...] + b2t_ref[...])
    h = _prelu_025(_conv_taps(h.astype(bf), b3w_ref, 3) * b3s_ref[...] + b3t_ref[...])
    h = _elu_03(_conv_taps(h.astype(bf), b4w_ref, 3) * b4s_ref[...] + b4t_ref[...])

    # AdaptiveAvgPool1d(1) + Squeeze.
    o_ref[...] = jnp.mean(h, axis=1, keepdims=True)              # (bb, 1, 128)


def rescnn_forward(x_ncl_bf16, p):
    """Whole ResCNN branch (block1 + blocks 2-4 + GAP) as one fused kernel."""
    B, C, L = x_ncl_bf16.shape
    assert C == 64, "ResCNN(64) expects 64 input channels"
    bb = _pick_batch_tile(B)
    assert B % bb == 0
    args = [x_ncl_bf16,
            p['wA'], p['wB'], p['wC'], p['sc_shift'],
            p['b2_w'], p['b2_s'], p['b2_t'],
            p['b3_w'], p['b3_s'], p['b3_t'],
            p['b4_w'], p['b4_s'], p['b4_t']]
    in_specs = ([pl.BlockSpec((bb, C, L), lambda i: (i, 0, 0))] +
                [_param_spec(a) for a in args[1:]])
    out = pl.pallas_call(
        _rescnn_kernel,
        out_shape=jax.ShapeDtypeStruct((B, 1, 128), jnp.float32),
        grid=(B // bb,),
        in_specs=in_specs,
        out_specs=pl.BlockSpec((bb, 1, 128), lambda i: (i, 0, 0)),
        compiler_params=pltpu.CompilerParams(dimension_semantics=("parallel",)),
    )(*args)
    return out.reshape(B, 128)


# ------------------------------ classifier head ------------------------------
# Consumes the three ResCNN outputs directly (x1/x2 hold the H and L branches
# stacked along batch); weight rows are sliced at 128-aligned offsets in-kernel,
# so no wrapper-side feature concat is needed.

def _head_kernel(x0_ref, x1_ref, x2_ref, w_ref, b_ref, o_ref):
    B = x0_ref.shape[0]

    def chunk(x, r0):
        return jnp.dot(x.astype(jnp.bfloat16), w_ref[r0:r0 + 128, :],
                       preferred_element_type=jnp.float32)

    acc = chunk(x0_ref[...], 0)                                  # x_out
    acc = acc + chunk(x1_ref[0:B, :], 128) + chunk(x1_ref[B:2 * B, :], 256)  # xh_1, xl_1
    acc = acc + chunk(x2_ref[0:B, :], 384) + chunk(x2_ref[B:2 * B, :], 512)  # xh_2, xl_2
    o_ref[...] = acc + b_ref[...]


def head_forward(x0, x1, x2, wt_pad, b_pad):
    B = x0.shape[0]
    return pl.pallas_call(
        _head_kernel,
        out_shape=jax.ShapeDtypeStruct((B, wt_pad.shape[1]), jnp.float32),
        in_specs=_vmem_specs(5),
        out_specs=pl.BlockSpec(memory_space=pltpu.MemorySpace.VMEM),
    )(x0, x1, x2, wt_pad, b_pad)


# --------------------------- parameter creation ------------------------------

L_FILTER = [-0.0106, 0.0329, 0.0308, -0.187, -0.028, 0.6309, 0.7148, 0.2304]
H_FILTER = [-0.2304, 0.7148, -0.6309, -0.028, 0.187, 0.0308, -0.0329, -0.0106]


def create_W(P, is_l, rng):
    filt = L_FILTER if is_l else H_FILTER
    max_eps = min(abs(v) for v in filt)
    w = rng.standard_normal((P, P)) * 0.1 * max_eps
    for i in range(P):
        for j in range(i, min(i + len(filt), P)):
            w[i, j] = filt[j - i]
    return jnp.asarray(w, jnp.float32)


def _pack_wavelet(W_H, W_L, b_H, b_L):
    """Fold the torch Linear transpose, H|L column concat and AvgPool1d(2) even/odd
    selection into two matmul operands (Sigmoid runs before the pool average)."""
    WT_H, WT_L = jnp.transpose(W_H), jnp.transpose(W_L)
    w_even = jnp.concatenate([WT_H[:, 0::2], WT_L[:, 0::2]], axis=1)
    w_odd = jnp.concatenate([WT_H[:, 1::2], WT_L[:, 1::2]], axis=1)
    b_even = jnp.concatenate([b_H[0::2], b_L[0::2]])[None, :]
    b_odd = jnp.concatenate([b_H[1::2], b_L[1::2]])[None, :]
    return (w_even.astype(jnp.bfloat16), w_odd.astype(jnp.bfloat16),
            b_even.astype(jnp.float32), b_odd.astype(jnp.float32))


def _conv_w(key, cout, cin, k):
    bound = 1.0 / np.sqrt(cin * k)
    return jax.random.uniform(key, (cout, cin, k), jnp.float32, -bound, bound)


def _bn_fold(key, c, eps=1e-5):
    k1, k2, k3, k4 = jax.random.split(key, 4)
    gamma = 1.0 + 0.1 * jax.random.normal(k1, (c,), jnp.float32)
    beta = 0.1 * jax.random.normal(k2, (c,), jnp.float32)
    mean = 0.1 * jax.random.normal(k3, (c,), jnp.float32)
    var = jnp.abs(1.0 + 0.1 * jax.random.normal(k4, (c,), jnp.float32))
    scale = gamma / jnp.sqrt(var + eps)
    shift = beta - mean * scale
    return scale, shift


def init_rescnn_params(key, c_in=64, nf=64):
    keys = jax.random.split(key, 11)

    def taps(w):  # torch (cout, cin, k) -> (k, cin, cout) for one-matmul-per-tap
        return jnp.transpose(w, (2, 1, 0))

    c1 = _conv_w(keys[0], nf, c_in, 7)
    c2 = _conv_w(keys[1], nf, nf, 5)
    c3 = _conv_w(keys[2], nf, nf, 3)
    sc = _conv_w(keys[3], nf, c_in, 1)
    sc_scale, sc_shift = _bn_fold(keys[4], nf)

    # Fused block1 weights: cols 0:nf = conv chain, cols nf:2nf = shortcut carry.
    wA = jnp.zeros((7, c_in, 2 * nf), jnp.float32).at[:, :, :nf].set(taps(c1))
    wA = wA.at[3, :, nf:].set((sc[:, :, 0] * sc_scale[:, None]).T)   # BN scale folded in
    wB = jnp.zeros((5, 2 * nf, 2 * nf), jnp.float32).at[:, :nf, :nf].set(taps(c2))
    wB = wB.at[2, nf:, nf:].set(jnp.eye(nf))                         # identity carry (center tap)
    wC = jnp.zeros((3, 2 * nf, nf), jnp.float32).at[:, :nf, :].set(taps(c3))
    wC = wC.at[1, nf:, :].set(jnp.eye(nf))                           # add shortcut into c3 output

    b2 = _conv_w(keys[5], nf * 2, nf, 3)
    b2s, b2t = _bn_fold(keys[6], nf * 2)
    b3 = _conv_w(keys[7], nf * 4, nf * 2, 3)
    b3s, b3t = _bn_fold(keys[8], nf * 4)
    b4 = _conv_w(keys[9], nf * 2, nf * 4, 3)
    b4s, b4t = _bn_fold(keys[10], nf * 2)

    bf = jnp.bfloat16
    return {
        'wA': wA.astype(bf), 'wB': wB.astype(bf), 'wC': wC.astype(bf),
        'sc_shift': sc_shift.reshape(1, 1, nf),
        'b2_w': taps(b2).astype(bf), 'b2_s': b2s.reshape(1, 1, -1), 'b2_t': b2t.reshape(1, 1, -1),
        'b3_w': taps(b3).astype(bf), 'b3_s': b3s.reshape(1, 1, -1), 'b3_t': b3t.reshape(1, 1, -1),
        'b4_w': taps(b4).astype(bf), 'b4_s': b4s.reshape(1, 1, -1), 'b4_t': b4t.reshape(1, 1, -1),
    }


def init_params(seq_len, activity_num, key):
    assert seq_len % 4 == 0, "seq_len must be divisible by 4"
    rng = np.random.default_rng(0)
    keys = jax.random.split(key, 9)
    L = seq_len
    bnd1 = 1.0 / np.sqrt(L)
    bnd2 = 1.0 / np.sqrt(L // 2)
    bnd3 = 1.0 / np.sqrt(5 * 128)
    W1_H = create_W(L, False, rng)
    W1_L = create_W(L, True, rng)
    W2_H = create_W(L // 2, False, rng)
    W2_L = create_W(L // 2, True, rng)
    b1_H = jax.random.uniform(keys[0], (L,), jnp.float32, -bnd1, bnd1)
    b1_L = jax.random.uniform(keys[1], (L,), jnp.float32, -bnd1, bnd1)
    b2_H = jax.random.uniform(keys[2], (L // 2,), jnp.float32, -bnd2, bnd2)
    b2_L = jax.random.uniform(keys[3], (L // 2,), jnp.float32, -bnd2, bnd2)
    out_w = jax.random.uniform(keys[7], (activity_num, 5 * 128), jnp.float32, -bnd3, bnd3)
    out_b = jax.random.uniform(keys[8], (activity_num,), jnp.float32, -bnd3, bnd3)
    # Pad the classifier out-dim to 128 lanes (zero columns) for lane-dense stores.
    wt_pad = jnp.zeros((5 * 128, 128), jnp.float32).at[:, :activity_num].set(out_w.T)
    b_pad = jnp.zeros((1, 128), jnp.float32).at[0, :activity_num].set(out_b)
    return {
        'wav1': _pack_wavelet(W1_H, W1_L, b1_H, b1_L),
        'wav2': _pack_wavelet(W2_H, W2_L, b2_H, b2_L),
        'rescnn_x': init_rescnn_params(keys[4], 64),
        'rescnn_x1': init_rescnn_params(keys[5], 64),
        'rescnn_x2': init_rescnn_params(keys[6], 64),
        'out_wt': wt_pad.astype(jnp.bfloat16),
        'out_b': b_pad,
    }


# ------------------------------ model forward --------------------------------

def wavelet2_rescnn_forward(x_bcl, params, activity_num):
    B, C, L = x_bcl.shape
    assert L % 4 == 0, "seq_len must be divisible by 4"
    # bf16 interfaces: the wavelet stage is HBM-bound and every kernel casts to
    # bf16 for the MXU anyway, so halve HBM traffic at the kernel boundaries.
    x_bf = x_bcl.astype(jnp.bfloat16)

    # mWDN levels 1 + 2, fused (H filter, L filter, Sigmoid, AvgPool1d(2) per level).
    lvl1, lvl2 = wavelet_stage(x_bf.reshape(B * C, L), params['wav1'], params['wav2'])
    # (2, B*C, L/2) -> (2B, C, L/2): contiguous row-major, so the reshape is free and
    # the H/L branches arrive already batch-stacked for the shared-weight ResCNNs.
    x1_in = lvl1.reshape(2 * B, C, L // 2)
    x2_in = lvl2.reshape(2 * B, C, L // 4)

    x_out = rescnn_forward(x_bf, params['rescnn_x'])             # (B, 128)
    x1_out = rescnn_forward(x1_in, params['rescnn_x1'])          # (2B, 128): [0:B]=xh_1, [B:]=xl_1
    x2_out = rescnn_forward(x2_in, params['rescnn_x2'])          # (2B, 128): [0:B]=xh_2, [B:]=xl_2

    logits = head_forward(x_out, x1_out, x2_out,
                          params['out_wt'], params['out_b'])[:, :activity_num]
    return x_out, logits


# ----------------------------------- main ------------------------------------

if __name__ == "__main__":
    B = 2
    SUBCARRIER = 64        # ResCNN(64) hard-codes 64 input channels
    SEQ_LEN = 32           # small stand-in for the default 300 (divisible by 4)
    ACTIVITY_NUM = 6

    key = jax.random.PRNGKey(0)
    k_in, k_p = jax.random.split(key)
    x = jax.random.normal(k_in, (B, SUBCARRIER, SEQ_LEN), jnp.float32)
    params = init_params(SEQ_LEN, ACTIVITY_NUM, k_p)

    fwd = jax.jit(wavelet2_rescnn_forward, static_argnums=(2,))
    x_out, out = fwd(x, params, ACTIVITY_NUM)
    jax.block_until_ready((x_out, out))

    assert x_out.shape == (B, 128)
    assert out.shape == (B, ACTIVITY_NUM)
    assert bool(jnp.all(jnp.isfinite(x_out))) and bool(jnp.all(jnp.isfinite(out)))
    print("KERNEL_OK")
</pallas_src>

<mosaic_0001>
module attributes {stable_mosaic.version = 11 : i64} {
  func.func @_wavelet2_kernel(%arg0: i32, %arg1: memref<64x32xbf16, #tpu.memory_space<vmem>>, %arg2: memref<32x32xbf16, #tpu.memory_space<vmem>>, %arg3: memref<32x32xbf16, #tpu.memory_space<vmem>>, %arg4: memref<1x32xf32, #tpu.memory_space<vmem>>, %arg5: memref<1x32xf32, #tpu.memory_space<vmem>>, %arg6: memref<16x16xbf16, #tpu.memory_space<vmem>>, %arg7: memref<16x16xbf16, #tpu.memory_space<vmem>>, %arg8: memref<1x16xf32, #tpu.memory_space<vmem>>, %arg9: memref<1x16xf32, #tpu.memory_space<vmem>>, %arg10: memref<2x64x16xbf16, #tpu.memory_space<vmem>>, %arg11: memref<2x64x8xbf16, #tpu.memory_space<vmem>>) attributes {dimension_semantics = [#tpu.dimension_semantics<parallel>], iteration_bounds = array<i64: 2>, scalar_prefetch = 0 : i64, scratch_operands = 0 : i64, tpu.core_type = #tpu.core_type<tc>, window_params = [{transform_indices = @transform_0, window_bounds = array<i64: 64, 32>}, {pipeline_mode = #tpu.pipeline_mode<synchronous>, transform_indices = @transform_1, window_bounds = array<i64: 32, 32>}, {pipeline_mode = #tpu.pipeline_mode<synchronous>, transform_indices = @transform_2, window_bounds = array<i64: 32, 32>}, {pipeline_mode = #tpu.pipeline_mode<synchronous>, transform_indices = @transform_3, window_bounds = array<i64: 1, 32>}, {pipeline_mode = #tpu.pipeline_mode<synchronous>, transform_indices = @transform_4, window_bounds = array<i64: 1, 32>}, {pipeline_mode = #tpu.pipeline_mode<synchronous>, transform_indices = @transform_5, window_bounds = array<i64: 16, 16>}, {pipeline_mode = #tpu.pipeline_mode<synchronous>, transform_indices = @transform_6, window_bounds = array<i64: 16, 16>}, {pipeline_mode = #tpu.pipeline_mode<synchronous>, transform_indices = @transform_7, window_bounds = array<i64: 1, 16>}, {pipeline_mode = #tpu.pipeline_mode<synchronous>, transform_indices = @transform_8, window_bounds = array<i64: 1, 16>}, {transform_indices = @transform_9, window_bounds = array<i64: 2, 64, 16>}, {transform_indices = @transform_10, window_bounds = array<i64: 2, 64, 8>}]} {
    %c0 = arith.constant 0 : index
    %c0_0 = arith.constant 0 : index
    %0 = vector.load %arg1[%c0, %c0_0] : memref<64x32xbf16, #tpu.memory_space<vmem>>, vector<64x32xbf16>
    %c0_1 = arith.constant 0 : index
    %c0_2 = arith.constant 0 : index
    %1 = vector.load %arg2[%c0_1, %c0_2] : memref<32x32xbf16, #tpu.memory_space<vmem>>, vector<32x32xbf16>
    %cst = arith.constant dense<0.000000e+00> : vector<64x32xf32>
    %2 = tpu.matmul %0, %1, %cst {dimension_numbers = #tpu.dot_dimension_numbers<[1], [0], [0], [1], [0, 0, 1, 1], [], []>} : vector<64x32xbf16>, vector<32x32xbf16>, vector<64x32xf32> -> vector<64x32xf32>
    %c0_3 = arith.constant 0 : index
    %c0_4 = arith.constant 0 : index
    %3 = vector.load %arg3[%c0_3, %c0_4] : memref<32x32xbf16, #tpu.memory_space<vmem>>, vector<32x32xbf16>
    %cst_5 = arith.constant dense<0.000000e+00> : vector<64x32xf32>
    %4 = tpu.matmul %0, %3, %cst_5 {dimension_numbers = #tpu.dot_dimension_numbers<[1], [0], [0], [1], [0, 0, 1, 1], [], []>} : vector<64x32xbf16>, vector<32x32xbf16>, vector<64x32xf32> -> vector<64x32xf32>
    %c0_6 = arith.constant 0 : index
    %c0_7 = arith.constant 0 : index
    %5 = vector.load %arg4[%c0_6, %c0_7] : memref<1x32xf32, #tpu.memory_space<vmem>>, vector<1x32xf32>
    %6 = vector.broadcast %5 : vector<1x32xf32> to vector<64x32xf32>
    %7 = arith.addf %2, %6 : vector<64x32xf32>
    %8 = arith.negf %7 : vector<64x32xf32>
    %9 = math.exp %8 : vector<64x32xf32>
    %cst_8 = arith.constant 1.000000e+00 : f32
    %10 = vector.broadcast %cst_8 : f32 to vector<64x32xf32>
    %11 = arith.addf %10, %9 : vector<64x32xf32>
    %12 = arith.divf %10, %11 : vector<64x32xf32>
    %c0_9 = arith.constant 0 : index
    %c0_10 = arith.constant 0 : index
    %13 = vector.load %arg5[%c0_9, %c0_10] : memref<1x32xf32, #tpu.memory_space<vmem>>, vector<1x32xf32>
    %14 = vector.broadcast %13 : vector<1x32xf32> to vector<64x32xf32>
    %15 = arith.addf %4, %14 : vector<64x32xf32>
    %16 = arith.negf %15 : vector<64x32xf32>
    %17 = math.exp %16 : vector<64x32xf32>
    %cst_11 = arith.constant 1.000000e+00 : f32
    %18 = vector.broadcast %cst_11 : f32 to vector<64x32xf32>
    %19 = arith.addf %18, %17 : vector<64x32xf32>
    %20 = arith.divf %18, %19 : vector<64x32xf32>
    %21 = arith.addf %12, %20 : vector<64x32xf32>
    %cst_12 = arith.constant 5.000000e-01 : f32
    %22 = vector.broadcast %cst_12 : f32 to vector<64x32xf32>
    %23 = arith.mulf %22, %21 : vector<64x32xf32>
    %24 = vector.extract_strided_slice %23 {offsets = [0, 0], sizes = [64, 16], strides = [1, 1]} : vector<64x32xf32> to vector<64x16xf32>
    %25 = vector.extract_strided_slice %23 {offsets = [0, 16], sizes = [64, 16], strides = [1, 1]} : vector<64x32xf32> to vector<64x16xf32>
    %26 = arith.truncf %24 : vector<64x16xf32> to vector<64x16xbf16>
    %c0_13 = arith.constant 0 : index
    %c0_14 = arith.constant 0 : index
    %c0_15 = arith.constant 0 : index
    %27 = vector.load %arg10[%c0_13, %c0_14, %c0_15] : memref<2x64x16xbf16, #tpu.memory_space<vmem>>, vector<1x64x16xbf16>
    %28 = vector.shape_cast %27 : vector<1x64x16xbf16> to vector<64x16xbf16>
    %29 = vector.shape_cast %26 : vector<64x16xbf16> to vector<1x64x16xbf16>
    tpu.vector_store %arg10[%c0_13, %c0_14, %c0_15], %29 {strides = array<i32>} : memref<2x64x16xbf16, #tpu.memory_space<vmem>>, vector<1x64x16xbf16>,
    %30 = arith.truncf %25 : vector<64x16xf32> to vector<64x16xbf16>
    %c1 = arith.constant 1 : index
    %c0_16 = arith.constant 0 : index
    %c0_17 = arith.constant 0 : index
    %31 = vector.load %arg10[%c1, %c0_16, %c0_17] : memref<2x64x16xbf16, #tpu.memory_space<vmem>>, vector<1x64x16xbf16>
    %32 = vector.shape_cast %31 : vector<1x64x16xbf16> to vector<64x16xbf16>
    %33 = vector.shape_cast %30 : vector<64x16xbf16> to vector<1x64x16xbf16>
    tpu.vector_store %arg10[%c1, %c0_16, %c0_17], %33 {strides = array<i32>} : memref<2x64x16xbf16, #tpu.memory_space<vmem>>, vector<1x64x16xbf16>,
    %34 = arith.truncf %25 : vector<64x16xf32> to vector<64x16xbf16>
    %c0_18 = arith.constant 0 : index
    %c0_19 = arith.constant 0 : index
    %35 = vector.load %arg6[%c0_18, %c0_19] : memref<16x16xbf16, #tpu.memory_space<vmem>>, vector<16x16xbf16>
    %cst_20 = arith.constant dense<0.000000e+00> : vector<64x16xf32>
    %36 = tpu.matmul %34, %35, %cst_20 {dimension_numbers = #tpu.dot_dimension_numbers<[1], [0], [0], [1], [0, 0, 1, 1], [], []>} : vector<64x16xbf16>, vector<16x16xbf16>, vector<64x16xf32> -> vector<64x16xf32>
    %c0_21 = arith.constant 0 : index
    %c0_22 = arith.constant 0 : index
    %37 = vector.load %arg7[%c0_21, %c0_22] : memref<16x16xbf16, #tpu.memory_space<vmem>>, vector<16x16xbf16>
    %cst_23 = arith.constant dense<0.000000e+00> : vector<64x16xf32>
    %38 = tpu.matmul %34, %37, %cst_23 {dimension_numbers = #tpu.dot_dimension_numbers<[1], [0], [0], [1], [0, 0, 1, 1], [], []>} : vector<64x16xbf16>, vector<16x16xbf16>, vector<64x16xf32> -> vector<64x16xf32>
    %c0_24 = arith.constant 0 : index
    %c0_25 = arith.constant 0 : index
    %39 = vector.load %arg8[%c0_24, %c0_25] : memref<1x16xf32, #tpu.memory_space<vmem>>, vector<1x16xf32>
    %40 = vector.broadcast %39 : vector<1x16xf32> to vector<64x16xf32>
    %41 = arith.addf %36, %40 : vector<64x16xf32>
    %42 = arith.negf %41 : vector<64x16xf32>
    %43 = math.exp %42 : vector<64x16xf32>
    %cst_26 = arith.constant 1.000000e+00 : f32
    %44 = vector.broadcast %cst_26 : f32 to vector<64x16xf32>
    %45 = arith.addf %44, %43 : vector<64x16xf32>
    %46 = arith.divf %44, %45 : vector<64x16xf32>
    %c0_27 = arith.constant 0 : index
    %c0_28 = arith.constant 0 : index
    %47 = vector.load %arg9[%c0_27, %c0_28] : memref<1x16xf32, #tpu.memory_space<vmem>>, vector<1x16xf32>
    %48 = vector.broadcast %47 : vector<1x16xf32> to vector<64x16xf32>
    %49 = arith.addf %38, %48 : vector<64x16xf32>
    %50 = arith.negf %49 : vector<64x16xf32>
    %51 = math.exp %50 : vector<64x16xf32>
    %cst_29 = arith.constant 1.000000e+00 : f32
    %52 = vector.broadcast %cst_29 : f32 to vector<64x16xf32>
    %53 = arith.addf %52, %51 : vector<64x16xf32>
    %54 = arith.divf %52, %53 : vector<64x16xf32>
    %55 = arith.addf %46, %54 : vector<64x16xf32>
    %cst_30 = arith.constant 5.000000e-01 : f32
    %56 = vector.broadcast %cst_30 : f32 to vector<64x16xf32>
    %57 = arith.mulf %56, %55 : vector<64x16xf32>
    %58 = vector.extract_strided_slice %57 {offsets = [0, 0], sizes = [64, 8], strides = [1, 1]} : vector<64x16xf32> to vector<64x8xf32>
    %59 = arith.truncf %58 : vector<64x8xf32> to vector<64x8xbf16>
    %c0_31 = arith.constant 0 : index
    %c0_32 = arith.constant 0 : index
    %c0_33 = arith.constant 0 : index
    %60 = vector.load %arg11[%c0_31, %c0_32, %c0_33] : memref<2x64x8xbf16, #tpu.memory_space<vmem>>, vector<1x64x8xbf16>
    %61 = vector.shape_cast %60 : vector<1x64x8xbf16> to vector<64x8xbf16>
    %62 = vector.shape_cast %59 : vector<64x8xbf16> to vector<1x64x8xbf16>
    tpu.vector_store %arg11[%c0_31, %c0_32, %c0_33], %62 {strides = array<i32>} : memref<2x64x8xbf16, #tpu.memory_space<vmem>>, vector<1x64x8xbf16>,
    %63 = vector.extract_strided_slice %57 {offsets = [0, 8], sizes = [64, 8], strides = [1, 1]} : vector<64x16xf32> to vector<64x8xf32>
    %64 = arith.truncf %63 : vector<64x8xf32> to vector<64x8xbf16>
    %c1_34 = arith.constant 1 : index
    %c0_35 = arith.constant 0 : index
    %c0_36 = arith.constant 0 : index
    %65 = vector.load %arg11[%c1_34, %c0_35, %c0_36] : memref<2x64x8xbf16, #tpu.memory_space<vmem>>, vector<1x64x8xbf16>
    %66 = vector.shape_cast %65 : vector<1x64x8xbf16> to vector<64x8xbf16>
    %67 = vector.shape_cast %64 : vector<64x8xbf16> to vector<1x64x8xbf16>
    tpu.vector_store %arg11[%c1_34, %c0_35, %c0_36], %67 {strides = array<i32>} : memref<2x64x8xbf16, #tpu.memory_space<vmem>>, vector<1x64x8xbf16>,
    return
  }
  func.func @transform_0(%arg0: i32) -> (i32, i32) {
    %c0_i32 = arith.constant 0 : i32
    %c0_i32_0 = arith.constant 0 : i32
    return %arg0, %c0_i32 : i32, i32
  }
  func.func @transform_1(%arg0: i32) -> (i32, i32) {
    %c0_i32 = arith.constant 0 : i32
    %c0_i32_0 = arith.constant 0 : i32
    %c0_i32_1 = arith.constant 0 : i32
    return %c0_i32, %c0_i32_0 : i32, i32
  }
  func.func @transform_2(%arg0: i32) -> (i32, i32) {
    %c0_i32 = arith.constant 0 : i32
    %c0_i32_0 = arith.constant 0 : i32
    %c0_i32_1 = arith.constant 0 : i32
    return %c0_i32, %c0_i32_0 : i32, i32
  }
  func.func @transform_3(%arg0: i32) -> (i32, i32) {
    %c0_i32 = arith.constant 0 : i32
    %c0_i32_0 = arith.constant 0 : i32
    %c0_i32_1 = arith.constant 0 : i32
    return %c0_i32, %c0_i32_0 : i32, i32
  }
  func.func @transform_4(%arg0: i32) -> (i32, i32) {
    %c0_i32 = arith.constant 0 : i32
    %c0_i32_0 = arith.constant 0 : i32
    %c0_i32_1 = arith.constant 0 : i32
    return %c0_i32, %c0_i32_0 : i32, i32
  }
  func.func @transform_5(%arg0: i32) -> (i32, i32) {
    %c0_i32 = arith.constant 0 : i32
    %c0_i32_0 = arith.constant 0 : i32
    %c0_i32_1 = arith.constant 0 : i32
    return %c0_i32, %c0_i32_0 : i32, i32
  }
  func.func @transform_6(%arg0: i32) -> (i32, i32) {
    %c0_i32 = arith.constant 0 : i32
    %c0_i32_0 = arith.constant 0 : i32
    %c0_i32_1 = arith.constant 0 : i32
    return %c0_i32, %c0_i32_0 : i32, i32
  }
  func.func @transform_7(%arg0: i32) -> (i32, i32) {
    %c0_i32 = arith.constant 0 : i32
    %c0_i32_0 = arith.constant 0 : i32
    %c0_i32_1 = arith.constant 0 : i32
    return %c0_i32, %c0_i32_0 : i32, i32
  }
  func.func @transform_8(%arg0: i32) -> (i32, i32) {
    %c0_i32 = arith.constant 0 : i32
    %c0_i32_0 = arith.constant 0 : i32
    %c0_i32_1 = arith.constant 0 : i32
    return %c0_i32, %c0_i32_0 : i32, i32
  }
  func.func @transform_9(%arg0: i32) -> (i32, i32, i32) {
    %c0_i32 = arith.constant 0 : i32
    %c0_i32_0 = arith.constant 0 : i32
    %c0_i32_1 = arith.constant 0 : i32
    return %c0_i32, %arg0, %c0_i32_0 : i32, i32, i32
  }
  func.func @transform_10(%arg0: i32) -> (i32, i32, i32) {
    %c0_i32 = arith.constant 0 : i32
    %c0_i32_0 = arith.constant 0 : i32
    %c0_i32_1 = arith.constant 0 : i32
    return %c0_i32, %arg0, %c0_i32_0 : i32, i32, i32
  }
}

module attributes {stable_mosaic.version = 11 : i64} {
  func.func @_rescnn_kernel(%arg0: i32, %arg1: memref<1x64x32xbf16, #tpu.memory_space<vmem>>, %arg2: memref<7x64x128xbf16, #tpu.memory_space<vmem>>, %arg3: memref<5x128x128xbf16, #tpu.memory_space<vmem>>, %arg4: memref<3x128x64xbf16, #tpu.memory_space<vmem>>, %arg5: memref<1x1x64xf32, #tpu.memory_space<vmem>>, %arg6: memref<3x64x128xbf16, #tpu.memory_space<vmem>>, %arg7: memref<1x1x128xf32, #tpu.memory_space<vmem>>, %arg8: memref<1x1x128xf32, #tpu.memory_space<vmem>>, %arg9: memref<3x128x256xbf16, #tpu.memory_space<vmem>>, %arg10: memref<1x1x256xf32, #tpu.memory_space<vmem>>, %arg11: memref<1x1x256xf32, #tpu.memory_space<vmem>>, %arg12: memref<3x256x128xbf16, #tpu.memory_space<vmem>>, %arg13: memref<1x1x128xf32, #tpu.memory_space<vmem>>, %arg14: memref<1x1x128xf32, #tpu.memory_space<vmem>>, %arg15: memref<1x1x128xf32, #tpu.memory_space<vmem>>) attributes {dimension_semantics = [#tpu.dimension_semantics<parallel>], iteration_bounds = array<i64: 2>, scalar_prefetch = 0 : i64, scratch_operands = 0 : i64, tpu.core_type = #tpu.core_type<tc>, window_params = [{transform_indices = @transform_0, window_bounds = array<i64: 1, 64, 32>}, {pipeline_mode = #tpu.pipeline_mode<synchronous>, transform_indices = @transform_1, window_bounds = array<i64: 7, 64, 128>}, {pipeline_mode = #tpu.pipeline_mode<synchronous>, transform_indices = @transform_2, window_bounds = array<i64: 5, 128, 128>}, {pipeline_mode = #tpu.pipeline_mode<synchronous>, transform_indices = @transform_3, window_bounds = array<i64: 3, 128, 64>}, {pipeline_mode = #tpu.pipeline_mode<synchronous>, transform_indices = @transform_4, window_bounds = array<i64: 1, 1, 64>}, {pipeline_mode = #tpu.pipeline_mode<synchronous>, transform_indices = @transform_5, window_bounds = array<i64: 3, 64, 128>}, {pipeline_mode = #tpu.pipeline_mode<synchronous>, transform_indices = @transform_6, window_bounds = array<i64: 1, 1, 128>}, {pipeline_mode = #tpu.pipeline_mode<synchronous>, transform_indices = @transform_7, window_bounds = array<i64: 1, 1, 128>}, {pipeline_mode = #tpu.pipeline_mode<synchronous>, transform_indices = @transform_8, window_bounds = array<i64: 3, 128, 256>}, {pipeline_mode = #tpu.pipeline_mode<synchronous>, transform_indices = @transform_9, window_bounds = array<i64: 1, 1, 256>}, {pipeline_mode = #tpu.pipeline_mode<synchronous>, transform_indices = @transform_10, window_bounds = array<i64: 1, 1, 256>}, {pipeline_mode = #tpu.pipeline_mode<synchronous>, transform_indices = @transform_11, window_bounds = array<i64: 3, 256, 128>}, {pipeline_mode = #tpu.pipeline_mode<synchronous>, transform_indices = @transform_12, window_bounds = array<i64: 1, 1, 128>}, {pipeline_mode = #tpu.pipeline_mode<synchronous>, transform_indices = @transform_13, window_bounds = array<i64: 1, 1, 128>}, {transform_indices = @transform_14, window_bounds = array<i64: 1, 1, 128>}]} {
    %c0 = arith.constant 0 : index
    %c0_0 = arith.constant 0 : index
    %c0_1 = arith.constant 0 : index
    %0 = vector.load %arg1[%c0, %c0_0, %c0_1] : memref<1x64x32xbf16, #tpu.memory_space<vmem>>, vector<1x64x32xbf16>
    %1 = arith.extf %0 : vector<1x64x32xbf16> to vector<1x64x32xf32>
    %2 = tpu.transpose %1, [0, 2, 1] : vector<1x64x32xf32> -> vector<1x32x64xf32>
    %3 = arith.truncf %2 : vector<1x32x64xf32> to vector<1x32x64xbf16>
    %cst = arith.constant 0.000000e+00 : bf16
    %4 = vector.broadcast %cst : bf16 to vector<1x3x64xbf16>
    %cst_2 = arith.constant 0.000000e+00 : bf16
    %5 = vector.broadcast %cst_2 : bf16 to vector<1x3x64xbf16>
    %6 = tpu.concatenate %4, %3, %5 in 1 : vector<1x3x64xbf16>, vector<1x32x64xbf16>, vector<1x3x64xbf16> -> vector<1x38x64xbf16>
    %7 = vector.extract_strided_slice %6 {offsets = [0, 0, 0], sizes = [1, 32, 64], strides = [1, 1, 1]} : vector<1x38x64xbf16> to vector<1x32x64xbf16>
    %c0_3 = arith.constant 0 : index
    %c0_4 = arith.constant 0 : index
    %c0_5 = arith.constant 0 : index
    %8 = vector.load %arg2[%c0_3, %c0_4, %c0_5] : memref<7x64x128xbf16, #tpu.memory_space<vmem>>, vector<1x64x128xbf16>
    %9 = vector.shape_cast %8 : vector<1x64x128xbf16> to vector<64x128xbf16>
    %cst_6 = arith.constant dense<0.000000e+00> : vector<1x32x128xf32>
    %10 = tpu.matmul %7, %9, %cst_6 {dimension_numbers = #tpu.dot_dimension_numbers<[2], [0], [0, 1], [1], [0, 0, 0, 1, 1, 1], [], []>} : vector<1x32x64xbf16>, vector<64x128xbf16>, vector<1x32x128xf32> -> vector<1x32x128xf32>
    %11 = vector.extract_strided_slice %6 {offsets = [0, 1, 0], sizes = [1, 32, 64], strides = [1, 1, 1]} : vector<1x38x64xbf16> to vector<1x32x64xbf16>
    %c1 = arith.constant 1 : index
    %c0_7 = arith.constant 0 : index
    %c0_8 = arith.constant 0 : index
    %12 = vector.load %arg2[%c1, %c0_7, %c0_8] : memref<7x64x128xbf16, #tpu.memory_space<vmem>>, vector<1x64x128xbf16>
    %13 = vector.shape_cast %12 : vector<1x64x128xbf16> to vector<64x128xbf16>
    %cst_9 = arith.constant dense<0.000000e+00> : vector<1x32x128xf32>
    %14 = tpu.matmul %11, %13, %cst_9 {dimension_numbers = #tpu.dot_dimension_numbers<[2], [0], [0, 1], [1], [0, 0, 0, 1, 1, 1], [], []>} : vector<1x32x64xbf16>, vector<64x128xbf16>, vector<1x32x128xf32> -> vector<1x32x128xf32>
    %15 = arith.addf %10, %14 : vector<1x32x128xf32>
    %16 = vector.extract_strided_slice %6 {offsets = [0, 2, 0], sizes = [1, 32, 64], strides = [1, 1, 1]} : vector<1x38x64xbf16> to vector<1x32x64xbf16>
    %c2 = arith.constant 2 : index
    %c0_10 = arith.constant 0 : index
    %c0_11 = arith.constant 0 : index
    %17 = vector.load %arg2[%c2, %c0_10, %c0_11] : memref<7x64x128xbf16, #tpu.memory_space<vmem>>, vector<1x64x128xbf16>
    %18 = vector.shape_cast %17 : vector<1x64x128xbf16> to vector<64x128xbf16>
    %cst_12 = arith.constant dense<0.000000e+00> : vector<1x32x128xf32>
    %19 = tpu.matmul %16, %18, %cst_12 {dimension_numbers = #tpu.dot_dimension_numbers<[2], [0], [0, 1], [1], [0, 0, 0, 1, 1, 1], [], []>} : vector<1x32x64xbf16>, vector<64x128xbf16>, vector<1x32x128xf32> -> vector<1x32x128xf32>
    %20 = arith.addf %15, %19 : vector<1x32x128xf32>
    %21 = vector.extract_strided_slice %6 {offsets = [0, 3, 0], sizes = [1, 32, 64], strides = [1, 1, 1]} : vector<1x38x64xbf16> to vector<1x32x64xbf16>
    %c3 = arith.constant 3 : index
    %c0_13 = arith.constant 0 : index
    %c0_14 = arith.constant 0 : index
    %22 = vector.load %arg2[%c3, %c0_13, %c0_14] : memref<7x64x128xbf16, #tpu.memory_space<vmem>>, vector<1x64x128xbf16>
    %23 = vector.shape_cast %22 : vector<1x64x128xbf16> to vector<64x128xbf16>
    %cst_15 = arith.constant dense<0.000000e+00> : vector<1x32x128xf32>
    %24 = tpu.matmul %21, %23, %cst_15 {dimension_numbers = #tpu.dot_dimension_numbers<[2], [0], [0, 1], [1], [0, 0, 0, 1, 1, 1], [], []>} : vector<1x32x64xbf16>, vector<64x128xbf16>, vector<1x32x128xf32> -> vector<1x32x128xf32>
    %25 = arith.addf %20, %24 : vector<1x32x128xf32>
    %26 = vector.extract_strided_slice %6 {offsets = [0, 4, 0], sizes = [1, 32, 64], strides = [1, 1, 1]} : vector<1x38x64xbf16> to vector<1x32x64xbf16>
    %c4 = arith.constant 4 : index
    %c0_16 = arith.constant 0 : index
    %c0_17 = arith.constant 0 : index
    %27 = vector.load %arg2[%c4, %c0_16, %c0_17] : memref<7x64x128xbf16, #tpu.memory_space<vmem>>, vector<1x64x128xbf16>
    %28 = vector.shape_cast %27 : vector<1x64x128xbf16> to vector<64x128xbf16>
    %cst_18 = arith.constant dense<0.000000e+00> : vector<1x32x128xf32>
    %29 = tpu.matmul %26, %28, %cst_18 {dimension_numbers = #tpu.dot_dimension_numbers<[2], [0], [0, 1], [1], [0, 0, 0, 1, 1, 1], [], []>} : vector<1x32x64xbf16>, vector<64x128xbf16>, vector<1x32x128xf32> -> vector<1x32x128xf32>
    %30 = arith.addf %25, %29 : vector<1x32x128xf32>
    %31 = vector.extract_strided_slice %6 {offsets = [0, 5, 0], sizes = [1, 32, 64], strides = [1, 1, 1]} : vector<1x38x64xbf16> to vector<1x32x64xbf16>
    %c5 = arith.constant 5 : index
    %c0_19 = arith.constant 0 : index
    %c0_20 = arith.constant 0 : index
    %32 = vector.load %arg2[%c5, %c0_19, %c0_20] : memref<7x64x128xbf16, #tpu.memory_space<vmem>>, vector<1x64x128xbf16>
    %33 = vector.shape_cast %32 : vector<1x64x128xbf16> to vector<64x128xbf16>
    %cst_21 = arith.constant dense<0.000000e+00> : vector<1x32x128xf32>
    %34 = tpu.matmul %31, %33, %cst_21 {dimension_numbers = #tpu.dot_dimension_numbers<[2], [0], [0, 1], [1], [0, 0, 0, 1, 1, 1], [], []>} : vector<1x32x64xbf16>, vector<64x128xbf16>, vector<1x32x128xf32> -> vector<1x32x128xf32>
    %35 = arith.addf %30, %34 : vector<1x32x128xf32>
    %36 = vector.extract_strided_slice %6 {offsets = [0, 6, 0], sizes = [1, 32, 64], strides = [1, 1, 1]} : vector<1x38x64xbf16> to vector<1x32x64xbf16>
    %c6 = arith.constant 6 : index
    %c0_22 = arith.constant 0 : index
    %c0_23 = arith.constant 0 : index
    %37 = vector.load %arg2[%c6, %c0_22, %c0_23] : memref<7x64x128xbf16, #tpu.memory_space<vmem>>, vector<1x64x128xbf16>
    %38 = vector.shape_cast %37 : vector<1x64x128xbf16> to vector<64x128xbf16>
    %cst_24 = arith.constant dense<0.000000e+00> : vector<1x32x128xf32>
    %39 = tpu.matmul %36, %38, %cst_24 {dimension_numbers = #tpu.dot_dimension_numbers<[2], [0], [0, 1], [1], [0, 0, 0, 1, 1, 1], [], []>} : vector<1x32x64xbf16>, vector<64x128xbf16>, vector<1x32x128xf32> -> vector<1x32x128xf32>
    %40 = arith.addf %35, %39 : vector<1x32x128xf32>
    %41 = arith.truncf %40 : vector<1x32x128xf32> to vector<1x32x128xbf16>
    %cst_25 = arith.constant 0.000000e+00 : bf16
    %42 = vector.broadcast %cst_25 : bf16 to vector<1x2x128xbf16>
    %cst_26 = arith.constant 0.000000e+00 : bf16
    %43 = vector.broadcast %cst_26 : bf16 to vector<1x2x128xbf16>
    %44 = tpu.concatenate %42, %41, %43 in 1 : vector<1x2x128xbf16>, vector<1x32x128xbf16>, vector<1x2x128xbf16> -> vector<1x36x128xbf16>
    %45 = vector.extract_strided_slice %44 {offsets = [0, 0, 0], sizes = [1, 32, 128], strides = [1, 1, 1]} : vector<1x36x128xbf16> to vector<1x32x128xbf16>
    %c0_27 = arith.constant 0 : index
    %c0_28 = arith.constant 0 : index
    %c0_29 = arith.constant 0 : index
    %46 = vector.load %arg3[%c0_27, %c0_28, %c0_29] : memref<5x128x128xbf16, #tpu.memory_space<vmem>>, vector<1x128x128xbf16>
    %47 = vector.shape_cast %46 : vector<1x128x128xbf16> to vector<128x128xbf16>
    %cst_30 = arith.constant dense<0.000000e+00> : vector<1x32x128xf32>
    %48 = tpu.matmul %45, %47, %cst_30 {dimension_numbers = #tpu.dot_dimension_numbers<[2], [0], [0, 1], [1], [0, 0, 0, 1, 1, 1], [], []>} : vector<1x32x128xbf16>, vector<128x128xbf16>, vector<1x32x128xf32> -> vector<1x32x128xf32>
    %49 = vector.extract_strided_slice %44 {offsets = [0, 1, 0], sizes = [1, 32, 128], strides = [1, 1, 1]} : vector<1x36x128xbf16> to vector<1x32x128xbf16>
    %c1_31 = arith.constant 1 : index
    %c0_32 = arith.constant 0 : index
    %c0_33 = arith.constant 0 : index
    %50 = vector.load %arg3[%c1_31, %c0_32, %c0_33] : memref<5x128x128xbf16, #tpu.memory_space<vmem>>, vector<1x128x128xbf16>
    %51 = vector.shape_cast %50 : vector<1x128x128xbf16> to vector<128x128xbf16>
    %cst_34 = arith.constant dense<0.000000e+00> : vector<1x32x128xf32>
    %52 = tpu.matmul %49, %51, %cst_34 {dimension_numbers = #tpu.dot_dimension_numbers<[2], [0], [0, 1], [1], [0, 0, 0, 1, 1, 1], [], []>} : vector<1x32x128xbf16>, vector<128x128xbf16>, vector<1x32x128xf32> -> vector<1x32x128xf32>
    %53 = arith.addf %48, %52 : vector<1x32x128xf32>
    %54 = vector.extract_strided_slice %44 {offsets = [0, 2, 0], sizes = [1, 32, 128], strides = [1, 1, 1]} : vector<1x36x128xbf16> to vector<1x32x128xbf16>
    %c2_35 = arith.constant 2 : index
    %c0_36 = arith.constant 0 : index
    %c0_37 = arith.constant 0 : index
    %55 = vector.load %arg3[%c2_35, %c0_36, %c0_37] : memref<5x128x128xbf16, #tpu.memory_space<vmem>>, vector<1x128x128xbf16>
    %56 = vector.shape_cast %55 : vector<1x128x128xbf16> to vector<128x128xbf16>
    %cst_38 = arith.constant dense<0.000000e+00> : vector<1x32x128xf32>
    %57 = tpu.matmul %54, %56, %cst_38 {dimension_numbers = #tpu.dot_dimension_numbers<[2], [0], [0, 1], [1], [0, 0, 0, 1, 1, 1], [], []>} : vector<1x32x128xbf16>, vector<128x128xbf16>, vector<1x32x128xf32> -> vector<1x32x128xf32>
    %58 = arith.addf %53, %57 : vector<1x32x128xf32>
    %59 = vector.extract_strided_slice %44 {offsets = [0, 3, 0], sizes = [1, 32, 128], strides = [1, 1, 1]} : vector<1x36x128xbf16> to vector<1x32x128xbf16>
    %c3_39 = arith.constant 3 : index
    %c0_40 = arith.constant 0 : index
    %c0_41 = arith.constant 0 : index
    %60 = vector.load %arg3[%c3_39, %c0_40, %c0_41] : memref<5x128x128xbf16, #tpu.memory_space<vmem>>, vector<1x128x128xbf16>
    %61 = vector.shape_cast %60 : vector<1x128x128xbf16> to vector<128x128xbf16>
    %cst_42 = arith.constant dense<0.000000e+00> : vector<1x32x128xf32>
    %62 = tpu.matmul %59, %61, %cst_42 {dimension_numbers = #tpu.dot_dimension_numbers<[2], [0], [0, 1], [1], [0, 0, 0, 1, 1, 1], [], []>} : vector<1x32x128xbf16>, vector<128x128xbf16>, vector<1x32x128xf32> -> vector<1x32x128xf32>
    %63 = arith.addf %58, %62 : vector<1x32x128xf32>
    %64 = vector.extract_strided_slice %44 {offsets = [0, 4, 0], sizes = [1, 32, 128], strides = [1, 1, 1]} : vector<1x36x128xbf16> to vector<1x32x128xbf16>
    %c4_43 = arith.constant 4 : index
    %c0_44 = arith.constant 0 : index
    %c0_45 = arith.constant 0 : index
    %65 = vector.load %arg3[%c4_43, %c0_44, %c0_45] : memref<5x128x128xbf16, #tpu.memory_space<vmem>>, vector<1x128x128xbf16>
    %66 = vector.shape_cast %65 : vector<1x128x128xbf16> to vector<128x128xbf16>
    %cst_46 = arith.constant dense<0.000000e+00> : vector<1x32x128xf32>
    %67 = tpu.matmul %64, %66, %cst_46 {dimension_numbers = #tpu.dot_dimension_numbers<[2], [0], [0, 1], [1], [0, 0, 0, 1, 1, 1], [], []>} : vector<1x32x128xbf16>, vector<128x128xbf16>, vector<1x32x128xf32> -> vector<1x32x128xf32>
    %68 = arith.addf %63, %67 : vector<1x32x128xf32>
    %69 = arith.truncf %68 : vector<1x32x128xf32> to vector<1x32x128xbf16>
    %cst_47 = arith.constant 0.000000e+00 : bf16
    %70 = vector.broadcast %cst_47 : bf16 to vector<1x1x128xbf16>
    %cst_48 = arith.constant 0.000000e+00 : bf16
    %71 = vector.broadcast %cst_48 : bf16 to vector<1x1x128xbf16>
    %72 = tpu.concatenate %70, %69, %71 in 1 : vector<1x1x128xbf16>, vector<1x32x128xbf16>, vector<1x1x128xbf16> -> vector<1x34x128xbf16>
    %73 = vector.extract_strided_slice %72 {offsets = [0, 0, 0], sizes = [1, 32, 128], strides = [1, 1, 1]} : vector<1x34x128xbf16> to vector<1x32x128xbf16>
    %c0_49 = arith.constant 0 : index
    %c0_50 = arith.constant 0 : index
    %c0_51 = arith.constant 0 : index
    %74 = vector.load %arg4[%c0_49, %c0_50, %c0_51] : memref<3x128x64xbf16, #tpu.memory_space<vmem>>, vector<1x128x64xbf16>
    %75 = vector.shape_cast %74 : vector<1x128x64xbf16> to vector<128x64xbf16>
    %cst_52 = arith.constant dense<0.000000e+00> : vector<1x32x64xf32>
    %76 = tpu.matmul %73, %75, %cst_52 {dimension_numbers = #tpu.dot_dimension_numbers<[2], [0], [0, 1], [1], [0, 0, 0, 1, 1, 1], [], []>} : vector<1x32x128xbf16>, vector<128x64xbf16>, vector<1x32x64xf32> -> vector<1x32x64xf32>
    %77 = vector.extract_strided_slice %72 {offsets = [0, 1, 0], sizes = [1, 32, 128], strides = [1, 1, 1]} : vector<1x34x128xbf16> to vector<1x32x128xbf16>
    %c1_53 = arith.constant 1 : index
    %c0_54 = arith.constant 0 : index
    %c0_55 = arith.constant 0 : index
    %78 = vector.load %arg4[%c1_53, %c0_54, %c0_55] : memref<3x128x64xbf16, #tpu.memory_space<vmem>>, vector<1x128x64xbf16>
    %79 = vector.shape_cast %78 : vector<1x128x64xbf16> to vector<128x64xbf16>
    %cst_56 = arith.constant dense<0.000000e+00> : vector<1x32x64xf32>
    %80 = tpu.matmul %77, %79, %cst_56 {dimension_numbers = #tpu.dot_dimension_numbers<[2], [0], [0, 1], [1], [0, 0, 0, 1, 1, 1], [], []>} : vector<1x32x128xbf16>, vector<128x64xbf16>, vector<1x32x64xf32> -> vector<1x32x64xf32>
    %81 = arith.addf %76, %80 : vector<1x32x64xf32>
    %82 = vector.extract_strided_slice %72 {offsets = [0, 2, 0], sizes = [1, 32, 128], strides = [1, 1, 1]} : vector<1x34x128xbf16> to vector<1x32x128xbf16>
    %c2_57 = arith.constant 2 : index
    %c0_58 = arith.constant 0 : index
    %c0_59 = arith.constant 0 : index
    %83 = vector.load %arg4[%c2_57, %c0_58, %c0_59] : memref<3x128x64xbf16, #tpu.memory_space<vmem>>, vector<1x128x64xbf16>
    %84 = vector.shape_cast %83 : vector<1x128x64xbf16> to vector<128x64xbf16>
    %cst_60 = arith.constant dense<0.000000e+00> : vector<1x32x64xf32>
    %85 = tpu.matmul %82, %84, %cst_60 {dimension_numbers = #tpu.dot_dimension_numbers<[2], [0], [0, 1], [1], [0, 0, 0, 1, 1, 1], [], []>} : vector<1x32x128xbf16>, vector<128x64xbf16>, vector<1x32x64xf32> -> vector<1x32x64xf32>
    %86 = arith.addf %81, %85 : vector<1x32x64xf32>
    %c0_61 = arith.constant 0 : index
    %c0_62 = arith.constant 0 : index
    %c0_63 = arith.constant 0 : index
    %87 = vector.load %arg5[%c0_61, %c0_62, %c0_63] : memref<1x1x64xf32, #tpu.memory_space<vmem>>, vector<1x1x64xf32>
    %88 = vector.broadcast %87 : vector<1x1x64xf32> to vector<1x32x64xf32>
    %89 = arith.addf %86, %88 : vector<1x32x64xf32>
    %cst_64 = arith.constant 0.000000e+00 : f32
    %90 = vector.broadcast %cst_64 : f32 to vector<1x32x64xf32>
    %91 = arith.maximumf %89, %90 : vector<1x32x64xf32>
    %92 = arith.truncf %91 : vector<1x32x64xf32> to vector<1x32x64xbf16>
    %cst_65 = arith.constant 0.000000e+00 : bf16
    %93 = vector.broadcast %cst_65 : bf16 to vector<1x1x64xbf16>
    %cst_66 = arith.constant 0.000000e+00 : bf16
    %94 = vector.broadcast %cst_66 : bf16 to vector<1x1x64xbf16>
    %95 = tpu.concatenate %93, %92, %94 in 1 : vector<1x1x64xbf16>, vector<1x32x64xbf16>, vector<1x1x64xbf16> -> vector<1x34x64xbf16>
    %96 = vector.extract_strided_slice %95 {offsets = [0, 0, 0], sizes = [1, 32, 64], strides = [1, 1, 1]} : vector<1x34x64xbf16> to vector<1x32x64xbf16>
    %c0_67 = arith.constant 0 : index
    %c0_68 = arith.constant 0 : index
    %c0_69 = arith.constant 0 : index
    %97 = vector.load %arg6[%c0_67, %c0_68, %c0_69] : memref<3x64x128xbf16, #tpu.memory_space<vmem>>, vector<1x64x128xbf16>
    %98 = vector.shape_cast %97 : vector<1x64x128xbf16> to vector<64x128xbf16>
    %cst_70 = arith.constant dense<0.000000e+00> : vector<1x32x128xf32>
    %99 = tpu.matmul %96, %98, %cst_70 {dimension_numbers = #tpu.dot_dimension_numbers<[2], [0], [0, 1], [1], [0, 0, 0, 1, 1, 1], [], []>} : vector<1x32x64xbf16>, vector<64x128xbf16>, vector<1x32x128xf32> -> vector<1x32x128xf32>
    %100 = vector.extract_strided_slice %95 {offsets = [0, 1, 0], sizes = [1, 32, 64], strides = [1, 1, 1]} : vector<1x34x64xbf16> to vector<1x32x64xbf16>
    %c1_71 = arith.constant 1 : index
    %c0_72 = arith.constant 0 : index
    %c0_73 = arith.constant 0 : index
    %101 = vector.load %arg6[%c1_71, %c0_72, %c0_73] : memref<3x64x128xbf16, #tpu.memory_space<vmem>>, vector<1x64x128xbf16>
    %102 = vector.shape_cast %101 : vector<1x64x128xbf16> to vector<64x128xbf16>
    %cst_74 = arith.constant dense<0.000000e+00> : vector<1x32x128xf32>
    %103 = tpu.matmul %100, %102, %cst_74 {dimension_numbers = #tpu.dot_dimension_numbers<[2], [0], [0, 1], [1], [0, 0, 0, 1, 1, 1], [], []>} : vector<1x32x64xbf16>, vector<64x128xbf16>, vector<1x32x128xf32> -> vector<1x32x128xf32>
    %104 = arith.addf %99, %103 : vector<1x32x128xf32>
    %105 = vector.extract_strided_slice %95 {offsets = [0, 2, 0], sizes = [1, 32, 64], strides = [1, 1, 1]} : vector<1x34x64xbf16> to vector<1x32x64xbf16>
    %c2_75 = arith.constant 2 : index
    %c0_76 = arith.constant 0 : index
    %c0_77 = arith.constant 0 : index
    %106 = vector.load %arg6[%c2_75, %c0_76, %c0_77] : memref<3x64x128xbf16, #tpu.memory_space<vmem>>, vector<1x64x128xbf16>
    %107 = vector.shape_cast %106 : vector<1x64x128xbf16> to vector<64x128xbf16>
    %cst_78 = arith.constant dense<0.000000e+00> : vector<1x32x128xf32>
    %108 = tpu.matmul %105, %107, %cst_78 {dimension_numbers = #tpu.dot_dimension_numbers<[2], [0], [0, 1], [1], [0, 0, 0, 1, 1, 1], [], []>} : vector<1x32x64xbf16>, vector<64x128xbf16>, vector<1x32x128xf32> -> vector<1x32x128xf32>
    %109 = arith.addf %104, %108 : vector<1x32x128xf32>
    %c0_79 = arith.constant 0 : index
    %c0_80 = arith.constant 0 : index
    %c0_81 = arith.constant 0 : index
    %110 = vector.load %arg7[%c0_79, %c0_80, %c0_81] : memref<1x1x128xf32, #tpu.memory_space<vmem>>, vector<1x1x128xf32>
    %111 = vector.broadcast %110 : vector<1x1x128xf32> to vector<1x32x128xf32>
    %112 = arith.mulf %109, %111 : vector<1x32x128xf32>
    %c0_82 = arith.constant 0 : index
    %c0_83 = arith.constant 0 : index
    %c0_84 = arith.constant 0 : index
    %113 = vector.load %arg8[%c0_82, %c0_83, %c0_84] : memref<1x1x128xf32, #tpu.memory_space<vmem>>, vector<1x1x128xf32>
    %114 = vector.broadcast %113 : vector<1x1x128xf32> to vector<1x32x128xf32>
    %115 = arith.addf %112, %114 : vector<1x32x128xf32>
    %cst_85 = arith.constant 0.000000e+00 : f32
    %116 = vector.broadcast %cst_85 : f32 to vector<1x32x128xf32>
    %117 = arith.cmpf ogt, %115, %116 : vector<1x32x128xf32>
    %cst_86 = arith.constant 2.000000e-01 : f32
    %118 = vector.broadcast %cst_86 : f32 to vector<1x32x128xf32>
    %119 = arith.mulf %118, %115 : vector<1x32x128xf32>
    %120 = arith.select %117, %115, %119 : vector<1x32x128xi1>, vector<1x32x128xf32>
    %121 = arith.truncf %120 : vector<1x32x128xf32> to vector<1x32x128xbf16>
    %cst_87 = arith.constant 0.000000e+00 : bf16
    %122 = vector.broadcast %cst_87 : bf16 to vector<1x1x128xbf16>
    %cst_88 = arith.constant 0.000000e+00 : bf16
    %123 = vector.broadcast %cst_88 : bf16 to vector<1x1x128xbf16>
    %124 = tpu.concatenate %122, %121, %123 in 1 : vector<1x1x128xbf16>, vector<1x32x128xbf16>, vector<1x1x128xbf16> -> vector<1x34x128xbf16>
    %125 = vector.extract_strided_slice %124 {offsets = [0, 0, 0], sizes = [1, 32, 128], strides = [1, 1, 1]} : vector<1x34x128xbf16> to vector<1x32x128xbf16>
    %c0_89 = arith.constant 0 : index
    %c0_90 = arith.constant 0 : index
    %c0_91 = arith.constant 0 : index
    %126 = vector.load %arg9[%c0_89, %c0_90, %c0_91] : memref<3x128x256xbf16, #tpu.memory_space<vmem>>, vector<1x128x256xbf16>
    %127 = vector.shape_cast %126 : vector<1x128x256xbf16> to vector<128x256xbf16>
    %cst_92 = arith.constant dense<0.000000e+00> : vector<1x32x256xf32>
    %128 = tpu.matmul %125, %127, %cst_92 {dimension_numbers = #tpu.dot_dimension_numbers<[2], [0], [0, 1], [1], [0, 0, 0, 1, 1, 1], [], []>} : vector<1x32x128xbf16>, vector<128x256xbf16>, vector<1x32x256xf32> -> vector<1x32x256xf32>
    %129 = vector.extract_strided_slice %124 {offsets = [0, 1, 0], sizes = [1, 32, 128], strides = [1, 1, 1]} : vector<1x34x128xbf16> to vector<1x32x128xbf16>
    %c1_93 = arith.constant 1 : index
    %c0_94 = arith.constant 0 : index
    %c0_95 = arith.constant 0 : index
    %130 = vector.load %arg9[%c1_93, %c0_94, %c0_95] : memref<3x128x256xbf16, #tpu.memory_space<vmem>>, vector<1x128x256xbf16>
    %131 = vector.shape_cast %130 : vector<1x128x256xbf16> to vector<128x256xbf16>
    %cst_96 = arith.constant dense<0.000000e+00> : vector<1x32x256xf32>
    %132 = tpu.matmul %129, %131, %cst_96 {dimension_numbers = #tpu.dot_dimension_numbers<[2], [0], [0, 1], [1], [0, 0, 0, 1, 1, 1], [], []>} : vector<1x32x128xbf16>, vector<128x256xbf16>, vector<1x32x256xf32> -> vector<1x32x256xf32>
    %133 = arith.addf %128, %132 : vector<1x32x256xf32>
    %134 = vector.extract_strided_slice %124 {offsets = [0, 2, 0], sizes = [1, 32, 128], strides = [1, 1, 1]} : vector<1x34x128xbf16> to vector<1x32x128xbf16>
    %c2_97 = arith.constant 2 : index
    %c0_98 = arith.constant 0 : index
    %c0_99 = arith.constant 0 : index
    %135 = vector.load %arg9[%c2_97, %c0_98, %c0_99] : memref<3x128x256xbf16, #tpu.memory_space<vmem>>, vector<1x128x256xbf16>
    %136 = vector.shape_cast %135 : vector<1x128x256xbf16> to vector<128x256xbf16>
    %cst_100 = arith.constant dense<0.000000e+00> : vector<1x32x256xf32>
    %137 = tpu.matmul %134, %136, %cst_100 {dimension_numbers = #tpu.dot_dimension_numbers<[2], [0], [0, 1], [1], [0, 0, 0, 1, 1, 1], [], []>} : vector<1x32x128xbf16>, vector<128x256xbf16>, vector<1x32x256xf32> -> vector<1x32x256xf32>
    %138 = arith.addf %133, %137 : vector<1x32x256xf32>
    %c0_101 = arith.constant 0 : index
    %c0_102 = arith.constant 0 : index
    %c0_103 = arith.constant 0 : index
    %139 = vector.load %arg10[%c0_101, %c0_102, %c0_103] : memref<1x1x256xf32, #tpu.memory_space<vmem>>, vector<1x1x256xf32>
    %140 = vector.broadcast %139 : vector<1x1x256xf32> to vector<1x32x256xf32>
    %141 = arith.mulf %138, %140 : vector<1x32x256xf32>
    %c0_104 = arith.constant 0 : index
    %c0_105 = arith.constant 0 : index
    %c0_106 = arith.constant 0 : index
    %142 = vector.load %arg11[%c0_104, %c0_105, %c0_106] : memref<1x1x256xf32, #tpu.memory_space<vmem>>, vector<1x1x256xf32>
    %143 = vector.broadcast %142 : vector<1x1x256xf32> to vector<1x32x256xf32>
    %144 = arith.addf %141, %143 : vector<1x32x256xf32>
    %cst_107 = arith.constant 0.000000e+00 : f32
    %145 = vector.broadcast %cst_107 : f32 to vector<1x32x256xf32>
    %146 = arith.cmpf ogt, %144, %145 : vector<1x32x256xf32>
    %cst_108 = arith.constant 2.500000e-01 : f32
    %147 = vector.broadcast %cst_108 : f32 to vector<1x32x256xf32>
    %148 = arith.mulf %147, %144 : vector<1x32x256xf32>
    %149 = arith.select %146, %144, %148 : vector<1x32x256xi1>, vector<1x32x256xf32>
    %150 = arith.truncf %149 : vector<1x32x256xf32> to vector<1x32x256xbf16>
    %cst_109 = arith.constant 0.000000e+00 : bf16
    %151 = vector.broadcast %cst_109 : bf16 to vector<1x1x256xbf16>
    %cst_110 = arith.constant 0.000000e+00 : bf16
    %152 = vector.broadcast %cst_110 : bf16 to vector<1x1x256xbf16>
    %153 = tpu.concatenate %151, %150, %152 in 1 : vector<1x1x256xbf16>, vector<1x32x256xbf16>, vector<1x1x256xbf16> -> vector<1x34x256xbf16>
    %154 = vector.extract_strided_slice %153 {offsets = [0, 0, 0], sizes = [1, 32, 256], strides = [1, 1, 1]} : vector<1x34x256xbf16> to vector<1x32x256xbf16>
    %c0_111 = arith.constant 0 : index
    %c0_112 = arith.constant 0 : index
    %c0_113 = arith.constant 0 : index
    %155 = vector.load %arg12[%c0_111, %c0_112, %c0_113] : memref<3x256x128xbf16, #tpu.memory_space<vmem>>, vector<1x256x128xbf16>
    %156 = vector.shape_cast %155 : vector<1x256x128xbf16> to vector<256x128xbf16>
    %cst_114 = arith.constant dense<0.000000e+00> : vector<1x32x128xf32>
    %157 = tpu.matmul %154, %156, %cst_114 {dimension_numbers = #tpu.dot_dimension_numbers<[2], [0], [0, 1], [1], [0, 0, 0, 1, 1, 1], [], []>} : vector<1x32x256xbf16>, vector<256x128xbf16>, vector<1x32x128xf32> -> vector<1x32x128xf32>
    %158 = vector.extract_strided_slice %153 {offsets = [0, 1, 0], sizes = [1, 32, 256], strides = [1, 1, 1]} : vector<1x34x256xbf16> to vector<1x32x256xbf16>
    %c1_115 = arith.constant 1 : index
    %c0_116 = arith.constant 0 : index
    %c0_117 = arith.constant 0 : index
    %159 = vector.load %arg12[%c1_115, %c0_116, %c0_117] : memref<3x256x128xbf16, #tpu.memory_space<vmem>>, vector<1x256x128xbf16>
    %160 = vector.shape_cast %159 : vector<1x256x128xbf16> to vector<256x128xbf16>
    %cst_118 = arith.constant dense<0.000000e+00> : vector<1x32x128xf32>
    %161 = tpu.matmul %158, %160, %cst_118 {dimension_numbers = #tpu.dot_dimension_numbers<[2], [0], [0, 1], [1], [0, 0, 0, 1, 1, 1], [], []>} : vector<1x32x256xbf16>, vector<256x128xbf16>, vector<1x32x128xf32> -> vector<1x32x128xf32>
    %162 = arith.addf %157, %161 : vector<1x32x128xf32>
    %163 = vector.extract_strided_slice %153 {offsets = [0, 2, 0], sizes = [1, 32, 256], strides = [1, 1, 1]} : vector<1x34x256xbf16> to vector<1x32x256xbf16>
    %c2_119 = arith.constant 2 : index
    %c0_120 = arith.constant 0 : index
    %c0_121 = arith.constant 0 : index
    %164 = vector.load %arg12[%c2_119, %c0_120, %c0_121] : memref<3x256x128xbf16, #tpu.memory_space<vmem>>, vector<1x256x128xbf16>
    %165 = vector.shape_cast %164 : vector<1x256x128xbf16> to vector<256x128xbf16>
    %cst_122 = arith.constant dense<0.000000e+00> : vector<1x32x128xf32>
    %166 = tpu.matmul %163, %165, %cst_122 {dimension_numbers = #tpu.dot_dimension_numbers<[2], [0], [0, 1], [1], [0, 0, 0, 1, 1, 1], [], []>} : vector<1x32x256xbf16>, vector<256x128xbf16>, vector<1x32x128xf32> -> vector<1x32x128xf32>
    %167 = arith.addf %162, %166 : vector<1x32x128xf32>
    %c0_123 = arith.constant 0 : index
    %c0_124 = arith.constant 0 : index
    %c0_125 = arith.constant 0 : index
    %168 = vector.load %arg13[%c0_123, %c0_124, %c0_125] : memref<1x1x128xf32, #tpu.memory_space<vmem>>, vector<1x1x128xf32>
    %169 = vector.broadcast %168 : vector<1x1x128xf32> to vector<1x32x128xf32>
    %170 = arith.mulf %167, %169 : vector<1x32x128xf32>
    %c0_126 = arith.constant 0 : index
    %c0_127 = arith.constant 0 : index
    %c0_128 = arith.constant 0 : index
    %171 = vector.load %arg14[%c0_126, %c0_127, %c0_128] : memref<1x1x128xf32, #tpu.memory_space<vmem>>, vector<1x1x128xf32>
    %172 = vector.broadcast %171 : vector<1x1x128xf32> to vector<1x32x128xf32>
    %173 = arith.addf %170, %172 : vector<1x32x128xf32>
    %cst_129 = arith.constant 0.000000e+00 : f32
    %174 = vector.broadcast %cst_129 : f32 to vector<1x32x128xf32>
    %175 = arith.cmpf ogt, %173, %174 : vector<1x32x128xf32>
    %cst_130 = arith.constant 0.000000e+00 : f32
    %176 = vector.broadcast %cst_130 : f32 to vector<1x32x128xf32>
    %177 = arith.minimumf %173, %176 : vector<1x32x128xf32>
    %178 = math.exp %177 : vector<1x32x128xf32>
    %cst_131 = arith.constant 1.000000e+00 : f32
    %179 = vector.broadcast %cst_131 : f32 to vector<1x32x128xf32>
    %180 = arith.subf %178, %179 : vector<1x32x128xf32>
    %cst_132 = arith.constant 3.000000e-01 : f32
    %181 = vector.broadcast %cst_132 : f32 to vector<1x32x128xf32>
    %182 = arith.mulf %181, %180 : vector<1x32x128xf32>
    %183 = arith.select %175, %173, %182 : vector<1x32x128xi1>, vector<1x32x128xf32>
    %cst_133 = arith.constant dense<0.000000e+00> : vector<1x128xf32>
    %184 = vector.multi_reduction <add>, %183, %cst_133 [1] : vector<1x32x128xf32> to vector<1x128xf32>
    %185 = vector.shape_cast %184 : vector<1x128xf32> to vector<1x1x128xf32>
    %cst_134 = arith.constant 3.200000e+01 : f32
    %186 = vector.broadcast %cst_134 : f32 to vector<1x1x128xf32>
    %187 = arith.divf %185, %186 : vector<1x1x128xf32>
    %c0_135 = arith.constant 0 : index
    %c0_136 = arith.constant 0 : index
    %c0_137 = arith.constant 0 : index
    %188 = vector.load %arg15[%c0_135, %c0_136, %c0_137] : memref<1x1x128xf32, #tpu.memory_space<vmem>>, vector<1x1x128xf32>
    tpu.vector_store %arg15[%c0_135, %c0_136, %c0_137], %187 {strides = array<i32>} : memref<1x1x128xf32, #tpu.memory_space<vmem>>, vector<1x1x128xf32>,
    return
  }
  func.func @transform_0(%arg0: i32) -> (i32, i32, i32) {
    %c0_i32 = arith.constant 0 : i32
    %c0_i32_0 = arith.constant 0 : i32
    %c0_i32_1 = arith.constant 0 : i32
    return %arg0, %c0_i32, %c0_i32_0 : i32, i32, i32
  }
  func.func @transform_1(%arg0: i32) -> (i32, i32, i32) {
    %c0_i32 = arith.constant 0 : i32
    %c0_i32_0 = arith.constant 0 : i32
    %c0_i32_1 = arith.constant 0 : i32
    %c0_i32_2 = arith.constant 0 : i32
    return %c0_i32, %c0_i32_0, %c0_i32_1 : i32, i32, i32
  }
  func.func @transform_2(%arg0: i32) -> (i32, i32, i32) {
    %c0_i32 = arith.constant 0 : i32
    %c0_i32_0 = arith.constant 0 : i32
    %c0_i32_1 = arith.constant 0 : i32
    %c0_i32_2 = arith.constant 0 : i32
    return %c0_i32, %c0_i32_0, %c0_i32_1 : i32, i32, i32
  }
  func.func @transform_3(%arg0: i32) -> (i32, i32, i32) {
    %c0_i32 = arith.constant 0 : i32
    %c0_i32_0 = arith.constant 0 : i32
    %c0_i32_1 = arith.constant 0 : i32
    %c0_i32_2 = arith.constant 0 : i32
    return %c0_i32, %c0_i32_0, %c0_i32_1 : i32, i32, i32
  }
  func.func @transform_4(%arg0: i32) -> (i32, i32, i32) {
    %c0_i32 = arith.constant 0 : i32
    %c0_i32_0 = arith.constant 0 : i32
    %c0_i32_1 = arith.constant 0 : i32
    %c0_i32_2 = arith.constant 0 : i32
    return %c0_i32, %c0_i32_0, %c0_i32_1 : i32, i32, i32
  }
  func.func @transform_5(%arg0: i32) -> (i32, i32, i32) {
    %c0_i32 = arith.constant 0 : i32
    %c0_i32_0 = arith.constant 0 : i32
    %c0_i32_1 = arith.constant 0 : i32
    %c0_i32_2 = arith.constant 0 : i32
    return %c0_i32, %c0_i32_0, %c0_i32_1 : i32, i32, i32
  }
  func.func @transform_6(%arg0: i32) -> (i32, i32, i32) {
    %c0_i32 = arith.constant 0 : i32
    %c0_i32_0 = arith.constant 0 : i32
    %c0_i32_1 = arith.constant 0 : i32
    %c0_i32_2 = arith.constant 0 : i32
    return %c0_i32, %c0_i32_0, %c0_i32_1 : i32, i32, i32
  }
  func.func @transform_7(%arg0: i32) -> (i32, i32, i32) {
    %c0_i32 = arith.constant 0 : i32
    %c0_i32_0 = arith.constant 0 : i32
    %c0_i32_1 = arith.constant 0 : i32
    %c0_i32_2 = arith.constant 0 : i32
    return %c0_i32, %c0_i32_0, %c0_i32_1 : i32, i32, i32
  }
  func.func @transform_8(%arg0: i32) -> (i32, i32, i32) {
    %c0_i32 = arith.constant 0 : i32
    %c0_i32_0 = arith.constant 0 : i32
    %c0_i32_1 = arith.constant 0 : i32
    %c0_i32_2 = arith.constant 0 : i32
    return %c0_i32, %c0_i32_0, %c0_i32_1 : i32, i32, i32
  }
  func.func @transform_9(%arg0: i32) -> (i32, i32, i32) {
    %c0_i32 = arith.constant 0 : i32
    %c0_i32_0 = arith.constant 0 : i32
    %c0_i32_1 = arith.constant 0 : i32
    %c0_i32_2 = arith.constant 0 : i32
    return %c0_i32, %c0_i32_0, %c0_i32_1 : i32, i32, i32
  }
  func.func @transform_10(%arg0: i32) -> (i32, i32, i32) {
    %c0_i32 = arith.constant 0 : i32
    %c0_i32_0 = arith.constant 0 : i32
    %c0_i32_1 = arith.constant 0 : i32
    %c0_i32_2 = arith.constant 0 : i32
    return %c0_i32, %c0_i32_0, %c0_i32_1 : i32, i32, i32
  }
  func.func @transform_11(%arg0: i32) -> (i32, i32, i32) {
    %c0_i32 = arith.constant 0 : i32
    %c0_i32_0 = arith.constant 0 : i32
    %c0_i32_1 = arith.constant 0 : i32
    %c0_i32_2 = arith.constant 0 : i32
    return %c0_i32, %c0_i32_0, %c0_i32_1 : i32, i32, i32
  }
  func.func @transform_12(%arg0: i32) -> (i32, i32, i32) {
    %c0_i32 = arith.constant 0 : i32
    %c0_i32_0 = arith.constant 0 : i32
    %c0_i32_1 = arith.constant 0 : i32
    %c0_i32_2 = arith.constant 0 : i32
    return %c0_i32, %c0_i32_0, %c0_i32_1 : i32, i32, i32
  }
  func.func @transform_13(%arg0: i32) -> (i32, i32, i32) {
    %c0_i32 = arith.constant 0 : i32
    %c0_i32_0 = arith.constant 0 : i32
    %c0_i32_1 = arith.constant 0 : i32
    %c0_i32_2 = arith.constant 0 : i32
    return %c0_i32, %c0_i32_0, %c0_i32_1 : i32, i32, i32
  }
  func.func @transform_14(%arg0: i32) -> (i32, i32, i32) {
    %c0_i32 = arith.constant 0 : i32
    %c0_i32_0 = arith.constant 0 : i32
    %c0_i32_1 = arith.constant 0 : i32
    return %arg0, %c0_i32, %c0_i32_0 : i32, i32, i32
  }
}

module attributes {stable_mosaic.version = 11 : i64} {
  func.func @_rescnn_kernel(%arg0: i32, %arg1: memref<2x64x8xbf16, #tpu.memory_space<vmem>>, %arg2: memref<7x64x128xbf16, #tpu.memory_space<vmem>>, %arg3: memref<5x128x128xbf16, #tpu.memory_space<vmem>>, %arg4: memref<3x128x64xbf16, #tpu.memory_space<vmem>>, %arg5: memref<1x1x64xf32, #tpu.memory_space<vmem>>, %arg6: memref<3x64x128xbf16, #tpu.memory_space<vmem>>, %arg7: memref<1x1x128xf32, #tpu.memory_space<vmem>>, %arg8: memref<1x1x128xf32, #tpu.memory_space<vmem>>, %arg9: memref<3x128x256xbf16, #tpu.memory_space<vmem>>, %arg10: memref<1x1x256xf32, #tpu.memory_space<vmem>>, %arg11: memref<1x1x256xf32, #tpu.memory_space<vmem>>, %arg12: memref<3x256x128xbf16, #tpu.memory_space<vmem>>, %arg13: memref<1x1x128xf32, #tpu.memory_space<vmem>>, %arg14: memref<1x1x128xf32, #tpu.memory_space<vmem>>, %arg15: memref<2x1x128xf32, #tpu.memory_space<vmem>>) attributes {dimension_semantics = [#tpu.dimension_semantics<parallel>], iteration_bounds = array<i64: 2>, scalar_prefetch = 0 : i64, scratch_operands = 0 : i64, tpu.core_type = #tpu.core_type<tc>, window_params = [{transform_indices = @transform_0, window_bounds = array<i64: 2, 64, 8>}, {pipeline_mode = #tpu.pipeline_mode<synchronous>, transform_indices = @transform_1, window_bounds = array<i64: 7, 64, 128>}, {pipeline_mode = #tpu.pipeline_mode<synchronous>, transform_indices = @transform_2, window_bounds = array<i64: 5, 128, 128>}, {pipeline_mode = #tpu.pipeline_mode<synchronous>, transform_indices = @transform_3, window_bounds = array<i64: 3, 128, 64>}, {pipeline_mode = #tpu.pipeline_mode<synchronous>, transform_indices = @transform_4, window_bounds = array<i64: 1, 1, 64>}, {pipeline_mode = #tpu.pipeline_mode<synchronous>, transform_indices = @transform_5, window_bounds = array<i64: 3, 64, 128>}, {pipeline_mode = #tpu.pipeline_mode<synchronous>, transform_indices = @transform_6, window_bounds = array<i64: 1, 1, 128>}, {pipeline_mode = #tpu.pipeline_mode<synchronous>, transform_indices = @transform_7, window_bounds = array<i64: 1, 1, 128>}, {pipeline_mode = #tpu.pipeline_mode<synchronous>, transform_indices = @transform_8, window_bounds = array<i64: 3, 128, 256>}, {pipeline_mode = #tpu.pipeline_mode<synchronous>, transform_indices = @transform_9, window_bounds = array<i64: 1, 1, 256>}, {pipeline_mode = #tpu.pipeline_mode<synchronous>, transform_indices = @transform_10, window_bounds = array<i64: 1, 1, 256>}, {pipeline_mode = #tpu.pipeline_mode<synchronous>, transform_indices = @transform_11, window_bounds = array<i64: 3, 256, 128>}, {pipeline_mode = #tpu.pipeline_mode<synchronous>, transform_indices = @transform_12, window_bounds = array<i64: 1, 1, 128>}, {pipeline_mode = #tpu.pipeline_mode<synchronous>, transform_indices = @transform_13, window_bounds = array<i64: 1, 1, 128>}, {transform_indices = @transform_14, window_bounds = array<i64: 2, 1, 128>}]} {
    %c0 = arith.constant 0 : index
    %c0_0 = arith.constant 0 : index
    %c0_1 = arith.constant 0 : index
    %0 = vector.load %arg1[%c0, %c0_0, %c0_1] : memref<2x64x8xbf16, #tpu.memory_space<vmem>>, vector<2x64x8xbf16>
    %1 = arith.extf %0 : vector<2x64x8xbf16> to vector<2x64x8xf32>
    %2 = tpu.transpose %1, [0, 2, 1] : vector<2x64x8xf32> -> vector<2x8x64xf32>
    %3 = arith.truncf %2 : vector<2x8x64xf32> to vector<2x8x64xbf16>
    %cst = arith.constant 0.000000e+00 : bf16
    %4 = vector.broadcast %cst : bf16 to vector<2x3x64xbf16>
    %cst_2 = arith.constant 0.000000e+00 : bf16
    %5 = vector.broadcast %cst_2 : bf16 to vector<2x3x64xbf16>
    %6 = tpu.concatenate %4, %3, %5 in 1 : vector<2x3x64xbf16>, vector<2x8x64xbf16>, vector<2x3x64xbf16> -> vector<2x14x64xbf16>
    %7 = vector.extract_strided_slice %6 {offsets = [0, 0, 0], sizes = [2, 8, 64], strides = [1, 1, 1]} : vector<2x14x64xbf16> to vector<2x8x64xbf16>
    %c0_3 = arith.constant 0 : index
    %c0_4 = arith.constant 0 : index
    %c0_5 = arith.constant 0 : index
    %8 = vector.load %arg2[%c0_3, %c0_4, %c0_5] : memref<7x64x128xbf16, #tpu.memory_space<vmem>>, vector<1x64x128xbf16>
    %9 = vector.shape_cast %8 : vector<1x64x128xbf16> to vector<64x128xbf16>
    %cst_6 = arith.constant dense<0.000000e+00> : vector<2x8x128xf32>
    %10 = tpu.matmul %7, %9, %cst_6 {dimension_numbers = #tpu.dot_dimension_numbers<[2], [0], [0, 1], [1], [0, 0, 0, 1, 1, 1], [], []>} : vector<2x8x64xbf16>, vector<64x128xbf16>, vector<2x8x128xf32> -> vector<2x8x128xf32>
    %11 = vector.extract_strided_slice %6 {offsets = [0, 1, 0], sizes = [2, 8, 64], strides = [1, 1, 1]} : vector<2x14x64xbf16> to vector<2x8x64xbf16>
    %c1 = arith.constant 1 : index
    %c0_7 = arith.constant 0 : index
    %c0_8 = arith.constant 0 : index
    %12 = vector.load %arg2[%c1, %c0_7, %c0_8] : memref<7x64x128xbf16, #tpu.memory_space<vmem>>, vector<1x64x128xbf16>
    %13 = vector.shape_cast %12 : vector<1x64x128xbf16> to vector<64x128xbf16>
    %cst_9 = arith.constant dense<0.000000e+00> : vector<2x8x128xf32>
    %14 = tpu.matmul %11, %13, %cst_9 {dimension_numbers = #tpu.dot_dimension_numbers<[2], [0], [0, 1], [1], [0, 0, 0, 1, 1, 1], [], []>} : vector<2x8x64xbf16>, vector<64x128xbf16>, vector<2x8x128xf32> -> vector<2x8x128xf32>
    %15 = arith.addf %10, %14 : vector<2x8x128xf32>
    %16 = vector.extract_strided_slice %6 {offsets = [0, 2, 0], sizes = [2, 8, 64], strides = [1, 1, 1]} : vector<2x14x64xbf16> to vector<2x8x64xbf16>
    %c2 = arith.constant 2 : index
    %c0_10 = arith.constant 0 : index
    %c0_11 = arith.constant 0 : index
    %17 = vector.load %arg2[%c2, %c0_10, %c0_11] : memref<7x64x128xbf16, #tpu.memory_space<vmem>>, vector<1x64x128xbf16>
    %18 = vector.shape_cast %17 : vector<1x64x128xbf16> to vector<64x128xbf16>
    %cst_12 = arith.constant dense<0.000000e+00> : vector<2x8x128xf32>
    %19 = tpu.matmul %16, %18, %cst_12 {dimension_numbers = #tpu.dot_dimension_numbers<[2], [0], [0, 1], [1], [0, 0, 0, 1, 1, 1], [], []>} : vector<2x8x64xbf16>, vector<64x128xbf16>, vector<2x8x128xf32> -> vector<2x8x128xf32>
    %20 = arith.addf %15, %19 : vector<2x8x128xf32>
    %21 = vector.extract_strided_slice %6 {offsets = [0, 3, 0], sizes = [2, 8, 64], strides = [1, 1, 1]} : vector<2x14x64xbf16> to vector<2x8x64xbf16>
    %c3 = arith.constant 3 : index
    %c0_13 = arith.constant 0 : index
    %c0_14 = arith.constant 0 : index
    %22 = vector.load %arg2[%c3, %c0_13, %c0_14] : memref<7x64x128xbf16, #tpu.memory_space<vmem>>, vector<1x64x128xbf16>
    %23 = vector.shape_cast %22 : vector<1x64x128xbf16> to vector<64x128xbf16>
    %cst_15 = arith.constant dense<0.000000e+00> : vector<2x8x128xf32>
    %24 = tpu.matmul %21, %23, %cst_15 {dimension_numbers = #tpu.dot_dimension_numbers<[2], [0], [0, 1], [1], [0, 0, 0, 1, 1, 1], [], []>} : vector<2x8x64xbf16>, vector<64x128xbf16>, vector<2x8x128xf32> -> vector<2x8x128xf32>
    %25 = arith.addf %20, %24 : vector<2x8x128xf32>
    %26 = vector.extract_strided_slice %6 {offsets = [0, 4, 0], sizes = [2, 8, 64], strides = [1, 1, 1]} : vector<2x14x64xbf16> to vector<2x8x64xbf16>
    %c4 = arith.constant 4 : index
    %c0_16 = arith.constant 0 : index
    %c0_17 = arith.constant 0 : index
    %27 = vector.load %arg2[%c4, %c0_16, %c0_17] : memref<7x64x128xbf16, #tpu.memory_space<vmem>>, vector<1x64x128xbf16>
    %28 = vector.shape_cast %27 : vector<1x64x128xbf16> to vector<64x128xbf16>
    %cst_18 = arith.constant dense<0.000000e+00> : vector<2x8x128xf32>
    %29 = tpu.matmul %26, %28, %cst_18 {dimension_numbers = #tpu.dot_dimension_numbers<[2], [0], [0, 1], [1], [0, 0, 0, 1, 1, 1], [], []>} : vector<2x8x64xbf16>, vector<64x128xbf16>, vector<2x8x128xf32> -> vector<2x8x128xf32>
    %30 = arith.addf %25, %29 : vector<2x8x128xf32>
    %31 = vector.extract_strided_slice %6 {offsets = [0, 5, 0], sizes = [2, 8, 64], strides = [1, 1, 1]} : vector<2x14x64xbf16> to vector<2x8x64xbf16>
    %c5 = arith.constant 5 : index
    %c0_19 = arith.constant 0 : index
    %c0_20 = arith.constant 0 : index
    %32 = vector.load %arg2[%c5, %c0_19, %c0_20] : memref<7x64x128xbf16, #tpu.memory_space<vmem>>, vector<1x64x128xbf16>
    %33 = vector.shape_cast %32 : vector<1x64x128xbf16> to vector<64x128xbf16>
    %cst_21 = arith.constant dense<0.000000e+00> : vector<2x8x128xf32>
    %34 = tpu.matmul %31, %33, %cst_21 {dimension_numbers = #tpu.dot_dimension_numbers<[2], [0], [0, 1], [1], [0, 0, 0, 1, 1, 1], [], []>} : vector<2x8x64xbf16>, vector<64x128xbf16>, vector<2x8x128xf32> -> vector<2x8x128xf32>
    %35 = arith.addf %30, %34 : vector<2x8x128xf32>
    %36 = vector.extract_strided_slice %6 {offsets = [0, 6, 0], sizes = [2, 8, 64], strides = [1, 1, 1]} : vector<2x14x64xbf16> to vector<2x8x64xbf16>
    %c6 = arith.constant 6 : index
    %c0_22 = arith.constant 0 : index
    %c0_23 = arith.constant 0 : index
    %37 = vector.load %arg2[%c6, %c0_22, %c0_23] : memref<7x64x128xbf16, #tpu.memory_space<vmem>>, vector<1x64x128xbf16>
    %38 = vector.shape_cast %37 : vector<1x64x128xbf16> to vector<64x128xbf16>
    %cst_24 = arith.constant dense<0.000000e+00> : vector<2x8x128xf32>
    %39 = tpu.matmul %36, %38, %cst_24 {dimension_numbers = #tpu.dot_dimension_numbers<[2], [0], [0, 1], [1], [0, 0, 0, 1, 1, 1], [], []>} : vector<2x8x64xbf16>, vector<64x128xbf16>, vector<2x8x128xf32> -> vector<2x8x128xf32>
    %40 = arith.addf %35, %39 : vector<2x8x128xf32>
    %41 = arith.truncf %40 : vector<2x8x128xf32> to vector<2x8x128xbf16>
    %cst_25 = arith.constant 0.000000e+00 : bf16
    %42 = vector.broadcast %cst_25 : bf16 to vector<2x2x128xbf16>
    %cst_26 = arith.constant 0.000000e+00 : bf16
    %43 = vector.broadcast %cst_26 : bf16 to vector<2x2x128xbf16>
    %44 = tpu.concatenate %42, %41, %43 in 1 : vector<2x2x128xbf16>, vector<2x8x128xbf16>, vector<2x2x128xbf16> -> vector<2x12x128xbf16>
    %45 = vector.extract_strided_slice %44 {offsets = [0, 0, 0], sizes = [2, 8, 128], strides = [1, 1, 1]} : vector<2x12x128xbf16> to vector<2x8x128xbf16>
    %c0_27 = arith.constant 0 : index
    %c0_28 = arith.constant 0 : index
    %c0_29 = arith.constant 0 : index
    %46 = vector.load %arg3[%c0_27, %c0_28, %c0_29] : memref<5x128x128xbf16, #tpu.memory_space<vmem>>, vector<1x128x128xbf16>
    %47 = vector.shape_cast %46 : vector<1x128x128xbf16> to vector<128x128xbf16>
    %cst_30 = arith.constant dense<0.000000e+00> : vector<2x8x128xf32>
    %48 = tpu.matmul %45, %47, %cst_30 {dimension_numbers = #tpu.dot_dimension_numbers<[2], [0], [0, 1], [1], [0, 0, 0, 1, 1, 1], [], []>} : vector<2x8x128xbf16>, vector<128x128xbf16>, vector<2x8x128xf32> -> vector<2x8x128xf32>
    %49 = vector.extract_strided_slice %44 {offsets = [0, 1, 0], sizes = [2, 8, 128], strides = [1, 1, 1]} : vector<2x12x128xbf16> to vector<2x8x128xbf16>
    %c1_31 = arith.constant 1 : index
    %c0_32 = arith.constant 0 : index
    %c0_33 = arith.constant 0 : index
    %50 = vector.load %arg3[%c1_31, %c0_32, %c0_33] : memref<5x128x128xbf16, #tpu.memory_space<vmem>>, vector<1x128x128xbf16>
    %51 = vector.shape_cast %50 : vector<1x128x128xbf16> to vector<128x128xbf16>
    %cst_34 = arith.constant dense<0.000000e+00> : vector<2x8x128xf32>
    %52 = tpu.matmul %49, %51, %cst_34 {dimension_numbers = #tpu.dot_dimension_numbers<[2], [0], [0, 1], [1], [0, 0, 0, 1, 1, 1], [], []>} : vector<2x8x128xbf16>, vector<128x128xbf16>, vector<2x8x128xf32> -> vector<2x8x128xf32>
    %53 = arith.addf %48, %52 : vector<2x8x128xf32>
    %54 = vector.extract_strided_slice %44 {offsets = [0, 2, 0], sizes = [2, 8, 128], strides = [1, 1, 1]} : vector<2x12x128xbf16> to vector<2x8x128xbf16>
    %c2_35 = arith.constant 2 : index
    %c0_36 = arith.constant 0 : index
    %c0_37 = arith.constant 0 : index
    %55 = vector.load %arg3[%c2_35, %c0_36, %c0_37] : memref<5x128x128xbf16, #tpu.memory_space<vmem>>, vector<1x128x128xbf16>
    %56 = vector.shape_cast %55 : vector<1x128x128xbf16> to vector<128x128xbf16>
    %cst_38 = arith.constant dense<0.000000e+00> : vector<2x8x128xf32>
    %57 = tpu.matmul %54, %56, %cst_38 {dimension_numbers = #tpu.dot_dimension_numbers<[2], [0], [0, 1], [1], [0, 0, 0, 1, 1, 1], [], []>} : vector<2x8x128xbf16>, vector<128x128xbf16>, vector<2x8x128xf32> -> vector<2x8x128xf32>
    %58 = arith.addf %53, %57 : vector<2x8x128xf32>
    %59 = vector.extract_strided_slice %44 {offsets = [0, 3, 0], sizes = [2, 8, 128], strides = [1, 1, 1]} : vector<2x12x128xbf16> to vector<2x8x128xbf16>
    %c3_39 = arith.constant 3 : index
    %c0_40 = arith.constant 0 : index
    %c0_41 = arith.constant 0 : index
    %60 = vector.load %arg3[%c3_39, %c0_40, %c0_41] : memref<5x128x128xbf16, #tpu.memory_space<vmem>>, vector<1x128x128xbf16>
    %61 = vector.shape_cast %60 : vector<1x128x128xbf16> to vector<128x128xbf16>
    %cst_42 = arith.constant dense<0.000000e+00> : vector<2x8x128xf32>
    %62 = tpu.matmul %59, %61, %cst_42 {dimension_numbers = #tpu.dot_dimension_numbers<[2], [0], [0, 1], [1], [0, 0, 0, 1, 1, 1], [], []>} : vector<2x8x128xbf16>, vector<128x128xbf16>, vector<2x8x128xf32> -> vector<2x8x128xf32>
    %63 = arith.addf %58, %62 : vector<2x8x128xf32>
    %64 = vector.extract_strided_slice %44 {offsets = [0, 4, 0], sizes = [2, 8, 128], strides = [1, 1, 1]} : vector<2x12x128xbf16> to vector<2x8x128xbf16>
    %c4_43 = arith.constant 4 : index
    %c0_44 = arith.constant 0 : index
    %c0_45 = arith.constant 0 : index
    %65 = vector.load %arg3[%c4_43, %c0_44, %c0_45] : memref<5x128x128xbf16, #tpu.memory_space<vmem>>, vector<1x128x128xbf16>
    %66 = vector.shape_cast %65 : vector<1x128x128xbf16> to vector<128x128xbf16>
    %cst_46 = arith.constant dense<0.000000e+00> : vector<2x8x128xf32>
    %67 = tpu.matmul %64, %66, %cst_46 {dimension_numbers = #tpu.dot_dimension_numbers<[2], [0], [0, 1], [1], [0, 0, 0, 1, 1, 1], [], []>} : vector<2x8x128xbf16>, vector<128x128xbf16>, vector<2x8x128xf32> -> vector<2x8x128xf32>
    %68 = arith.addf %63, %67 : vector<2x8x128xf32>
    %69 = arith.truncf %68 : vector<2x8x128xf32> to vector<2x8x128xbf16>
    %cst_47 = arith.constant 0.000000e+00 : bf16
    %70 = vector.broadcast %cst_47 : bf16 to vector<2x1x128xbf16>
    %cst_48 = arith.constant 0.000000e+00 : bf16
    %71 = vector.broadcast %cst_48 : bf16 to vector<2x1x128xbf16>
    %72 = tpu.concatenate %70, %69, %71 in 1 : vector<2x1x128xbf16>, vector<2x8x128xbf16>, vector<2x1x128xbf16> -> vector<2x10x128xbf16>
    %73 = vector.extract_strided_slice %72 {offsets = [0, 0, 0], sizes = [2, 8, 128], strides = [1, 1, 1]} : vector<2x10x128xbf16> to vector<2x8x128xbf16>
    %c0_49 = arith.constant 0 : index
    %c0_50 = arith.constant 0 : index
    %c0_51 = arith.constant 0 : index
    %74 = vector.load %arg4[%c0_49, %c0_50, %c0_51] : memref<3x128x64xbf16, #tpu.memory_space<vmem>>, vector<1x128x64xbf16>
    %75 = vector.shape_cast %74 : vector<1x128x64xbf16> to vector<128x64xbf16>
    %cst_52 = arith.constant dense<0.000000e+00> : vector<2x8x64xf32>
    %76 = tpu.matmul %73, %75, %cst_52 {dimension_numbers = #tpu.dot_dimension_numbers<[2], [0], [0, 1], [1], [0, 0, 0, 1, 1, 1], [], []>} : vector<2x8x128xbf16>, vector<128x64xbf16>, vector<2x8x64xf32> -> vector<2x8x64xf32>
    %77 = vector.extract_strided_slice %72 {offsets = [0, 1, 0], sizes = [2, 8, 128], strides = [1, 1, 1]} : vector<2x10x128xbf16> to vector<2x8x128xbf16>
    %c1_53 = arith.constant 1 : index
    %c0_54 = arith.constant 0 : index
    %c0_55 = arith.constant 0 : index
    %78 = vector.load %arg4[%c1_53, %c0_54, %c0_55] : memref<3x128x64xbf16, #tpu.memory_space<vmem>>, vector<1x128x64xbf16>
    %79 = vector.shape_cast %78 : vector<1x128x64xbf16> to vector<128x64xbf16>
    %cst_56 = arith.constant dense<0.000000e+00> : vector<2x8x64xf32>
    %80 = tpu.matmul %77, %79, %cst_56 {dimension_numbers = #tpu.dot_dimension_numbers<[2], [0], [0, 1], [1], [0, 0, 0, 1, 1, 1], [], []>} : vector<2x8x128xbf16>, vector<128x64xbf16>, vector<2x8x64xf32> -> vector<2x8x64xf32>
    %81 = arith.addf %76, %80 : vector<2x8x64xf32>
    %82 = vector.extract_strided_slice %72 {offsets = [0, 2, 0], sizes = [2, 8, 128], strides = [1, 1, 1]} : vector<2x10x128xbf16> to vector<2x8x128xbf16>
    %c2_57 = arith.constant 2 : index
    %c0_58 = arith.constant 0 : index
    %c0_59 = arith.constant 0 : index
    %83 = vector.load %arg4[%c2_57, %c0_58, %c0_59] : memref<3x128x64xbf16, #tpu.memory_space<vmem>>, vector<1x128x64xbf16>
    %84 = vector.shape_cast %83 : vector<1x128x64xbf16> to vector<128x64xbf16>
    %cst_60 = arith.constant dense<0.000000e+00> : vector<2x8x64xf32>
    %85 = tpu.matmul %82, %84, %cst_60 {dimension_numbers = #tpu.dot_dimension_numbers<[2], [0], [0, 1], [1], [0, 0, 0, 1, 1, 1], [], []>} : vector<2x8x128xbf16>, vector<128x64xbf16>, vector<2x8x64xf32> -> vector<2x8x64xf32>
    %86 = arith.addf %81, %85 : vector<2x8x64xf32>
    %c0_61 = arith.constant 0 : index
    %c0_62 = arith.constant 0 : index
    %c0_63 = arith.constant 0 : index
    %87 = vector.load %arg5[%c0_61, %c0_62, %c0_63] : memref<1x1x64xf32, #tpu.memory_space<vmem>>, vector<1x1x64xf32>
    %88 = vector.broadcast %87 : vector<1x1x64xf32> to vector<2x8x64xf32>
    %89 = arith.addf %86, %88 : vector<2x8x64xf32>
    %cst_64 = arith.constant 0.000000e+00 : f32
    %90 = vector.broadcast %cst_64 : f32 to vector<2x8x64xf32>
    %91 = arith.maximumf %89, %90 : vector<2x8x64xf32>
    %92 = arith.truncf %91 : vector<2x8x64xf32> to vector<2x8x64xbf16>
    %cst_65 = arith.constant 0.000000e+00 : bf16
    %93 = vector.broadcast %cst_65 : bf16 to vector<2x1x64xbf16>
    %cst_66 = arith.constant 0.000000e+00 : bf16
    %94 = vector.broadcast %cst_66 : bf16 to vector<2x1x64xbf16>
    %95 = tpu.concatenate %93, %92, %94 in 1 : vector<2x1x64xbf16>, vector<2x8x64xbf16>, vector<2x1x64xbf16> -> vector<2x10x64xbf16>
    %96 = vector.extract_strided_slice %95 {offsets = [0, 0, 0], sizes = [2, 8, 64], strides = [1, 1, 1]} : vector<2x10x64xbf16> to vector<2x8x64xbf16>
    %c0_67 = arith.constant 0 : index
    %c0_68 = arith.constant 0 : index
    %c0_69 = arith.constant 0 : index
    %97 = vector.load %arg6[%c0_67, %c0_68, %c0_69] : memref<3x64x128xbf16, #tpu.memory_space<vmem>>, vector<1x64x128xbf16>
    %98 = vector.shape_cast %97 : vector<1x64x128xbf16> to vector<64x128xbf16>
    %cst_70 = arith.constant dense<0.000000e+00> : vector<2x8x128xf32>
    %99 = tpu.matmul %96, %98, %cst_70 {dimension_numbers = #tpu.dot_dimension_numbers<[2], [0], [0, 1], [1], [0, 0, 0, 1, 1, 1], [], []>} : vector<2x8x64xbf16>, vector<64x128xbf16>, vector<2x8x128xf32> -> vector<2x8x128xf32>
    %100 = vector.extract_strided_slice %95 {offsets = [0, 1, 0], sizes = [2, 8, 64], strides = [1, 1, 1]} : vector<2x10x64xbf16> to vector<2x8x64xbf16>
    %c1_71 = arith.constant 1 : index
    %c0_72 = arith.constant 0 : index
    %c0_73 = arith.constant 0 : index
    %101 = vector.load %arg6[%c1_71, %c0_72, %c0_73] : memref<3x64x128xbf16, #tpu.memory_space<vmem>>, vector<1x64x128xbf16>
    %102 = vector.shape_cast %101 : vector<1x64x128xbf16> to vector<64x128xbf16>
    %cst_74 = arith.constant dense<0.000000e+00> : vector<2x8x128xf32>
    %103 = tpu.matmul %100, %102, %cst_74 {dimension_numbers = #tpu.dot_dimension_numbers<[2], [0], [0, 1], [1], [0, 0, 0, 1, 1, 1], [], []>} : vector<2x8x64xbf16>, vector<64x128xbf16>, vector<2x8x128xf32> -> vector<2x8x128xf32>
    %104 = arith.addf %99, %103 : vector<2x8x128xf32>
    %105 = vector.extract_strided_slice %95 {offsets = [0, 2, 0], sizes = [2, 8, 64], strides = [1, 1, 1]} : vector<2x10x64xbf16> to vector<2x8x64xbf16>
    %c2_75 = arith.constant 2 : index
    %c0_76 = arith.constant 0 : index
    %c0_77 = arith.constant 0 : index
    %106 = vector.load %arg6[%c2_75, %c0_76, %c0_77] : memref<3x64x128xbf16, #tpu.memory_space<vmem>>, vector<1x64x128xbf16>
    %107 = vector.shape_cast %106 : vector<1x64x128xbf16> to vector<64x128xbf16>
    %cst_78 = arith.constant dense<0.000000e+00> : vector<2x8x128xf32>
    %108 = tpu.matmul %105, %107, %cst_78 {dimension_numbers = #tpu.dot_dimension_numbers<[2], [0], [0, 1], [1], [0, 0, 0, 1, 1, 1], [], []>} : vector<2x8x64xbf16>, vector<64x128xbf16>, vector<2x8x128xf32> -> vector<2x8x128xf32>
    %109 = arith.addf %104, %108 : vector<2x8x128xf32>
    %c0_79 = arith.constant 0 : index
    %c0_80 = arith.constant 0 : index
    %c0_81 = arith.constant 0 : index
    %110 = vector.load %arg7[%c0_79, %c0_80, %c0_81] : memref<1x1x128xf32, #tpu.memory_space<vmem>>, vector<1x1x128xf32>
    %111 = vector.broadcast %110 : vector<1x1x128xf32> to vector<2x8x128xf32>
    %112 = arith.mulf %109, %111 : vector<2x8x128xf32>
    %c0_82 = arith.constant 0 : index
    %c0_83 = arith.constant 0 : index
    %c0_84 = arith.constant 0 : index
    %113 = vector.load %arg8[%c0_82, %c0_83, %c0_84] : memref<1x1x128xf32, #tpu.memory_space<vmem>>, vector<1x1x128xf32>
    %114 = vector.broadcast %113 : vector<1x1x128xf32> to vector<2x8x128xf32>
    %115 = arith.addf %112, %114 : vector<2x8x128xf32>
    %cst_85 = arith.constant 0.000000e+00 : f32
    %116 = vector.broadcast %cst_85 : f32 to vector<2x8x128xf32>
    %117 = arith.cmpf ogt, %115, %116 : vector<2x8x128xf32>
    %cst_86 = arith.constant 2.000000e-01 : f32
    %118 = vector.broadcast %cst_86 : f32 to vector<2x8x128xf32>
    %119 = arith.mulf %118, %115 : vector<2x8x128xf32>
    %120 = arith.select %117, %115, %119 : vector<2x8x128xi1>, vector<2x8x128xf32>
    %121 = arith.truncf %120 : vector<2x8x128xf32> to vector<2x8x128xbf16>
    %cst_87 = arith.constant 0.000000e+00 : bf16
    %122 = vector.broadcast %cst_87 : bf16 to vector<2x1x128xbf16>
    %cst_88 = arith.constant 0.000000e+00 : bf16
    %123 = vector.broadcast %cst_88 : bf16 to vector<2x1x128xbf16>
    %124 = tpu.concatenate %122, %121, %123 in 1 : vector<2x1x128xbf16>, vector<2x8x128xbf16>, vector<2x1x128xbf16> -> vector<2x10x128xbf16>
    %125 = vector.extract_strided_slice %124 {offsets = [0, 0, 0], sizes = [2, 8, 128], strides = [1, 1, 1]} : vector<2x10x128xbf16> to vector<2x8x128xbf16>
    %c0_89 = arith.constant 0 : index
    %c0_90 = arith.constant 0 : index
    %c0_91 = arith.constant 0 : index
    %126 = vector.load %arg9[%c0_89, %c0_90, %c0_91] : memref<3x128x256xbf16, #tpu.memory_space<vmem>>, vector<1x128x256xbf16>
    %127 = vector.shape_cast %126 : vector<1x128x256xbf16> to vector<128x256xbf16>
    %cst_92 = arith.constant dense<0.000000e+00> : vector<2x8x256xf32>
    %128 = tpu.matmul %125, %127, %cst_92 {dimension_numbers = #tpu.dot_dimension_numbers<[2], [0], [0, 1], [1], [0, 0, 0, 1, 1, 1], [], []>} : vector<2x8x128xbf16>, vector<128x256xbf16>, vector<2x8x256xf32> -> vector<2x8x256xf32>
    %129 = vector.extract_strided_slice %124 {offsets = [0, 1, 0], sizes = [2, 8, 128], strides = [1, 1, 1]} : vector<2x10x128xbf16> to vector<2x8x128xbf16>
    %c1_93 = arith.constant 1 : index
    %c0_94 = arith.constant 0 : index
    %c0_95 = arith.constant 0 : index
    %130 = vector.load %arg9[%c1_93, %c0_94, %c0_95] : memref<3x128x256xbf16, #tpu.memory_space<vmem>>, vector<1x128x256xbf16>
    %131 = vector.shape_cast %130 : vector<1x128x256xbf16> to vector<128x256xbf16>
    %cst_96 = arith.constant dense<0.000000e+00> : vector<2x8x256xf32>
    %132 = tpu.matmul %129, %131, %cst_96 {dimension_numbers = #tpu.dot_dimension_numbers<[2], [0], [0, 1], [1], [0, 0, 0, 1, 1, 1], [], []>} : vector<2x8x128xbf16>, vector<128x256xbf16>, vector<2x8x256xf32> -> vector<2x8x256xf32>
    %133 = arith.addf %128, %132 : vector<2x8x256xf32>
    %134 = vector.extract_strided_slice %124 {offsets = [0, 2, 0], sizes = [2, 8, 128], strides = [1, 1, 1]} : vector<2x10x128xbf16> to vector<2x8x128xbf16>
    %c2_97 = arith.constant 2 : index
    %c0_98 = arith.constant 0 : index
    %c0_99 = arith.constant 0 : index
    %135 = vector.load %arg9[%c2_97, %c0_98, %c0_99] : memref<3x128x256xbf16, #tpu.memory_space<vmem>>, vector<1x128x256xbf16>
    %136 = vector.shape_cast %135 : vector<1x128x256xbf16> to vector<128x256xbf16>
    %cst_100 = arith.constant dense<0.000000e+00> : vector<2x8x256xf32>
    %137 = tpu.matmul %134, %136, %cst_100 {dimension_numbers = #tpu.dot_dimension_numbers<[2], [0], [0, 1], [1], [0, 0, 0, 1, 1, 1], [], []>} : vector<2x8x128xbf16>, vector<128x256xbf16>, vector<2x8x256xf32> -> vector<2x8x256xf32>
    %138 = arith.addf %133, %137 : vector<2x8x256xf32>
    %c0_101 = arith.constant 0 : index
    %c0_102 = arith.constant 0 : index
    %c0_103 = arith.constant 0 : index
    %139 = vector.load %arg10[%c0_101, %c0_102, %c0_103] : memref<1x1x256xf32, #tpu.memory_space<vmem>>, vector<1x1x256xf32>
    %140 = vector.broadcast %139 : vector<1x1x256xf32> to vector<2x8x256xf32>
    %141 = arith.mulf %138, %140 : vector<2x8x256xf32>
    %c0_104 = arith.constant 0 : index
    %c0_105 = arith.constant 0 : index
    %c0_106 = arith.constant 0 : index
    %142 = vector.load %arg11[%c0_104, %c0_105, %c0_106] : memref<1x1x256xf32, #tpu.memory_space<vmem>>, vector<1x1x256xf32>
    %143 = vector.broadcast %142 : vector<1x1x256xf32> to vector<2x8x256xf32>
    %144 = arith.addf %141, %143 : vector<2x8x256xf32>
    %cst_107 = arith.constant 0.000000e+00 : f32
    %145 = vector.broadcast %cst_107 : f32 to vector<2x8x256xf32>
    %146 = arith.cmpf ogt, %144, %145 : vector<2x8x256xf32>
    %cst_108 = arith.constant 2.500000e-01 : f32
    %147 = vector.broadcast %cst_108 : f32 to vector<2x8x256xf32>
    %148 = arith.mulf %147, %144 : vector<2x8x256xf32>
    %149 = arith.select %146, %144, %148 : vector<2x8x256xi1>, vector<2x8x256xf32>
    %150 = arith.truncf %149 : vector<2x8x256xf32> to vector<2x8x256xbf16>
    %cst_109 = arith.constant 0.000000e+00 : bf16
    %151 = vector.broadcast %cst_109 : bf16 to vector<2x1x256xbf16>
    %cst_110 = arith.constant 0.000000e+00 : bf16
    %152 = vector.broadcast %cst_110 : bf16 to vector<2x1x256xbf16>
    %153 = tpu.concatenate %151, %150, %152 in 1 : vector<2x1x256xbf16>, vector<2x8x256xbf16>, vector<2x1x256xbf16> -> vector<2x10x256xbf16>
    %154 = vector.extract_strided_slice %153 {offsets = [0, 0, 0], sizes = [2, 8, 256], strides = [1, 1, 1]} : vector<2x10x256xbf16> to vector<2x8x256xbf16>
    %c0_111 = arith.constant 0 : index
    %c0_112 = arith.constant 0 : index
    %c0_113 = arith.constant 0 : index
    %155 = vector.load %arg12[%c0_111, %c0_112, %c0_113] : memref<3x256x128xbf16, #tpu.memory_space<vmem>>, vector<1x256x128xbf16>
    %156 = vector.shape_cast %155 : vector<1x256x128xbf16> to vector<256x128xbf16>
    %cst_114 = arith.constant dense<0.000000e+00> : vector<2x8x128xf32>
    %157 = tpu.matmul %154, %156, %cst_114 {dimension_numbers = #tpu.dot_dimension_numbers<[2], [0], [0, 1], [1], [0, 0, 0, 1, 1, 1], [], []>} : vector<2x8x256xbf16>, vector<256x128xbf16>, vector<2x8x128xf32> -> vector<2x8x128xf32>
    %158 = vector.extract_strided_slice %153 {offsets = [0, 1, 0], sizes = [2, 8, 256], strides = [1, 1, 1]} : vector<2x10x256xbf16> to vector<2x8x256xbf16>
    %c1_115 = arith.constant 1 : index
    %c0_116 = arith.constant 0 : index
    %c0_117 = arith.constant 0 : index
    %159 = vector.load %arg12[%c1_115, %c0_116, %c0_117] : memref<3x256x128xbf16, #tpu.memory_space<vmem>>, vector<1x256x128xbf16>
    %160 = vector.shape_cast %159 : vector<1x256x128xbf16> to vector<256x128xbf16>
    %cst_118 = arith.constant dense<0.000000e+00> : vector<2x8x128xf32>
    %161 = tpu.matmul %158, %160, %cst_118 {dimension_numbers = #tpu.dot_dimension_numbers<[2], [0], [0, 1], [1], [0, 0, 0, 1, 1, 1], [], []>} : vector<2x8x256xbf16>, vector<256x128xbf16>, vector<2x8x128xf32> -> vector<2x8x128xf32>
    %162 = arith.addf %157, %161 : vector<2x8x128xf32>
    %163 = vector.extract_strided_slice %153 {offsets = [0, 2, 0], sizes = [2, 8, 256], strides = [1, 1, 1]} : vector<2x10x256xbf16> to vector<2x8x256xbf16>
    %c2_119 = arith.constant 2 : index
    %c0_120 = arith.constant 0 : index
    %c0_121 = arith.constant 0 : index
    %164 = vector.load %arg12[%c2_119, %c0_120, %c0_121] : memref<3x256x128xbf16, #tpu.memory_space<vmem>>, vector<1x256x128xbf16>
    %165 = vector.shape_cast %164 : vector<1x256x128xbf16> to vector<256x128xbf16>
    %cst_122 = arith.constant dense<0.000000e+00> : vector<2x8x128xf32>
    %166 = tpu.matmul %163, %165, %cst_122 {dimension_numbers = #tpu.dot_dimension_numbers<[2], [0], [0, 1], [1], [0, 0, 0, 1, 1, 1], [], []>} : vector<2x8x256xbf16>, vector<256x128xbf16>, vector<2x8x128xf32> -> vector<2x8x128xf32>
    %167 = arith.addf %162, %166 : vector<2x8x128xf32>
    %c0_123 = arith.constant 0 : index
    %c0_124 = arith.constant 0 : index
    %c0_125 = arith.constant 0 : index
    %168 = vector.load %arg13[%c0_123, %c0_124, %c0_125] : memref<1x1x128xf32, #tpu.memory_space<vmem>>, vector<1x1x128xf32>
    %169 = vector.broadcast %168 : vector<1x1x128xf32> to vector<2x8x128xf32>
    %170 = arith.mulf %167, %169 : vector<2x8x128xf32>
    %c0_126 = arith.constant 0 : index
    %c0_127 = arith.constant 0 : index
    %c0_128 = arith.constant 0 : index
    %171 = vector.load %arg14[%c0_126, %c0_127, %c0_128] : memref<1x1x128xf32, #tpu.memory_space<vmem>>, vector<1x1x128xf32>
    %172 = vector.broadcast %171 : vector<1x1x128xf32> to vector<2x8x128xf32>
    %173 = arith.addf %170, %172 : vector<2x8x128xf32>
    %cst_129 = arith.constant 0.000000e+00 : f32
    %174 = vector.broadcast %cst_129 : f32 to vector<2x8x128xf32>
    %175 = arith.cmpf ogt, %173, %174 : vector<2x8x128xf32>
    %cst_130 = arith.constant 0.000000e+00 : f32
    %176 = vector.broadcast %cst_130 : f32 to vector<2x8x128xf32>
    %177 = arith.minimumf %173, %176 : vector<2x8x128xf32>
    %178 = math.exp %177 : vector<2x8x128xf32>
    %cst_131 = arith.constant 1.000000e+00 : f32
    %179 = vector.broadcast %cst_131 : f32 to vector<2x8x128xf32>
    %180 = arith.subf %178, %179 : vector<2x8x128xf32>
    %cst_132 = arith.constant 3.000000e-01 : f32
    %181 = vector.broadcast %cst_132 : f32 to vector<2x8x128xf32>
    %182 = arith.mulf %181, %180 : vector<2x8x128xf32>
    %183 = arith.select %175, %173, %182 : vector<2x8x128xi1>, vector<2x8x128xf32>
    %cst_133 = arith.constant dense<0.000000e+00> : vector<2x128xf32>
    %184 = vector.multi_reduction <add>, %183, %cst_133 [1] : vector<2x8x128xf32> to vector<2x128xf32>
    %185 = vector.shape_cast %184 : vector<2x128xf32> to vector<2x1x128xf32>
    %cst_134 = arith.constant 8.000000e+00 : f32
    %186 = vector.broadcast %cst_134 : f32 to vector<2x1x128xf32>
    %187 = arith.divf %185, %186 : vector<2x1x128xf32>
    %c0_135 = arith.constant 0 : index
    %c0_136 = arith.constant 0 : index
    %c0_137 = arith.constant 0 : index
    %188 = vector.load %arg15[%c0_135, %c0_136, %c0_137] : memref<2x1x128xf32, #tpu.memory_space<vmem>>, vector<2x1x128xf32>
    tpu.vector_store %arg15[%c0_135, %c0_136, %c0_137], %187 {strides = array<i32>} : memref<2x1x128xf32, #tpu.memory_space<vmem>>, vector<2x1x128xf32>,
    return
  }
  func.func @transform_0(%arg0: i32) -> (i32, i32, i32) {
    %c0_i32 = arith.constant 0 : i32
    %c0_i32_0 = arith.constant 0 : i32
    %c0_i32_1 = arith.constant 0 : i32
    return %arg0, %c0_i32, %c0_i32_0 : i32, i32, i32
  }
  func.func @transform_1(%arg0: i32) -> (i32, i32, i32) {
    %c0_i32 = arith.constant 0 : i32
    %c0_i32_0 = arith.constant 0 : i32
    %c0_i32_1 = arith.constant 0 : i32
    %c0_i32_2 = arith.constant 0 : i32
    return %c0_i32, %c0_i32_0, %c0_i32_1 : i32, i32, i32
  }
  func.func @transform_2(%arg0: i32) -> (i32, i32, i32) {
    %c0_i32 = arith.constant 0 : i32
    %c0_i32_0 = arith.constant 0 : i32
    %c0_i32_1 = arith.constant 0 : i32
    %c0_i32_2 = arith.constant 0 : i32
    return %c0_i32, %c0_i32_0, %c0_i32_1 : i32, i32, i32
  }
  func.func @transform_3(%arg0: i32) -> (i32, i32, i32) {
    %c0_i32 = arith.constant 0 : i32
    %c0_i32_0 = arith.constant 0 : i32
    %c0_i32_1 = arith.constant 0 : i32
    %c0_i32_2 = arith.constant 0 : i32
    return %c0_i32, %c0_i32_0, %c0_i32_1 : i32, i32, i32
  }
  func.func @transform_4(%arg0: i32) -> (i32, i32, i32) {
    %c0_i32 = arith.constant 0 : i32
    %c0_i32_0 = arith.constant 0 : i32
    %c0_i32_1 = arith.constant 0 : i32
    %c0_i32_2 = arith.constant 0 : i32
    return %c0_i32, %c0_i32_0, %c0_i32_1 : i32, i32, i32
  }
  func.func @transform_5(%arg0: i32) -> (i32, i32, i32) {
    %c0_i32 = arith.constant 0 : i32
    %c0_i32_0 = arith.constant 0 : i32
    %c0_i32_1 = arith.constant 0 : i32
    %c0_i32_2 = arith.constant 0 : i32
    return %c0_i32, %c0_i32_0, %c0_i32_1 : i32, i32, i32
  }
  func.func @transform_6(%arg0: i32) -> (i32, i32, i32) {
    %c0_i32 = arith.constant 0 : i32
    %c0_i32_0 = arith.constant 0 : i32
    %c0_i32_1 = arith.constant 0 : i32
    %c0_i32_2 = arith.constant 0 : i32
    return %c0_i32, %c0_i32_0, %c0_i32_1 : i32, i32, i32
  }
  func.func @transform_7(%arg0: i32) -> (i32, i32, i32) {
    %c0_i32 = arith.constant 0 : i32
    %c0_i32_0 = arith.constant 0 : i32
    %c0_i32_1 = arith.constant 0 : i32
    %c0_i32_2 = arith.constant 0 : i32
    return %c0_i32, %c0_i32_0, %c0_i32_1 : i32, i32, i32
  }
  func.func @transform_8(%arg0: i32) -> (i32, i32, i32) {
    %c0_i32 = arith.constant 0 : i32
    %c0_i32_0 = arith.constant 0 : i32
    %c0_i32_1 = arith.constant 0 : i32
    %c0_i32_2 = arith.constant 0 : i32
    return %c0_i32, %c0_i32_0, %c0_i32_1 : i32, i32, i32
  }
  func.func @transform_9(%arg0: i32) -> (i32, i32, i32) {
    %c0_i32 = arith.constant 0 : i32
    %c0_i32_0 = arith.constant 0 : i32
    %c0_i32_1 = arith.constant 0 : i32
    %c0_i32_2 = arith.constant 0 : i32
    return %c0_i32, %c0_i32_0, %c0_i32_1 : i32, i32, i32
  }
  func.func @transform_10(%arg0: i32) -> (i32, i32, i32) {
    %c0_i32 = arith.constant 0 : i32
    %c0_i32_0 = arith.constant 0 : i32
    %c0_i32_1 = arith.constant 0 : i32
    %c0_i32_2 = arith.constant 0 : i32
    return %c0_i32, %c0_i32_0, %c0_i32_1 : i32, i32, i32
  }
  func.func @transform_11(%arg0: i32) -> (i32, i32, i32) {
    %c0_i32 = arith.constant 0 : i32
    %c0_i32_0 = arith.constant 0 : i32
    %c0_i32_1 = arith.constant 0 : i32
    %c0_i32_2 = arith.constant 0 : i32
    return %c0_i32, %c0_i32_0, %c0_i32_1 : i32, i32, i32
  }
  func.func @transform_12(%arg0: i32) -> (i32, i32, i32) {
    %c0_i32 = arith.constant 0 : i32
    %c0_i32_0 = arith.constant 0 : i32
    %c0_i32_1 = arith.constant 0 : i32
    %c0_i32_2 = arith.constant 0 : i32
    return %c0_i32, %c0_i32_0, %c0_i32_1 : i32, i32, i32
  }
  func.func @transform_13(%arg0: i32) -> (i32, i32, i32) {
    %c0_i32 = arith.constant 0 : i32
    %c0_i32_0 = arith.constant 0 : i32
    %c0_i32_1 = arith.constant 0 : i32
    %c0_i32_2 = arith.constant 0 : i32
    return %c0_i32, %c0_i32_0, %c0_i32_1 : i32, i32, i32
  }
  func.func @transform_14(%arg0: i32) -> (i32, i32, i32) {
    %c0_i32 = arith.constant 0 : i32
    %c0_i32_0 = arith.constant 0 : i32
    %c0_i32_1 = arith.constant 0 : i32
    return %arg0, %c0_i32, %c0_i32_0 : i32, i32, i32
  }
}

module attributes {stable_mosaic.version = 11 : i64} {
  func.func @_rescnn_kernel(%arg0: i32, %arg1: memref<2x64x16xbf16, #tpu.memory_space<vmem>>, %arg2: memref<7x64x128xbf16, #tpu.memory_space<vmem>>, %arg3: memref<5x128x128xbf16, #tpu.memory_space<vmem>>, %arg4: memref<3x128x64xbf16, #tpu.memory_space<vmem>>, %arg5: memref<1x1x64xf32, #tpu.memory_space<vmem>>, %arg6: memref<3x64x128xbf16, #tpu.memory_space<vmem>>, %arg7: memref<1x1x128xf32, #tpu.memory_space<vmem>>, %arg8: memref<1x1x128xf32, #tpu.memory_space<vmem>>, %arg9: memref<3x128x256xbf16, #tpu.memory_space<vmem>>, %arg10: memref<1x1x256xf32, #tpu.memory_space<vmem>>, %arg11: memref<1x1x256xf32, #tpu.memory_space<vmem>>, %arg12: memref<3x256x128xbf16, #tpu.memory_space<vmem>>, %arg13: memref<1x1x128xf32, #tpu.memory_space<vmem>>, %arg14: memref<1x1x128xf32, #tpu.memory_space<vmem>>, %arg15: memref<2x1x128xf32, #tpu.memory_space<vmem>>) attributes {dimension_semantics = [#tpu.dimension_semantics<parallel>], iteration_bounds = array<i64: 2>, scalar_prefetch = 0 : i64, scratch_operands = 0 : i64, tpu.core_type = #tpu.core_type<tc>, window_params = [{transform_indices = @transform_0, window_bounds = array<i64: 2, 64, 16>}, {pipeline_mode = #tpu.pipeline_mode<synchronous>, transform_indices = @transform_1, window_bounds = array<i64: 7, 64, 128>}, {pipeline_mode = #tpu.pipeline_mode<synchronous>, transform_indices = @transform_2, window_bounds = array<i64: 5, 128, 128>}, {pipeline_mode = #tpu.pipeline_mode<synchronous>, transform_indices = @transform_3, window_bounds = array<i64: 3, 128, 64>}, {pipeline_mode = #tpu.pipeline_mode<synchronous>, transform_indices = @transform_4, window_bounds = array<i64: 1, 1, 64>}, {pipeline_mode = #tpu.pipeline_mode<synchronous>, transform_indices = @transform_5, window_bounds = array<i64: 3, 64, 128>}, {pipeline_mode = #tpu.pipeline_mode<synchronous>, transform_indices = @transform_6, window_bounds = array<i64: 1, 1, 128>}, {pipeline_mode = #tpu.pipeline_mode<synchronous>, transform_indices = @transform_7, window_bounds = array<i64: 1, 1, 128>}, {pipeline_mode = #tpu.pipeline_mode<synchronous>, transform_indices = @transform_8, window_bounds = array<i64: 3, 128, 256>}, {pipeline_mode = #tpu.pipeline_mode<synchronous>, transform_indices = @transform_9, window_bounds = array<i64: 1, 1, 256>}, {pipeline_mode = #tpu.pipeline_mode<synchronous>, transform_indices = @transform_10, window_bounds = array<i64: 1, 1, 256>}, {pipeline_mode = #tpu.pipeline_mode<synchronous>, transform_indices = @transform_11, window_bounds = array<i64: 3, 256, 128>}, {pipeline_mode = #tpu.pipeline_mode<synchronous>, transform_indices = @transform_12, window_bounds = array<i64: 1, 1, 128>}, {pipeline_mode = #tpu.pipeline_mode<synchronous>, transform_indices = @transform_13, window_bounds = array<i64: 1, 1, 128>}, {transform_indices = @transform_14, window_bounds = array<i64: 2, 1, 128>}]} {
    %c0 = arith.constant 0 : index
    %c0_0 = arith.constant 0 : index
    %c0_1 = arith.constant 0 : index
    %0 = vector.load %arg1[%c0, %c0_0, %c0_1] : memref<2x64x16xbf16, #tpu.memory_space<vmem>>, vector<2x64x16xbf16>
    %1 = arith.extf %0 : vector<2x64x16xbf16> to vector<2x64x16xf32>
    %2 = tpu.transpose %1, [0, 2, 1] : vector<2x64x16xf32> -> vector<2x16x64xf32>
    %3 = arith.truncf %2 : vector<2x16x64xf32> to vector<2x16x64xbf16>
    %cst = arith.constant 0.000000e+00 : bf16
    %4 = vector.broadcast %cst : bf16 to vector<2x3x64xbf16>
    %cst_2 = arith.constant 0.000000e+00 : bf16
    %5 = vector.broadcast %cst_2 : bf16 to vector<2x3x64xbf16>
    %6 = tpu.concatenate %4, %3, %5 in 1 : vector<2x3x64xbf16>, vector<2x16x64xbf16>, vector<2x3x64xbf16> -> vector<2x22x64xbf16>
    %7 = vector.extract_strided_slice %6 {offsets = [0, 0, 0], sizes = [2, 16, 64], strides = [1, 1, 1]} : vector<2x22x64xbf16> to vector<2x16x64xbf16>
    %c0_3 = arith.constant 0 : index
    %c0_4 = arith.constant 0 : index
    %c0_5 = arith.constant 0 : index
    %8 = vector.load %arg2[%c0_3, %c0_4, %c0_5] : memref<7x64x128xbf16, #tpu.memory_space<vmem>>, vector<1x64x128xbf16>
    %9 = vector.shape_cast %8 : vector<1x64x128xbf16> to vector<64x128xbf16>
    %cst_6 = arith.constant dense<0.000000e+00> : vector<2x16x128xf32>
    %10 = tpu.matmul %7, %9, %cst_6 {dimension_numbers = #tpu.dot_dimension_numbers<[2], [0], [0, 1], [1], [0, 0, 0, 1, 1, 1], [], []>} : vector<2x16x64xbf16>, vector<64x128xbf16>, vector<2x16x128xf32> -> vector<2x16x128xf32>
    %11 = vector.extract_strided_slice %6 {offsets = [0, 1, 0], sizes = [2, 16, 64], strides = [1, 1, 1]} : vector<2x22x64xbf16> to vector<2x16x64xbf16>
    %c1 = arith.constant 1 : index
    %c0_7 = arith.constant 0 : index
    %c0_8 = arith.constant 0 : index
    %12 = vector.load %arg2[%c1, %c0_7, %c0_8] : memref<7x64x128xbf16, #tpu.memory_space<vmem>>, vector<1x64x128xbf16>
    %13 = vector.shape_cast %12 : vector<1x64x128xbf16> to vector<64x128xbf16>
    %cst_9 = arith.constant dense<0.000000e+00> : vector<2x16x128xf32>
    %14 = tpu.matmul %11, %13, %cst_9 {dimension_numbers = #tpu.dot_dimension_numbers<[2], [0], [0, 1], [1], [0, 0, 0, 1, 1, 1], [], []>} : vector<2x16x64xbf16>, vector<64x128xbf16>, vector<2x16x128xf32> -> vector<2x16x128xf32>
    %15 = arith.addf %10, %14 : vector<2x16x128xf32>
    %16 = vector.extract_strided_slice %6 {offsets = [0, 2, 0], sizes = [2, 16, 64], strides = [1, 1, 1]} : vector<2x22x64xbf16> to vector<2x16x64xbf16>
    %c2 = arith.constant 2 : index
    %c0_10 = arith.constant 0 : index
    %c0_11 = arith.constant 0 : index
    %17 = vector.load %arg2[%c2, %c0_10, %c0_11] : memref<7x64x128xbf16, #tpu.memory_space<vmem>>, vector<1x64x128xbf16>
    %18 = vector.shape_cast %17 : vector<1x64x128xbf16> to vector<64x128xbf16>
    %cst_12 = arith.constant dense<0.000000e+00> : vector<2x16x128xf32>
    %19 = tpu.matmul %16, %18, %cst_12 {dimension_numbers = #tpu.dot_dimension_numbers<[2], [0], [0, 1], [1], [0, 0, 0, 1, 1, 1], [], []>} : vector<2x16x64xbf16>, vector<64x128xbf16>, vector<2x16x128xf32> -> vector<2x16x128xf32>
    %20 = arith.addf %15, %19 : vector<2x16x128xf32>
    %21 = vector.extract_strided_slice %6 {offsets = [0, 3, 0], sizes = [2, 16, 64], strides = [1, 1, 1]} : vector<2x22x64xbf16> to vector<2x16x64xbf16>
    %c3 = arith.constant 3 : index
    %c0_13 = arith.constant 0 : index
    %c0_14 = arith.constant 0 : index
    %22 = vector.load %arg2[%c3, %c0_13, %c0_14] : memref<7x64x128xbf16, #tpu.memory_space<vmem>>, vector<1x64x128xbf16>
    %23 = vector.shape_cast %22 : vector<1x64x128xbf16> to vector<64x128xbf16>
    %cst_15 = arith.constant dense<0.000000e+00> : vector<2x16x128xf32>
    %24 = tpu.matmul %21, %23, %cst_15 {dimension_numbers = #tpu.dot_dimension_numbers<[2], [0], [0, 1], [1], [0, 0, 0, 1, 1, 1], [], []>} : vector<2x16x64xbf16>, vector<64x128xbf16>, vector<2x16x128xf32> -> vector<2x16x128xf32>
    %25 = arith.addf %20, %24 : vector<2x16x128xf32>
    %26 = vector.extract_strided_slice %6 {offsets = [0, 4, 0], sizes = [2, 16, 64], strides = [1, 1, 1]} : vector<2x22x64xbf16> to vector<2x16x64xbf16>
    %c4 = arith.constant 4 : index
    %c0_16 = arith.constant 0 : index
    %c0_17 = arith.constant 0 : index
    %27 = vector.load %arg2[%c4, %c0_16, %c0_17] : memref<7x64x128xbf16, #tpu.memory_space<vmem>>, vector<1x64x128xbf16>
    %28 = vector.shape_cast %27 : vector<1x64x128xbf16> to vector<64x128xbf16>
    %cst_18 = arith.constant dense<0.000000e+00> : vector<2x16x128xf32>
    %29 = tpu.matmul %26, %28, %cst_18 {dimension_numbers = #tpu.dot_dimension_numbers<[2], [0], [0, 1], [1], [0, 0, 0, 1, 1, 1], [], []>} : vector<2x16x64xbf16>, vector<64x128xbf16>, vector<2x16x128xf32> -> vector<2x16x128xf32>
    %30 = arith.addf %25, %29 : vector<2x16x128xf32>
    %31 = vector.extract_strided_slice %6 {offsets = [0, 5, 0], sizes = [2, 16, 64], strides = [1, 1, 1]} : vector<2x22x64xbf16> to vector<2x16x64xbf16>
    %c5 = arith.constant 5 : index
    %c0_19 = arith.constant 0 : index
    %c0_20 = arith.constant 0 : index
    %32 = vector.load %arg2[%c5, %c0_19, %c0_20] : memref<7x64x128xbf16, #tpu.memory_space<vmem>>, vector<1x64x128xbf16>
    %33 = vector.shape_cast %32 : vector<1x64x128xbf16> to vector<64x128xbf16>
    %cst_21 = arith.constant dense<0.000000e+00> : vector<2x16x128xf32>
    %34 = tpu.matmul %31, %33, %cst_21 {dimension_numbers = #tpu.dot_dimension_numbers<[2], [0], [0, 1], [1], [0, 0, 0, 1, 1, 1], [], []>} : vector<2x16x64xbf16>, vector<64x128xbf16>, vector<2x16x128xf32> -> vector<2x16x128xf32>
    %35 = arith.addf %30, %34 : vector<2x16x128xf32>
    %36 = vector.extract_strided_slice %6 {offsets = [0, 6, 0], sizes = [2, 16, 64], strides = [1, 1, 1]} : vector<2x22x64xbf16> to vector<2x16x64xbf16>
    %c6 = arith.constant 6 : index
    %c0_22 = arith.constant 0 : index
    %c0_23 = arith.constant 0 : index
    %37 = vector.load %arg2[%c6, %c0_22, %c0_23] : memref<7x64x128xbf16, #tpu.memory_space<vmem>>, vector<1x64x128xbf16>
    %38 = vector.shape_cast %37 : vector<1x64x128xbf16> to vector<64x128xbf16>
    %cst_24 = arith.constant dense<0.000000e+00> : vector<2x16x128xf32>
    %39 = tpu.matmul %36, %38, %cst_24 {dimension_numbers = #tpu.dot_dimension_numbers<[2], [0], [0, 1], [1], [0, 0, 0, 1, 1, 1], [], []>} : vector<2x16x64xbf16>, vector<64x128xbf16>, vector<2x16x128xf32> -> vector<2x16x128xf32>
    %40 = arith.addf %35, %39 : vector<2x16x128xf32>
    %41 = arith.truncf %40 : vector<2x16x128xf32> to vector<2x16x128xbf16>
    %cst_25 = arith.constant 0.000000e+00 : bf16
    %42 = vector.broadcast %cst_25 : bf16 to vector<2x2x128xbf16>
    %cst_26 = arith.constant 0.000000e+00 : bf16
    %43 = vector.broadcast %cst_26 : bf16 to vector<2x2x128xbf16>
    %44 = tpu.concatenate %42, %41, %43 in 1 : vector<2x2x128xbf16>, vector<2x16x128xbf16>, vector<2x2x128xbf16> -> vector<2x20x128xbf16>
    %45 = vector.extract_strided_slice %44 {offsets = [0, 0, 0], sizes = [2, 16, 128], strides = [1, 1, 1]} : vector<2x20x128xbf16> to vector<2x16x128xbf16>
    %c0_27 = arith.constant 0 : index
    %c0_28 = arith.constant 0 : index
    %c0_29 = arith.constant 0 : index
    %46 = vector.load %arg3[%c0_27, %c0_28, %c0_29] : memref<5x128x128xbf16, #tpu.memory_space<vmem>>, vector<1x128x128xbf16>
    %47 = vector.shape_cast %46 : vector<1x128x128xbf16> to vector<128x128xbf16>
    %cst_30 = arith.constant dense<0.000000e+00> : vector<2x16x128xf32>
    %48 = tpu.matmul %45, %47, %cst_30 {dimension_numbers = #tpu.dot_dimension_numbers<[2], [0], [0, 1], [1], [0, 0, 0, 1, 1, 1], [], []>} : vector<2x16x128xbf16>, vector<128x128xbf16>, vector<2x16x128xf32> -> vector<2x16x128xf32>
    %49 = vector.extract_strided_slice %44 {offsets = [0, 1, 0], sizes = [2, 16, 128], strides = [1, 1, 1]} : vector<2x20x128xbf16> to vector<2x16x128xbf16>
    %c1_31 = arith.constant 1 : index
    %c0_32 = arith.constant 0 : index
    %c0_33 = arith.constant 0 : index
    %50 = vector.load %arg3[%c1_31, %c0_32, %c0_33] : memref<5x128x128xbf16, #tpu.memory_space<vmem>>, vector<1x128x128xbf16>
    %51 = vector.shape_cast %50 : vector<1x128x128xbf16> to vector<128x128xbf16>
    %cst_34 = arith.constant dense<0.000000e+00> : vector<2x16x128xf32>
    %52 = tpu.matmul %49, %51, %cst_34 {dimension_numbers = #tpu.dot_dimension_numbers<[2], [0], [0, 1], [1], [0, 0, 0, 1, 1, 1], [], []>} : vector<2x16x128xbf16>, vector<128x128xbf16>, vector<2x16x128xf32> -> vector<2x16x128xf32>
    %53 = arith.addf %48, %52 : vector<2x16x128xf32>
    %54 = vector.extract_strided_slice %44 {offsets = [0, 2, 0], sizes = [2, 16, 128], strides = [1, 1, 1]} : vector<2x20x128xbf16> to vector<2x16x128xbf16>
    %c2_35 = arith.constant 2 : index
    %c0_36 = arith.constant 0 : index
    %c0_37 = arith.constant 0 : index
    %55 = vector.load %arg3[%c2_35, %c0_36, %c0_37] : memref<5x128x128xbf16, #tpu.memory_space<vmem>>, vector<1x128x128xbf16>
    %56 = vector.shape_cast %55 : vector<1x128x128xbf16> to vector<128x128xbf16>
    %cst_38 = arith.constant dense<0.000000e+00> : vector<2x16x128xf32>
    %57 = tpu.matmul %54, %56, %cst_38 {dimension_numbers = #tpu.dot_dimension_numbers<[2], [0], [0, 1], [1], [0, 0, 0, 1, 1, 1], [], []>} : vector<2x16x128xbf16>, vector<128x128xbf16>, vector<2x16x128xf32> -> vector<2x16x128xf32>
    %58 = arith.addf %53, %57 : vector<2x16x128xf32>
    %59 = vector.extract_strided_slice %44 {offsets = [0, 3, 0], sizes = [2, 16, 128], strides = [1, 1, 1]} : vector<2x20x128xbf16> to vector<2x16x128xbf16>
    %c3_39 = arith.constant 3 : index
    %c0_40 = arith.constant 0 : index
    %c0_41 = arith.constant 0 : index
    %60 = vector.load %arg3[%c3_39, %c0_40, %c0_41] : memref<5x128x128xbf16, #tpu.memory_space<vmem>>, vector<1x128x128xbf16>
    %61 = vector.shape_cast %60 : vector<1x128x128xbf16> to vector<128x128xbf16>
    %cst_42 = arith.constant dense<0.000000e+00> : vector<2x16x128xf32>
    %62 = tpu.matmul %59, %61, %cst_42 {dimension_numbers = #tpu.dot_dimension_numbers<[2], [0], [0, 1], [1], [0, 0, 0, 1, 1, 1], [], []>} : vector<2x16x128xbf16>, vector<128x128xbf16>, vector<2x16x128xf32> -> vector<2x16x128xf32>
    %63 = arith.addf %58, %62 : vector<2x16x128xf32>
    %64 = vector.extract_strided_slice %44 {offsets = [0, 4, 0], sizes = [2, 16, 128], strides = [1, 1, 1]} : vector<2x20x128xbf16> to vector<2x16x128xbf16>
    %c4_43 = arith.constant 4 : index
    %c0_44 = arith.constant 0 : index
    %c0_45 = arith.constant 0 : index
    %65 = vector.load %arg3[%c4_43, %c0_44, %c0_45] : memref<5x128x128xbf16, #tpu.memory_space<vmem>>, vector<1x128x128xbf16>
    %66 = vector.shape_cast %65 : vector<1x128x128xbf16> to vector<128x128xbf16>
    %cst_46 = arith.constant dense<0.000000e+00> : vector<2x16x128xf32>
    %67 = tpu.matmul %64, %66, %cst_46 {dimension_numbers = #tpu.dot_dimension_numbers<[2], [0], [0, 1], [1], [0, 0, 0, 1, 1, 1], [], []>} : vector<2x16x128xbf16>, vector<128x128xbf16>, vector<2x16x128xf32> -> vector<2x16x128xf32>
    %68 = arith.addf %63, %67 : vector<2x16x128xf32>
    %69 = arith.truncf %68 : vector<2x16x128xf32> to vector<2x16x128xbf16>
    %cst_47 = arith.constant 0.000000e+00 : bf16
    %70 = vector.broadcast %cst_47 : bf16 to vector<2x1x128xbf16>
    %cst_48 = arith.constant 0.000000e+00 : bf16
    %71 = vector.broadcast %cst_48 : bf16 to vector<2x1x128xbf16>
    %72 = tpu.concatenate %70, %69, %71 in 1 : vector<2x1x128xbf16>, vector<2x16x128xbf16>, vector<2x1x128xbf16> -> vector<2x18x128xbf16>
    %73 = vector.extract_strided_slice %72 {offsets = [0, 0, 0], sizes = [2, 16, 128], strides = [1, 1, 1]} : vector<2x18x128xbf16> to vector<2x16x128xbf16>
    %c0_49 = arith.constant 0 : index
    %c0_50 = arith.constant 0 : index
    %c0_51 = arith.constant 0 : index
    %74 = vector.load %arg4[%c0_49, %c0_50, %c0_51] : memref<3x128x64xbf16, #tpu.memory_space<vmem>>, vector<1x128x64xbf16>
    %75 = vector.shape_cast %74 : vector<1x128x64xbf16> to vector<128x64xbf16>
    %cst_52 = arith.constant dense<0.000000e+00> : vector<2x16x64xf32>
    %76 = tpu.matmul %73, %75, %cst_52 {dimension_numbers = #tpu.dot_dimension_numbers<[2], [0], [0, 1], [1], [0, 0, 0, 1, 1, 1], [], []>} : vector<2x16x128xbf16>, vector<128x64xbf16>, vector<2x16x64xf32> -> vector<2x16x64xf32>
    %77 = vector.extract_strided_slice %72 {offsets = [0, 1, 0], sizes = [2, 16, 128], strides = [1, 1, 1]} : vector<2x18x128xbf16> to vector<2x16x128xbf16>
    %c1_53 = arith.constant 1 : index
    %c0_54 = arith.constant 0 : index
    %c0_55 = arith.constant 0 : index
    %78 = vector.load %arg4[%c1_53, %c0_54, %c0_55] : memref<3x128x64xbf16, #tpu.memory_space<vmem>>, vector<1x128x64xbf16>
    %79 = vector.shape_cast %78 : vector<1x128x64xbf16> to vector<128x64xbf16>
    %cst_56 = arith.constant dense<0.000000e+00> : vector<2x16x64xf32>
    %80 = tpu.matmul %77, %79, %cst_56 {dimension_numbers = #tpu.dot_dimension_numbers<[2], [0], [0, 1], [1], [0, 0, 0, 1, 1, 1], [], []>} : vector<2x16x128xbf16>, vector<128x64xbf16>, vector<2x16x64xf32> -> vector<2x16x64xf32>
    %81 = arith.addf %76, %80 : vector<2x16x64xf32>
    %82 = vector.extract_strided_slice %72 {offsets = [0, 2, 0], sizes = [2, 16, 128], strides = [1, 1, 1]} : vector<2x18x128xbf16> to vector<2x16x128xbf16>
    %c2_57 = arith.constant 2 : index
    %c0_58 = arith.constant 0 : index
    %c0_59 = arith.constant 0 : index
    %83 = vector.load %arg4[%c2_57, %c0_58, %c0_59] : memref<3x128x64xbf16, #tpu.memory_space<vmem>>, vector<1x128x64xbf16>
    %84 = vector.shape_cast %83 : vector<1x128x64xbf16> to vector<128x64xbf16>
    %cst_60 = arith.constant dense<0.000000e+00> : vector<2x16x64xf32>
    %85 = tpu.matmul %82, %84, %cst_60 {dimension_numbers = #tpu.dot_dimension_numbers<[2], [0], [0, 1], [1], [0, 0, 0, 1, 1, 1], [], []>} : vector<2x16x128xbf16>, vector<128x64xbf16>, vector<2x16x64xf32> -> vector<2x16x64xf32>
    %86 = arith.addf %81, %85 : vector<2x16x64xf32>
    %c0_61 = arith.constant 0 : index
    %c0_62 = arith.constant 0 : index
    %c0_63 = arith.constant 0 : index
    %87 = vector.load %arg5[%c0_61, %c0_62, %c0_63] : memref<1x1x64xf32, #tpu.memory_space<vmem>>, vector<1x1x64xf32>
    %88 = vector.broadcast %87 : vector<1x1x64xf32> to vector<2x16x64xf32>
    %89 = arith.addf %86, %88 : vector<2x16x64xf32>
    %cst_64 = arith.constant 0.000000e+00 : f32
    %90 = vector.broadcast %cst_64 : f32 to vector<2x16x64xf32>
    %91 = arith.maximumf %89, %90 : vector<2x16x64xf32>
    %92 = arith.truncf %91 : vector<2x16x64xf32> to vector<2x16x64xbf16>
    %cst_65 = arith.constant 0.000000e+00 : bf16
    %93 = vector.broadcast %cst_65 : bf16 to vector<2x1x64xbf16>
    %cst_66 = arith.constant 0.000000e+00 : bf16
    %94 = vector.broadcast %cst_66 : bf16 to vector<2x1x64xbf16>
    %95 = tpu.concatenate %93, %92, %94 in 1 : vector<2x1x64xbf16>, vector<2x16x64xbf16>, vector<2x1x64xbf16> -> vector<2x18x64xbf16>
    %96 = vector.extract_strided_slice %95 {offsets = [0, 0, 0], sizes = [2, 16, 64], strides = [1, 1, 1]} : vector<2x18x64xbf16> to vector<2x16x64xbf16>
    %c0_67 = arith.constant 0 : index
    %c0_68 = arith.constant 0 : index
    %c0_69 = arith.constant 0 : index
    %97 = vector.load %arg6[%c0_67, %c0_68, %c0_69] : memref<3x64x128xbf16, #tpu.memory_space<vmem>>, vector<1x64x128xbf16>
    %98 = vector.shape_cast %97 : vector<1x64x128xbf16> to vector<64x128xbf16>
    %cst_70 = arith.constant dense<0.000000e+00> : vector<2x16x128xf32>
    %99 = tpu.matmul %96, %98, %cst_70 {dimension_numbers = #tpu.dot_dimension_numbers<[2], [0], [0, 1], [1], [0, 0, 0, 1, 1, 1], [], []>} : vector<2x16x64xbf16>, vector<64x128xbf16>, vector<2x16x128xf32> -> vector<2x16x128xf32>
    %100 = vector.extract_strided_slice %95 {offsets = [0, 1, 0], sizes = [2, 16, 64], strides = [1, 1, 1]} : vector<2x18x64xbf16> to vector<2x16x64xbf16>
    %c1_71 = arith.constant 1 : index
    %c0_72 = arith.constant 0 : index
    %c0_73 = arith.constant 0 : index
    %101 = vector.load %arg6[%c1_71, %c0_72, %c0_73] : memref<3x64x128xbf16, #tpu.memory_space<vmem>>, vector<1x64x128xbf16>
    %102 = vector.shape_cast %101 : vector<1x64x128xbf16> to vector<64x128xbf16>
    %cst_74 = arith.constant dense<0.000000e+00> : vector<2x16x128xf32>
    %103 = tpu.matmul %100, %102, %cst_74 {dimension_numbers = #tpu.dot_dimension_numbers<[2], [0], [0, 1], [1], [0, 0, 0, 1, 1, 1], [], []>} : vector<2x16x64xbf16>, vector<64x128xbf16>, vector<2x16x128xf32> -> vector<2x16x128xf32>
    %104 = arith.addf %99, %103 : vector<2x16x128xf32>
    %105 = vector.extract_strided_slice %95 {offsets = [0, 2, 0], sizes = [2, 16, 64], strides = [1, 1, 1]} : vector<2x18x64xbf16> to vector<2x16x64xbf16>
    %c2_75 = arith.constant 2 : index
    %c0_76 = arith.constant 0 : index
    %c0_77 = arith.constant 0 : index
    %106 = vector.load %arg6[%c2_75, %c0_76, %c0_77] : memref<3x64x128xbf16, #tpu.memory_space<vmem>>, vector<1x64x128xbf16>
    %107 = vector.shape_cast %106 : vector<1x64x128xbf16> to vector<64x128xbf16>
    %cst_78 = arith.constant dense<0.000000e+00> : vector<2x16x128xf32>
    %108 = tpu.matmul %105, %107, %cst_78 {dimension_numbers = #tpu.dot_dimension_numbers<[2], [0], [0, 1], [1], [0, 0, 0, 1, 1, 1], [], []>} : vector<2x16x64xbf16>, vector<64x128xbf16>, vector<2x16x128xf32> -> vector<2x16x128xf32>
    %109 = arith.addf %104, %108 : vector<2x16x128xf32>
    %c0_79 = arith.constant 0 : index
    %c0_80 = arith.constant 0 : index
    %c0_81 = arith.constant 0 : index
    %110 = vector.load %arg7[%c0_79, %c0_80, %c0_81] : memref<1x1x128xf32, #tpu.memory_space<vmem>>, vector<1x1x128xf32>
    %111 = vector.broadcast %110 : vector<1x1x128xf32> to vector<2x16x128xf32>
    %112 = arith.mulf %109, %111 : vector<2x16x128xf32>
    %c0_82 = arith.constant 0 : index
    %c0_83 = arith.constant 0 : index
    %c0_84 = arith.constant 0 : index
    %113 = vector.load %arg8[%c0_82, %c0_83, %c0_84] : memref<1x1x128xf32, #tpu.memory_space<vmem>>, vector<1x1x128xf32>
    %114 = vector.broadcast %113 : vector<1x1x128xf32> to vector<2x16x128xf32>
    %115 = arith.addf %112, %114 : vector<2x16x128xf32>
    %cst_85 = arith.constant 0.000000e+00 : f32
    %116 = vector.broadcast %cst_85 : f32 to vector<2x16x128xf32>
    %117 = arith.cmpf ogt, %115, %116 : vector<2x16x128xf32>
    %cst_86 = arith.constant 2.000000e-01 : f32
    %118 = vector.broadcast %cst_86 : f32 to vector<2x16x128xf32>
    %119 = arith.mulf %118, %115 : vector<2x16x128xf32>
    %120 = arith.select %117, %115, %119 : vector<2x16x128xi1>, vector<2x16x128xf32>
    %121 = arith.truncf %120 : vector<2x16x128xf32> to vector<2x16x128xbf16>
    %cst_87 = arith.constant 0.000000e+00 : bf16
    %122 = vector.broadcast %cst_87 : bf16 to vector<2x1x128xbf16>
    %cst_88 = arith.constant 0.000000e+00 : bf16
    %123 = vector.broadcast %cst_88 : bf16 to vector<2x1x128xbf16>
    %124 = tpu.concatenate %122, %121, %123 in 1 : vector<2x1x128xbf16>, vector<2x16x128xbf16>, vector<2x1x128xbf16> -> vector<2x18x128xbf16>
    %125 = vector.extract_strided_slice %124 {offsets = [0, 0, 0], sizes = [2, 16, 128], strides = [1, 1, 1]} : vector<2x18x128xbf16> to vector<2x16x128xbf16>
    %c0_89 = arith.constant 0 : index
    %c0_90 = arith.constant 0 : index
    %c0_91 = arith.constant 0 : index
    %126 = vector.load %arg9[%c0_89, %c0_90, %c0_91] : memref<3x128x256xbf16, #tpu.memory_space<vmem>>, vector<1x128x256xbf16>
    %127 = vector.shape_cast %126 : vector<1x128x256xbf16> to vector<128x256xbf16>
    %cst_92 = arith.constant dense<0.000000e+00> : vector<2x16x256xf32>
    %128 = tpu.matmul %125, %127, %cst_92 {dimension_numbers = #tpu.dot_dimension_numbers<[2], [0], [0, 1], [1], [0, 0, 0, 1, 1, 1], [], []>} : vector<2x16x128xbf16>, vector<128x256xbf16>, vector<2x16x256xf32> -> vector<2x16x256xf32>
    %129 = vector.extract_strided_slice %124 {offsets = [0, 1, 0], sizes = [2, 16, 128], strides = [1, 1, 1]} : vector<2x18x128xbf16> to vector<2x16x128xbf16>
    %c1_93 = arith.constant 1 : index
    %c0_94 = arith.constant 0 : index
    %c0_95 = arith.constant 0 : index
    %130 = vector.load %arg9[%c1_93, %c0_94, %c0_95] : memref<3x128x256xbf16, #tpu.memory_space<vmem>>, vector<1x128x256xbf16>
    %131 = vector.shape_cast %130 : vector<1x128x256xbf16> to vector<128x256xbf16>
    %cst_96 = arith.constant dense<0.000000e+00> : vector<2x16x256xf32>
    %132 = tpu.matmul %129, %131, %cst_96 {dimension_numbers = #tpu.dot_dimension_numbers<[2], [0], [0, 1], [1], [0, 0, 0, 1, 1, 1], [], []>} : vector<2x16x128xbf16>, vector<128x256xbf16>, vector<2x16x256xf32> -> vector<2x16x256xf32>
    %133 = arith.addf %128, %132 : vector<2x16x256xf32>
    %134 = vector.extract_strided_slice %124 {offsets = [0, 2, 0], sizes = [2, 16, 128], strides = [1, 1, 1]} : vector<2x18x128xbf16> to vector<2x16x128xbf16>
    %c2_97 = arith.constant 2 : index
    %c0_98 = arith.constant 0 : index
    %c0_99 = arith.constant 0 : index
    %135 = vector.load %arg9[%c2_97, %c0_98, %c0_99] : memref<3x128x256xbf16, #tpu.memory_space<vmem>>, vector<1x128x256xbf16>
    %136 = vector.shape_cast %135 : vector<1x128x256xbf16> to vector<128x256xbf16>
    %cst_100 = arith.constant dense<0.000000e+00> : vector<2x16x256xf32>
    %137 = tpu.matmul %134, %136, %cst_100 {dimension_numbers = #tpu.dot_dimension_numbers<[2], [0], [0, 1], [1], [0, 0, 0, 1, 1, 1], [], []>} : vector<2x16x128xbf16>, vector<128x256xbf16>, vector<2x16x256xf32> -> vector<2x16x256xf32>
    %138 = arith.addf %133, %137 : vector<2x16x256xf32>
    %c0_101 = arith.constant 0 : index
    %c0_102 = arith.constant 0 : index
    %c0_103 = arith.constant 0 : index
    %139 = vector.load %arg10[%c0_101, %c0_102, %c0_103] : memref<1x1x256xf32, #tpu.memory_space<vmem>>, vector<1x1x256xf32>
    %140 = vector.broadcast %139 : vector<1x1x256xf32> to vector<2x16x256xf32>
    %141 = arith.mulf %138, %140 : vector<2x16x256xf32>
    %c0_104 = arith.constant 0 : index
    %c0_105 = arith.constant 0 : index
    %c0_106 = arith.constant 0 : index
    %142 = vector.load %arg11[%c0_104, %c0_105, %c0_106] : memref<1x1x256xf32, #tpu.memory_space<vmem>>, vector<1x1x256xf32>
    %143 = vector.broadcast %142 : vector<1x1x256xf32> to vector<2x16x256xf32>
    %144 = arith.addf %141, %143 : vector<2x16x256xf32>
    %cst_107 = arith.constant 0.000000e+00 : f32
    %145 = vector.broadcast %cst_107 : f32 to vector<2x16x256xf32>
    %146 = arith.cmpf ogt, %144, %145 : vector<2x16x256xf32>
    %cst_108 = arith.constant 2.500000e-01 : f32
    %147 = vector.broadcast %cst_108 : f32 to vector<2x16x256xf32>
    %148 = arith.mulf %147, %144 : vector<2x16x256xf32>
    %149 = arith.select %146, %144, %148 : vector<2x16x256xi1>, vector<2x16x256xf32>
    %150 = arith.truncf %149 : vector<2x16x256xf32> to vector<2x16x256xbf16>
    %cst_109 = arith.constant 0.000000e+00 : bf16
    %151 = vector.broadcast %cst_109 : bf16 to vector<2x1x256xbf16>
    %cst_110 = arith.constant 0.000000e+00 : bf16
    %152 = vector.broadcast %cst_110 : bf16 to vector<2x1x256xbf16>
    %153 = tpu.concatenate %151, %150, %152 in 1 : vector<2x1x256xbf16>, vector<2x16x256xbf16>, vector<2x1x256xbf16> -> vector<2x18x256xbf16>
    %154 = vector.extract_strided_slice %153 {offsets = [0, 0, 0], sizes = [2, 16, 256], strides = [1, 1, 1]} : vector<2x18x256xbf16> to vector<2x16x256xbf16>
    %c0_111 = arith.constant 0 : index
    %c0_112 = arith.constant 0 : index
    %c0_113 = arith.constant 0 : index
    %155 = vector.load %arg12[%c0_111, %c0_112, %c0_113] : memref<3x256x128xbf16, #tpu.memory_space<vmem>>, vector<1x256x128xbf16>
    %156 = vector.shape_cast %155 : vector<1x256x128xbf16> to vector<256x128xbf16>
    %cst_114 = arith.constant dense<0.000000e+00> : vector<2x16x128xf32>
    %157 = tpu.matmul %154, %156, %cst_114 {dimension_numbers = #tpu.dot_dimension_numbers<[2], [0], [0, 1], [1], [0, 0, 0, 1, 1, 1], [], []>} : vector<2x16x256xbf16>, vector<256x128xbf16>, vector<2x16x128xf32> -> vector<2x16x128xf32>
    %158 = vector.extract_strided_slice %153 {offsets = [0, 1, 0], sizes = [2, 16, 256], strides = [1, 1, 1]} : vector<2x18x256xbf16> to vector<2x16x256xbf16>
    %c1_115 = arith.constant 1 : index
    %c0_116 = arith.constant 0 : index
    %c0_117 = arith.constant 0 : index
    %159 = vector.load %arg12[%c1_115, %c0_116, %c0_117] : memref<3x256x128xbf16, #tpu.memory_space<vmem>>, vector<1x256x128xbf16>
    %160 = vector.shape_cast %159 : vector<1x256x128xbf16> to vector<256x128xbf16>
    %cst_118 = arith.constant dense<0.000000e+00> : vector<2x16x128xf32>
    %161 = tpu.matmul %158, %160, %cst_118 {dimension_numbers = #tpu.dot_dimension_numbers<[2], [0], [0, 1], [1], [0, 0, 0, 1, 1, 1], [], []>} : vector<2x16x256xbf16>, vector<256x128xbf16>, vector<2x16x128xf32> -> vector<2x16x128xf32>
    %162 = arith.addf %157, %161 : vector<2x16x128xf32>
    %163 = vector.extract_strided_slice %153 {offsets = [0, 2, 0], sizes = [2, 16, 256], strides = [1, 1, 1]} : vector<2x18x256xbf16> to vector<2x16x256xbf16>
    %c2_119 = arith.constant 2 : index
    %c0_120 = arith.constant 0 : index
    %c0_121 = arith.constant 0 : index
    %164 = vector.load %arg12[%c2_119, %c0_120, %c0_121] : memref<3x256x128xbf16, #tpu.memory_space<vmem>>, vector<1x256x128xbf16>
    %165 = vector.shape_cast %164 : vector<1x256x128xbf16> to vector<256x128xbf16>
    %cst_122 = arith.constant dense<0.000000e+00> : vector<2x16x128xf32>
    %166 = tpu.matmul %163, %165, %cst_122 {dimension_numbers = #tpu.dot_dimension_numbers<[2], [0], [0, 1], [1], [0, 0, 0, 1, 1, 1], [], []>} : vector<2x16x256xbf16>, vector<256x128xbf16>, vector<2x16x128xf32> -> vector<2x16x128xf32>
    %167 = arith.addf %162, %166 : vector<2x16x128xf32>
    %c0_123 = arith.constant 0 : index
    %c0_124 = arith.constant 0 : index
    %c0_125 = arith.constant 0 : index
    %168 = vector.load %arg13[%c0_123, %c0_124, %c0_125] : memref<1x1x128xf32, #tpu.memory_space<vmem>>, vector<1x1x128xf32>
    %169 = vector.broadcast %168 : vector<1x1x128xf32> to vector<2x16x128xf32>
    %170 = arith.mulf %167, %169 : vector<2x16x128xf32>
    %c0_126 = arith.constant 0 : index
    %c0_127 = arith.constant 0 : index
    %c0_128 = arith.constant 0 : index
    %171 = vector.load %arg14[%c0_126, %c0_127, %c0_128] : memref<1x1x128xf32, #tpu.memory_space<vmem>>, vector<1x1x128xf32>
    %172 = vector.broadcast %171 : vector<1x1x128xf32> to vector<2x16x128xf32>
    %173 = arith.addf %170, %172 : vector<2x16x128xf32>
    %cst_129 = arith.constant 0.000000e+00 : f32
    %174 = vector.broadcast %cst_129 : f32 to vector<2x16x128xf32>
    %175 = arith.cmpf ogt, %173, %174 : vector<2x16x128xf32>
    %cst_130 = arith.constant 0.000000e+00 : f32
    %176 = vector.broadcast %cst_130 : f32 to vector<2x16x128xf32>
    %177 = arith.minimumf %173, %176 : vector<2x16x128xf32>
    %178 = math.exp %177 : vector<2x16x128xf32>
    %cst_131 = arith.constant 1.000000e+00 : f32
    %179 = vector.broadcast %cst_131 : f32 to vector<2x16x128xf32>
    %180 = arith.subf %178, %179 : vector<2x16x128xf32>
    %cst_132 = arith.constant 3.000000e-01 : f32
    %181 = vector.broadcast %cst_132 : f32 to vector<2x16x128xf32>
    %182 = arith.mulf %181, %180 : vector<2x16x128xf32>
    %183 = arith.select %175, %173, %182 : vector<2x16x128xi1>, vector<2x16x128xf32>
    %cst_133 = arith.constant dense<0.000000e+00> : vector<2x128xf32>
    %184 = vector.multi_reduction <add>, %183, %cst_133 [1] : vector<2x16x128xf32> to vector<2x128xf32>
    %185 = vector.shape_cast %184 : vector<2x128xf32> to vector<2x1x128xf32>
    %cst_134 = arith.constant 1.600000e+01 : f32
    %186 = vector.broadcast %cst_134 : f32 to vector<2x1x128xf32>
    %187 = arith.divf %185, %186 : vector<2x1x128xf32>
    %c0_135 = arith.constant 0 : index
    %c0_136 = arith.constant 0 : index
    %c0_137 = arith.constant 0 : index
    %188 = vector.load %arg15[%c0_135, %c0_136, %c0_137] : memref<2x1x128xf32, #tpu.memory_space<vmem>>, vector<2x1x128xf32>
    tpu.vector_store %arg15[%c0_135, %c0_136, %c0_137], %187 {strides = array<i32>} : memref<2x1x128xf32, #tpu.memory_space<vmem>>, vector<2x1x128xf32>,
    return
  }
  func.func @transform_0(%arg0: i32) -> (i32, i32, i32) {
    %c0_i32 = arith.constant 0 : i32
    %c0_i32_0 = arith.constant 0 : i32
    %c0_i32_1 = arith.constant 0 : i32
    return %arg0, %c0_i32, %c0_i32_0 : i32, i32, i32
  }
  func.func @transform_1(%arg0: i32) -> (i32, i32, i32) {
    %c0_i32 = arith.constant 0 : i32
    %c0_i32_0 = arith.constant 0 : i32
    %c0_i32_1 = arith.constant 0 : i32
    %c0_i32_2 = arith.constant 0 : i32
    return %c0_i32, %c0_i32_0, %c0_i32_1 : i32, i32, i32
  }
  func.func @transform_2(%arg0: i32) -> (i32, i32, i32) {
    %c0_i32 = arith.constant 0 : i32
    %c0_i32_0 = arith.constant 0 : i32
    %c0_i32_1 = arith.constant 0 : i32
    %c0_i32_2 = arith.constant 0 : i32
    return %c0_i32, %c0_i32_0, %c0_i32_1 : i32, i32, i32
  }
  func.func @transform_3(%arg0: i32) -> (i32, i32, i32) {
    %c0_i32 = arith.constant 0 : i32
    %c0_i32_0 = arith.constant 0 : i32
    %c0_i32_1 = arith.constant 0 : i32
    %c0_i32_2 = arith.constant 0 : i32
    return %c0_i32, %c0_i32_0, %c0_i32_1 : i32, i32, i32
  }
  func.func @transform_4(%arg0: i32) -> (i32, i32, i32) {
    %c0_i32 = arith.constant 0 : i32
    %c0_i32_0 = arith.constant 0 : i32
    %c0_i32_1 = arith.constant 0 : i32
    %c0_i32_2 = arith.constant 0 : i32
    return %c0_i32, %c0_i32_0, %c0_i32_1 : i32, i32, i32
  }
  func.func @transform_5(%arg0: i32) -> (i32, i32, i32) {
    %c0_i32 = arith.constant 0 : i32
    %c0_i32_0 = arith.constant 0 : i32
    %c0_i32_1 = arith.constant 0 : i32
    %c0_i32_2 = arith.constant 0 : i32
    return %c0_i32, %c0_i32_0, %c0_i32_1 : i32, i32, i32
  }
  func.func @transform_6(%arg0: i32) -> (i32, i32, i32) {
    %c0_i32 = arith.constant 0 : i32
    %c0_i32_0 = arith.constant 0 : i32
    %c0_i32_1 = arith.constant 0 : i32
    %c0_i32_2 = arith.constant 0 : i32
    return %c0_i32, %c0_i32_0, %c0_i32_1 : i32, i32, i32
  }
  func.func @transform_7(%arg0: i32) -> (i32, i32, i32) {
    %c0_i32 = arith.constant 0 : i32
    %c0_i32_0 = arith.constant 0 : i32
    %c0_i32_1 = arith.constant 0 : i32
    %c0_i32_2 = arith.constant 0 : i32
    return %c0_i32, %c0_i32_0, %c0_i32_1 : i32, i32, i32
  }
  func.func @transform_8(%arg0: i32) -> (i32, i32, i32) {
    %c0_i32 = arith.constant 0 : i32
    %c0_i32_0 = arith.constant 0 : i32
    %c0_i32_1 = arith.constant 0 : i32
    %c0_i32_2 = arith.constant 0 : i32
    return %c0_i32, %c0_i32_0, %c0_i32_1 : i32, i32, i32
  }
  func.func @transform_9(%arg0: i32) -> (i32, i32, i32) {
    %c0_i32 = arith.constant 0 : i32
    %c0_i32_0 = arith.constant 0 : i32
    %c0_i32_1 = arith.constant 0 : i32
    %c0_i32_2 = arith.constant 0 : i32
    return %c0_i32, %c0_i32_0, %c0_i32_1 : i32, i32, i32
  }
  func.func @transform_10(%arg0: i32) -> (i32, i32, i32) {
    %c0_i32 = arith.constant 0 : i32
    %c0_i32_0 = arith.constant 0 : i32
    %c0_i32_1 = arith.constant 0 : i32
    %c0_i32_2 = arith.constant 0 : i32
    return %c0_i32, %c0_i32_0, %c0_i32_1 : i32, i32, i32
  }
  func.func @transform_11(%arg0: i32) -> (i32, i32, i32) {
    %c0_i32 = arith.constant 0 : i32
    %c0_i32_0 = arith.constant 0 : i32
    %c0_i32_1 = arith.constant 0 : i32
    %c0_i32_2 = arith.constant 0 : i32
    return %c0_i32, %c0_i32_0, %c0_i32_1 : i32, i32, i32
  }
  func.func @transform_12(%arg0: i32) -> (i32, i32, i32) {
    %c0_i32 = arith.constant 0 : i32
    %c0_i32_0 = arith.constant 0 : i32
    %c0_i32_1 = arith.constant 0 : i32
    %c0_i32_2 = arith.constant 0 : i32
    return %c0_i32, %c0_i32_0, %c0_i32_1 : i32, i32, i32
  }
  func.func @transform_13(%arg0: i32) -> (i32, i32, i32) {
    %c0_i32 = arith.constant 0 : i32
    %c0_i32_0 = arith.constant 0 : i32
    %c0_i32_1 = arith.constant 0 : i32
    %c0_i32_2 = arith.constant 0 : i32
    return %c0_i32, %c0_i32_0, %c0_i32_1 : i32, i32, i32
  }
  func.func @transform_14(%arg0: i32) -> (i32, i32, i32) {
    %c0_i32 = arith.constant 0 : i32
    %c0_i32_0 = arith.constant 0 : i32
    %c0_i32_1 = arith.constant 0 : i32
    return %arg0, %c0_i32, %c0_i32_0 : i32, i32, i32
  }
}

module attributes {stable_mosaic.version = 11 : i64} {
  func.func @_head_kernel(%arg0: memref<2x128xf32, #tpu.memory_space<vmem>>, %arg1: memref<4x128xf32, #tpu.memory_space<vmem>>, %arg2: memref<4x128xf32, #tpu.memory_space<vmem>>, %arg3: memref<640x128xbf16, #tpu.memory_space<vmem>>, %arg4: memref<1x128xf32, #tpu.memory_space<vmem>>, %arg5: memref<2x128xf32, #tpu.memory_space<vmem>>) attributes {dimension_semantics = [], scalar_prefetch = 0 : i64, scratch_operands = 0 : i64, tpu.core_type = #tpu.core_type<tc>} {
    %c0 = arith.constant 0 : index
    %c0_0 = arith.constant 0 : index
    %0 = vector.load %arg0[%c0, %c0_0] : memref<2x128xf32, #tpu.memory_space<vmem>>, vector<2x128xf32>
    %1 = arith.truncf %0 : vector<2x128xf32> to vector<2x128xbf16>
    %c0_1 = arith.constant 0 : index
    %c0_2 = arith.constant 0 : index
    %2 = vector.load %arg3[%c0_1, %c0_2] : memref<640x128xbf16, #tpu.memory_space<vmem>>, vector<128x128xbf16>
    %cst = arith.constant dense<0.000000e+00> : vector<2x128xf32>
    %3 = tpu.matmul %1, %2, %cst {dimension_numbers = #tpu.dot_dimension_numbers<[1], [0], [0], [1], [0, 0, 1, 1], [], []>} : vector<2x128xbf16>, vector<128x128xbf16>, vector<2x128xf32> -> vector<2x128xf32>
    %c0_3 = arith.constant 0 : index
    %c0_4 = arith.constant 0 : index
    %4 = vector.load %arg1[%c0_3, %c0_4] : memref<4x128xf32, #tpu.memory_space<vmem>>, vector<2x128xf32>
    %5 = arith.truncf %4 : vector<2x128xf32> to vector<2x128xbf16>
    %c128 = arith.constant 128 : index
    %c0_5 = arith.constant 0 : index
    %6 = vector.load %arg3[%c128, %c0_5] : memref<640x128xbf16, #tpu.memory_space<vmem>>, vector<128x128xbf16>
    %cst_6 = arith.constant dense<0.000000e+00> : vector<2x128xf32>
    %7 = tpu.matmul %5, %6, %cst_6 {dimension_numbers = #tpu.dot_dimension_numbers<[1], [0], [0], [1], [0, 0, 1, 1], [], []>} : vector<2x128xbf16>, vector<128x128xbf16>, vector<2x128xf32> -> vector<2x128xf32>
    %8 = arith.addf %3, %7 : vector<2x128xf32>
    %c2 = arith.constant 2 : index
    %c0_7 = arith.constant 0 : index
    %9 = vector.load %arg1[%c2, %c0_7] : memref<4x128xf32, #tpu.memory_space<vmem>>, vector<2x128xf32>
    %10 = arith.truncf %9 : vector<2x128xf32> to vector<2x128xbf16>
    %c256 = arith.constant 256 : index
    %c0_8 = arith.constant 0 : index
    %11 = vector.load %arg3[%c256, %c0_8] : memref<640x128xbf16, #tpu.memory_space<vmem>>, vector<128x128xbf16>
    %cst_9 = arith.constant dense<0.000000e+00> : vector<2x128xf32>
    %12 = tpu.matmul %10, %11, %cst_9 {dimension_numbers = #tpu.dot_dimension_numbers<[1], [0], [0], [1], [0, 0, 1, 1], [], []>} : vector<2x128xbf16>, vector<128x128xbf16>, vector<2x128xf32> -> vector<2x128xf32>
    %13 = arith.addf %8, %12 : vector<2x128xf32>
    %c0_10 = arith.constant 0 : index
    %c0_11 = arith.constant 0 : index
    %14 = vector.load %arg2[%c0_10, %c0_11] : memref<4x128xf32, #tpu.memory_space<vmem>>, vector<2x128xf32>
    %15 = arith.truncf %14 : vector<2x128xf32> to vector<2x128xbf16>
    %c384 = arith.constant 384 : index
    %c0_12 = arith.constant 0 : index
    %16 = vector.load %arg3[%c384, %c0_12] : memref<640x128xbf16, #tpu.memory_space<vmem>>, vector<128x128xbf16>
    %cst_13 = arith.constant dense<0.000000e+00> : vector<2x128xf32>
    %17 = tpu.matmul %15, %16, %cst_13 {dimension_numbers = #tpu.dot_dimension_numbers<[1], [0], [0], [1], [0, 0, 1, 1], [], []>} : vector<2x128xbf16>, vector<128x128xbf16>, vector<2x128xf32> -> vector<2x128xf32>
    %18 = arith.addf %13, %17 : vector<2x128xf32>
    %c2_14 = arith.constant 2 : index
    %c0_15 = arith.constant 0 : index
    %19 = vector.load %arg2[%c2_14, %c0_15] : memref<4x128xf32, #tpu.memory_space<vmem>>, vector<2x128xf32>
    %20 = arith.truncf %19 : vector<2x128xf32> to vector<2x128xbf16>
    %c512 = arith.constant 512 : index
    %c0_16 = arith.constant 0 : index
    %21 = vector.load %arg3[%c512, %c0_16] : memref<640x128xbf16, #tpu.memory_space<vmem>>, vector<128x128xbf16>
    %cst_17 = arith.constant dense<0.000000e+00> : vector<2x128xf32>
    %22 = tpu.matmul %20, %21, %cst_17 {dimension_numbers = #tpu.dot_dimension_numbers<[1], [0], [0], [1], [0, 0, 1, 1], [], []>} : vector<2x128xbf16>, vector<128x128xbf16>, vector<2x128xf32> -> vector<2x128xf32>
    %23 = arith.addf %18, %22 : vector<2x128xf32>
    %c0_18 = arith.constant 0 : index
    %c0_19 = arith.constant 0 : index
    %24 = vector.load %arg4[%c0_18, %c0_19] : memref<1x128xf32, #tpu.memory_space<vmem>>, vector<1x128xf32>
    %25 = vector.broadcast %24 : vector<1x128xf32> to vector<2x128xf32>
    %26 = arith.addf %23, %25 : vector<2x128xf32>
    %c0_20 = arith.constant 0 : index
    %c0_21 = arith.constant 0 : index
    %27 = vector.load %arg5[%c0_20, %c0_21] : memref<2x128xf32, #tpu.memory_space<vmem>>, vector<2x128xf32>
    tpu.vector_store %arg5[%c0_20, %c0_21], %26 {strides = array<i32>} : memref<2x128xf32, #tpu.memory_space<vmem>>, vector<2x128xf32>,
    return
  }
}

</mosaic_0001>

<bundles_post_ra>
// kernel: wavelet2_rescnn_forward.5
= control target key start
LH: loop header
LB: loop body
LE: loop exit
PB: predicated region body
PF: predicated region fallthrough
CT: control target
= control target key end

     0   :  { %s1872_s13 = smov 0   ;;  %s1874_s14 = smov 0   ;;  %s2114_s0 = inlined_call_operand.vmem [shape: bf16[128,32], index: 0, kind: input, shape index: {}]   ;;  %s2115_s1 = inlined_call_operand.vmem [shape: bf16[32,32], index: 1, kind: input, shape index: {}]   ;;  %s2116_s2 = inlined_call_operand.vmem [shape: bf16[32,32], index: 2, kind: input, shape index: {}]   ;;  %s2117_s3 = inlined_call_operand.vmem [shape: f32[1,32], index: 3, kind: input, shape index: {}]   ;;  %s2118_s4 = inlined_call_operand.vmem [shape: f32[1,32], index: 4, kind: input, shape index: {}]   ;;  %s2119_s5 = inlined_call_operand.vmem [shape: bf16[16,16], index: 5, kind: input, shape index: {}]   ;;  %s2120_s6 = inlined_call_operand.vmem [shape: bf16[16,16], index: 6, kind: input, shape index: {}]   ;;  %s2121_s7 = inlined_call_operand.vmem [shape: f32[1,16], index: 7, kind: input, shape index: {}]   ;;  %s2122_s8 = inlined_call_operand.vmem [shape: f32[1,16], index: 8, kind: input, shape index: {}]   ;;  %s2123_s9 = inlined_call_operand.vmem [shape: bf16[2,128,16], index: 9, kind: output, shape index: {0}]   ;;  %s2124_s10 = inlined_call_operand.vmem [shape: bf16[2,128,8], index: 10, kind: output, shape index: {1}]  }
   0x1   :  { %s1876_s15 = smov 0  }
   0x2 LB: > { %s1885_s16 = sadd.s32 4294967295, %s1813_s15   ;;  %s1887_s17 = sadd.s32 1, %s1813_s15   ;;  %s1813_s15 = sphi %s1876_s15, %s2128_s15   ;;  %s1809_s14 = sphi %s1874_s14, %s2127_s14   ;;  %s1805_s13 = sphi %s1872_s13, %s2126_s13  }
   0x3   : > { %s219_s18 = ssub.s32 %s1813_s15, %s1887_s17  ;;  %s222_s19 = sadd.s32 1, %s1809_s14 }
   0x4   : > { %p220_p0 = scmp.eq.s32.totalorder %s219_s18, 0  ;;  %p232_p1 = scmp.ne.s32.totalorder %s1809_s14, %s1805_s13 }
   0x5   : > { %p233_p2 = scmp.eq.s32.totalorder %s1885_s16, 1  ;;  %p1436_p3 = scmp.ge.s32.totalorder %s1813_s15, 1 }
   0x6   : > { %s1895_s20 = scalar_select %p220_p0, %s1809_s14, %s222_s19  }
   0x7   : > { %p1897_p4 = por %p233_p2, %p232_p1  ;;  %p316_p5 = scmp.lt.s32.totalorder %s1813_s15, 3 }
   0x9   : > { %p317_p6 = pnand %p1436_p3, %p316_p5 }
   0xa   : > { %v1653_v0 = vld [vmem:[%s2115_s1] sm:$0xff] (!%p317_p6)   ;;  %s1439_s24 = sshll.u32 (!%p317_p6), %s1885_s16, 3  ;;  %v1655_v2 = vld [vmem:[%s2115_s1 + $0x8] sm:$0xff] (!%p317_p6)   ;;  %vm421_vm0 = vcmask (!%p317_p6), 261120   ;;  %s348_s29 = sand.u32 (!%p317_p6), 1, %s1805_s13   ;;  %vm727_vm1 = vcmask (!%p317_p6), 125952  }
   0xb   : > { %320 = sbr.rel (%p317_p6) target bundleno = 797 (0x31d), region = 56  ;;  %v1654_v1 = vld [vmem:[%s2116_s2] sm:$0xff] (!%p317_p6)   ;;  %p358_p7 = scmp.lt.s32.totalorder (!%p317_p6), %s1439_s24, 15  ;;  %1583 = vmatprep.subr.bf16.mxu0 (!%p317_p6), %v1653_v0  ;;  %v1656_v3 = vld [vmem:[%s2116_s2 + $0x8] sm:$0xff] (!%p317_p6)   ;;  %vm794_vm2 = vcmask (!%p317_p6), 130048   ;;  %vm1094_vm3 = vcmask (!%p317_p6), 60416  }
   0xc   : > { %1595 = vmatprep.subr.bf16.mxu1 (!%p317_p6), %v1654_v1  ;;  %1584 = vmatpush3.bf16.msra.mxu0 (!%p317_p6), %v1653_v0  ;;  %v1661_v8 = vld [vmem:[%s2119_s5] sm:$0xff] (!%p317_p6)   ;;  %s1950_s30 = sshll.u32 (!%p317_p6), %s348_s29, 6  ;;  %s1816_s22 = smov (!%p317_p6), 120  }
   0xd   : > { %1596 = vmatpush3.bf16.msra.mxu1 (!%p317_p6), %v1654_v1  ;;  %1585 = vmatprep.subr.bf16.mxu0 (!%p317_p6), %v1655_v2  ;;  %v1662_v9 = vld [vmem:[%s2120_s6] sm:$0xff] (!%p317_p6)   ;;  %s1953_s13 = scalar_lea.vmem (!%p317_p6), [#allocation2], %s1950_s30  ;;  %s2035_s23 = scalar_lea.vmem (!%p317_p6), [#allocation3], %s1950_s30 }
   0xe   : > { %1597 = vmatprep.subr.bf16.mxu1 (!%p317_p6), %v1656_v3  ;;  %v1926_v10 = vld [vmem:[%s2117_s3] ss:$0 sm:$0xff] (!%p317_p6) }
   0xf   : > { %v1931_v11 = vld [vmem:[%s2118_s4] ss:$0 sm:$0xff] (!%p317_p6) }
  0x10   : > { %1586 = vmatpush3.bf16.msra.mxu0 (!%p317_p6), %v1655_v2 }
  0x11   : > { %1598 = vmatpush3.bf16.msra.mxu1 (!%p317_p6), %v1656_v3  ;;  %1607 = vmatprep.subr.bf16.mxu0 (!%p317_p6), %v1661_v8 }
  0x12   : > { %s2130_s24 = smov (!%p358_p7, %s1439_s24), 15  ;;  %1617 = vmatprep.subr.bf16.mxu1 %v1662_v9 }
  0x13   : > { %s1440_s11 = sshll.u32 %s2130_s24, 2  ;;  %s1559_s24 = sshll.u32 (%p1897_p4), %s1885_s16, 5 }
  0x14   : > { %s361_s18 = scalar_lea.vmem %s2114_s0, %s1440_s11  ;;  %s1815_s11 = smov 112  }
  0x15   : > { %v1657_v4 = vld [vmem:[%s361_s18] sm:$0xff]   ;;  %v1658_v5 = vld [vmem:[%s361_s18 + $0x8] sm:$0xff]   ;;  %v1659_v6 = vld [vmem:[%s361_s18 + $0x10] sm:$0xff]   ;;  %s1149_s27 = scalar_lea.vmem (%p1897_p4), %s2123_s9, %s1559_s24 }
  0x16   : > { %1587 = vmatprep.mubr.msk.bf16.mxu0 %vm421_vm0, %v1657_v4  ;;  %1599 = vmatprep.mubr.msk.bf16.mxu1 %vm421_vm0, %v1657_v4  ;;  %v1660_v7 = vld [vmem:[%s361_s18 + $0x18] sm:$0xff]  }
  0x17   : > { %1588 = vmatmul.mubr.msk.bf16.vlgmr.msra.gmra.mrb[0].mxu0 %vm421_vm0, %v1658_v5  ;;  %1600 = vmatmul.mubr.msk.bf16.vlgmr.msra.gmra.mrb[0].mxu1 %vm421_vm0, %v1658_v5 }
  0x18   : > { %1591 = vmatprep.mubr.msk.bf16.mxu0 %vm421_vm0, %v1659_v6  ;;  %1603 = vmatprep.mubr.msk.bf16.mxu1 %vm421_vm0, %v1659_v6 }
  0x19   : > { %1608 = vmatpush3.bf16.msra.mxu0 %v1661_v8  ;;  %1618 = vmatpush3.bf16.msra.mxu1 %v1662_v9 }
  0x1f   : > { %1592 = vmatmul.mubr.msk.bf16.gmra.mrb[4].mxu0 %vm421_vm0, %v1660_v7  ;;  %1604 = vmatmul.mubr.msk.bf16.gmra.mrb[4].mxu1 %vm421_vm0, %v1660_v7 }
  0xea   : > { %v1589_v12 = vpop.f32.mrb[0].mxu0  ;;  %v1601_v14 = vpop.f32.mrb[0].mxu1 }
  0xeb   : > { %v477_v13 = vadd.f32 %v1589_v12, %v1926_v10  ;;  %v468_v15 = vpop.f32.mrb[1].mxu0  ;;  %v609_v16 = vadd.f32 %v1601_v14, %v1931_v11  ;;  %v600_v18 = vpop.f32.mrb[1].mxu1 }
  0xec   : > { %v469_v17 = vadd.f32 %v1926_v10, %v468_v15  ;;  %v1590_v19 = vpop.f32.mrb[2].mxu0  ;;  %v601_v21 = vadd.f32 %v1931_v11, %v600_v18  ;;  %v1602_v23 = vpop.f32.mrb[2].mxu1 }
  0xed   : > { %v1454_v20 = vmul.f32 -1.442695, %v477_v13  ;;  %v480_v22 = vadd.f32 %v1590_v19, %v1926_v10  ;;  %v471_v24 = vpop.f32.mrb[3].mxu0  ;;  %v1469_v25 = vmul.f32 -1.442695, %v609_v16  ;;  %v612_v27 = vadd.f32 %v1602_v23, %v1931_v11  ;;  %v603_v29 = vpop.f32.mrb[3].mxu1 }
  0xee   : > { %v1452_v26 = vmul.f32 -1.442695, %v469_v17  ;;  %v472_v28 = vadd.f32 %v1926_v10, %v471_v24  ;;  %v1467_v30 = vmul.f32 -1.442695, %v601_v21  ;;  %v604_v32 = vadd.f32 %v1931_v11, %v603_v29 }
  0xef   : > { %1663 = vpow2.f32 %v1454_v20  ;;  %v1455_v31 = vmul.f32 -1.442695, %v480_v22  ;;  %v1470_v33 = vmul.f32 -1.442695, %v612_v27 }
  0xf0   : > { %1665 = vpow2.f32 %v1469_v25  ;;  %v1453_v34 = vmul.f32 -1.442695, %v472_v28  ;;  %v1468_v35 = vmul.f32 -1.442695, %v604_v32 }
  0xf1   : > { %1667 = vpow2.f32 %v1452_v26 }
  0xf2   : > { %1669 = vpow2.f32 %v1467_v30  ;;  %v1593_v36 = vpop.f32.mrb[4].mxu0  ;;  %v1605_v38 = vpop.f32.mrb[4].mxu1 }
  0xf3   : > { %1671 = vpow2.f32 %v1455_v31  ;;  %v493_v37 = vadd.f32 %v1593_v36, %v1926_v10  ;;  %v484_v39 = vpop.f32.mrb[5].mxu0  ;;  %v625_v40 = vadd.f32 %v1605_v38, %v1931_v11  ;;  %v616_v42 = vpop.f32.mrb[5].mxu1 }
  0xf4   : > { %1673 = vpow2.f32 %v1470_v33  ;;  %v485_v41 = vadd.f32 %v1926_v10, %v484_v39  ;;  %v1594_v43 = vpop.f32.mrb[6].mxu0  ;;  %v617_v45 = vadd.f32 %v1931_v11, %v616_v42  ;;  %v1606_v47 = vpop.f32.mrb[6].mxu1 }
  0xf5   : > { %1675 = vpow2.f32 %v1453_v34  ;;  %v1458_v44 = vmul.f32 -1.442695, %v493_v37  ;;  %v496_v46 = vadd.f32 %v1594_v43, %v1926_v10  ;;  %v487_v48 = vpop.f32.mrb[7].mxu0  ;;  %v1473_v49 = vmul.f32 -1.442695, %v625_v40  ;;  %v619_v51 = vpop.f32.mrb[7].mxu1 }
  0xf6   : > { %1677 = vpow2.f32 %v1468_v35  ;;  %v1456_v50 = vmul.f32 -1.442695, %v485_v41  ;;  %v1471_v52 = vmul.f32 -1.442695, %v617_v45  ;;  %v628_v7 = vadd.f32 %v1606_v47, %v1931_v11 }
  0xf7   : > { %1679 = vpow2.f32 %v1458_v44  ;;  %v1459_v53 = vmul.f32 -1.442695, %v496_v46  ;;  %v488_v12 = vadd.f32 %v1926_v10, %v487_v48  ;;  %v620_v15 = vadd.f32 %v1931_v11, %v619_v51 }
  0xf8   : > { %1681 = vpow2.f32 %v1473_v49  ;;  %v1474_v20 = vmul.f32 -1.442695, %v628_v7 }
  0xf9   : > { %v1664_v54 = vpop.eup %1663  ;;  %1683 = vpow2.f32 %v1456_v50  ;;  %v1457_v22 = vmul.f32 -1.442695, %v488_v12  ;;  %v1472_v24 = vmul.f32 -1.442695, %v620_v15 }
  0xfa   : > { %v1666_v55 = vpop.eup %1665  ;;  %v525_v56 = vadd.f32 1.0, %v1664_v54  ;;  %1685 = vpow2.f32 %v1471_v52 }
  0xfb   : > { %v1668_v57 = vpop.eup %1667  ;;  %v657_v58 = vadd.f32 1.0, %v1666_v55  ;;  %1687 = vpow2.f32 %v1459_v53 }
  0xfc   : > { %v1670_v59 = vpop.eup %1669  ;;  %1689 = vrcp.f32 %v525_v56  ;;  %v523_v60 = vadd.f32 1.0, %v1668_v57 }
  0xfd   : > { %v1672_v61 = vpop.eup %1671  ;;  %1691 = vrcp.f32 %v657_v58  ;;  %v655_v62 = vadd.f32 1.0, %v1670_v59 }
  0xfe   : > { %v1674_v63 = vpop.eup %1673  ;;  %1693 = vrcp.f32 %v523_v60  ;;  %v526_v0 = vadd.f32 1.0, %v1672_v61 }
  0xff   : > { %v1676_v1 = vpop.eup %1675  ;;  %1695 = vrcp.f32 %v655_v62  ;;  %v658_v2 = vadd.f32 1.0, %v1674_v63 }
 0x100   : > { %v1678_v3 = vpop.eup %1677  ;;  %1697 = vrcp.f32 %v526_v0  ;;  %v524_v4 = vadd.f32 1.0, %v1676_v1 }
 0x101   : > { %v1680_v5 = vpop.eup %1679  ;;  %1699 = vrcp.f32 %v658_v2  ;;  %v656_v6 = vadd.f32 1.0, %v1678_v3 }
 0x102   : > { %v1682_v8 = vpop.eup %1681  ;;  %1701 = vrcp.f32 %v524_v4  ;;  %v529_v9 = vadd.f32 1.0, %v1680_v5 }
 0x103   : > { %v1684_v13 = vpop.eup %1683  ;;  %1703 = vrcp.f32 %v656_v6  ;;  %v661_v14 = vadd.f32 1.0, %v1682_v8 }
 0x104   : > { %v1686_v16 = vpop.eup %1685  ;;  %1705 = vrcp.f32 %v529_v9  ;;  %v527_v17 = vadd.f32 1.0, %v1684_v13 }
 0x105   : > { %v1688_v18 = vpop.eup %1687  ;;  %1707 = vrcp.f32 %v661_v14  ;;  %v659_v19 = vadd.f32 1.0, %v1686_v16 }
 0x106   : > { %v1690_v21 = vpop.eup %1689  ;;  %1709 = vrcp.f32 %v527_v17  ;;  %v530_v40 = vadd.f32 1.0, %v1688_v18 }
 0x107   : > { %v1692_v23 = vpop.eup %1691  ;;  %1711 = vrcp.f32 %v659_v19 }
 0x108   : > { %v1694_v10 = vpop.eup %1693  ;;  %v681_v25 = vadd.f32 %v1692_v23, %v1690_v21  ;;  %1713 = vpow2.f32 %v1474_v20  ;;  %v2015_v23 = vld [vmem:[%s2122_s8] ss:$0 sm:$0xff] }
 0x109   : > { %v1696_v26 = vpop.eup %1695  ;;  %1715 = vpow2.f32 %v1457_v22  ;;  %v2010_v22 = vld [vmem:[%s2121_s7] ss:$0 sm:$0xff] }
 0x10a   : > { %v1698_v11 = vpop.eup %1697  ;;  %v679_v27 = vadd.f32 %v1696_v26, %v1694_v10  ;;  %v689_v28 = vmul.f32 0.5, %v681_v25  ;;  %1717 = vpow2.f32 %v1472_v24 }
 0x10b   : > { %v1700_v29 = vpop.eup %1699  ;;  %1719 = vrcp.f32 %v530_v40 }
 0x10c   : > { %v1702_v30 = vpop.eup %1701  ;;  %v687_v31 = vmul.f32 0.5, %v679_v27  ;;  %v682_v32 = vadd.f32 %v1700_v29, %v1698_v11  ;;  %v1545_v33 = vpack.c.bf16 %v689_v28, %v689_v28 }
 0x10d   : > { %v1704_v34 = vpop.eup %1703 }
 0x10e   : > { %v1706_v35 = vpop.eup %1705  ;;  %v680_v36 = vadd.f32 %v1704_v34, %v1702_v30  ;;  %v690_v37 = vmul.f32 0.5, %v682_v32  ;;  %v1543_v38 = vpack.c.bf16 %v687_v31, %v687_v31  ;;  %730 = vst.msk [vmem:[%s1953_s13 + $0x8] sm:$0xf] %vm727_vm1, %v1545_v33 }
 0x10f   : > { %v1708_v39 = vpop.eup %1707 }
 0x110   : > { %v1710_v41 = vpop.eup %1709  ;;  %v688_v42 = vmul.f32 0.5, %v680_v36  ;;  %v696_v43 = vpack.c.bf16 %v690_v37, %v689_v28  ;;  %728 = vst.msk [vmem:[%s1953_s13] sm:$0xf] %vm727_vm1, %v1543_v38  ;;  %v685_v44 = vadd.f32 %v1708_v39, %v1706_v35  ;;  %v1546_v45 = vpack.c.bf16 %v690_v37, %v690_v37 }
 0x111   : > { %v1712_v46 = vpop.eup %1711 }
 0x112   : > { %v695_v47 = vpack.c.bf16 %v688_v42, %v687_v31  ;;  %v683_v48 = vadd.f32 %v1712_v46, %v1710_v41  ;;  %v693_v49 = vmul.f32 0.5, %v685_v44  ;;  %v1544_v50 = vpack.c.bf16 %v688_v42, %v688_v42  ;;  %731 = vst.msk [vmem:[%s1953_s13 + $0xc] sm:$0xf] %vm727_vm1, %v1546_v45  ;;  %v1714_v51 = vpop.eup %1713 }
 0x113   : > { %v1716_v52 = vpop.eup %1715  ;;  %v662_v53 = vadd.f32 1.0, %v1714_v51 }
 0x114   : > { %780 = vrot.lane.b32.xlu0 %v695_v47, %s1815_s11  ;;  %v691_v54 = vmul.f32 0.5, %v683_v48  ;;  %729 = vst.msk [vmem:[%s1953_s13 + $0x4] sm:$0xf] %vm727_vm1, %v1544_v50  ;;  %v1549_v55 = vpack.c.bf16 %v693_v49, %v693_v49  ;;  %v1718_v56 = vpop.eup %1717  ;;  %v528_v57 = vadd.f32 1.0, %v1716_v52 }
 0x115   : > { %1721 = vrcp.f32 %v662_v53  ;;  %v660_v58 = vadd.f32 1.0, %v1718_v56  ;;  %v1720_v60 = vpop.eup %1719 }
 0x116   : > { %v1547_v59 = vpack.c.bf16 %v691_v54, %v691_v54  ;;  %734 = vst.msk [vmem:[%s1953_s13 + $0x18] sm:$0xf] %vm727_vm1, %v1549_v55  ;;  %1723 = vrcp.f32 %v528_v57 }
 0x117   : > { %1725 = vrcp.f32 %v660_v58 }
 0x118   : > { %782 = vrot.lane.b32.xlu0 %v696_v43, %s1815_s11  ;;  %732 = vst.msk [vmem:[%s1953_s13 + $0x10] sm:$0xf] %vm727_vm1, %v1547_v59 }
 0x11c   : > { %736 = vrot.lane.b32.xlu0 %v1543_v38, %s1815_s11 }
 0x11f   : > { %v1722_v61 = vpop.eup %1721 }
 0x120   : > { %740 = vrot.lane.b32.xlu0 %v1545_v33, %s1815_s11  ;;  %v1724_v62 = vpop.eup %1723  ;;  %v686_v63 = vadd.f32 %v1722_v61, %v1720_v60 }
 0x121   : > { %v1726_v0 = vpop.eup %1725 }
 0x122   : > { %v684_v1 = vadd.f32 %v1726_v0, %v1724_v62  ;;  %v694_v2 = vmul.f32 0.5, %v686_v63 }
 0x124   : > { %744 = vrot.lane.b32.xlu0 %v1547_v59, %s1815_s11  ;;  %v692_v3 = vmul.f32 0.5, %v684_v1  ;;  %v698_v4 = vpack.c.bf16 %v694_v2, %v693_v49  ;;  %v1550_v5 = vpack.c.bf16 %v694_v2, %v694_v2 }
 0x126   : > { %v697_v6 = vpack.c.bf16 %v692_v3, %v691_v54  ;;  %735 = vst.msk [vmem:[%s1953_s13 + $0x1c] sm:$0xf] %vm727_vm1, %v1550_v5  ;;  %v1548_v7 = vpack.c.bf16 %v692_v3, %v692_v3 }
 0x128   : > { %748 = vrot.lane.b32.xlu0 %v1549_v55, %s1815_s11  ;;  %784 = vrot.lane.b32.xlu1 %v697_v6, %s1815_s11  ;;  %733 = vst.msk [vmem:[%s1953_s13 + $0x14] sm:$0xf] %vm727_vm1, %v1548_v7 }
 0x12c   : > { %786 = vrot.lane.b32.xlu1 %v698_v4, %s1815_s11 }
 0x130   : > { %738 = vrot.lane.b32.xlu1 %v1544_v50, %s1815_s11 }
 0x134   : > { %742 = vrot.lane.b32.xlu1 %v1546_v45, %s1815_s11 }
 0x138   : > { %750 = vrot.lane.b32.xlu1 %v1550_v5, %s1815_s11 }
 0x13c   : > { %746 = vrot.lane.b32.xlu1 %v1548_v7, %s1815_s11 }
 0x186   : > { %v781_v8 = vpop.permute.xlu0 %780 }
 0x187   : > { %1609 = vmatprep.mubr.msk.bf16.mxu0 %vm794_vm2, %v781_v8  ;;  %1619 = vmatprep.mubr.msk.bf16.mxu1 %vm794_vm2, %v781_v8 }
 0x18a   : > { %v783_v9 = vpop.permute.xlu0 %782 }
 0x18b   : > { %1610 = vmatmul.mubr.msk.bf16.vlgmr.msra.gmra.mrb[8].mxu0 %vm794_vm2, %v783_v9  ;;  %1620 = vmatmul.mubr.msk.bf16.vlgmr.msra.gmra.mrb[8].mxu1 %vm794_vm2, %v783_v9 }
 0x18e   : > { %v737_v12 = vpop.permute.xlu0 %736 }
 0x18f   : > { %1483 = vst.msk [vmem:[%s1953_s13 + $0x20] sm:$0xf] %vm727_vm1, %v737_v12 }
 0x192   : > { %v741_v13 = vpop.permute.xlu0 %740 }
 0x193   : > { %1485 = vst.msk [vmem:[%s1953_s13 + $0x28] sm:$0xf] %vm727_vm1, %v741_v13 }
 0x196   : > { %v745_v14 = vpop.permute.xlu0 %744 }
 0x197   : > { %1487 = vst.msk [vmem:[%s1953_s13 + $0x30] sm:$0xf] %vm727_vm1, %v745_v14 }
 0x19a   : > { %v749_v15 = vpop.permute.xlu0 %748  ;;  %v785_v16 = vpop.permute.xlu1 %784 }
 0x19b   : > { %1489 = vst.msk [vmem:[%s1953_s13 + $0x38] sm:$0xf] %vm727_vm1, %v749_v15  ;;  %1613 = vmatprep.mubr.msk.bf16.mxu0 %vm794_vm2, %v785_v16  ;;  %1623 = vmatprep.mubr.msk.bf16.mxu1 %vm794_vm2, %v785_v16 }
 0x19e   : > { %v787_v17 = vpop.permute.xlu1 %786 }
 0x19f   : > { %1614 = vmatmul.mubr.msk.bf16.gmra.mrb[12].mxu0 %vm794_vm2, %v787_v17  ;;  %1624 = vmatmul.mubr.msk.bf16.gmra.mrb[12].mxu1 %vm794_vm2, %v787_v17 }
 0x1a2   : > { %v739_v18 = vpop.permute.xlu1 %738 }
 0x1a3   : > { %1484 = vst.msk [vmem:[%s1953_s13 + $0x24] sm:$0xf] %vm727_vm1, %v739_v18 }
 0x1a6   : > { %v743_v19 = vpop.permute.xlu1 %742 }
 0x1a7   : > { %1486 = vst.msk [vmem:[%s1953_s13 + $0x2c] sm:$0xf] %vm727_vm1, %v743_v19 }
 0x1aa   : > { %v751_v20 = vpop.permute.xlu1 %750 }
 0x1ab   : > { %1490 = vst.msk [vmem:[%s1953_s13 + $0x3c] sm:$0xf] %vm727_vm1, %v751_v20 }
 0x1ae   : > { %v747_v21 = vpop.permute.xlu1 %746 }
 0x1af   : > { %1488 = vst.msk [vmem:[%s1953_s13 + $0x34] sm:$0xf] %vm727_vm1, %v747_v21 }
 0x25e   : > { %v1611_v24 = vpop.f32.mrb[8].mxu0  ;;  %v1621_v10 = vpop.f32.mrb[8].mxu1 }
 0x25f   : > { %v850_v25 = vadd.f32 %v1611_v24, %v2010_v22  ;;  %v976_v26 = vadd.f32 %v1621_v10, %v2015_v23  ;;  %v841_v11 = vpop.f32.mrb[9].mxu0  ;;  %v967_v27 = vpop.f32.mrb[9].mxu1 }
 0x260   : > { %v842_v28 = vadd.f32 %v2010_v22, %v841_v11  ;;  %v968_v29 = vadd.f32 %v2015_v23, %v967_v27  ;;  %v1612_v30 = vpop.f32.mrb[10].mxu0  ;;  %v1622_v31 = vpop.f32.mrb[10].mxu1 }
 0x261   : > { %v1499_v32 = vmul.f32 -1.442695, %v850_v25  ;;  %v1513_v33 = vmul.f32 -1.442695, %v976_v26  ;;  %v853_v34 = vadd.f32 %v1612_v30, %v2010_v22  ;;  %v979_v35 = vadd.f32 %v1622_v31, %v2015_v23  ;;  %v844_v36 = vpop.f32.mrb[11].mxu0  ;;  %v970_v37 = vpop.f32.mrb[11].mxu1 }
 0x262   : > { %v1497_v38 = vmul.f32 -1.442695, %v842_v28  ;;  %v1511_v39 = vmul.f32 -1.442695, %v968_v29  ;;  %v845_v40 = vadd.f32 %v2010_v22, %v844_v36  ;;  %v971_v41 = vadd.f32 %v2015_v23, %v970_v37 }
 0x263   : > { %1727 = vpow2.f32 %v1499_v32  ;;  %v1500_v42 = vmul.f32 -1.442695, %v853_v34  ;;  %v1514_v43 = vmul.f32 -1.442695, %v979_v35 }
 0x264   : > { %1729 = vpow2.f32 %v1513_v33  ;;  %v1498_v44 = vmul.f32 -1.442695, %v845_v40  ;;  %v1512_v45 = vmul.f32 -1.442695, %v971_v41 }
 0x265   : > { %1731 = vpow2.f32 %v1497_v38 }
 0x266   : > { %1733 = vpow2.f32 %v1511_v39 }
 0x267   : > { %1735 = vpow2.f32 %v1500_v42 }
 0x268   : > { %1737 = vpow2.f32 %v1514_v43 }
 0x269   : > { %1739 = vpow2.f32 %v1498_v44 }
 0x26a   : > { %1741 = vpow2.f32 %v1512_v45 }
 0x26d   : > { %v1728_v46 = vpop.eup %1727 }
 0x26e   : > { %v1730_v47 = vpop.eup %1729  ;;  %v898_v48 = vadd.f32 1.0, %v1728_v46 }
 0x26f   : > { %v1732_v49 = vpop.eup %1731  ;;  %v1024_v50 = vadd.f32 1.0, %v1730_v47 }
 0x270   : > { %v1734_v51 = vpop.eup %1733  ;;  %1743 = vrcp.f32 %v898_v48  ;;  %v896_v52 = vadd.f32 1.0, %v1732_v49 }
 0x271   : > { %v1736_v53 = vpop.eup %1735  ;;  %1745 = vrcp.f32 %v1024_v50  ;;  %v1022_v54 = vadd.f32 1.0, %v1734_v51 }
 0x272   : > { %v1738_v55 = vpop.eup %1737  ;;  %1747 = vrcp.f32 %v896_v52  ;;  %v899_v56 = vadd.f32 1.0, %v1736_v53  ;;  %v1615_v59 = vpop.f32.mrb[12].mxu0 }
 0x273   : > { %v1740_v57 = vpop.eup %1739  ;;  %1749 = vrcp.f32 %v1022_v54  ;;  %v1025_v58 = vadd.f32 1.0, %v1738_v55  ;;  %v1625_v60 = vpop.f32.mrb[12].mxu1  ;;  %v866_v63 = vadd.f32 %v1615_v59, %v2010_v22 }
 0x274   : > { %v1742_v61 = vpop.eup %1741  ;;  %1751 = vrcp.f32 %v899_v56  ;;  %v897_v62 = vadd.f32 1.0, %v1740_v57  ;;  %v992_v0 = vadd.f32 %v1625_v60, %v2015_v23  ;;  %v857_v1 = vpop.f32.mrb[13].mxu0 }
 0x275   : > { %v983_v2 = vpop.f32.mrb[13].mxu1  ;;  %1753 = vrcp.f32 %v1025_v58  ;;  %v1023_v3 = vadd.f32 1.0, %v1742_v61  ;;  %v858_v4 = vadd.f32 %v2010_v22, %v857_v1  ;;  %v1616_v6 = vpop.f32.mrb[14].mxu0  ;;  %v1503_v8 = vmul.f32 -1.442695, %v866_v63 }
 0x276   : > { %v984_v5 = vadd.f32 %v2015_v23, %v983_v2  ;;  %v1626_v7 = vpop.f32.mrb[14].mxu1  ;;  %1755 = vrcp.f32 %v897_v62  ;;  %v1517_v9 = vmul.f32 -1.442695, %v992_v0  ;;  %v869_v12 = vadd.f32 %v1616_v6, %v2010_v22  ;;  %v860_v13 = vpop.f32.mrb[15].mxu0 }
 0x277   : > { %v986_v14 = vpop.f32.mrb[15].mxu1  ;;  %1757 = vrcp.f32 %v1023_v3  ;;  %v1501_v15 = vmul.f32 -1.442695, %v858_v4  ;;  %v995_v17 = vadd.f32 %v1626_v7, %v2015_v23  ;;  %v861_v19 = vadd.f32 %v2010_v22, %v860_v13 }
 0x278   : > { %v1515_v16 = vmul.f32 -1.442695, %v984_v5  ;;  %1759 = vpow2.f32 %v1503_v8  ;;  %v1504_v18 = vmul.f32 -1.442695, %v869_v12  ;;  %v987_v20 = vadd.f32 %v2015_v23, %v986_v14 }
 0x279   : > { %1761 = vpow2.f32 %v1517_v9  ;;  %v1518_v21 = vmul.f32 -1.442695, %v995_v17  ;;  %v1502_v10 = vmul.f32 -1.442695, %v861_v19 }
 0x27a   : > { %v1744_v24 = vpop.eup %1743  ;;  %1763 = vpow2.f32 %v1501_v15  ;;  %v1516_v26 = vmul.f32 -1.442695, %v987_v20 }
 0x27b   : > { %v1746_v25 = vpop.eup %1745  ;;  %1765 = vpow2.f32 %v1515_v16 }
 0x27c   : > { %v1748_v11 = vpop.eup %1747  ;;  %1767 = vpow2.f32 %v1504_v18  ;;  %v1048_v27 = vadd.f32 %v1746_v25, %v1744_v24  ;;  %v1165_v25 = vld [vmem:[%s1953_s13] sm:$0xff] (%p1897_p4)  }
 0x27d   : > { %v1750_v28 = vpop.eup %1749  ;;  %1769 = vpow2.f32 %v1518_v21  ;;  %1166 = vst [vmem:[%s1149_s27] sm:$0xff] (%p1897_p4), %v1165_v25  }
 0x27e   : > { %v1752_v29 = vpop.eup %1751  ;;  %1771 = vpow2.f32 %v1502_v10  ;;  %v1056_v30 = vmul.f32 0.5, %v1048_v27  ;;  %v1046_v22 = vadd.f32 %v1750_v28, %v1748_v11  ;;  %v1173_v11 = vld [vmem:[%s1953_s13 + $0x10] sm:$0xff] (%p1897_p4)   ;;  %v1177_v27 = vld [vmem:[%s1953_s13 + $0x18] sm:$0xff] (%p1897_p4)   ;;  %v1181_v28 = vld [vmem:[%s1953_s13 + $0x20] sm:$0xff] (%p1897_p4)  }
 0x27f   : > { %v1754_v31 = vpop.eup %1753  ;;  %1773 = vpow2.f32 %v1516_v26  ;;  %v1169_v26 = vld [vmem:[%s1953_s13 + $0x8] sm:$0xff] (%p1897_p4)   ;;  %1174 = vst [vmem:[%s1149_s27 + $0x10] sm:$0xff] (%p1897_p4), %v1173_v11   ;;  %1178 = vst [vmem:[%s1149_s27 + $0x18] sm:$0xff] (%p1897_p4), %v1177_v27  }
 0x280   : > { %v1756_v23 = vpop.eup %1755  ;;  %v1553_v32 = vpack.c.bf16 %v1056_v30, %v1056_v30  ;;  %v1049_v33 = vadd.f32 %v1754_v31, %v1752_v29  ;;  %v1054_v34 = vmul.f32 0.5, %v1046_v22  ;;  %v1185_v29 = vld [vmem:[%s1953_s13 + $0x28] sm:$0xff] (%p1897_p4)   ;;  %1170 = vst [vmem:[%s1149_s27 + $0x8] sm:$0xff] (%p1897_p4), %v1169_v26   ;;  %1182 = vst [vmem:[%s1149_s27 + $0x40] sm:$0xff] (%p1897_p4), %v1181_v28   ;;  %v1189_v30 = vld [vmem:[%s1953_s13 + $0x30] sm:$0xff] (%p1897_p4)  }
 0x281   : > { %v1758_v35 = vpop.eup %1757  ;;  %1186 = vst [vmem:[%s1149_s27 + $0x48] sm:$0xff] (%p1897_p4), %v1185_v29   ;;  %v1193_v22 = vld [vmem:[%s1953_s13 + $0x38] sm:$0xff] (%p1897_p4)   ;;  %1190 = vst [vmem:[%s1149_s27 + $0x50] sm:$0xff] (%p1897_p4), %v1189_v30  }
 0x282   : > { %v1760_v36 = vpop.eup %1759  ;;  %1107 = vrot.lane.b32.xlu0 %v1553_v32, %s1816_s22  ;;  %1097 = vst.msk [vmem:[%s2035_s23 + $0x8] sm:$0xf] %vm1094_vm3, %v1553_v32  ;;  %v1057_v37 = vmul.f32 0.5, %v1049_v33  ;;  %v1551_v38 = vpack.c.bf16 %v1054_v34, %v1054_v34  ;;  %v1047_v39 = vadd.f32 %v1758_v35, %v1756_v23  ;;  %1194 = vst [vmem:[%s1149_s27 + $0x58] sm:$0xff] (%p1897_p4), %v1193_v22  }
 0x283   : > { %v1762_v40 = vpop.eup %1761  ;;  %v902_v41 = vadd.f32 1.0, %v1760_v36 }
 0x284   : > { %v1764_v42 = vpop.eup %1763  ;;  %v1028_v43 = vadd.f32 1.0, %v1762_v40  ;;  %v1554_v44 = vpack.c.bf16 %v1057_v37, %v1057_v37  ;;  %1095 = vst.msk [vmem:[%s2035_s23] sm:$0xf] %vm1094_vm3, %v1551_v38  ;;  %v1055_v45 = vmul.f32 0.5, %v1047_v39 }
 0x285   : > { %v1766_v46 = vpop.eup %1765  ;;  %1775 = vrcp.f32 %v902_v41  ;;  %v900_v47 = vadd.f32 1.0, %v1764_v42 }
 0x286   : > { %v1768_v48 = vpop.eup %1767  ;;  %1777 = vrcp.f32 %v1028_v43  ;;  %v1026_v49 = vadd.f32 1.0, %v1766_v46  ;;  %1109 = vrot.lane.b32.xlu1 %v1554_v44, %s1816_s22  ;;  %1098 = vst.msk [vmem:[%s2035_s23 + $0xc] sm:$0xf] %vm1094_vm3, %v1554_v44  ;;  %1103 = vrot.lane.b32.xlu0 %v1551_v38, %s1816_s22  ;;  %v1552_v50 = vpack.c.bf16 %v1055_v45, %v1055_v45 }
 0x287   : > { %v1770_v51 = vpop.eup %1769  ;;  %1779 = vrcp.f32 %v900_v47  ;;  %v903_v52 = vadd.f32 1.0, %v1768_v48 }
 0x288   : > { %v1772_v53 = vpop.eup %1771  ;;  %1781 = vrcp.f32 %v1026_v49  ;;  %v1029_v54 = vadd.f32 1.0, %v1770_v51  ;;  %1096 = vst.msk [vmem:[%s2035_s23 + $0x4] sm:$0xf] %vm1094_vm3, %v1552_v50 }
 0x289   : > { %v1774_v55 = vpop.eup %1773  ;;  %1783 = vrcp.f32 %v903_v52  ;;  %v901_v56 = vadd.f32 1.0, %v1772_v53 }
 0x28a   : > { %1785 = vrcp.f32 %v1029_v54  ;;  %v1027_v57 = vadd.f32 1.0, %v1774_v55  ;;  %1105 = vrot.lane.b32.xlu1 %v1552_v50, %s1816_s22 }
 0x28b   : > { %1787 = vrcp.f32 %v901_v56 }
 0x28c   : > { %1789 = vrcp.f32 %v1027_v57 }
 0x28f   : > { %v1776_v58 = vpop.eup %1775 }
 0x290   : > { %v1778_v59 = vpop.eup %1777 }
 0x291   : > { %v1780_v60 = vpop.eup %1779  ;;  %v1052_v61 = vadd.f32 %v1778_v59, %v1776_v58 }
 0x292   : > { %v1782_v62 = vpop.eup %1781 }
 0x293   : > { %v1784_v63 = vpop.eup %1783  ;;  %v1050_v0 = vadd.f32 %v1782_v62, %v1780_v60  ;;  %v1060_v1 = vmul.f32 0.5, %v1052_v61 }
 0x294   : > { %v1786_v2 = vpop.eup %1785 }
 0x295   : > { %v1788_v3 = vpop.eup %1787  ;;  %v1058_v4 = vmul.f32 0.5, %v1050_v0  ;;  %v1557_v5 = vpack.c.bf16 %v1060_v1, %v1060_v1  ;;  %v1053_v6 = vadd.f32 %v1786_v2, %v1784_v63 }
 0x296   : > { %v1790_v7 = vpop.eup %1789 }
 0x297   : > { %v1555_v8 = vpack.c.bf16 %v1058_v4, %v1058_v4  ;;  %v1051_v9 = vadd.f32 %v1790_v7, %v1788_v3  ;;  %1101 = vst.msk [vmem:[%s2035_s23 + $0x18] sm:$0xf] %vm1094_vm3, %v1557_v5  ;;  %v1061_v12 = vmul.f32 0.5, %v1053_v6 }
 0x299   : > { %1111 = vrot.lane.b32.xlu0 %v1555_v8, %s1816_s22  ;;  %1099 = vst.msk [vmem:[%s2035_s23 + $0x10] sm:$0xf] %vm1094_vm3, %v1555_v8  ;;  %v1059_v13 = vmul.f32 0.5, %v1051_v9  ;;  %v1558_v14 = vpack.c.bf16 %v1061_v12, %v1061_v12 }
 0x29b   : > { %v1556_v15 = vpack.c.bf16 %v1059_v13, %v1059_v13  ;;  %1102 = vst.msk [vmem:[%s2035_s23 + $0x1c] sm:$0xf] %vm1094_vm3, %v1558_v14 }
 0x29d   : > { %1113 = vrot.lane.b32.xlu1 %v1556_v15, %s1816_s22  ;;  %1100 = vst.msk [vmem:[%s2035_s23 + $0x14] sm:$0xf] %vm1094_vm3, %v1556_v15  ;;  %1115 = vrot.lane.b32.xlu0 %v1557_v5, %s1816_s22 }
 0x2a1   : > { %1117 = vrot.lane.b32.xlu1 %v1558_v14, %s1816_s22 }
 0x2f4   : > { %v1108_v16 = vpop.permute.xlu0 %1107 }
 0x2f5   : > { %1529 = vst.msk [vmem:[%s2035_s23 + $0x28] sm:$0xf] %vm1094_vm3, %v1108_v16 }
 0x2f8   : > { %v1110_v17 = vpop.permute.xlu1 %1109  ;;  %v1104_v18 = vpop.permute.xlu0 %1103 }
 0x2f9   : > { %1530 = vst.msk [vmem:[%s2035_s23 + $0x2c] sm:$0xf] %vm1094_vm3, %v1110_v17  ;;  %1527 = vst.msk [vmem:[%s2035_s23 + $0x20] sm:$0xf] %vm1094_vm3, %v1104_v18 }
 0x2fc   : > { %v1106_v19 = vpop.permute.xlu1 %1105 }
 0x2fd   : > { %1528 = vst.msk [vmem:[%s2035_s23 + $0x24] sm:$0xf] %vm1094_vm3, %v1106_v19 }
 0x30b   : > { %v1112_v20 = vpop.permute.xlu0 %1111 }
 0x30c   : > { %1531 = vst.msk [vmem:[%s2035_s23 + $0x30] sm:$0xf] %vm1094_vm3, %v1112_v20 }
 0x30e   : > { %1146 = sbr.rel (!%p1897_p4) target bundleno = 789 (0x315), region = 60 }
 0x30f   : > { %v1114_v21 = vpop.permute.xlu1 %1113  ;;  %v1116_v24 = vpop.permute.xlu0 %1115 }
 0x310   : > { %1532 = vst.msk [vmem:[%s2035_s23 + $0x34] sm:$0xf] %vm1094_vm3, %v1114_v21  ;;  %1533 = vst.msk [vmem:[%s2035_s23 + $0x38] sm:$0xf] %vm1094_vm3, %v1116_v24 }
 0x313   : > { %v1118_v10 = vpop.permute.xlu1 %1117 }
 0x314   : > { %1534 = vst.msk [vmem:[%s2035_s23 + $0x3c] sm:$0xf] %vm1094_vm3, %v1118_v10 }
 0x315 PF: > { %1251 = sbr.rel (!%p1897_p4) target bundleno = 797 (0x31d), region = 101  ;;  %s1560_s28 = sshll.u32 (%p1897_p4), %s1885_s16, 5  ;;  %v1270_v31 = vld [vmem:[%s2035_s23] sm:$0xff] (%p1897_p4)   ;;  %v1274_v23 = vld [vmem:[%s2035_s23 + $0x8] sm:$0xff] (%p1897_p4)   ;;  %v1278_v32 = vld [vmem:[%s2035_s23 + $0x10] sm:$0xff] (%p1897_p4)  }
 0x316   : > { %s1254_s13 = scalar_lea.vmem (%p1897_p4), %s2124_s10, %s1560_s28  ;;  %v1282_v33 = vld [vmem:[%s2035_s23 + $0x18] sm:$0xff] (%p1897_p4)   ;;  %v1286_v34 = vld [vmem:[%s2035_s23 + $0x20] sm:$0xff] (%p1897_p4)   ;;  %v1290_v35 = vld [vmem:[%s2035_s23 + $0x28] sm:$0xff] (%p1897_p4)  }
 0x317   : > { %1271 = vst [vmem:[%s1254_s13] sm:$0xff] (%p1897_p4), %v1270_v31   ;;  %1275 = vst [vmem:[%s1254_s13 + $0x8] sm:$0xff] (%p1897_p4), %v1274_v23   ;;  %v1294_v36 = vld [vmem:[%s2035_s23 + $0x30] sm:$0xff] (%p1897_p4)  }
 0x318   : > { %1279 = vst [vmem:[%s1254_s13 + $0x10] sm:$0xff] (%p1897_p4), %v1278_v32   ;;  %1283 = vst [vmem:[%s1254_s13 + $0x18] sm:$0xff] (%p1897_p4), %v1282_v33  }
 0x319   : > { %1287 = vst [vmem:[%s1254_s13 + $0x40] sm:$0xff] (%p1897_p4), %v1286_v34   ;;  %1291 = vst [vmem:[%s1254_s13 + $0x48] sm:$0xff] (%p1897_p4), %v1290_v35  }
 0x31a   : > { %1295 = vst [vmem:[%s1254_s13 + $0x50] sm:$0xff] (%p1897_p4), %v1294_v36  }
 0x31b   : > { %v1298_v37 = vld [vmem:[%s2035_s23 + $0x38] sm:$0xff] (%p1897_p4)  }
 0x31c   : > { %1299 = vst [vmem:[%s1254_s13 + $0x58] sm:$0xff] %v1298_v37  }
 0x31d PF: > { %p18_p8 = scmp.ge.s32.totalorder %s1887_s17, 4   ;;  %s2126_s13 = smov %s1809_s14 }
 0x31e   : > { %s2127_s14 = smov %s1895_s20  ;;  %s2128_s15 = smov %s1887_s17 }
 0x31f   :  { %20 = sbr.rel (!%p18_p8) target bundleno = 2 (0x2), region = 182 }

// kernel: wavelet2_rescnn_forward.9
= control target key start
LH: loop header
LB: loop body
LE: loop exit
PB: predicated region body
PF: predicated region fallthrough
CT: control target
= control target key end

     0   :  { %v831_v1 = vmov 0.0   ;;  %vm832_vm0 = vmmov 0   ;;  %s1064_s0 = inlined_call_operand.vmem [shape: f32[2,128], index: 0, kind: input, shape index: {}]   ;;  %s1065_s1 = inlined_call_operand.vmem [shape: f32[4,128], index: 1, kind: input, shape index: {}]   ;;  %s1066_s2 = inlined_call_operand.vmem [shape: f32[4,128], index: 2, kind: input, shape index: {}]   ;;  %s1067_s3 = inlined_call_operand.vmem [shape: bf16[640,128], index: 3, kind: input, shape index: {}]   ;;  %s1068_s4 = inlined_call_operand.vmem [shape: f32[1,128], index: 4, kind: input, shape index: {}]   ;;  %s1069_s5 = inlined_call_operand.hbm [shape: f32[2,128], index: 5, kind: output, shape index: {}]  }
   0x1   :  { %v767_v0 = vld [vmem:[%s1067_s3 + $0x40] sm:$0xff]   ;;  %664 = vmatprep.subr.bf16.mxu0 %v831_v1  ;;  %684 = vmatprep.subr.bf16.mxu1 %v831_v1  ;;  %v769_v3 = vld [vmem:[%s1067_s3 + $0x48] sm:$0xff]   ;;  %v771_v5 = vld [vmem:[%s1067_s3 + $0x50] sm:$0xff]  }
   0x2   :  { %v768_v2 = vld [vmem:[%s1067_s3] sm:$0xff]   ;;  %665 = vmatpush3.bf16.msra.mxu0 %v767_v0  ;;  %680 = vmatprep.mubr.msk.bf16.mxu0 %vm832_vm0, %v831_v1  ;;  %v770_v4 = vld [vmem:[%s1067_s3 + $0x8] sm:$0xff]   ;;  %v772_v6 = vld [vmem:[%s1067_s3 + $0x10] sm:$0xff]  }
   0x3   :  { %685 = vmatpush3.bf16.msra.mxu1 %v768_v2  ;;  %666 = vmatprep.subr.bf16.mxu0 %v831_v1  ;;  %v773_v7 = vld [vmem:[%s1067_s3 + $0x58] sm:$0xff]   ;;  %v775_v9 = vld [vmem:[%s1067_s3 + $0x60] sm:$0xff]   ;;  %v777_v11 = vld [vmem:[%s1067_s3 + $0x68] sm:$0xff]  }
   0x4   :  { %686 = vmatprep.subr.bf16.mxu1 %v831_v1  ;;  %700 = vmatprep.mubr.msk.bf16.mxu1 %vm832_vm0, %v831_v1  ;;  %v774_v8 = vld [vmem:[%s1067_s3 + $0x18] sm:$0xff]   ;;  %v776_v10 = vld [vmem:[%s1067_s3 + $0x20] sm:$0xff]   ;;  %v778_v12 = vld [vmem:[%s1067_s3 + $0x28] sm:$0xff]  }
   0x5   :  { %v779_v13 = vld [vmem:[%s1067_s3 + $0x70] sm:$0xff]   ;;  %v781_v15 = vld [vmem:[%s1067_s3 + $0x78] sm:$0xff]   ;;  %v40_v17 = vld [vmem:[%s1065_s1] sm:$0x3] }
   0x6   :  { %667 = vmatpush3.bf16.msra.mxu0 %v769_v3  ;;  %v780_v14 = vld [vmem:[%s1067_s3 + $0x30] sm:$0xff]   ;;  %v782_v16 = vld [vmem:[%s1067_s3 + $0x38] sm:$0xff]   ;;  %v22_v18 = vld [vmem:[%s1064_s0] sm:$0x3]  ;;  %v41_v19 = vpack.c.bf16 %v40_v17, %v40_v17 }
   0x7   :  { %687 = vmatpush3.bf16.msra.mxu1 %v770_v4  ;;  %668 = vmatprep.subr.bf16.mxu0 %v831_v1  ;;  %v23_v20 = vpack.c.bf16 %v22_v18, %v22_v18  ;;  %v783_v21 = vld [vmem:[%s1067_s3 + $0x80] sm:$0xff]   ;;  %v785_v23 = vld [vmem:[%s1067_s3 + $0x88] sm:$0xff]   ;;  %v787_v25 = vld [vmem:[%s1067_s3 + $0x90] sm:$0xff]  }
   0x8   :  { %688 = vmatprep.subr.bf16.mxu1 %v831_v1  ;;  %v784_v22 = vld [vmem:[%s1067_s3 + $0xc0] sm:$0xff]   ;;  %v786_v24 = vld [vmem:[%s1067_s3 + $0xc8] sm:$0xff]   ;;  %v788_v26 = vld [vmem:[%s1067_s3 + $0xd0] sm:$0xff]  }
   0xa   :  { %669 = vmatpush3.bf16.msra.mxu0 %v771_v5 }
   0xb   :  { %689 = vmatpush3.bf16.msra.mxu1 %v772_v6  ;;  %670 = vmatprep.subr.bf16.mxu0 %v831_v1 }
   0xc   :  { %690 = vmatprep.subr.bf16.mxu1 %v831_v1 }
   0xe   :  { %671 = vmatpush3.bf16.msra.mxu0 %v773_v7 }
   0xf   :  { %691 = vmatpush3.bf16.msra.mxu1 %v774_v8  ;;  %672 = vmatprep.subr.bf16.mxu0 %v831_v1 }
  0x10   :  { %692 = vmatprep.subr.bf16.mxu1 %v831_v1 }
  0x12   :  { %673 = vmatpush3.bf16.msra.mxu0 %v775_v9 }
  0x13   :  { %693 = vmatpush3.bf16.msra.mxu1 %v776_v10  ;;  %674 = vmatprep.subr.bf16.mxu0 %v831_v1 }
  0x14   :  { %694 = vmatprep.subr.bf16.mxu1 %v831_v1 }
  0x16   :  { %675 = vmatpush3.bf16.msra.mxu0 %v777_v11 }
  0x17   :  { %695 = vmatpush3.bf16.msra.mxu1 %v778_v12  ;;  %676 = vmatprep.subr.bf16.mxu0 %v831_v1 }
  0x18   :  { %696 = vmatprep.subr.bf16.mxu1 %v831_v1 }
  0x1a   :  { %677 = vmatpush3.bf16.msra.mxu0 %v779_v13 }
  0x1b   :  { %697 = vmatpush3.bf16.msra.mxu1 %v780_v14  ;;  %678 = vmatprep.subr.bf16.mxu0 %v831_v1 }
  0x1c   :  { %698 = vmatprep.subr.bf16.mxu1 %v831_v1 }
  0x1e   :  { %679 = vmatpush3.bf16.msra.mxu0 %v781_v15 }
  0x1f   :  { %699 = vmatpush3.bf16.msra.mxu1 %v782_v16  ;;  %704 = vmatprep.subr.bf16.mxu0 %v831_v1 }
  0x20   :  { %724 = vmatprep.subr.bf16.mxu1 %v831_v1 }
  0x21   :  { %681 = vmatmul.mubr.bf16.vlgmr.msra.gmra.mrb[0].mxu0 %v41_v19 }
  0x22   :  { %701 = vmatmul.mubr.bf16.vlgmr.msra.gmra.mrb[0].mxu1 %v23_v20  ;;  %705 = vmatpush3.bf16.msra.mxu0 %v783_v21 }
  0x23   :  { %725 = vmatpush3.bf16.msra.mxu1 %v784_v22  ;;  %706 = vmatprep.subr.bf16.mxu0 %v831_v1 }
  0x24   :  { %726 = vmatprep.subr.bf16.mxu1 %v831_v1  ;;  %720 = vmatprep.mubr.msk.bf16.mxu0 %vm832_vm0, %v831_v1 }
  0x25   :  { %740 = vmatprep.mubr.msk.bf16.mxu1 %vm832_vm0, %v831_v1 }
  0x26   :  { %707 = vmatpush3.bf16.msra.mxu0 %v785_v23 }
  0x27   :  { %727 = vmatpush3.bf16.msra.mxu1 %v786_v24  ;;  %708 = vmatprep.subr.bf16.mxu0 %v831_v1 }
  0x28   :  { %728 = vmatprep.subr.bf16.mxu1 %v831_v1 }
  0x29   :  { %10 = vsyncpa [#allocation3], 0  ;;  %v789_v27 = vld [vmem:[%s1067_s3 + $0x98] sm:$0xff]   ;;  %v791_v29 = vld [vmem:[%s1067_s3 + $0xa0] sm:$0xff]   ;;  %s833_s30 = smov [#allocation2]  }
  0x2a   :  { %709 = vmatpush3.bf16.msra.mxu0 %v787_v25  ;;  %v790_v28 = vld [vmem:[%s1067_s3 + $0xd8] sm:$0xff]   ;;  %v792_v30 = vld [vmem:[%s1067_s3 + $0xe0] sm:$0xff]   ;;  %v793_v31 = vld [vmem:[%s1067_s3 + $0xa8] sm:$0xff]   ;;  %s570_s6 = sshll.u32 %s833_s30, 4  ;;  %s571_s6 = int_to_ptr.vmem [resolvable:$true] %s570_s6 }
  0x2b   :  { %729 = vmatpush3.bf16.msra.mxu1 %v788_v26  ;;  %710 = vmatprep.subr.bf16.mxu0 %v831_v1  ;;  %v794_v32 = vld [vmem:[%s1067_s3 + $0xe8] sm:$0xff]   ;;  %v795_v33 = vld [vmem:[%s1067_s3 + $0xb0] sm:$0xff]   ;;  %v797_v35 = vld [vmem:[%s1067_s3 + $0xb8] sm:$0xff]   ;;  %s807_s7 = scalar_lea.vmem %s571_s6, 32  ;;  %p812_p1 = scmp.lt.s32.totalorder %s571_s6, %s571_s6 }
  0x2c   :  { %730 = vmatprep.subr.bf16.mxu1 %v831_v1  ;;  %v796_v34 = vld [vmem:[%s1067_s3 + $0xf0] sm:$0xff]   ;;  %v234_v36 = vld [vmem:[%s1065_s1 + $0x2] sm:$0x3]  ;;  %v798_v37 = vld [vmem:[%s1067_s3 + $0xf8] sm:$0xff]   ;;  %p808_p0 = scmp.ne.s32.totalorder %s571_s6, %s807_s7  ;;  %p813_p2 = scmp.lt.s32.totalorder %s807_s7, %s807_s7 }
  0x2d   :  { %v341_v38 = vld [vmem:[%s1066_s2] sm:$0x3]  ;;  %v235_v39 = vpack.c.bf16 %v234_v36, %v234_v36  ;;  %v800_v42 = vld [vmem:[%s1067_s3 + $0x108] sm:$0xff]   ;;  %v801_v43 = vld [vmem:[%s1067_s3 + $0x110] sm:$0xff]  }
  0x2e   :  { %711 = vmatpush3.bf16.msra.mxu0 %v789_v27  ;;  %v799_v40 = vld [vmem:[%s1067_s3 + $0x100] sm:$0xff]   ;;  %v342_v41 = vpack.c.bf16 %v341_v38, %v341_v38  ;;  %v802_v44 = vld [vmem:[%s1067_s3 + $0x118] sm:$0xff]   ;;  %v804_v46 = vld [vmem:[%s1067_s3 + $0x128] sm:$0xff]   ;;  %p814_p3 = por %p813_p2, %p812_p1 }
  0x2f   :  { %731 = vmatpush3.bf16.msra.mxu1 %v790_v28  ;;  %712 = vmatprep.subr.bf16.mxu0 %v831_v1  ;;  %v803_v45 = vld [vmem:[%s1067_s3 + $0x120] sm:$0xff]   ;;  %v805_v47 = vld [vmem:[%s1067_s3 + $0x130] sm:$0xff]   ;;  %v806_v48 = vld [vmem:[%s1067_s3 + $0x138] sm:$0xff]  }
  0x30   :  { %732 = vmatprep.subr.bf16.mxu1 %v831_v1  ;;  %v448_v49 = vld [vmem:[%s1066_s2 + $0x2] sm:$0x3]  ;;  %v618_v7 = vld [vmem:[%s1068_s4] ss:$0 sm:$0xff]  ;;  %p815_p4 = pnand %p814_p3, %p808_p0 }
  0x31   :  { %v449_v50 = vpack.c.bf16 %v448_v49, %v448_v49 }
  0x32   :  { %713 = vmatpush3.bf16.msra.mxu0 %v791_v29 }
  0x33   :  { %733 = vmatpush3.bf16.msra.mxu1 %v792_v30  ;;  %714 = vmatprep.subr.bf16.mxu0 %v831_v1 }
  0x34   :  { %734 = vmatprep.subr.bf16.mxu1 %v831_v1 }
  0x36   :  { %715 = vmatpush3.bf16.msra.mxu0 %v793_v31 }
  0x37   :  { %735 = vmatpush3.bf16.msra.mxu1 %v794_v32  ;;  %716 = vmatprep.subr.bf16.mxu0 %v831_v1 }
  0x38   :  { %736 = vmatprep.subr.bf16.mxu1 %v831_v1 }
  0x3a   :  { %717 = vmatpush3.bf16.msra.mxu0 %v795_v33 }
  0x3b   :  { %737 = vmatpush3.bf16.msra.mxu1 %v796_v34  ;;  %718 = vmatprep.subr.bf16.mxu0 %v831_v1 }
  0x3c   :  { %738 = vmatprep.subr.bf16.mxu1 %v831_v1 }
  0x3e   :  { %719 = vmatpush3.bf16.msra.mxu0 %v797_v35 }
  0x3f   :  { %739 = vmatpush3.bf16.msra.mxu1 %v798_v37  ;;  %744 = vmatprep.subr.bf16.mxu0 %v831_v1 }
  0x41   :  { %721 = vmatmul.mubr.bf16.vlgmr.msra.gmra.mrb[4].mxu0 %v235_v39 }
  0x42   :  { %745 = vmatpush3.bf16.msra.mxu0 %v799_v40  ;;  %741 = vmatmul.mubr.bf16.vlgmr.msra.gmra.mrb[4].mxu1 %v342_v41 }
  0x43   :  { %746 = vmatprep.subr.bf16.mxu0 %v831_v1  ;;  %760 = vmatprep.mubr.msk.bf16.mxu0 %vm832_vm0, %v831_v1 }
  0x46   :  { %747 = vmatpush3.bf16.msra.mxu0 %v800_v42 }
  0x47   :  { %748 = vmatprep.subr.bf16.mxu0 %v831_v1 }
  0x4a   :  { %749 = vmatpush3.bf16.msra.mxu0 %v801_v43 }
  0x4b   :  { %750 = vmatprep.subr.bf16.mxu0 %v831_v1 }
  0x4e   :  { %751 = vmatpush3.bf16.msra.mxu0 %v802_v44 }
  0x4f   :  { %752 = vmatprep.subr.bf16.mxu0 %v831_v1 }
  0x52   :  { %753 = vmatpush3.bf16.msra.mxu0 %v803_v45 }
  0x53   :  { %754 = vmatprep.subr.bf16.mxu0 %v831_v1 }
  0x56   :  { %755 = vmatpush3.bf16.msra.mxu0 %v804_v46 }
  0x57   :  { %756 = vmatprep.subr.bf16.mxu0 %v831_v1 }
  0x5a   :  { %757 = vmatpush3.bf16.msra.mxu0 %v805_v47 }
  0x5b   :  { %758 = vmatprep.subr.bf16.mxu0 %v831_v1 }
  0x5e   :  { %759 = vmatpush3.bf16.msra.mxu0 %v806_v48 }
  0x61   :  { %761 = vmatmul.mubr.bf16.vlgmr.msra.gmra.mrb[8].mxu0 %v449_v50 }
  0xf4   :  { %v140_v51 = vpop.f32.mrb[0].mxu0 }
  0xf5   :  { %v682_v52 = vpop.f32.mrb[1].mxu0  ;;  %v228_v53 = vpop.f32.mrb[0].mxu1 }
  0xf6   :  { %v229_v54 = vadd.f32 %v228_v53, %v140_v51  ;;  %v143_v55 = vpop.f32.mrb[2].mxu0  ;;  %v702_v56 = vpop.f32.mrb[1].mxu1 }
  0xf7   :  { %v683_v57 = vpop.f32.mrb[3].mxu0  ;;  %v231_v58 = vpop.f32.mrb[2].mxu1 }
  0xf8   :  { %v703_v59 = vpop.f32.mrb[3].mxu1 }
 0x114   :  { %v334_v60 = vpop.f32.mrb[4].mxu0 }
 0x115   :  { %v340_v61 = vadd.f32 %v334_v60, %v229_v54  ;;  %v722_v62 = vpop.f32.mrb[5].mxu0  ;;  %v441_v63 = vpop.f32.mrb[4].mxu1 }
 0x116   :  { %v337_v0 = vpop.f32.mrb[6].mxu0  ;;  %v742_v2 = vpop.f32.mrb[5].mxu1 }
 0x117   :  { %v447_v3 = vadd.f32 %v441_v63, %v340_v61  ;;  %v723_v1 = vpop.f32.mrb[7].mxu0  ;;  %v444_v4 = vpop.f32.mrb[6].mxu1 }
 0x118   :  { %v743_v5 = vpop.f32.mrb[7].mxu1 }
 0x134   :  { %v548_v6 = vpop.f32.mrb[8].mxu0 }
 0x135   :  { %v554_v8 = vadd.f32 %v548_v6, %v447_v3  ;;  %v762_v9 = vpop.f32.mrb[9].mxu0 }
 0x136   :  { %v551_v10 = vpop.f32.mrb[10].mxu0 }
 0x137   :  { %v763_v11 = vpop.f32.mrb[11].mxu0  ;;  %v562_v12 = vadd.f32 %v618_v7, %v554_v8 }
 0x139   :  { %563 = vst [vmem:[#allocation2] sm:$0x3] %v562_v12 }
 0x13a   :  { %818 = shalt.err (!%p815_p4)
}
 0x13b   :  { %s819_s4 = scalar_lea.hbm %s1069_s5, 32 }
 0x13c   :  { %p820_p5 = scmp.ne.s32.totalorder %s1069_s5, %s819_s4  ;;  %p823_p6 = scmp.lt.u32.totalorder %s819_s4, %s1069_s5 }
 0x13e   :  { %p825_p7 = pnand %p823_p6, %p820_p5 }
 0x140   :  { %828 = shalt.err (!%p825_p7)
}
 0x141   :  { %573 = dma.vmem_to_hbm [thread:$0]  %s571_s6, 32, %s1069_s5, [#allocation3]  }
 0x142   :  { %829 = dma.done.wait [#allocation3], 32  }
 0x143   :  { %830 = vsyncadd [#allocation3], 4294967264 }
 0x144   :  { %577 = vsyncpa [#allocation3], 1 }

// kernel: wavelet2_rescnn_forward.6
= control target key start
LH: loop header
LB: loop body
LE: loop exit
PB: predicated region body
PF: predicated region fallthrough
CT: control target
= control target key end

     0   :  { %s6494_s0 = inlined_call_operand.vmem [shape: bf16[2,64,32], index: 0, kind: input, shape index: {}]   ;;  %s6495_s1 = inlined_call_operand.hbm [shape: bf16[7,64,128], index: 1, kind: input, shape index: {}]   ;;  %s6496_s2 = inlined_call_operand.hbm [shape: bf16[5,128,128], index: 2, kind: input, shape index: {}]   ;;  %s6497_s3 = inlined_call_operand.vmem [shape: bf16[3,128,64], index: 3, kind: input, shape index: {}]   ;;  %s6498_s4 = inlined_call_operand.vmem [shape: f32[1,1,64], index: 4, kind: input, shape index: {}]   ;;  %s6499_s5 = inlined_call_operand.vmem [shape: bf16[3,64,128], index: 5, kind: input, shape index: {}]   ;;  %s6500_s6 = inlined_call_operand.hbm [shape: f32[1,1,128], index: 6, kind: input, shape index: {}]   ;;  %s6501_s7 = inlined_call_operand.hbm [shape: f32[1,1,128], index: 7, kind: input, shape index: {}]   ;;  %s6502_s8 = inlined_call_operand.vmem [shape: bf16[3,128,256], index: 8, kind: input, shape index: {}]   ;;  %s6503_s9 = inlined_call_operand.vmem [shape: f32[1,1,256], index: 9, kind: input, shape index: {}]   ;;  %s6504_s10 = inlined_call_operand.hbm [shape: f32[1,1,256], index: 10, kind: input, shape index: {}]   ;;  %s6505_s11 = inlined_call_operand.hbm [shape: bf16[3,256,128], index: 11, kind: input, shape index: {}]   ;;  %s6506_s12 = inlined_call_operand.hbm [shape: f32[1,1,128], index: 12, kind: input, shape index: {}]   ;;  %s6507_s13 = inlined_call_operand.hbm [shape: f32[1,1,128], index: 13, kind: input, shape index: {}]   ;;  %s6508_s14 = inlined_call_operand.vmem [shape: f32[2,1,128], index: 14, kind: output, shape index: {}]  }
   0x1   :  { %6512 = sst [smem:[#allocation21_spill]] %s6498_s4 }
   0x2   :  { %6513 = sst [smem:[#allocation22_spill]] %s6503_s9 }
   0x3   :  { %6514 = sst [smem:[#allocation23_spill]] %s6508_s14 }
   0x4   :  { %19 = vsyncpa [#allocation3], 0 }
   0x5   :  { %20 = vsyncpa [#allocation5], 0 }
   0x6   :  { %21 = vsyncpa [#allocation8], 0 }
   0x7   :  { %22 = vsyncpa [#allocation11], 0 }
   0x8   :  { %23 = vsyncpa [#allocation14], 0  ;;  %s5757_s29 = smov 0  }
   0x9 LB: > { %6515 = sst [smem:[#allocation20_spill]] %s5669_s29  ;;  %s5763_s30 = sadd.s32 4294967295, %s5669_s29   ;;  %s5669_s29 = sphi %s5757_s29, %s29_s29  }
   0xa   : > { %p4164_p0 = scmp.ge.s32.totalorder %s5669_s29, 1  ;;  %p359_p1 = scmp.lt.s32.totalorder %s5669_s29, 3 }
   0xb   : > { %p6510_p2 = scmp.eq.s32.totalorder %s5763_s30, 0  ;;  %s5671_s16 = smov [#allocation4]  }
   0xc   : > { %p5768_p3 = pnand %p4164_p0, %p359_p1  ;;  %s384_s17 = sshll.u32 %s5671_s16, 4  ;;  %s5772_s17 = int_to_ptr.vmem [resolvable:$true] %s384_s17 }
   0xd   : > { %s5672_s18 = smov [#allocation7]   ;;  %s5673_s21 = smov [#allocation10]  }
   0xe   : > { %s6516_s15 = scalar_select %p5768_p3, 1, 0 }
   0xf   : > { %p5126_p4 = pneg %p5768_p3  ;;  %s418_s19 = sshll.u32 %s5672_s18, 4  ;;  %s5776_s19 = int_to_ptr.vmem [resolvable:$true] %s418_s19 }
  0x10   : > { %s445_s22 = sshll.u32 %s5673_s21, 4  ;;  %s5674_s23 = smov [#allocation2]   ;;  %s5784_s22 = int_to_ptr.vmem [resolvable:$true] %s445_s22 }
  0x11   : > { %p5780_p5 = pnand %p6510_p2, %p5126_p4  ;;  %s5786_s24 = sshll.u32 %s5674_s23, 4  ;;  %s372_s24 = int_to_ptr.vmem [resolvable:$true] %s5786_s24 }
  0x12   : > { %s5419_s27 = scalar_lea.hbm %s6496_s2, 5120 }
  0x13   : > { %p5420_p6 = scmp.ne.s32.totalorder %s6496_s2, %s5419_s27  ;;  %p5796_p7 = pneg %p5780_p5 }
  0x14   : > { %p5426_p10 = scmp.lt.u32.totalorder %s5419_s27, %s6496_s2 }
  0x15   : > { %p5422_p8 = pnand %p5796_p7, %p5420_p6 }
  0x17   : > { %p5423_p9 = pneg %p5422_p8 }
  0x19   : > { %p5428_p11 = pnand %p5426_p10, %p5423_p9 }
  0x1b   : > { %5431 = shalt.err (!%p5428_p11)
}
  0x1c   : > { %s5432_s25 = scalar_lea.vmem %s5772_s17, 5120  ;;  %p5440_p1 = scmp.lt.s32.totalorder %s5772_s17, %s5772_s17 }
  0x1d   : > { %p5433_p12 = scmp.ne.s32.totalorder %s5772_s17, %s5432_s25  ;;  %p5441_p4 = scmp.lt.s32.totalorder %s5432_s25, %s5432_s25 }
  0x1f   : > { %p5435_p13 = pnand %p5433_p12, %p5796_p7  ;;  %p5442_p6 = por %p5441_p4, %p5440_p1 }
  0x21   : > { %p5436_p0 = pneg %p5435_p13 }
  0x23   : > { %p5443_p8 = pnand %p5442_p6, %p5436_p0 }
  0x25   : > { %5446 = shalt.err (!%p5443_p8)
}
  0x26   : > { %s5675_s26 = smov 64   ;;  %s5676_s27 = smov 4  }
  0x27   : > { %5132 = dma.hbm_to_vmem [thread:$0]  (!%p5780_p5), %s6496_s2, 5120, %s5772_s17, [#allocation5], %s5675_s26, %s5675_s26, %s5676_s27  }
  0x28   : > { %s5447_s25 = scalar_lea.hbm %s6501_s7, 16 }
  0x29   : > { %p5448_p9 = scmp.ne.s32.totalorder %s6501_s7, %s5447_s25  ;;  %p5454_p12 = scmp.lt.u32.totalorder %s5447_s25, %s6501_s7 }
  0x2b   : > { %p5450_p10 = pnand %p5448_p9, %p5796_p7 }
  0x2d   : > { %p5451_p11 = pneg %p5450_p10 }
  0x2f   : > { %p5456_p13 = pnand %p5454_p12, %p5451_p11 }
  0x31   : > { %5459 = shalt.err (!%p5456_p13)
}
  0x32   : > { %s5460_s17 = scalar_lea.vmem %s5776_s19, 16  ;;  %s5467_s14 = scalar_lea.vmem %s5776_s19, 32 }
  0x33   : > { %p5461_p0 = scmp.ne.s32.totalorder %s5776_s19, %s5460_s17  ;;  %p5468_p6 = scmp.lt.s32.totalorder %s5776_s19, %s5776_s19 }
  0x34   : > { %p5469_p8 = scmp.lt.s32.totalorder %s5467_s14, %s5460_s17 }
  0x35   : > { %p5463_p1 = pnand %p5461_p0, %p5796_p7 }
  0x36   : > { %p5470_p9 = por %p5469_p8, %p5468_p6 }
  0x37   : > { %p5464_p4 = pneg %p5463_p1 }
  0x39   : > { %p5471_p10 = pnand %p5470_p9, %p5464_p4 }
  0x3b   : > { %5474 = shalt.err (!%p5471_p10)
}
  0x3c   : > { %5138 = dma.hbm_to_vmem [thread:$0]  (!%p5780_p5), %s6501_s7, 16, %s5776_s19, [#allocation8]  }
  0x3d   : > { %s5475_s16 = scalar_lea.hbm %s6505_s11, 6144 }
  0x3e   : > { %p5476_p11 = scmp.ne.s32.totalorder %s6505_s11, %s5475_s16  ;;  %p5482_p0 = scmp.lt.u32.totalorder %s5475_s16, %s6505_s11 }
  0x40   : > { %p5478_p12 = pnand %p5476_p11, %p5796_p7 }
  0x42   : > { %p5479_p13 = pneg %p5478_p12 }
  0x44   : > { %p5484_p1 = pnand %p5482_p0, %p5479_p13 }
  0x46   : > { %5487 = shalt.err (!%p5484_p1)
}
  0x47   : > { %s5488_s19 = scalar_lea.vmem %s5784_s22, 6144  ;;  %p5496_p9 = scmp.lt.s32.totalorder %s5784_s22, %s5784_s22 }
  0x48   : > { %p5489_p4 = scmp.ne.s32.totalorder %s5784_s22, %s5488_s19  ;;  %p5497_p10 = scmp.lt.s32.totalorder %s5488_s19, %s5488_s19 }
  0x4a   : > { %p5491_p6 = pnand %p5489_p4, %p5796_p7  ;;  %p5498_p11 = por %p5497_p10, %p5496_p9 }
  0x4c   : > { %p5492_p8 = pneg %p5491_p6 }
  0x4e   : > { %p5499_p12 = pnand %p5498_p11, %p5492_p8 }
  0x50   : > { %5502 = shalt.err (!%p5499_p12)
}
  0x51   : > { %5144 = dma.hbm_to_vmem [thread:$0]  (!%p5780_p5), %s6505_s11, 6144, %s5784_s22, [#allocation11], %s5675_s26, %s5675_s26, %s5676_s27  }
  0x52   : > { %s5503_s28 = scalar_lea.hbm %s6495_s1, 3584 }
  0x53   : > { %p5504_p13 = scmp.ne.s32.totalorder %s6495_s1, %s5503_s28  ;;  %p5510_p4 = scmp.lt.u32.totalorder %s5503_s28, %s6495_s1 }
  0x55   : > { %p5506_p0 = pnand %p5504_p13, %p5796_p7 }
  0x57   : > { %p5507_p1 = pneg %p5506_p0 }
  0x59   : > { %p5512_p6 = pnand %p5510_p4, %p5507_p1 }
  0x5b   : > { %5515 = shalt.err (!%p5512_p6)
}
  0x5c   : > { %s5516_s17 = scalar_lea.vmem %s372_s24, 3584  ;;  %p5524_p11 = scmp.lt.s32.totalorder %s372_s24, %s372_s24 }
  0x5d   : > { %p5517_p8 = scmp.ne.s32.totalorder %s372_s24, %s5516_s17  ;;  %p5525_p12 = scmp.lt.s32.totalorder %s5516_s17, %s5516_s17 }
  0x5f   : > { %p5519_p9 = pnand %p5517_p8, %p5796_p7  ;;  %p5526_p2 = por %p5525_p12, %p5524_p11 }
  0x61   : > { %p5520_p10 = pneg %p5519_p9 }
  0x63   : > { %p5527_p3 = pnand %p5526_p2, %p5520_p10 }
  0x65   : > { %5530 = shalt.err (!%p5527_p3)
}
  0x66   : > { %5129 = dma.hbm_to_vmem [thread:$0]  (!%p5780_p5), %s6495_s1, 3584, %s372_s24, [#allocation3], %s5675_s26, %s5675_s26, %s5676_s27  }
  0x67   : > { %s5677_s14 = smov [#allocation6]   ;;  %s5678_s9 = smov [#allocation9]  }
  0x68   : > { %s407_s4 = sshll.u32 %s5677_s14, 4  ;;  %s435_s29 = sshll.u32 %s5678_s9, 4  ;;  %s408_s4 = int_to_ptr.vmem [resolvable:$true] %s407_s4  ;;  %s436_s29 = int_to_ptr.vmem [resolvable:$true] %s435_s29 }
  0x69   : > { %s5531_s21 = scalar_lea.hbm %s6500_s6, 16 }
  0x6a   : > { %p5532_p2 = scmp.ne.s32.totalorder %s6500_s6, %s5531_s21  ;;  %p5538_p0 = scmp.lt.u32.totalorder %s5531_s21, %s6500_s6 }
  0x6c   : > { %p5534_p3 = pnand %p5532_p2, %p5796_p7 }
  0x6e   : > { %p5535_p13 = pneg %p5534_p3 }
  0x70   : > { %p5540_p1 = pnand %p5538_p0, %p5535_p13 }
  0x72   : > { %5543 = shalt.err (!%p5540_p1)
}
  0x73   : > { %s5544_s24 = scalar_lea.vmem %s408_s4, 16  ;;  %s5551_s26 = scalar_lea.vmem %s408_s4, 32 }
  0x74   : > { %p5545_p4 = scmp.ne.s32.totalorder %s408_s4, %s5544_s24  ;;  %p5552_p9 = scmp.lt.s32.totalorder %s408_s4, %s408_s4 }
  0x75   : > { %p5553_p10 = scmp.lt.s32.totalorder %s5551_s26, %s5544_s24 }
  0x76   : > { %p5547_p6 = pnand %p5545_p4, %p5796_p7 }
  0x77   : > { %p5554_p11 = por %p5553_p10, %p5552_p9 }
  0x78   : > { %p5548_p8 = pneg %p5547_p6 }
  0x7a   : > { %p5555_p12 = pnand %p5554_p11, %p5548_p8 }
  0x7c   : > { %5558 = shalt.err (!%p5555_p12)
}
  0x7d   : > { %5135 = dma.hbm_to_vmem [thread:$0]  (!%p5780_p5), %s6500_s6, 16, %s408_s4, [#allocation5]  }
  0x7e   : > { %s5559_s28 = scalar_lea.hbm %s6504_s10, 32 }
  0x7f   : > { %p5560_p2 = scmp.ne.s32.totalorder %s6504_s10, %s5559_s28  ;;  %p5566_p0 = scmp.lt.u32.totalorder %s5559_s28, %s6504_s10 }
  0x81   : > { %p5562_p3 = pnand %p5560_p2, %p5796_p7 }
  0x83   : > { %p5563_p13 = pneg %p5562_p3 }
  0x85   : > { %p5568_p1 = pnand %p5566_p0, %p5563_p13 }
  0x87   : > { %5571 = shalt.err (!%p5568_p1)
}
  0x88   : > { %s5572_s17 = scalar_lea.vmem %s436_s29, 32  ;;  %p5580_p9 = scmp.lt.s32.totalorder %s436_s29, %s436_s29 }
  0x89   : > { %p5573_p4 = scmp.ne.s32.totalorder %s436_s29, %s5572_s17  ;;  %p5581_p10 = scmp.lt.s32.totalorder %s5572_s17, %s5572_s17 }
  0x8b   : > { %p5575_p6 = pnand %p5573_p4, %p5796_p7  ;;  %p5582_p11 = por %p5581_p10, %p5580_p9 }
  0x8d   : > { %p5576_p8 = pneg %p5575_p6 }
  0x8f   : > { %p5583_p12 = pnand %p5582_p11, %p5576_p8 }
  0x91   : > { %5586 = shalt.err (!%p5583_p12)
}
  0x92   : > { %5141 = dma.hbm_to_vmem [thread:$0]  (!%p5780_p5), %s6504_s10, 32, %s436_s29, [#allocation8]  }
  0x93   : > { %s5679_s24 = smov [#allocation12]   ;;  %s5680_s27 = smov [#allocation13]  }
  0x94   : > { %s459_s26 = sshll.u32 %s5679_s24, 4  ;;  %s470_s19 = sshll.u32 %s5680_s27, 4  ;;  %s460_s26 = int_to_ptr.vmem [resolvable:$true] %s459_s26  ;;  %s471_s19 = int_to_ptr.vmem [resolvable:$true] %s470_s19 }
  0x95   : > { %s5587_s28 = scalar_lea.hbm %s6506_s12, 16 }
  0x96   : > { %p5588_p2 = scmp.ne.s32.totalorder %s6506_s12, %s5587_s28  ;;  %p5594_p0 = scmp.lt.u32.totalorder %s5587_s28, %s6506_s12 }
  0x98   : > { %p5590_p3 = pnand %p5588_p2, %p5796_p7 }
  0x9a   : > { %p5591_p13 = pneg %p5590_p3 }
  0x9c   : > { %p5596_p1 = pnand %p5594_p0, %p5591_p13 }
  0x9e   : > { %5599 = shalt.err (!%p5596_p1)
}
  0x9f   : > { %s5600_s29 = scalar_lea.vmem %s460_s26, 16  ;;  %s5607_s17 = scalar_lea.vmem %s460_s26, 32 }
  0xa0   : > { %p5601_p4 = scmp.ne.s32.totalorder %s460_s26, %s5600_s29  ;;  %p5608_p9 = scmp.lt.s32.totalorder %s460_s26, %s460_s26 }
  0xa1   : > { %p5609_p10 = scmp.lt.s32.totalorder %s5607_s17, %s5600_s29 }
  0xa2   : > { %p5603_p6 = pnand %p5601_p4, %p5796_p7 }
  0xa3   : > { %p5610_p11 = por %p5609_p10, %p5608_p9 }
  0xa4   : > { %p5604_p8 = pneg %p5603_p6 }
  0xa6   : > { %p5611_p12 = pnand %p5610_p11, %p5604_p8 }
  0xa8   : > { %5614 = shalt.err (!%p5611_p12)
}
  0xa9   : > { %5147 = dma.hbm_to_vmem [thread:$0]  (!%p5780_p5), %s6506_s12, 16, %s460_s26, [#allocation11]  }
  0xaa   : > { %s5615_s14 = scalar_lea.hbm %s6507_s13, 16 }
  0xab   : > { %p5616_p2 = scmp.ne.s32.totalorder %s6507_s13, %s5615_s14  ;;  %p5622_p0 = scmp.lt.u32.totalorder %s5615_s14, %s6507_s13 }
  0xad   : > { %p5618_p3 = pnand %p5616_p2, %p5796_p7 }
  0xaf   : > { %p5619_p13 = pneg %p5618_p3 }
  0xb1   : > { %p5624_p1 = pnand %p5622_p0, %p5619_p13 }
  0xb3   : > { %5627 = shalt.err (!%p5624_p1)
}
  0xb4   : > { %s5628_s23 = scalar_lea.vmem %s471_s19, 16  ;;  %s5635_s26 = scalar_lea.vmem %s471_s19, 32 }
  0xb5   : > { %p5629_p4 = scmp.ne.s32.totalorder %s471_s19, %s5628_s23  ;;  %p5636_p9 = scmp.lt.s32.totalorder %s471_s19, %s471_s19 }
  0xb6   : > { %p5637_p10 = scmp.lt.s32.totalorder %s5635_s26, %s5628_s23 }
  0xb7   : > { %p5631_p6 = pnand %p5629_p4, %p5796_p7 }
  0xb8   : > { %p5638_p11 = por %p5637_p10, %p5636_p9 }
  0xb9   : > { %p5632_p8 = pneg %p5631_p6 }
  0xbb   : > { %p5639_p12 = pnand %p5638_p11, %p5632_p8 }
  0xbd   : > { %5642 = shalt.err (!%p5639_p12)
}
  0xbe   : > { %5150 = dma.hbm_to_vmem [thread:$0]  (!%p5780_p5), %s6507_s13, 16, %s471_s19, [#allocation14]  }
  0xbf   : > { %p6519_p2 = scmp.ne.s32.totalorder %s6516_s15, 0 }
  0xc0   : > { %p6520_p3 = scmp.eq.s32.totalorder (!%p6519_p2), %s5763_s30, 0 }
  0xc1   : > { %491 = sbr.rel (%p6519_p2) target bundleno = 2275 (0x8e3), region = 76 }
  0xc8   : > { %5648 = dma.done.wait (%p6520_p3), [#allocation3], 3584   ;;  %p6521_p7 = pmov %p6520_p3 }
  0xc9   : > { %p6522_p13 = pmov %p6520_p3 }
  0xca   : > { %5650 = vsyncadd (%p6521_p7), [#allocation3], 4294963712 }
  0xcb   : > { %5652 = dma.done.wait (%p6522_p13), [#allocation5], 5136   ;;  %p6523_p0 = pmov %p6520_p3 }
  0xcd   : > { %5654 = vsyncadd (%p6523_p0), [#allocation5], 4294962160  ;;  %p6524_p1 = pmov %p6523_p0 }
  0xce   : > { %p6525_p5 = pmov %p6523_p0 }
  0xcf   : > { %5656 = dma.done.wait (%p6524_p1), [#allocation8], 48  }
  0xd0   : > { %5658 = vsyncadd (%p6525_p5), [#allocation8], 4294967248  ;;  %p6526_p4 = pmov %p6523_p0 }
  0xd1   : > { %p6527_p6 = pmov %p6523_p0 }
  0xd2   : > { %5660 = dma.done.wait (%p6526_p4), [#allocation11], 6160  }
  0xd3   : > { %5662 = vsyncadd (%p6527_p6), [#allocation11], 4294961136  ;;  %p6528_p8 = pmov %p6523_p0 }
  0xd4   : > { %p6529_p9 = pmov %p6523_p0 }
  0xd5   : > { %5664 = dma.done.wait (%p6528_p8), [#allocation14], 16  }
  0xd6   : > { %5666 = vsyncadd (%p6529_p9), [#allocation14], 4294967280  ;;  %p563_p10 = scmp.lt.s32.totalorder %s5763_s30, 1  ;;  %v5187_v7 = vld [vmem:[#allocation2 + $0x20] sm:$0xff]   ;;  %v5188_v9 = vld [vmem:[#allocation2 + $0x28] sm:$0xff]   ;;  %vm642_vm1 = vcmask 1041408  }
  0xd7   : > { %4742 = vmatprep.subr.bf16.mxu0 %v5187_v7  ;;  %v5189_v12 = vld [vmem:[#allocation2 + $0x30] sm:$0xff]   ;;  %v5190_v14 = vld [vmem:[#allocation2 + $0x38] sm:$0xff]   ;;  %v5994_v16 = vld [vmem:[#allocation2] sm:$0xff]   ;;  %vm622_vm0 = vsmask.f32 1280  ;;  %vm708_vm4 = vcmask 523264  }
  0xd8   : > { %s6539_s30 = smov (!%p563_p10, %s5763_s30), 1  ;;  %4743 = vmatpush3.bf16.msra.mxu0 %v5187_v7  ;;  %v5215_v17 = vld [vmem:[#allocation4 + $0x40] sm:$0xff]   ;;  %v5216_v18 = vld [vmem:[#allocation4 + $0x48] sm:$0xff]   ;;  %v5217_v20 = vld [vmem:[#allocation4 + $0x50] sm:$0xff]   ;;  %vm663_vm3 = vsmask.f32 7424 }
  0xd9   : > { %s4498_s15 = sshll.u32 %s6539_s30, 5  ;;  %4744 = vmatprep.subr.bf16.mxu0 %v5188_v9  ;;  %4826 = vmatprep.subr.bf16.mxu1 %v5215_v17  ;;  %v5218_v23 = vld [vmem:[#allocation4 + $0x58] sm:$0xff]   ;;  %vm5998_vm2 = vmand %vm642_vm1, %vm622_vm0  ;;  %v5192_v56 = vld [vmem:[#allocation2 + $0x8] sm:$0xff]   ;;  %vm1258_vm5 = vcmask 1044480   ;;  %vm1154_vm6 = vsmask.f32 5376 }
  0xda   : > { %s567_s19 = scalar_lea.vmem %s6494_s0, %s4498_s15  ;;  %4827 = vmatpush3.bf16.msra.mxu1 %v5215_v17  ;;  %vm852_vm7 = vcmask 1046528   ;;  %vm950_vm8 = vsmask.f32 6400  ;;  %vm1056_vm9 = vcmask 1045504   ;;  %vm1351_vm10 = vcmask 1040384   ;;  %s6534_s15 = sld [smem:[#allocation21_spill]] }
  0xdb   : > { %v4500_v0 = vld [vmem:[%s567_s19] sm:$0xff]   ;;  %v4515_v3 = vld [vmem:[%s567_s19 + $0x8] sm:$0xff]   ;;  %v4516_v5 = vld [vmem:[%s567_s19 + $0x10] sm:$0xff]   ;;  %4828 = vmatprep.subr.bf16.mxu1 %v5216_v18  ;;  %vm1997_vm12 = vsmask.f32 256  ;;  %s6535_s26 = sld [smem:[#allocation22_spill]] }
  0xdc   : > { %v4501_v1 = vunpack.c.l.bf16 %v4500_v0  ;;  %v4502_v2 = vunpack.c.h.bf16 %v4500_v0  ;;  %v4505_v4 = vunpack.c.l.bf16 %v4515_v3  ;;  %v4506_v6 = vunpack.c.h.bf16 %v4515_v3  ;;  %v4517_v10 = vld [vmem:[%s567_s19 + $0x18] sm:$0xff]   ;;  %4745 = vmatpush3.bf16.msra.mxu0 %v5188_v9  ;;  %v5193_v3 = vld [vmem:[#allocation2 + $0x10] sm:$0xff]   ;;  %v5195_v9 = vld [vmem:[#allocation2 + $0x40] sm:$0xff]  }
  0xdd   : > { %v4509_v8 = vunpack.c.l.bf16 %v4516_v5  ;;  %v4510_v11 = vunpack.c.h.bf16 %v4516_v5  ;;  %v4513_v13 = vunpack.c.l.bf16 %v4517_v10  ;;  %4746 = vmatprep.subr.bf16.mxu0 %v5189_v12  ;;  %v4514_v15 = vunpack.c.h.bf16 %v4517_v10  ;;  %vm4243_vm11 = vmneg %vm1351_vm10 }
  0xde   : > { %588 = vxpose.xlu0.b32.start [1/8] (short) (narrow) %v4501_v1, 32  ;;  %4829 = vmatpush3.bf16.msra.mxu1 %v5216_v18  ;;  %v5199_v18 = vld [vmem:[#allocation2 + $0x60] sm:$0xff]   ;;  %vm6156_vm13 = vmand %vm1351_vm10, %vm1997_vm12 }
  0xdf   : > { %4830 = vmatprep.subr.bf16.mxu1 %v5217_v20 }
  0xe0   : > { %4747 = vmatpush3.bf16.msra.mxu0 %v5189_v12  ;;  %v5196_v12 = vld [vmem:[#allocation2 + $0x48] sm:$0xff]  }
  0xe1   : > { %4748 = vmatprep.subr.bf16.mxu0 %v5190_v14 }
  0xe2   : > { %589 = vxpose.xlu0.b32.cont [2/8] (short) (narrow) %v4502_v2, 32  ;;  %4831 = vmatpush3.bf16.msra.mxu1 %v5217_v20 }
  0xe3   : > { %4832 = vmatprep.subr.bf16.mxu1 %v5218_v23 }
  0xe4   : > { %4749 = vmatpush3.bf16.msra.mxu0 %v5190_v14  ;;  %v5197_v14 = vld [vmem:[#allocation2 + $0x50] sm:$0xff]  }
  0xe5   : > { %4754 = vmatprep.subr.bf16.mxu0 %v5994_v16 }
  0xe6   : > { %590 = vxpose.xlu0.b32.cont [3/8] (short) (narrow) %v4505_v4, 32  ;;  %4833 = vmatpush3.bf16.msra.mxu1 %v5218_v23 }
  0xea   : > { %591 = vxpose.xlu0.b32.cont [4/8] (short) (narrow) %v4506_v6, 32 }
  0xee   : > { %592 = vxpose.xlu0.b32.cont [5/8] (short) (narrow) %v4509_v8, 32  ;;  %v5194_v8 = vld [vmem:[#allocation2 + $0x18] sm:$0xff]  }
  0xf2   : > { %593 = vxpose.xlu0.b32.cont [6/8] (short) (narrow) %v4510_v11, 32 }
  0xf6   : > { %594 = vxpose.xlu0.b32.cont [7/8] (short) (narrow) %v4513_v13, 32 }
  0xfa   : > { %595 = vxpose.xlu0.b32.end [8/8] (short) (narrow) %v4514_v15, 32  ;;  %v5198_v15 = vld [vmem:[#allocation2 + $0x58] sm:$0xff]  }
 0x15e   : > { %v604_v19 = vpop.trf.xlu0 }
 0x162   : > { %v605_v21 = vpop.trf.xlu0 }
 0x163   : > { %v620_v22 = vpack.c.bf16 %v605_v21, %v604_v19 }
 0x165   : > { %v624_v24 = vshrl.u32 %v620_v22, 16  ;;  %v627_v25 = vshll.u32 %v620_v22, 16 }
 0x166   : > { %v606_v26 = vpop.trf.xlu0 }
 0x167   : > { %v626_v27 = vrot.slane %v624_v24, 6  ;;  %v629_v28 = vrot.slane %v627_v25, 7  ;;  %v5200_v24 = vld [vmem:[#allocation2 + $0x68] sm:$0xff]  }
 0x169   : > { %v630_v30 = vor.u32 %v629_v28, %v626_v27  ;;  %v5201_v27 = vld [vmem:[#allocation2 + $0x70] sm:$0xff]   ;;  %v5202_v28 = vld [vmem:[#allocation2 + $0x78] sm:$0xff]  }
 0x16a   : > { %v607_v31 = vpop.trf.xlu0 }
 0x16b   : > { %v6004_v32 = vsel %vm5998_vm2, 0, %v630_v30  ;;  %v621_v33 = vpack.c.bf16 %v607_v31, %v606_v26  ;;  %v5203_v31 = vld [vmem:[#allocation2 + $0x80] sm:$0xff]  }
 0x16c   : > { %v6007_v34 = vshrl.u32 %v6004_v32, 16  ;;  %v6010_v35 = vshll.u32 %v6004_v32, 16  ;;  %v1259_v63 = vrot.slane %v6004_v32, 3  ;;  %v853_v11 = vrot.slane %v6004_v32, 1 }
 0x16d   : > { %v632_v36 = vshrl.u32 %v621_v33, 16  ;;  %v635_v37 = vshll.u32 %v621_v33, 16 }
 0x16e   : > { %v1155_v38 = vrot.slane %v6007_v34, 2  ;;  %v1156_v41 = vrot.slane %v6010_v35, 3  ;;  %v669_v44 = vrot.slane %v6010_v35, 1  ;;  %v951_v19 = vrot.slane %v6007_v34, 1 }
 0x16f   : > { %v634_v39 = vrot.slane %v632_v36, 6  ;;  %v637_v40 = vrot.slane %v635_v37, 7  ;;  %v952_v20 = vrot.slane %v6010_v35, 2  ;;  %v1057_v35 = vrot.slane %v6004_v32, 2  ;;  %v5204_v36 = vld [vmem:[#allocation2 + $0x88] sm:$0xff]  }
 0x170   : > { %v1157_v43 = vor.u32 %v1156_v41, %v1155_v38  ;;  %v670_v51 = vor.u32 %v669_v44, %v6007_v34  ;;  %v5207_v41 = vld [vmem:[#allocation2 + $0xa0] sm:$0xff]   ;;  %v5209_v44 = vld [vmem:[#allocation2 + $0xb0] sm:$0xff]  }
 0x171   : > { %v638_v42 = vor.u32 %v637_v40, %v634_v39  ;;  %v953_v23 = vor.u32 %v952_v20, %v951_v19  ;;  %v5205_v39 = vld [vmem:[#allocation2 + $0x90] sm:$0xff]   ;;  %v5206_v40 = vld [vmem:[#allocation2 + $0x98] sm:$0xff]  }
 0x173   : > { %v6016_v45 = vsel %vm622_vm0, %v630_v30, %v638_v42  ;;  %v6020_v46 = vsel %vm5998_vm2, %v638_v42, 0  ;;  %v5208_v42 = vld [vmem:[#allocation2 + $0xa8] sm:$0xff]  }
 0x174   : > { %v6023_v47 = vshll.u32 %v6016_v45, 16  ;;  %v6026_v48 = vshll.u32 %v6020_v46, 16  ;;  %v676_v49 = vshrl.u32 %v6016_v45, 16  ;;  %v958_v50 = vshrl.u32 %v6020_v46, 16 }
 0x175   : > { %v1260_v0 = vrot.slane %v6016_v45, 3  ;;  %v1262_v1 = vrot.slane %v6020_v46, 3  ;;  %v854_v10 = vrot.slane %v6016_v45, 1  ;;  %v856_v21 = vrot.slane %v6020_v46, 1 }
 0x176   : > { %v674_v52 = vrot.slane %v6023_v47, 1  ;;  %v682_v55 = vrot.slane %v6026_v48, 1  ;;  %v1158_v57 = vrot.slane %v676_v49, 2  ;;  %v1159_v58 = vrot.slane %v6023_v47, 3 }
 0x177   : > { %v1162_v60 = vrot.slane %v958_v50, 2  ;;  %v1163_v61 = vrot.slane %v6026_v48, 3  ;;  %v6051_v5 = vsel %vm1258_vm5, %v1259_v63, %v1260_v0  ;;  %v6054_v6 = vsel %vm1258_vm5, %v1260_v0, %v1262_v1 }
 0x178   : > { %v675_v53 = vsel %vm663_vm3, %v670_v51, %v674_v52  ;;  %v678_v54 = vor.u32 %v676_v49, %v674_v52  ;;  %v1160_v62 = vor.u32 %v1159_v58, %v1158_v57  ;;  %v855_v13 = vsel %vm852_vm7, %v853_v11, %v854_v10  ;;  %v5220_v51 = vld [vmem:[#allocation4 + $0x68] sm:$0xff]   ;;  %v5221_v52 = vld [vmem:[#allocation4 + $0x70] sm:$0xff]  }
 0x179   : > { %4750 = vmatprep.mubr.msk.bf16.mxu0 %vm708_vm4, %v675_v53  ;;  %v1164_v2 = vor.u32 %v1163_v61, %v1162_v60  ;;  %v955_v17 = vrot.slane %v6023_v47, 2  ;;  %v857_v25 = vsel %vm852_vm7, %v854_v10, %v856_v21  ;;  %v960_v29 = vrot.slane %v958_v50, 1  ;;  %v5211_v47 = vld [vmem:[#allocation2 + $0xc0] sm:$0xff]   ;;  %v5222_v53 = vld [vmem:[#allocation4 + $0x78] sm:$0xff]  }
 0x17a   : > { %v683_v59 = vsel %vm663_vm3, %v678_v54, %v682_v55  ;;  %v6048_v4 = vsel %vm1154_vm6, %v1157_v43, %v1160_v62  ;;  %v961_v30 = vrot.slane %v6026_v48, 2  ;;  %v1058_v34 = vrot.slane %v6016_v45, 2  ;;  %v5213_v48 = vld [vmem:[#allocation2 + $0xd0] sm:$0xff]   ;;  %v5219_v50 = vld [vmem:[#allocation4 + $0x60] sm:$0xff]  }
 0x17b   : > { %4751 = vmatmul.mubr.msk.bf16.vlgmr.msra.gmra.mrb[0].mxu0 %vm708_vm4, %v683_v59  ;;  %v6057_v7 = vsel %vm1154_vm6, %v1160_v62, %v1164_v2  ;;  %4834 = vmatprep.subr.bf16.mxu1 %v5219_v50  ;;  %v5223_v54 = vld [vmem:[#allocation4] sm:$0xff]  }
 0x17c   : > { %4755 = vmatpush3.bf16.msra.mxu0 %v5994_v16  ;;  %4762 = vmatprep.mubr.msk.bf16.mxu0 %vm708_vm4, %v6004_v32  ;;  %v954_v16 = vrot.slane %v676_v49, 1  ;;  %v962_v33 = vor.u32 %v961_v30, %v960_v29  ;;  %v1059_v38 = vsel %vm1056_vm9, %v1057_v35, %v1058_v34  ;;  %v1060_v32 = vrot.slane %v6020_v46, 2  ;;  %v5212_v46 = vld [vmem:[#allocation2 + $0xc8] sm:$0xff]   ;;  %v5214_v49 = vld [vmem:[#allocation2 + $0xd8] sm:$0xff]  }
 0x17d   : > { %4756 = vmatprep.subr.bf16.mxu0 %v5192_v56  ;;  %4835 = vmatpush3.bf16.msra.mxu1 %v5219_v50  ;;  %v5235_v50 = vld [vmem:[#allocation4 + $0xa0] sm:$0xff]  }
 0x17e   : > { %v956_v22 = vor.u32 %v955_v17, %v954_v16  ;;  %v1061_v43 = vsel %vm1056_vm9, %v1058_v34, %v1060_v32  ;;  %4836 = vmatprep.subr.bf16.mxu1 %v5220_v51  ;;  %v5226_v32 = vld [vmem:[#allocation4 + $0x18] sm:$0xff]  }
 0x180   : > { %4757 = vmatpush3.bf16.msra.mxu0 %v5192_v56  ;;  %v957_v26 = vsel %vm950_vm8, %v953_v23, %v956_v22  ;;  %v963_v37 = vsel %vm950_vm8, %v956_v22, %v962_v33 }
 0x181   : > { %4758 = vmatprep.subr.bf16.mxu0 %v5193_v3  ;;  %4837 = vmatpush3.bf16.msra.mxu1 %v5220_v51  ;;  %v5236_v51 = vld [vmem:[#allocation4 + $0xa8] sm:$0xff]  }
 0x182   : > { %4838 = vmatprep.subr.bf16.mxu1 %v5221_v52 }
 0x184   : > { %4759 = vmatpush3.bf16.msra.mxu0 %v5193_v3 }
 0x185   : > { %4760 = vmatprep.subr.bf16.mxu0 %v5194_v8  ;;  %4839 = vmatpush3.bf16.msra.mxu1 %v5221_v52  ;;  %v5237_v52 = vld [vmem:[#allocation4 + $0xb0] sm:$0xff]  }
 0x186   : > { %4840 = vmatprep.subr.bf16.mxu1 %v5222_v53 }
 0x188   : > { %4761 = vmatpush3.bf16.msra.mxu0 %v5194_v8 }
 0x189   : > { %4766 = vmatprep.subr.bf16.mxu0 %v5195_v9  ;;  %4841 = vmatpush3.bf16.msra.mxu1 %v5222_v53  ;;  %v5238_v53 = vld [vmem:[#allocation4 + $0xb8] sm:$0xff]  }
 0x18a   : > { %4846 = vmatprep.subr.bf16.mxu1 %v5223_v54 }
 0x18b   : > { %4763 = vmatmul.mubr.msk.bf16.vlgmr.msra.gmra.mrb[0].mxu0 %vm708_vm4, %v6016_v45  ;;  %v5210_v45 = vld [vmem:[#allocation2 + $0xb8] sm:$0xff]  }
 0x18c   : > { %4767 = vmatpush3.bf16.msra.mxu0 %v5195_v9  ;;  %4774 = vmatprep.mubr.msk.bf16.mxu0 %vm708_vm4, %v855_v13 }
 0x18d   : > { %4768 = vmatprep.subr.bf16.mxu0 %v5196_v12 }
 0x190   : > { %4769 = vmatpush3.bf16.msra.mxu0 %v5196_v12 }
 0x191   : > { %4770 = vmatprep.subr.bf16.mxu0 %v5197_v14 }
 0x194   : > { %4771 = vmatpush3.bf16.msra.mxu0 %v5197_v14 }
 0x195   : > { %4772 = vmatprep.subr.bf16.mxu0 %v5198_v15 }
 0x198   : > { %4773 = vmatpush3.bf16.msra.mxu0 %v5198_v15 }
 0x199   : > { %4778 = vmatprep.subr.bf16.mxu0 %v5199_v18 }
 0x19b   : > { %4775 = vmatmul.mubr.msk.bf16.vlgmr.msra.gmra.mrb[0].mxu0 %vm708_vm4, %v857_v25 }
 0x19c   : > { %4779 = vmatpush3.bf16.msra.mxu0 %v5199_v18  ;;  %4786 = vmatprep.mubr.msk.bf16.mxu0 %vm708_vm4, %v957_v26 }
 0x19d   : > { %4780 = vmatprep.subr.bf16.mxu0 %v5200_v24 }
 0x1a0   : > { %4781 = vmatpush3.bf16.msra.mxu0 %v5200_v24 }
 0x1a1   : > { %4782 = vmatprep.subr.bf16.mxu0 %v5201_v27 }
 0x1a4   : > { %4783 = vmatpush3.bf16.msra.mxu0 %v5201_v27 }
 0x1a5   : > { %4784 = vmatprep.subr.bf16.mxu0 %v5202_v28 }
 0x1a8   : > { %4785 = vmatpush3.bf16.msra.mxu0 %v5202_v28 }
 0x1a9   : > { %4790 = vmatprep.subr.bf16.mxu0 %v5203_v31 }
 0x1ab   : > { %4787 = vmatmul.mubr.msk.bf16.vlgmr.msra.gmra.mrb[0].mxu0 %vm708_vm4, %v963_v37 }
 0x1ac   : > { %4791 = vmatpush3.bf16.msra.mxu0 %v5203_v31  ;;  %4798 = vmatprep.mubr.msk.bf16.mxu0 %vm708_vm4, %v1059_v38  ;;  %v5224_v31 = vld [vmem:[#allocation4 + $0x8] sm:$0xff]   ;;  %v5255_v38 = vld [vmem:[%s6497_s3 + $0x40] sm:$0xff]  }
 0x1ad   : > { %4792 = vmatprep.subr.bf16.mxu0 %v5204_v36 }
 0x1b0   : > { %4793 = vmatpush3.bf16.msra.mxu0 %v5204_v36 }
 0x1b1   : > { %4794 = vmatprep.subr.bf16.mxu0 %v5205_v39 }
 0x1b4   : > { %4795 = vmatpush3.bf16.msra.mxu0 %v5205_v39  ;;  %v5256_v39 = vld [vmem:[%s6497_s3 + $0x48] sm:$0xff]  }
 0x1b5   : > { %4796 = vmatprep.subr.bf16.mxu0 %v5206_v40 }
 0x1b8   : > { %4797 = vmatpush3.bf16.msra.mxu0 %v5206_v40  ;;  %v5225_v40 = vld [vmem:[#allocation4 + $0x10] sm:$0xff]  }
 0x1b9   : > { %4802 = vmatprep.subr.bf16.mxu0 %v5207_v41 }
 0x1bb   : > { %4799 = vmatmul.mubr.msk.bf16.vlgmr.msra.gmra.mrb[0].mxu0 %vm708_vm4, %v1061_v43  ;;  %v5228_v43 = vld [vmem:[#allocation4 + $0x28] sm:$0xff]  }
 0x1bc   : > { %4803 = vmatpush3.bf16.msra.mxu0 %v5207_v41  ;;  %4810 = vmatprep.mubr.msk.bf16.mxu0 %vm708_vm4, %v6048_v4  ;;  %v5257_v41 = vld [vmem:[%s6497_s3 + $0x50] sm:$0xff]  }
 0x1bd   : > { %4804 = vmatprep.subr.bf16.mxu0 %v5208_v42 }
 0x1c0   : > { %4805 = vmatpush3.bf16.msra.mxu0 %v5208_v42  ;;  %v5227_v42 = vld [vmem:[#allocation4 + $0x20] sm:$0xff]  }
 0x1c1   : > { %4806 = vmatprep.subr.bf16.mxu0 %v5209_v44 }
 0x1c4   : > { %4807 = vmatpush3.bf16.msra.mxu0 %v5209_v44  ;;  %v5229_v44 = vld [vmem:[#allocation4 + $0x30] sm:$0xff]  }
 0x1c5   : > { %4808 = vmatprep.subr.bf16.mxu0 %v5210_v45 }
 0x1c8   : > { %4809 = vmatpush3.bf16.msra.mxu0 %v5210_v45  ;;  %v5230_v45 = vld [vmem:[#allocation4 + $0x38] sm:$0xff]  }
 0x1c9   : > { %4814 = vmatprep.subr.bf16.mxu0 %v5211_v47 }
 0x1cb   : > { %4811 = vmatmul.mubr.msk.bf16.vlgmr.msra.gmra.mrb[0].mxu0 %vm708_vm4, %v6057_v7 }
 0x1cc   : > { %4815 = vmatpush3.bf16.msra.mxu0 %v5211_v47  ;;  %4822 = vmatprep.mubr.msk.bf16.mxu0 %vm708_vm4, %v6051_v5  ;;  %v5231_v47 = vld [vmem:[#allocation4 + $0x80] sm:$0xff]  }
 0x1cd   : > { %4816 = vmatprep.subr.bf16.mxu0 %v5212_v46 }
 0x1d0   : > { %4817 = vmatpush3.bf16.msra.mxu0 %v5212_v46  ;;  %v5232_v46 = vld [vmem:[#allocation4 + $0x88] sm:$0xff]  }
 0x1d1   : > { %4818 = vmatprep.subr.bf16.mxu0 %v5213_v48 }
 0x1d4   : > { %4819 = vmatpush3.bf16.msra.mxu0 %v5213_v48  ;;  %v5233_v48 = vld [vmem:[#allocation4 + $0x90] sm:$0xff]  }
 0x1d5   : > { %4820 = vmatprep.subr.bf16.mxu0 %v5214_v49 }
 0x1d8   : > { %4821 = vmatpush3.bf16.msra.mxu0 %v5214_v49  ;;  %v5234_v49 = vld [vmem:[#allocation4 + $0x98] sm:$0xff]  }
 0x1d9   : > { %4926 = vmatprep.subr.bf16.mxu0 %v5255_v38 }
 0x1db   : > { %4823 = vmatmul.mubr.msk.bf16.vlgmr.msra.gmra.mrb[0].mxu0 %vm708_vm4, %v6054_v6 }
 0x1dc   : > { %4927 = vmatpush3.bf16.msra.mxu0 %v5255_v38 }
 0x1dd   : > { %4928 = vmatprep.subr.bf16.mxu0 %v5256_v39 }
 0x1e0   : > { %4929 = vmatpush3.bf16.msra.mxu0 %v5256_v39 }
 0x1e1   : > { %4930 = vmatprep.subr.bf16.mxu0 %v5257_v41 }
 0x1e4   : > { %4931 = vmatpush3.bf16.msra.mxu0 %v5257_v41 }
 0x2ae   : > { %v4824_v55 = vpop.f32.mrb[0].mxu0 }
 0x2af   : > { %v1328_v56 = vpop.f32.mrb[1].mxu0 }
 0x2b0   : > { %v4825_v57 = vpop.f32.mrb[2].mxu0 }
 0x2b1   : > { %v1348_v58 = vpack.c.bf16 %v4825_v57, %v4824_v55  ;;  %v1331_v59 = vpop.f32.mrb[3].mxu0  ;;  %v5240_v55 = vld [vmem:[#allocation4 + $0xc8] sm:$0xff]   ;;  %v5242_v57 = vld [vmem:[#allocation4 + $0xd8] sm:$0xff]  }
 0x2b2   : > { %v1347_v60 = vpack.c.bf16 %v1331_v59, %v1328_v56  ;;  %v5241_v56 = vld [vmem:[#allocation4 + $0xd0] sm:$0xff]   ;;  %v5244_v59 = vld [vmem:[#allocation4 + $0xe8] sm:$0xff]  }
 0x2b3   : > { %v1353_v61 = vrot.slane %v1348_v58, 7  ;;  %v5243_v58 = vld [vmem:[#allocation4 + $0xe0] sm:$0xff]  }
 0x2b4   : > { %v1352_v62 = vrot.slane %v1347_v60, 7  ;;  %v5245_v60 = vld [vmem:[#allocation4 + $0xf0] sm:$0xff]  }
 0x2b5   : > { %v1362_v63 = vsel %vm1351_vm10, %v1353_v61, 0 }
 0x2b6   : > { %v1410_v0 = vshll.u32 %v1362_v63, 16  ;;  %v1761_v1 = vshrl.u32 %v1362_v63, 16  ;;  %v1632_v2 = vrot.slane %v1362_v63, 1  ;;  %v1890_v3 = vrot.slane %v1362_v63, 2  ;;  %v5248_v63 = vld [vmem:[#allocation4 + $0x108] sm:$0xff]  }
 0x2b7   : > { %v6095_v4 = vsel %vm1351_vm10, %v1352_v62, %v1353_v61  ;;  %v1359_v5 = vsel %vm1351_vm10, 0, %v1352_v62  ;;  %v5246_v61 = vld [vmem:[#allocation4 + $0xf8] sm:$0xff]  }
 0x2b8   : > { %v1763_v6 = vrot.slane %v1761_v1, 1  ;;  %v1764_v7 = vrot.slane %v1410_v0, 2  ;;  %v1396_v8 = vshrl.u32 %v1359_v5, 16  ;;  %v1398_v9 = vshll.u32 %v1359_v5, 16  ;;  %v5250_v1 = vld [vmem:[#allocation4 + $0x118] sm:$0xff]  }
 0x2b9   : > { %v1403_v10 = vshll.u32 %v6095_v4, 16  ;;  %v1407_v11 = vshrl.u32 %v6095_v4, 16  ;;  %v1412_v12 = vrot.slane %v1410_v0, 1  ;;  %v1629_v13 = vrot.slane %v1359_v5, 1  ;;  %v5249_v0 = vld [vmem:[#allocation4 + $0x110] sm:$0xff]  }
 0x2ba   : > { %v1400_v14 = vrot.slane %v1398_v9, 1  ;;  %v1630_v15 = vrot.slane %v6095_v4, 1  ;;  %v1754_v16 = vrot.slane %v1396_v8, 1  ;;  %v1755_v17 = vrot.slane %v1398_v9, 2  ;;  %v5261_v9 = vld [vmem:[%s6497_s3 + $0x70] sm:$0xff]  }
 0x2bb   : > { %v1405_v18 = vrot.slane %v1403_v10, 1  ;;  %v1757_v19 = vrot.slane %v1407_v11, 1  ;;  %v1758_v20 = vrot.slane %v1403_v10, 2  ;;  %v1765_v21 = vor.u32 %v1764_v7, %v1763_v6  ;;  %v5258_v6 = vld [vmem:[%s6497_s3 + $0x58] sm:$0xff]   ;;  %v5259_v7 = vld [vmem:[%s6497_s3 + $0x60] sm:$0xff]  }
 0x2bc   : > { %v1401_v22 = vor.u32 %v1400_v14, %v1396_v8  ;;  %v1631_v23 = vsel %vm852_vm7, %v1629_v13, %v1630_v15  ;;  %v6103_v24 = vsel %vm852_vm7, %v1630_v15, %v1632_v2  ;;  %v1756_v25 = vor.u32 %v1755_v17, %v1754_v16  ;;  %v5251_v2 = vld [vmem:[#allocation4 + $0x120] sm:$0xff]   ;;  %4932 = vmatprep.subr.bf16.mxu0 %v5258_v6  ;;  %v5260_v8 = vld [vmem:[%s6497_s3 + $0x68] sm:$0xff]   ;;  %v5262_v10 = vld [vmem:[%s6497_s3 + $0x78] sm:$0xff]  }
 0x2bd   : > { %v1409_v26 = vor.u32 %v1407_v11, %v1405_v18  ;;  %v1759_v27 = vor.u32 %v1758_v20, %v1757_v19  ;;  %v1887_v28 = vrot.slane %v1359_v5, 2  ;;  %v1888_v29 = vrot.slane %v6095_v4, 2  ;;  %v5254_v5 = vld [vmem:[#allocation4 + $0x138] sm:$0xff]   ;;  %4933 = vmatpush3.bf16.msra.mxu0 %v5258_v6  ;;  %v5263_v11 = vld [vmem:[%s6497_s3] sm:$0xff]  }
 0x2be   : > { %v1406_v30 = vsel %vm663_vm3, %v1401_v22, %v1405_v18  ;;  %4934 = vmatprep.subr.bf16.mxu0 %v5259_v7  ;;  %v5294_v6 = vld [vmem:[%s6502_s8 + $0x90] ss:$8 sps:$4 sm:$0xff]  }
 0x2bf   : > { %4842 = vmatprep.mubr.bf16.mxu1 %v1406_v30  ;;  %v1413_v33 = vsel %vm663_vm3, %v1409_v26, %v1412_v12  ;;  %v6110_v34 = vsel %vm950_vm8, %v1756_v25, %v1759_v27  ;;  %v6113_v35 = vsel %vm950_vm8, %v1759_v27, %v1765_v21  ;;  %v6116_v36 = vsel %vm1056_vm9, %v1887_v28, %v1888_v29 }
 0x2c0   : > { %4843 = vmatmul.mubr.bf16.vlgmr.msra.gmra.mrb[0].mxu1 %v1413_v33  ;;  %v6119_v37 = vsel %vm1056_vm9, %v1888_v29, %v1890_v3  ;;  %v5252_v3 = vld [vmem:[#allocation4 + $0x128] sm:$0xff]  }
 0x2c1   : > { %4847 = vmatpush3.bf16.msra.mxu1 %v5223_v54  ;;  %4862 = vmatprep.mubr.msk.bf16.mxu1 %vm4243_vm11, %v1352_v62  ;;  %v5239_v54 = vld [vmem:[#allocation4 + $0xc0] sm:$0xff]  }
 0x2c2   : > { %4848 = vmatprep.subr.bf16.mxu1 %v5224_v31  ;;  %v5247_v62 = vld [vmem:[#allocation4 + $0x100] sm:$0xff]   ;;  %4935 = vmatpush3.bf16.msra.mxu0 %v5259_v7 }
 0x2c3   : > { %4936 = vmatprep.subr.bf16.mxu0 %v5260_v8  ;;  %v4325_v7 = vld [vmem:[%s6534_s15] ss:$0 sm:$0xff]  ;;  %s6536_s15 = sld [smem:[#allocation23_spill]] }
 0x2c5   : > { %4849 = vmatpush3.bf16.msra.mxu1 %v5224_v31 }
 0x2c6   : > { %4850 = vmatprep.subr.bf16.mxu1 %v5225_v40  ;;  %4937 = vmatpush3.bf16.msra.mxu0 %v5260_v8 }
 0x2c7   : > { %4938 = vmatprep.subr.bf16.mxu0 %v5261_v9 }
 0x2c9   : > { %4851 = vmatpush3.bf16.msra.mxu1 %v5225_v40  ;;  %s570_s20 = scalar_lea.vmem %s6536_s15, %s6539_s30 }
 0x2ca   : > { %4852 = vmatprep.subr.bf16.mxu1 %v5226_v32  ;;  %4939 = vmatpush3.bf16.msra.mxu0 %v5261_v9 }
 0x2cb   : > { %4940 = vmatprep.subr.bf16.mxu0 %v5262_v10 }
 0x2cd   : > { %4853 = vmatpush3.bf16.msra.mxu1 %v5226_v32 }
 0x2ce   : > { %4854 = vmatprep.subr.bf16.mxu1 %v5227_v42  ;;  %4941 = vmatpush3.bf16.msra.mxu0 %v5262_v10 }
 0x2cf   : > { %4946 = vmatprep.subr.bf16.mxu0 %v5263_v11 }
 0x2d1   : > { %4855 = vmatpush3.bf16.msra.mxu1 %v5227_v42 }
 0x2d2   : > { %4856 = vmatprep.subr.bf16.mxu1 %v5228_v43 }
 0x2d5   : > { %4857 = vmatpush3.bf16.msra.mxu1 %v5228_v43 }
 0x2d6   : > { %4858 = vmatprep.subr.bf16.mxu1 %v5229_v44 }
 0x2d9   : > { %4859 = vmatpush3.bf16.msra.mxu1 %v5229_v44 }
 0x2da   : > { %4860 = vmatprep.subr.bf16.mxu1 %v5230_v45 }
 0x2dd   : > { %4861 = vmatpush3.bf16.msra.mxu1 %v5230_v45 }
 0x2de   : > { %4866 = vmatprep.subr.bf16.mxu1 %v5231_v47 }
 0x2e0   : > { %4863 = vmatmul.mubr.bf16.vlgmr.msra.gmra.mrb[0].mxu1 %v6095_v4  ;;  %v5253_v4 = vld [vmem:[#allocation4 + $0x130] sm:$0xff]  }
 0x2e1   : > { %4867 = vmatpush3.bf16.msra.mxu1 %v5231_v47  ;;  %4882 = vmatprep.mubr.bf16.mxu1 %v1631_v23 }
 0x2e2   : > { %4868 = vmatprep.subr.bf16.mxu1 %v5232_v46 }
 0x2e5   : > { %4869 = vmatpush3.bf16.msra.mxu1 %v5232_v46  ;;  %v5264_v46 = vld [vmem:[%s6497_s3 + $0x8] sm:$0xff]  }
 0x2e6   : > { %4870 = vmatprep.subr.bf16.mxu1 %v5233_v48 }
 0x2e9   : > { %4871 = vmatpush3.bf16.msra.mxu1 %v5233_v48  ;;  %v5265_v48 = vld [vmem:[%s6497_s3 + $0x10] sm:$0xff]  }
 0x2ea   : > { %4872 = vmatprep.subr.bf16.mxu1 %v5234_v49 }
 0x2ed   : > { %4873 = vmatpush3.bf16.msra.mxu1 %v5234_v49  ;;  %v5266_v49 = vld [vmem:[%s6497_s3 + $0x18] sm:$0xff]  }
 0x2ee   : > { %4874 = vmatprep.subr.bf16.mxu1 %v5235_v50 }
 0x2f1   : > { %4875 = vmatpush3.bf16.msra.mxu1 %v5235_v50  ;;  %v5267_v50 = vld [vmem:[%s6497_s3 + $0x20] sm:$0xff]  }
 0x2f2   : > { %4876 = vmatprep.subr.bf16.mxu1 %v5236_v51 }
 0x2f5   : > { %4877 = vmatpush3.bf16.msra.mxu1 %v5236_v51  ;;  %v5268_v51 = vld [vmem:[%s6497_s3 + $0x28] sm:$0xff]  }
 0x2f6   : > { %4878 = vmatprep.subr.bf16.mxu1 %v5237_v52 }
 0x2f9   : > { %4879 = vmatpush3.bf16.msra.mxu1 %v5237_v52  ;;  %v5269_v52 = vld [vmem:[%s6497_s3 + $0x30] sm:$0xff]  }
 0x2fa   : > { %4880 = vmatprep.subr.bf16.mxu1 %v5238_v53 }
 0x2fd   : > { %4881 = vmatpush3.bf16.msra.mxu1 %v5238_v53  ;;  %v5270_v53 = vld [vmem:[%s6497_s3 + $0x38] sm:$0xff]  }
 0x2fe   : > { %4886 = vmatprep.subr.bf16.mxu1 %v5239_v54 }
 0x300   : > { %4883 = vmatmul.mubr.bf16.vlgmr.msra.gmra.mrb[0].mxu1 %v6103_v24 }
 0x301   : > { %4887 = vmatpush3.bf16.msra.mxu1 %v5239_v54  ;;  %4902 = vmatprep.mubr.bf16.mxu1 %v6110_v34  ;;  %v5271_v54 = vld [vmem:[%s6497_s3 + $0x80] sm:$0xff]  }
 0x302   : > { %4888 = vmatprep.subr.bf16.mxu1 %v5240_v55 }
 0x305   : > { %4889 = vmatpush3.bf16.msra.mxu1 %v5240_v55  ;;  %v5272_v55 = vld [vmem:[%s6497_s3 + $0x88] sm:$0xff]  }
 0x306   : > { %4890 = vmatprep.subr.bf16.mxu1 %v5241_v56 }
 0x309   : > { %4891 = vmatpush3.bf16.msra.mxu1 %v5241_v56  ;;  %v5273_v56 = vld [vmem:[%s6497_s3 + $0x90] sm:$0xff]  }
 0x30a   : > { %4892 = vmatprep.subr.bf16.mxu1 %v5242_v57 }
 0x30d   : > { %4893 = vmatpush3.bf16.msra.mxu1 %v5242_v57  ;;  %v5274_v57 = vld [vmem:[%s6497_s3 + $0x98] sm:$0xff]  }
 0x30e   : > { %4894 = vmatprep.subr.bf16.mxu1 %v5243_v58 }
 0x311   : > { %4895 = vmatpush3.bf16.msra.mxu1 %v5243_v58  ;;  %v5275_v58 = vld [vmem:[%s6497_s3 + $0xa0] sm:$0xff]  }
 0x312   : > { %4896 = vmatprep.subr.bf16.mxu1 %v5244_v59 }
 0x315   : > { %4897 = vmatpush3.bf16.msra.mxu1 %v5244_v59  ;;  %v5276_v59 = vld [vmem:[%s6497_s3 + $0xa8] sm:$0xff]  }
 0x316   : > { %4898 = vmatprep.subr.bf16.mxu1 %v5245_v60 }
 0x319   : > { %4899 = vmatpush3.bf16.msra.mxu1 %v5245_v60  ;;  %v5277_v60 = vld [vmem:[%s6497_s3 + $0xb0] sm:$0xff]  }
 0x31a   : > { %4900 = vmatprep.subr.bf16.mxu1 %v5246_v61 }
 0x31d   : > { %4901 = vmatpush3.bf16.msra.mxu1 %v5246_v61  ;;  %v5278_v61 = vld [vmem:[%s6497_s3 + $0xb8] sm:$0xff]  }
 0x31e   : > { %4906 = vmatprep.subr.bf16.mxu1 %v5247_v62 }
 0x320   : > { %4903 = vmatmul.mubr.bf16.vlgmr.msra.gmra.mrb[0].mxu1 %v6113_v35 }
 0x321   : > { %4907 = vmatpush3.bf16.msra.mxu1 %v5247_v62  ;;  %4922 = vmatprep.mubr.bf16.mxu1 %v6116_v36  ;;  %v5279_v62 = vld [vmem:[%s6499_s5 + $0x20] sm:$0xff]  }
 0x322   : > { %4908 = vmatprep.subr.bf16.mxu1 %v5248_v63 }
 0x325   : > { %4909 = vmatpush3.bf16.msra.mxu1 %v5248_v63  ;;  %v5280_v63 = vld [vmem:[%s6499_s5 + $0x28] sm:$0xff]  }
 0x326   : > { %4910 = vmatprep.subr.bf16.mxu1 %v5249_v0 }
 0x329   : > { %4911 = vmatpush3.bf16.msra.mxu1 %v5249_v0  ;;  %v5281_v0 = vld [vmem:[%s6499_s5 + $0x30] sm:$0xff]  }
 0x32a   : > { %4912 = vmatprep.subr.bf16.mxu1 %v5250_v1 }
 0x32d   : > { %4913 = vmatpush3.bf16.msra.mxu1 %v5250_v1  ;;  %v5282_v1 = vld [vmem:[%s6499_s5 + $0x38] sm:$0xff]  }
 0x32e   : > { %4914 = vmatprep.subr.bf16.mxu1 %v5251_v2 }
 0x331   : > { %4915 = vmatpush3.bf16.msra.mxu1 %v5251_v2  ;;  %v5283_v2 = vld [vmem:[%s6499_s5] sm:$0xff]  }
 0x332   : > { %4916 = vmatprep.subr.bf16.mxu1 %v5252_v3 }
 0x335   : > { %4917 = vmatpush3.bf16.msra.mxu1 %v5252_v3  ;;  %v5291_v3 = vld [vmem:[%s6502_s8 + $0x80] ss:$8 sps:$4 sm:$0xff]  }
 0x336   : > { %4918 = vmatprep.subr.bf16.mxu1 %v5253_v4 }
 0x339   : > { %4919 = vmatpush3.bf16.msra.mxu1 %v5253_v4  ;;  %v5293_v4 = vld [vmem:[%s6502_s8 + $0x84] ss:$8 sps:$4 sm:$0xff]  }
 0x33a   : > { %4920 = vmatprep.subr.bf16.mxu1 %v5254_v5 }
 0x33d   : > { %4921 = vmatpush3.bf16.msra.mxu1 %v5254_v5  ;;  %v5296_v5 = vld [vmem:[%s6502_s8 + $0x94] ss:$8 sps:$4 sm:$0xff]  }
 0x33e   : > { %4986 = vmatprep.subr.bf16.mxu1 %v5279_v62 }
 0x340   : > { %4923 = vmatmul.mubr.bf16.vlgmr.msra.gmra.mrb[0].mxu1 %v6119_v37 }
 0x341   : > { %4987 = vmatpush3.bf16.msra.mxu1 %v5279_v62  ;;  %v5305_v62 = vld [vmem:[%s6502_s8 + $0xc4] ss:$8 sps:$4 sm:$0xff]  }
 0x342   : > { %4988 = vmatprep.subr.bf16.mxu1 %v5280_v63 }
 0x345   : > { %4989 = vmatpush3.bf16.msra.mxu1 %v5280_v63  ;;  %v5303_v63 = vld [vmem:[%s6502_s8 + $0xc0] ss:$8 sps:$4 sm:$0xff]  }
 0x346   : > { %4990 = vmatprep.subr.bf16.mxu1 %v5281_v0 }
 0x349   : > { %4991 = vmatpush3.bf16.msra.mxu1 %v5281_v0  ;;  %v5308_v0 = vld [vmem:[%s6502_s8 + $0xd4] ss:$8 sps:$4 sm:$0xff]  }
 0x34a   : > { %4992 = vmatprep.subr.bf16.mxu1 %v5282_v1 }
 0x34d   : > { %4993 = vmatpush3.bf16.msra.mxu1 %v5282_v1  ;;  %v5306_v1 = vld [vmem:[%s6502_s8 + $0xd0] ss:$8 sps:$4 sm:$0xff]  }
 0x34e   : > { %4998 = vmatprep.subr.bf16.mxu1 %v5283_v2 }
 0x413   : > { %v4924_v12 = vpop.f32.mrb[0].mxu1 }
 0x414   : > { %v1976_v13 = vpop.f32.mrb[1].mxu1 }
 0x415   : > { %v4925_v14 = vpop.f32.mrb[2].mxu1 }
 0x416   : > { %v1996_v15 = vpack.c.bf16 %v4925_v14, %v4924_v12  ;;  %v1979_v16 = vpop.f32.mrb[3].mxu1 }
 0x417   : > { %v1995_v17 = vpack.c.bf16 %v1979_v16, %v1976_v13 }
 0x418   : > { %v2006_v18 = vshrl.u32 %v1996_v15, 16  ;;  %v2009_v22 = vshll.u32 %v1996_v15, 16 }
 0x419   : > { %v1999_v20 = vshrl.u32 %v1995_v17, 16  ;;  %v2002_v24 = vshll.u32 %v1995_v17, 16 }
 0x41a   : > { %v2008_v21 = vrot.slane %v2006_v18, 7 }
 0x41b   : > { %v2001_v23 = vrot.slane %v1999_v20, 7 }
 0x41c   : > { %v2011_v25 = vor.u32 %v2009_v22, %v2008_v21  ;;  %v2018_v26 = vsel %vm6156_vm13, %v2008_v21, 0 }
 0x41d   : > { %v2004_v27 = vor.u32 %v2002_v24, %v2001_v23  ;;  %v2068_v29 = vshll.u32 %v2018_v26, 16  ;;  %v2290_v33 = vrot.slane %v2018_v26, 1 }
 0x41e   : > { %v2012_v28 = vsel %vm1997_vm12, %v2001_v23, %v2011_v25 }
 0x41f   : > { %v2017_v30 = vsel %vm6156_vm13, 0, %v2004_v27  ;;  %v2060_v31 = vshll.u32 %v2012_v28, 16  ;;  %v2288_v36 = vrot.slane %v2012_v28, 1  ;;  %v2064_v38 = vshrl.u32 %v2012_v28, 16 }
 0x420   : > { %v2055_v34 = vshll.u32 %v2017_v30, 16  ;;  %v2287_v35 = vrot.slane %v2017_v30, 1  ;;  %v2053_v39 = vshrl.u32 %v2017_v30, 16  ;;  %v2070_v42 = vrot.slane %v2068_v29, 1 }
 0x421   : > { %v2062_v37 = vrot.slane %v2060_v31, 1  ;;  %v2291_v32 = vsel %vm852_vm7, %v2288_v36, %v2290_v33 }
 0x422   : > { %v2057_v40 = vrot.slane %v2055_v34, 1  ;;  %v2289_v41 = vsel %vm852_vm7, %v2287_v35, %v2288_v36 }
 0x423   : > { %v2066_v43 = vor.u32 %v2064_v38, %v2062_v37 }
 0x424   : > { %v2058_v44 = vor.u32 %v2057_v40, %v2053_v39 }
 0x425   : > { %v2071_v45 = vsel %vm663_vm3, %v2066_v43, %v2070_v42 }
 0x426   : > { %v2063_v47 = vsel %vm663_vm3, %v2058_v44, %v2062_v37 }
 0x427   : > { %4942 = vmatprep.mubr.bf16.mxu0 %v2063_v47 }
 0x428   : > { %4943 = vmatmul.mubr.bf16.vlgmr.msra.gmra.mrb[4].mxu0 %v2071_v45 }
 0x429   : > { %4947 = vmatpush3.bf16.msra.mxu0 %v5263_v11  ;;  %4962 = vmatprep.mubr.bf16.mxu0 %v2017_v30 }
 0x42a   : > { %4948 = vmatprep.subr.bf16.mxu0 %v5264_v46 }
 0x42d   : > { %4949 = vmatpush3.bf16.msra.mxu0 %v5264_v46 }
 0x42e   : > { %4950 = vmatprep.subr.bf16.mxu0 %v5265_v48 }
 0x431   : > { %4951 = vmatpush3.bf16.msra.mxu0 %v5265_v48 }
 0x432   : > { %4952 = vmatprep.subr.bf16.mxu0 %v5266_v49 }
 0x435   : > { %4953 = vmatpush3.bf16.msra.mxu0 %v5266_v49 }
 0x436   : > { %4954 = vmatprep.subr.bf16.mxu0 %v5267_v50 }
 0x439   : > { %4955 = vmatpush3.bf16.msra.mxu0 %v5267_v50 }
 0x43a   : > { %4956 = vmatprep.subr.bf16.mxu0 %v5268_v51 }
 0x43d   : > { %4957 = vmatpush3.bf16.msra.mxu0 %v5268_v51  ;;  %v5284_v51 = vld [vmem:[%s6499_s5 + $0x8] sm:$0xff]  }
 0x43e   : > { %4958 = vmatprep.subr.bf16.mxu0 %v5269_v52 }
 0x441   : > { %4959 = vmatpush3.bf16.msra.mxu0 %v5269_v52  ;;  %v5285_v52 = vld [vmem:[%s6499_s5 + $0x10] sm:$0xff]  }
 0x442   : > { %4960 = vmatprep.subr.bf16.mxu0 %v5270_v53 }
 0x445   : > { %4961 = vmatpush3.bf16.msra.mxu0 %v5270_v53  ;;  %v5286_v53 = vld [vmem:[%s6499_s5 + $0x18] sm:$0xff]  }
 0x446   : > { %4966 = vmatprep.subr.bf16.mxu0 %v5271_v54 }
 0x448   : > { %4963 = vmatmul.mubr.bf16.vlgmr.msra.gmra.mrb[4].mxu0 %v2012_v28 }
 0x449   : > { %4967 = vmatpush3.bf16.msra.mxu0 %v5271_v54  ;;  %4982 = vmatprep.mubr.bf16.mxu0 %v2289_v41  ;;  %v5287_v54 = vld [vmem:[%s6499_s5 + $0x40] sm:$0xff]  }
 0x44a   : > { %4968 = vmatprep.subr.bf16.mxu0 %v5272_v55 }
 0x44d   : > { %4969 = vmatpush3.bf16.msra.mxu0 %v5272_v55  ;;  %v5288_v55 = vld [vmem:[%s6499_s5 + $0x48] sm:$0xff]  }
 0x44e   : > { %4970 = vmatprep.subr.bf16.mxu0 %v5273_v56 }
 0x451   : > { %4971 = vmatpush3.bf16.msra.mxu0 %v5273_v56  ;;  %v5289_v56 = vld [vmem:[%s6499_s5 + $0x50] sm:$0xff]  }
 0x452   : > { %4972 = vmatprep.subr.bf16.mxu0 %v5274_v57 }
 0x455   : > { %4973 = vmatpush3.bf16.msra.mxu0 %v5274_v57  ;;  %v5290_v57 = vld [vmem:[%s6499_s5 + $0x58] sm:$0xff]  }
 0x456   : > { %4974 = vmatprep.subr.bf16.mxu0 %v5275_v58 }
 0x459   : > { %4975 = vmatpush3.bf16.msra.mxu0 %v5275_v58  ;;  %v5299_v58 = vld [vmem:[%s6502_s8 + $0xa4] ss:$8 sps:$4 sm:$0xff]  }
 0x45a   : > { %4976 = vmatprep.subr.bf16.mxu0 %v5276_v59 }
 0x45d   : > { %4977 = vmatpush3.bf16.msra.mxu0 %v5276_v59  ;;  %v5297_v59 = vld [vmem:[%s6502_s8 + $0xa0] ss:$8 sps:$4 sm:$0xff]  }
 0x45e   : > { %4978 = vmatprep.subr.bf16.mxu0 %v5277_v60 }
 0x461   : > { %4979 = vmatpush3.bf16.msra.mxu0 %v5277_v60  ;;  %v5302_v60 = vld [vmem:[%s6502_s8 + $0xb4] ss:$8 sps:$4 sm:$0xff]  }
 0x462   : > { %4980 = vmatprep.subr.bf16.mxu0 %v5278_v61 }
 0x465   : > { %4981 = vmatpush3.bf16.msra.mxu0 %v5278_v61  ;;  %v5300_v61 = vld [vmem:[%s6502_s8 + $0xb0] ss:$8 sps:$4 sm:$0xff]  }
 0x466   : > { %2914 = vmatprep.subr.bf16.mxu0 %v5293_v4  ;;  %v5314_v4 = vld [vmem:[%s6502_s8 + $0xf4] ss:$8 sps:$4 sm:$0xff]  }
 0x468   : > { %4983 = vmatmul.mubr.bf16.vlgmr.msra.gmra.mrb[4].mxu0 %v2291_v32 }
 0x469   : > { %2915 = vmatpush1.bf16.msra.mxu0 %v5291_v3  ;;  %v5309_v3 = vld [vmem:[%s6502_s8 + $0xe0] ss:$8 sps:$4 sm:$0xff]  }
 0x46a   : > { %2916 = vmatprep.subr.bf16.mxu0 %v5296_v5  ;;  %v5681_v5 = vmov 0  }
 0x46b   : > { %2946 = vmatprep.mubr.bf16.mxu0 %v5681_v5 }
 0x46d   : > { %2917 = vmatpush1.bf16.msra.mxu0 %v5294_v6  ;;  %v5312_v6 = vld [vmem:[%s6502_s8 + $0xf0] ss:$8 sps:$4 sm:$0xff]  }
 0x46e   : > { %2918 = vmatprep.subr.bf16.mxu0 %v5299_v58  ;;  %v5315_v58 = vld [vmem:[%s6502_s8] ss:$8 sps:$4 sm:$0xff]  }
 0x471   : > { %2919 = vmatpush1.bf16.msra.mxu0 %v5297_v59 }
 0x472   : > { %2920 = vmatprep.subr.bf16.mxu0 %v5302_v60  ;;  %v5320_v60 = vld [vmem:[%s6502_s8 + $0x14] ss:$8 sps:$4 sm:$0xff]  }
 0x475   : > { %2921 = vmatpush1.bf16.msra.mxu0 %v5300_v61 }
 0x476   : > { %2922 = vmatprep.subr.bf16.mxu0 %v5305_v62 }
 0x479   : > { %2923 = vmatpush1.bf16.msra.mxu0 %v5303_v63  ;;  %v5318_v63 = vld [vmem:[%s6502_s8 + $0x10] ss:$8 sps:$4 sm:$0xff]  }
 0x47a   : > { %2924 = vmatprep.subr.bf16.mxu0 %v5308_v0  ;;  %v5323_v0 = vld [vmem:[%s6502_s8 + $0x24] ss:$8 sps:$4 sm:$0xff]  }
 0x47d   : > { %2925 = vmatpush1.bf16.msra.mxu0 %v5306_v1  ;;  %v5321_v1 = vld [vmem:[%s6502_s8 + $0x20] ss:$8 sps:$4 sm:$0xff]  }
 0x53b   : > { %v4984_v8 = vpop.f32.mrb[4].mxu0 }
 0x53c   : > { %v2404_v9 = vadd.f32 %v4984_v8, %v4325_v7  ;;  %v2376_v10 = vpop.f32.mrb[5].mxu0  ;;  %v4360_v8 = vld [vmem:[#allocation6] ss:$0 sm:$0xff] }
 0x53d   : > { %v2402_v11 = vadd.f32 %v4325_v7, %v2376_v10  ;;  %v4985_v12 = vpop.f32.mrb[6].mxu0  ;;  %v4361_v10 = vld [vmem:[#allocation7] ss:$0 sm:$0xff] }
 0x53e   : > { %v2405_v13 = vadd.f32 %v4985_v12, %v4325_v7  ;;  %v2379_v14 = vpop.f32.mrb[7].mxu0  ;;  %v2408_v16 = vmax.f32 %v2404_v9, 0.0 }
 0x53f   : > { %v2403_v15 = vadd.f32 %v4325_v7, %v2379_v14  ;;  %v2406_v18 = vmax.f32 %v2402_v11, 0.0  ;;  %v5317_v7 = vld [vmem:[%s6502_s8 + $0x4] ss:$8 sps:$4 sm:$0xff]  }
 0x540   : > { %v2409_v17 = vmax.f32 %v2405_v13, 0.0 }
 0x541   : > { %v2407_v20 = vmax.f32 %v2403_v15, 0.0 }
 0x542   : > { %v2411_v21 = vpack.c.bf16 %v2409_v17, %v2408_v16 }
 0x543   : > { %v2410_v22 = vpack.c.bf16 %v2407_v20, %v2406_v18 }
 0x544   : > { %v2420_v23 = vshrl.u32 %v2411_v21, 16  ;;  %v2423_v26 = vshll.u32 %v2411_v21, 16 }
 0x545   : > { %v2413_v24 = vshrl.u32 %v2410_v22, 16  ;;  %v2416_v28 = vshll.u32 %v2410_v22, 16 }
 0x546   : > { %v2422_v25 = vrot.slane %v2420_v23, 7 }
 0x547   : > { %v2415_v27 = vrot.slane %v2413_v24, 7 }
 0x548   : > { %v2425_v29 = vor.u32 %v2423_v26, %v2422_v25  ;;  %v2430_v30 = vsel %vm6156_vm13, %v2422_v25, 0 }
 0x549   : > { %v2418_v31 = vor.u32 %v2416_v28, %v2415_v27  ;;  %v2464_v34 = vshll.u32 %v2430_v30, 16  ;;  %v2638_v37 = vrot.slane %v2430_v30, 1 }
 0x54a   : > { %v2426_v33 = vsel %vm1997_vm12, %v2415_v27, %v2425_v29 }
 0x54b   : > { %v2429_v35 = vsel %vm6156_vm13, 0, %v2418_v31  ;;  %v2456_v36 = vshll.u32 %v2426_v33, 16  ;;  %v2636_v40 = vrot.slane %v2426_v33, 1  ;;  %v2460_v32 = vshrl.u32 %v2426_v33, 16 }
 0x54c   : > { %v2451_v38 = vshll.u32 %v2429_v35, 16  ;;  %v2635_v39 = vrot.slane %v2429_v35, 1  ;;  %v2449_v42 = vshrl.u32 %v2429_v35, 16  ;;  %v2466_v47 = vrot.slane %v2464_v34, 1 }
 0x54d   : > { %v2458_v41 = vrot.slane %v2456_v36, 1  ;;  %v2639_v45 = vsel %vm852_vm7, %v2636_v40, %v2638_v37 }
 0x54e   : > { %v2453_v43 = vrot.slane %v2451_v38, 1  ;;  %v2637_v44 = vsel %vm852_vm7, %v2635_v39, %v2636_v40 }
 0x54f   : > { %v2462_v46 = vor.u32 %v2460_v32, %v2458_v41 }
 0x550   : > { %v2454_v48 = vor.u32 %v2453_v43, %v2449_v42 }
 0x551   : > { %v2467_v49 = vsel %vm663_vm3, %v2462_v46, %v2466_v47 }
 0x552   : > { %v2459_v50 = vsel %vm663_vm3, %v2454_v48, %v2458_v41 }
 0x553   : > { %4994 = vmatprep.mubr.msk.bf16.mxu1 %vm708_vm4, %v2459_v50 }
 0x554   : > { %4995 = vmatmul.mubr.msk.bf16.vlgmr.msra.gmra.mrb[4].mxu1 %vm708_vm4, %v2467_v49 }
 0x555   : > { %4999 = vmatpush3.bf16.msra.mxu1 %v5283_v2  ;;  %5006 = vmatprep.mubr.msk.bf16.mxu1 %vm708_vm4, %v2429_v35  ;;  %v5311_v2 = vld [vmem:[%s6502_s8 + $0xe4] ss:$8 sps:$4 sm:$0xff]  }
 0x556   : > { %5000 = vmatprep.subr.bf16.mxu1 %v5284_v51  ;;  %2926 = vmatprep.subr.bf16.mxu0 %v5311_v2  ;;  %v5326_v2 = vld [vmem:[%s6502_s8 + $0x34] ss:$8 sps:$4 sm:$0xff]  }
 0x557   : > { %2927 = vmatpush1.bf16.msra.mxu0 %v5309_v3  ;;  %v5324_v3 = vld [vmem:[%s6502_s8 + $0x30] ss:$8 sps:$4 sm:$0xff]  }
 0x558   : > { %2928 = vmatprep.subr.bf16.mxu0 %v5314_v4  ;;  %v5329_v4 = vld [vmem:[%s6502_s8 + $0x44] ss:$8 sps:$4 sm:$0xff]  }
 0x559   : > { %5001 = vmatpush3.bf16.msra.mxu1 %v5284_v51 }
 0x55a   : > { %5002 = vmatprep.subr.bf16.mxu1 %v5285_v52 }
 0x55b   : > { %2929 = vmatpush1.bf16.msra.mxu0 %v5312_v6  ;;  %v5327_v6 = vld [vmem:[%s6502_s8 + $0x40] ss:$8 sps:$4 sm:$0xff]  }
 0x55c   : > { %3047 = vmatprep.subr.bf16.mxu0 %v5317_v7  ;;  %v5332_v7 = vld [vmem:[%s6502_s8 + $0x54] ss:$8 sps:$4 sm:$0xff]  }
 0x55d   : > { %5003 = vmatpush3.bf16.msra.mxu1 %v5285_v52 }
 0x55e   : > { %5004 = vmatprep.subr.bf16.mxu1 %v5286_v53 }
 0x561   : > { %5005 = vmatpush3.bf16.msra.mxu1 %v5286_v53 }
 0x562   : > { %5010 = vmatprep.subr.bf16.mxu1 %v5287_v54 }
 0x564   : > { %5007 = vmatmul.mubr.msk.bf16.vlgmr.msra.gmra.mrb[4].mxu1 %vm708_vm4, %v2426_v33 }
 0x565   : > { %5011 = vmatpush3.bf16.msra.mxu1 %v5287_v54  ;;  %5018 = vmatprep.mubr.msk.bf16.mxu1 %vm708_vm4, %v2637_v44 }
 0x566   : > { %5012 = vmatprep.subr.bf16.mxu1 %v5288_v55 }
 0x569   : > { %5013 = vmatpush3.bf16.msra.mxu1 %v5288_v55 }
 0x56a   : > { %5014 = vmatprep.subr.bf16.mxu1 %v5289_v56 }
 0x56d   : > { %5015 = vmatpush3.bf16.msra.mxu1 %v5289_v56 }
 0x56e   : > { %5016 = vmatprep.subr.bf16.mxu1 %v5290_v57 }
 0x571   : > { %5017 = vmatpush3.bf16.msra.mxu1 %v5290_v57 }
 0x574   : > { %5019 = vmatmul.mubr.msk.bf16.vlgmr.msra.gmra.mrb[4].mxu1 %vm708_vm4, %v2639_v45 }
 0x647   : > { %v5020_v9 = vpop.f32.mrb[4].mxu1 }
 0x648   : > { %v2732_v11 = vmul.f32 %v5020_v9, %v4360_v8  ;;  %v2704_v12 = vpop.f32.mrb[5].mxu1  ;;  %v5335_v9 = vld [vmem:[%s6502_s8 + $0x64] ss:$8 sps:$4 sm:$0xff]  }
 0x649   : > { %v2730_v13 = vmul.f32 %v4360_v8, %v2704_v12  ;;  %v5021_v14 = vpop.f32.mrb[6].mxu1  ;;  %v5336_v12 = vld [vmem:[%s6502_s8 + $0x70] ss:$8 sps:$4 sm:$0xff]  }
 0x64a   : > { %v2743_v15 = vadd.f32 %v4361_v10, %v2732_v11  ;;  %v2733_v16 = vmul.f32 %v5021_v14, %v4360_v8  ;;  %v2707_v17 = vpop.f32.mrb[7].mxu1  ;;  %v5338_v11 = vld [vmem:[%s6502_s8 + $0x74] ss:$8 sps:$4 sm:$0xff]   ;;  %v5339_v14 = vld [vmem:[%s6502_s8 + $0x100] ss:$8 sps:$4 sm:$0xff]  }
 0x64b   : > { %v2741_v18 = vadd.f32 %v4361_v10, %v2730_v13  ;;  %v2731_v20 = vmul.f32 %v4360_v8, %v2707_v17  ;;  %v5330_v8 = vld [vmem:[%s6502_s8 + $0x50] ss:$8 sps:$4 sm:$0xff]   ;;  %v5341_v13 = vld [vmem:[%s6502_s8 + $0x104] ss:$8 sps:$4 sm:$0xff]  }
 0x64c   : > { %v2751_v21 = vmul.f32 0.2, %v2743_v15  ;;  %v2744_v22 = vadd.f32 %v4361_v10, %v2733_v16  ;;  %vm2747_vm14 = vcmp.gt.f32.partialorder %v2743_v15, 0.0  ;;  %v5342_v16 = vld [vmem:[%s6502_s8 + $0x110] ss:$8 sps:$4 sm:$0xff]  }
 0x64d   : > { %v2749_v23 = vmul.f32 0.2, %v2741_v18  ;;  %v2742_v24 = vadd.f32 %v4361_v10, %v2731_v20  ;;  %vm2745_vm15 = vcmp.gt.f32.partialorder %v2741_v18, 0.0  ;;  %v5333_v10 = vld [vmem:[%s6502_s8 + $0x60] ss:$8 sps:$4 sm:$0xff]  }
 0x64e   : > { %vm2748_vm0 = vcmp.gt.f32.partialorder %v2744_v22, 0.0  ;;  %v2752_v25 = vmul.f32 0.2, %v2744_v22  ;;  %v2755_v27 = vsel %vm2747_vm14, %v2743_v15, %v2751_v21  ;;  %v5344_v15 = vld [vmem:[%s6502_s8 + $0x114] ss:$8 sps:$4 sm:$0xff]  }
 0x64f   : > { %vm2746_vm1 = vcmp.gt.f32.partialorder %v2742_v24, 0.0  ;;  %v2750_v26 = vmul.f32 0.2, %v2742_v24  ;;  %v2753_v29 = vsel %vm2745_vm15, %v2741_v18, %v2749_v23  ;;  %v5347_v17 = vld [vmem:[%s6502_s8 + $0x124] ss:$8 sps:$4 sm:$0xff]  }
 0x650   : > { %v2756_v28 = vsel %vm2748_vm0, %v2744_v22, %v2752_v25  ;;  %v5345_v18 = vld [vmem:[%s6502_s8 + $0x120] ss:$8 sps:$4 sm:$0xff]   ;;  %v5350_v20 = vld [vmem:[%s6502_s8 + $0x134] ss:$8 sps:$4 sm:$0xff]   ;;  %v5348_v21 = vld [vmem:[%s6502_s8 + $0x130] ss:$8 sps:$4 sm:$0xff]  }
 0x651   : > { %v2758_v30 = vpack.c.bf16 %v2756_v28, %v2755_v27  ;;  %v2754_v31 = vsel %vm2746_vm1, %v2742_v24, %v2750_v26  ;;  %v5353_v22 = vld [vmem:[%s6502_s8 + $0x144] ss:$8 sps:$4 sm:$0xff]   ;;  %v5351_v23 = vld [vmem:[%s6502_s8 + $0x140] ss:$8 sps:$4 sm:$0xff]   ;;  %v5356_v24 = vld [vmem:[%s6502_s8 + $0x154] ss:$8 sps:$4 sm:$0xff]  }
 0x652   : > { %v2757_v33 = vpack.c.bf16 %v2754_v31, %v2753_v29  ;;  %v5354_v25 = vld [vmem:[%s6502_s8 + $0x150] ss:$8 sps:$4 sm:$0xff]   ;;  %v5359_v26 = vld [vmem:[%s6502_s8 + $0x164] ss:$8 sps:$4 sm:$0xff]   ;;  %v5357_v27 = vld [vmem:[%s6502_s8 + $0x160] ss:$8 sps:$4 sm:$0xff]  }
 0x653   : > { %v2767_v34 = vshrl.u32 %v2758_v30, 16  ;;  %v2770_v37 = vshll.u32 %v2758_v30, 16  ;;  %v5362_v28 = vld [vmem:[%s6502_s8 + $0x174] ss:$8 sps:$4 sm:$0xff]   ;;  %v5360_v29 = vld [vmem:[%s6502_s8 + $0x170] ss:$8 sps:$4 sm:$0xff]  }
 0x654   : > { %v2760_v35 = vshrl.u32 %v2757_v33, 16  ;;  %v2763_v39 = vshll.u32 %v2757_v33, 16  ;;  %v5363_v30 = vld [vmem:[#allocation10 + $0xc0] sm:$0xff]   ;;  %v5365_v33 = vld [vmem:[#allocation10 + $0xc8] sm:$0xff]  }
 0x655   : > { %v2769_v36 = vrot.slane %v2767_v34, 7  ;;  %v5364_v31 = vld [vmem:[#allocation10 + $0x80] sm:$0xff]   ;;  %4658 = vmatprep.subr.bf16.mxu1 %v5363_v30  ;;  %v5366_v34 = vld [vmem:[#allocation10 + $0x88] sm:$0xff]  }
 0x656   : > { %v2762_v38 = vrot.slane %v2760_v35, 7  ;;  %4659 = vmatpush3.bf16.msra.mxu1 %v5364_v31  ;;  %v5367_v35 = vld [vmem:[#allocation10 + $0xd0] sm:$0xff]  }
 0x657   : > { %v2772_v40 = vor.u32 %v2770_v37, %v2769_v36  ;;  %v2778_v41 = vsel %vm6156_vm13, %v2769_v36, 0  ;;  %4660 = vmatprep.subr.bf16.mxu1 %v5365_v33  ;;  %v5368_v36 = vld [vmem:[#allocation10 + $0x90] sm:$0xff]   ;;  %v5369_v37 = vld [vmem:[#allocation10 + $0xd8] sm:$0xff]  }
 0x658   : > { %v2765_v32 = vor.u32 %v2763_v39, %v2762_v38  ;;  %v2828_v45 = vshll.u32 %v2778_v41, 16  ;;  %v3122_v49 = vrot.slane %v2778_v41, 1  ;;  %v5371_v39 = vld [vmem:[#allocation10 + $0xe0] sm:$0xff]   ;;  %v5374_v41 = vld [vmem:[#allocation10 + $0xa8] sm:$0xff]  }
 0x659   : > { %v6323_v42 = vsel %vm1997_vm12, %v2762_v38, %v2772_v40  ;;  %v5370_v38 = vld [vmem:[#allocation10 + $0x98] sm:$0xff]   ;;  %v5373_v40 = vld [vmem:[#allocation10 + $0xe8] sm:$0xff]  }
 0x65a   : > { %v2777_v43 = vsel %vm6156_vm13, 0, %v2765_v32  ;;  %v2820_v44 = vshll.u32 %v6323_v42, 16  ;;  %v3120_v48 = vrot.slane %v6323_v42, 1  ;;  %v2824_v51 = vshrl.u32 %v6323_v42, 16  ;;  %4661 = vmatpush3.bf16.msra.mxu1 %v5366_v34  ;;  %v5375_v32 = vld [vmem:[#allocation10 + $0xf0] sm:$0xff]  }
 0x65b   : > { %v2815_v47 = vshll.u32 %v2777_v43, 16  ;;  %v3119_v46 = vrot.slane %v2777_v43, 1  ;;  %v2813_v52 = vshrl.u32 %v2777_v43, 16  ;;  %v2830_v57 = vrot.slane %v2828_v45, 1  ;;  %4662 = vmatprep.subr.bf16.mxu1 %v5367_v35  ;;  %v5379_v45 = vld [vmem:[#allocation10 + $0x40] sm:$0xff]  }
 0x65c   : > { %v2822_v50 = vrot.slane %v2820_v44, 1  ;;  %v6334_v55 = vsel %vm852_vm7, %v3120_v48, %v3122_v49  ;;  %v5378_v44 = vld [vmem:[#allocation10 + $0xb8] sm:$0xff]  }
 0x65d   : > { %v2817_v53 = vrot.slane %v2815_v47, 1  ;;  %v6331_v54 = vsel %vm852_vm7, %v3119_v46, %v3120_v48  ;;  %v3269_v47 = vlaneseq  ;;  %v3267_v49 = vld [vmem:[%s6535_s26] sm:$0x3] }
 0x65e   : > { %v2826_v56 = vor.u32 %v2824_v51, %v2822_v50  ;;  %4663 = vmatpush3.bf16.msra.mxu1 %v5368_v36  ;;  %v3287_v51 = vld [vmem:[#allocation9] sm:$0x3] }
 0x65f   : > { %v2818_v59 = vor.u32 %v2817_v53, %v2813_v52  ;;  %4664 = vmatprep.subr.bf16.mxu1 %v5369_v37  ;;  %v3270_v46 = vshrl.u32 %v3269_v47, 7 }
 0x660   : > { %v2831_v61 = vsel %vm663_vm3, %v2826_v56, %v2830_v57 }
 0x661   : > { %v2823_v62 = vsel %vm663_vm3, %v2818_v59, %v2822_v50  ;;  %v3271_v48 = vsub.s32 0, %v3270_v46  ;;  %v3275_v50 = vsub.s32 1, %v3270_v46 }
 0x662   : > { %2947 = vmatmul.mubr.bf16.vlgmr.msra.gmra.mrb[8].mxu0 %v2823_v62  ;;  %4665 = vmatpush3.bf16.msra.mxu1 %v5370_v38 }
 0x663   : > { %3048 = vmatpush1.bf16.msra.mxu0 %v5315_v58  ;;  %2956 = vmatprep.mubr.bf16.mxu0 %v5681_v5  ;;  %v3272_v52 = vrot.slane %v3267_v49, %v3271_v48  ;;  %v3276_v53 = vrot.slane %v3267_v49, %v3275_v50  ;;  %v3296_v56 = vrot.slane %v3287_v51, %v3275_v50 }
 0x664   : > { %3049 = vmatprep.subr.bf16.mxu0 %v5320_v60  ;;  %4666 = vmatprep.subr.bf16.mxu1 %v5371_v39 }
 0x667   : > { %3050 = vmatpush1.bf16.msra.mxu0 %v5318_v63 }
 0x668   : > { %3051 = vmatprep.subr.bf16.mxu0 %v5323_v0 }
 0x66a   : > { %2957 = vmatmul.mubr.bf16.gmra.mrb[12].mxu0 %v2831_v61 }
 0x66b   : > { %3052 = vmatpush1.bf16.msra.mxu0 %v5321_v1  ;;  %3079 = vmatprep.mubr.bf16.mxu0 %v5681_v5 }
 0x66c   : > { %3053 = vmatprep.subr.bf16.mxu0 %v5326_v2 }
 0x66f   : > { %3054 = vmatpush1.bf16.msra.mxu0 %v5324_v3 }
 0x670   : > { %3055 = vmatprep.subr.bf16.mxu0 %v5329_v4 }
 0x673   : > { %3056 = vmatpush1.bf16.msra.mxu0 %v5327_v6 }
 0x674   : > { %3057 = vmatprep.subr.bf16.mxu0 %v5332_v7 }
 0x677   : > { %3058 = vmatpush1.bf16.msra.mxu0 %v5330_v8 }
 0x678   : > { %3059 = vmatprep.subr.bf16.mxu0 %v5335_v9 }
 0x67b   : > { %3060 = vmatpush1.bf16.msra.mxu0 %v5333_v10 }
 0x67c   : > { %3061 = vmatprep.subr.bf16.mxu0 %v5338_v11 }
 0x67f   : > { %3062 = vmatpush1.bf16.msra.mxu0 %v5336_v12 }
 0x680   : > { %3206 = vmatprep.subr.bf16.mxu0 %v5341_v13 }
 0x682   : > { %3080 = vmatmul.mubr.bf16.vlgmr.msra.gmra.mrb[8].mxu0 %v2777_v43  ;;  %v5377_v43 = vld [vmem:[#allocation10 + $0xf8] sm:$0xff]  }
 0x683   : > { %3207 = vmatpush1.bf16.msra.mxu0 %v5339_v14  ;;  %3089 = vmatprep.mubr.bf16.mxu0 %v5681_v5 }
 0x684   : > { %3208 = vmatprep.subr.bf16.mxu0 %v5344_v15 }
 0x687   : > { %3209 = vmatpush1.bf16.msra.mxu0 %v5342_v16 }
 0x688   : > { %3210 = vmatprep.subr.bf16.mxu0 %v5347_v17 }
 0x68a   : > { %3090 = vmatmul.mubr.bf16.gmra.mrb[12].mxu0 %v6323_v42  ;;  %v5376_v42 = vld [vmem:[#allocation10 + $0xb0] sm:$0xff]  }
 0x68b   : > { %3211 = vmatpush1.bf16.msra.mxu0 %v5345_v18  ;;  %3238 = vmatprep.mubr.bf16.mxu0 %v5681_v5 }
 0x68c   : > { %3212 = vmatprep.subr.bf16.mxu0 %v5350_v20 }
 0x68f   : > { %3213 = vmatpush1.bf16.msra.mxu0 %v5348_v21 }
 0x690   : > { %3214 = vmatprep.subr.bf16.mxu0 %v5353_v22 }
 0x693   : > { %3215 = vmatpush1.bf16.msra.mxu0 %v5351_v23 }
 0x694   : > { %3216 = vmatprep.subr.bf16.mxu0 %v5356_v24 }
 0x697   : > { %3217 = vmatpush1.bf16.msra.mxu0 %v5354_v25 }
 0x698   : > { %3218 = vmatprep.subr.bf16.mxu0 %v5359_v26 }
 0x69b   : > { %3219 = vmatpush1.bf16.msra.mxu0 %v5357_v27 }
 0x69c   : > { %3220 = vmatprep.subr.bf16.mxu0 %v5362_v28 }
 0x69f   : > { %3221 = vmatpush1.bf16.msra.mxu0 %v5360_v29 }
 0x6a2   : > { %3239 = vmatmul.mubr.bf16.vlgmr.msra.gmra.mrb[8].mxu0 %v6331_v54  ;;  %v3292_v54 = vrot.slane %v3287_v51, %v3271_v48 }
 0x6a3   : > { %3248 = vmatprep.mubr.bf16.mxu0 %v5681_v5  ;;  %v5372_v5 = vld [vmem:[#allocation10 + $0xa0] sm:$0xff]  }
 0x6a4   : > { %4667 = vmatpush3.bf16.msra.mxu1 %v5372_v5 }
 0x6a5   : > { %4668 = vmatprep.subr.bf16.mxu1 %v5373_v40 }
 0x6a8   : > { %4669 = vmatpush3.bf16.msra.mxu1 %v5374_v41 }
 0x6a9   : > { %4670 = vmatprep.subr.bf16.mxu1 %v5375_v32 }
 0x6aa   : > { %3249 = vmatmul.mubr.bf16.gmra.mrb[12].mxu0 %v6334_v55 }
 0x6ac   : > { %4671 = vmatpush3.bf16.msra.mxu1 %v5376_v42 }
 0x6ad   : > { %4672 = vmatprep.subr.bf16.mxu1 %v5377_v43 }
 0x6b0   : > { %4673 = vmatpush3.bf16.msra.mxu1 %v5378_v44 }
 0x6b1   : > { %4686 = vmatprep.subr.bf16.mxu1 %v5379_v45 }
 0x775   : > { %v3240_v55 = vpop.f32.mrb[8].mxu0 }
 0x776   : > { %v3279_v57 = vmul.f32 %v3272_v52, %v3240_v55  ;;  %v3242_v58 = vpop.f32.mrb[9].mxu0 }
 0x777   : > { %v3280_v59 = vmul.f32 %v3276_v53, %v3242_v58  ;;  %v3244_v60 = vpop.f32.mrb[10].mxu0 }
 0x778   : > { %v3299_v61 = vadd.f32 %v3292_v54, %v3279_v57  ;;  %v3281_v62 = vmul.f32 %v3272_v52, %v3244_v60  ;;  %v3246_v63 = vpop.f32.mrb[11].mxu0 }
 0x779   : > { %v3300_v0 = vadd.f32 %v3296_v56, %v3280_v59  ;;  %v3282_v1 = vmul.f32 %v3276_v53, %v3246_v63 }
 0x77a   : > { %v3315_v2 = vmul.f32 0.25, %v3299_v61  ;;  %v3301_v3 = vadd.f32 %v3292_v54, %v3281_v62  ;;  %vm3307_vm2 = vcmp.gt.f32.partialorder %v3299_v61, 0.0 }
 0x77b   : > { %v3316_v4 = vmul.f32 0.25, %v3300_v0  ;;  %v3302_v6 = vadd.f32 %v3296_v56, %v3282_v1  ;;  %vm3308_vm4 = vcmp.gt.f32.partialorder %v3300_v0, 0.0 }
 0x77c   : > { %vm3309_vm5 = vcmp.gt.f32.partialorder %v3301_v3, 0.0  ;;  %v3317_v7 = vmul.f32 0.25, %v3301_v3  ;;  %v3323_v10 = vsel %vm3307_vm2, %v3299_v61, %v3315_v2 }
 0x77d   : > { %vm3310_vm6 = vcmp.gt.f32.partialorder %v3302_v6, 0.0  ;;  %v3318_v8 = vmul.f32 0.25, %v3302_v6  ;;  %v3250_v9 = vpop.f32.mrb[12].mxu0  ;;  %v3324_v14 = vsel %vm3308_vm4, %v3300_v0, %v3316_v4 }
 0x77e   : > { %v3325_v11 = vsel %vm3309_vm5, %v3301_v3, %v3317_v7  ;;  %v3283_v12 = vmul.f32 %v3272_v52, %v3250_v9  ;;  %v3252_v13 = vpop.f32.mrb[13].mxu0 }
 0x77f   : > { %v3331_v15 = vpack.c.bf16 %v3325_v11, %v3323_v10  ;;  %v3326_v16 = vsel %vm3310_vm6, %v3302_v6, %v3318_v8  ;;  %v3284_v17 = vmul.f32 %v3276_v53, %v3252_v13  ;;  %v3254_v18 = vpop.f32.mrb[14].mxu0 }
 0x780   : > { %v3332_v20 = vpack.c.bf16 %v3326_v16, %v3324_v14  ;;  %v3303_v21 = vadd.f32 %v3292_v54, %v3283_v12  ;;  %v3285_v22 = vmul.f32 %v3272_v52, %v3254_v18  ;;  %v3256_v23 = vpop.f32.mrb[15].mxu0 }
 0x781   : > { %v3336_v24 = vshrl.u32 %v3331_v15, 16  ;;  %v3304_v25 = vadd.f32 %v3296_v56, %v3284_v17  ;;  %v3286_v26 = vmul.f32 %v3276_v53, %v3256_v23  ;;  %v3339_v27 = vshll.u32 %v3331_v15, 16 }
 0x782   : > { %v3343_v28 = vshrl.u32 %v3332_v20, 16  ;;  %v3346_v30 = vshll.u32 %v3332_v20, 16  ;;  %v3319_v31 = vmul.f32 0.25, %v3303_v21  ;;  %v3305_v33 = vadd.f32 %v3292_v54, %v3285_v22  ;;  %v5380_v22 = vld [vmem:[#allocation10] sm:$0xff]  }
 0x783   : > { %v3338_v29 = vrot.slane %v3336_v24, 7  ;;  %vm3311_vm8 = vcmp.gt.f32.partialorder %v3303_v21, 0.0  ;;  %v3320_v35 = vmul.f32 0.25, %v3304_v25  ;;  %v3306_v36 = vadd.f32 %v3296_v56, %v3286_v26 }
 0x784   : > { %v3345_v34 = vrot.slane %v3343_v28, 7  ;;  %vm3312_vm9 = vcmp.gt.f32.partialorder %v3304_v25, 0.0  ;;  %vm3313_vm10 = vcmp.gt.f32.partialorder %v3305_v33, 0.0  ;;  %v3321_v38 = vmul.f32 0.25, %v3305_v33 }
 0x785   : > { %v3341_v37 = vor.u32 %v3339_v27, %v3338_v29  ;;  %vm3314_vm11 = vcmp.gt.f32.partialorder %v3306_v36, 0.0  ;;  %v3322_v5 = vmul.f32 0.25, %v3306_v36  ;;  %v3327_v40 = vsel %vm3311_vm8, %v3303_v21, %v3319_v31 }
 0x786   : > { %v3348_v39 = vor.u32 %v3346_v30, %v3345_v34  ;;  %v3329_v41 = vsel %vm3313_vm10, %v3305_v33, %v3321_v38  ;;  %v3328_v42 = vsel %vm3312_vm9, %v3304_v25, %v3320_v35  ;;  %v5382_v33 = vld [vmem:[#allocation10 + $0x8] sm:$0xff]   ;;  %v5384_v35 = vld [vmem:[#allocation10 + $0x10] sm:$0xff]   ;;  %v5387_v38 = vld [vmem:[#allocation10 + $0x60] sm:$0xff]  }
 0x787   : > { %v6444_v32 = vsel %vm6156_vm13, 0, %v3341_v37  ;;  %v3333_v43 = vpack.c.bf16 %v3329_v41, %v3327_v40  ;;  %v3330_v44 = vsel %vm3314_vm11, %v3306_v36, %v3322_v5  ;;  %v5385_v36 = vld [vmem:[#allocation10 + $0x58] sm:$0xff]   ;;  %v5389_v5 = vld [vmem:[#allocation10 + $0x68] sm:$0xff]   ;;  %v5391_v41 = vld [vmem:[#allocation10 + $0x70] sm:$0xff]  }
 0x788   : > { %v3372_v45 = vsel %vm6156_vm13, 0, %v3348_v39  ;;  %v3334_v47 = vpack.c.bf16 %v3330_v44, %v3328_v42  ;;  %v3443_v48 = vshll.u32 %v6444_v32, 16  ;;  %v3441_v61 = vshrl.u32 %v6444_v32, 16  ;;  %v5386_v37 = vld [vmem:[#allocation10 + $0x18] sm:$0xff]   ;;  %v5388_v39 = vld [vmem:[#allocation10 + $0x20] sm:$0xff]   ;;  %v5390_v40 = vld [vmem:[#allocation10 + $0x28] sm:$0xff]  }
 0x789   : > { %v3455_v46 = vshll.u32 %v3372_v45, 16  ;;  %v3350_v49 = vshrl.u32 %v3333_v43, 16  ;;  %v3353_v52 = vshll.u32 %v3333_v43, 16  ;;  %v3453_v58 = vshrl.u32 %v3372_v45, 16  ;;  %v5392_v42 = vld [vmem:[#allocation10 + $0x30] sm:$0xff]   ;;  %v5393_v43 = vld [vmem:[#allocation10 + $0x78] sm:$0xff]  }
 0x78a   : > { %v3358_v50 = vshrl.u32 %v3334_v47, 16  ;;  %v3361_v55 = vshll.u32 %v3334_v47, 16  ;;  %v3445_v56 = vrot.slane %v3443_v48, 1  ;;  %v3814_v2 = vrot.slane %v3372_v45, 1  ;;  %v5394_v44 = vld [vmem:[#allocation10 + $0x38] sm:$0xff]   ;;  %v5395_v47 = vld [vmem:[#allocation10 + $0x140] sm:$0xff]  }
 0x78b   : > { %v3352_v51 = vrot.slane %v3350_v49, 7  ;;  %v3457_v53 = vrot.slane %v3455_v46, 1  ;;  %v3811_v3 = vrot.slane %v6444_v32, 1  ;;  %v5397_v46 = vld [vmem:[#allocation10 + $0x148] sm:$0xff]   ;;  %v5399_v49 = vld [vmem:[#allocation10 + $0x150] sm:$0xff]  }
 0x78c   : > { %v3360_v54 = vrot.slane %v3358_v50, 7  ;;  %v3446_v6 = vor.u32 %v3445_v56, %v3441_v61  ;;  %v5398_v48 = vld [vmem:[#allocation10 + $0x108] sm:$0xff]   ;;  %v5400_v50 = vld [vmem:[#allocation10 + $0x110] sm:$0xff]  }
 0x78d   : > { %v3355_v57 = vor.u32 %v3353_v52, %v3352_v51  ;;  %v3373_v59 = vsel %vm6156_vm13, %v3352_v51, 0  ;;  %v3458_v0 = vor.u32 %v3457_v53, %v3453_v58  ;;  %v5401_v51 = vld [vmem:[#allocation10 + $0x158] sm:$0xff]   ;;  %v5403_v53 = vld [vmem:[#allocation10 + $0x160] sm:$0xff]   ;;  %v5407_v56 = vld [vmem:[#allocation10 + $0x170] sm:$0xff]  }
 0x78e   : > { %v3363_v60 = vor.u32 %v3361_v55, %v3360_v54  ;;  %v3374_v62 = vsel %vm6156_vm13, %v3360_v54, 0  ;;  %v3468_v63 = vshll.u32 %v3373_v59, 16  ;;  %v3817_v8 = vrot.slane %v3373_v59, 1  ;;  %v5402_v52 = vld [vmem:[#allocation10 + $0x118] sm:$0xff]   ;;  %v5404_v54 = vld [vmem:[#allocation10 + $0x120] sm:$0xff]   ;;  %v5406_v55 = vld [vmem:[#allocation10 + $0x128] sm:$0xff]  }
 0x78f   : > { %v6455_v1 = vsel %vm1997_vm12, %v3338_v29, %v3355_v57  ;;  %v3476_v10 = vshll.u32 %v3374_v62, 16  ;;  %v3819_v11 = vrot.slane %v3374_v62, 1  ;;  %v5381_v29 = vld [vmem:[#allocation10 + $0x48] sm:$0xff]   ;;  %v5408_v57 = vld [vmem:[#allocation10 + $0x130] sm:$0xff]   ;;  %v5409_v58 = vld [vmem:[#allocation10 + $0x178] sm:$0xff]  }
 0x790   : > { %v6459_v4 = vsel %vm1997_vm12, %v3345_v34, %v3363_v60  ;;  %v3448_v7 = vshll.u32 %v6455_v1, 16  ;;  %v3464_v13 = vshrl.u32 %v6455_v1, 16  ;;  %v3470_v14 = vrot.slane %v3468_v63, 1  ;;  %v5383_v34 = vld [vmem:[#allocation10 + $0x50] sm:$0xff]   ;;  %v5410_v59 = vld [vmem:[#allocation10 + $0x138] sm:$0xff]  }
 0x791   : > { %v3460_v9 = vshll.u32 %v6459_v4, 16  ;;  %v3815_v19 = vrot.slane %v6459_v4, 1  ;;  %v3812_v15 = vrot.slane %v6455_v1, 1  ;;  %v3472_v17 = vshrl.u32 %v6459_v4, 16 }
 0x792   : > { %v3450_v12 = vrot.slane %v3448_v7, 1  ;;  %v3478_v28 = vrot.slane %v3476_v10, 1 }
 0x793   : > { %v3462_v16 = vrot.slane %v3460_v9, 1  ;;  %v3816_v18 = vsel %vm852_vm7, %v3814_v2, %v3815_v19  ;;  %v6469_v20 = vsel %vm852_vm7, %v3815_v19, %v3819_v11  ;;  %v6473_v24 = vsel %vm852_vm7, %v3811_v3, %v3812_v15 }
 0x794   : > { %v3451_v21 = vsel %vm663_vm3, %v3446_v6, %v3450_v12  ;;  %v3466_v23 = vor.u32 %v3464_v13, %v3450_v12  ;;  %v6476_v25 = vsel %vm852_vm7, %v3812_v15, %v3817_v8 }
 0x795   : > { %v3463_v26 = vsel %vm663_vm3, %v3458_v0, %v3462_v16  ;;  %v3474_v27 = vor.u32 %v3472_v17, %v3462_v16 }
 0x796   : > { %3612 = vmatprep.mubr.bf16.mxu1 %v3463_v26  ;;  %v3471_v30 = vsel %vm663_vm3, %v3466_v23, %v3470_v14 }
 0x797   : > { %3613 = vmatmul.mubr.bf16.vlgmr.msra.gmra.mrb[8].mxu1 %v3451_v21  ;;  %v3479_v31 = vsel %vm663_vm3, %v3474_v27, %v3478_v28 }
 0x798   : > { %4687 = vmatpush3.bf16.msra.mxu1 %v5380_v22  ;;  %3620 = vmatprep.mubr.bf16.mxu1 %v3479_v31 }
 0x799   : > { %4688 = vmatprep.subr.bf16.mxu1 %v5381_v29  ;;  %v4490_v29 = vld [vmem:[#allocation12] ss:$0 sm:$0xff] }
 0x79c   : > { %4689 = vmatpush3.bf16.msra.mxu1 %v5382_v33 }
 0x79d   : > { %4690 = vmatprep.subr.bf16.mxu1 %v5383_v34  ;;  %v4491_v34 = vld [vmem:[#allocation13] ss:$0 sm:$0xff] }
 0x79f   : > { %3621 = vmatmul.mubr.bf16.gmra.mrb[12].mxu1 %v3471_v30 }
 0x7a0   : > { %4691 = vmatpush3.bf16.msra.mxu1 %v5384_v35  ;;  %3757 = vmatprep.mubr.bf16.mxu1 %v3372_v45  ;;  %v5396_v45 = vld [vmem:[#allocation10 + $0x100] sm:$0xff]  }
 0x7a1   : > { %4692 = vmatprep.subr.bf16.mxu1 %v5385_v36 }
 0x7a4   : > { %4693 = vmatpush3.bf16.msra.mxu1 %v5386_v37 }
 0x7a5   : > { %4694 = vmatprep.subr.bf16.mxu1 %v5387_v38 }
 0x7a8   : > { %4695 = vmatpush3.bf16.msra.mxu1 %v5388_v39 }
 0x7a9   : > { %4696 = vmatprep.subr.bf16.mxu1 %v5389_v5 }
 0x7ac   : > { %4697 = vmatpush3.bf16.msra.mxu1 %v5390_v40 }
 0x7ad   : > { %4698 = vmatprep.subr.bf16.mxu1 %v5391_v41 }
 0x7b0   : > { %4699 = vmatpush3.bf16.msra.mxu1 %v5392_v42 }
 0x7b1   : > { %4700 = vmatprep.subr.bf16.mxu1 %v5393_v43 }
 0x7b4   : > { %4701 = vmatpush3.bf16.msra.mxu1 %v5394_v44 }
 0x7b5   : > { %4714 = vmatprep.subr.bf16.mxu1 %v5395_v47 }
 0x7b7   : > { %3758 = vmatmul.mubr.bf16.vlgmr.msra.gmra.mrb[16].mxu1 %v6444_v32  ;;  %v5405_v32 = vld [vmem:[#allocation10 + $0x168] sm:$0xff]  }
 0x7b8   : > { %3765 = vmatprep.mubr.bf16.mxu1 %v6459_v4  ;;  %4715 = vmatpush3.bf16.msra.mxu1 %v5396_v45 }
 0x7b9   : > { %4716 = vmatprep.subr.bf16.mxu1 %v5397_v46 }
 0x7bc   : > { %4717 = vmatpush3.bf16.msra.mxu1 %v5398_v48 }
 0x7bd   : > { %4718 = vmatprep.subr.bf16.mxu1 %v5399_v49 }
 0x7bf   : > { %3766 = vmatmul.mubr.bf16.gmra.mrb[20].mxu1 %v6455_v1 }
 0x7c0   : > { %4719 = vmatpush3.bf16.msra.mxu1 %v5400_v50  ;;  %3953 = vmatprep.mubr.bf16.mxu1 %v3816_v18 }
 0x7c1   : > { %4720 = vmatprep.subr.bf16.mxu1 %v5401_v51 }
 0x7c4   : > { %4721 = vmatpush3.bf16.msra.mxu1 %v5402_v52 }
 0x7c5   : > { %4722 = vmatprep.subr.bf16.mxu1 %v5403_v53 }
 0x7c8   : > { %4723 = vmatpush3.bf16.msra.mxu1 %v5404_v54 }
 0x7c9   : > { %4724 = vmatprep.subr.bf16.mxu1 %v5405_v32 }
 0x7cc   : > { %4725 = vmatpush3.bf16.msra.mxu1 %v5406_v55 }
 0x7cd   : > { %4726 = vmatprep.subr.bf16.mxu1 %v5407_v56 }
 0x7d0   : > { %4727 = vmatpush3.bf16.msra.mxu1 %v5408_v57 }
 0x7d1   : > { %4728 = vmatprep.subr.bf16.mxu1 %v5409_v58 }
 0x7d4   : > { %4729 = vmatpush3.bf16.msra.mxu1 %v5410_v59 }
 0x7d7   : > { %3954 = vmatmul.mubr.bf16.vlgmr.msra.gmra.mrb[24].mxu1 %v6473_v24 }
 0x7d8   : > { %3961 = vmatprep.mubr.bf16.mxu1 %v6469_v20 }
 0x7df   : > { %3962 = vmatmul.mubr.bf16.gmra.mrb[28].mxu1 %v6476_v25 }
 0x86a   : > { %v4674_v60 = vpop.f32.mrb[8].mxu1 }
 0x86b   : > { %v4675_v61 = vpop.f32.mrb[9].mxu1 }
 0x86c   : > { %v4676_v62 = vadd.f32 %v4675_v61, %v4674_v60  ;;  %v4677_v63 = vpop.f32.mrb[10].mxu1 }
 0x86d   : > { %v4678_v0 = vpop.f32.mrb[11].mxu1 }
 0x86e   : > { %v4679_v1 = vadd.f32 %v4678_v0, %v4677_v63 }
 0x872   : > { %v4680_v2 = vpop.f32.mrb[12].mxu1 }
 0x873   : > { %v4681_v3 = vpop.f32.mrb[13].mxu1 }
 0x874   : > { %v4682_v4 = vadd.f32 %v4681_v3, %v4680_v2  ;;  %v4683_v6 = vpop.f32.mrb[14].mxu1 }
 0x875   : > { %v4684_v7 = vpop.f32.mrb[15].mxu1 }
 0x876   : > { %v4685_v8 = vadd.f32 %v4684_v7, %v4683_v6 }
 0x88a   : > { %v4702_v9 = vpop.f32.mrb[16].mxu1 }
 0x88b   : > { %v4703_v10 = vpop.f32.mrb[17].mxu1 }
 0x88c   : > { %v4704_v19 = vadd.f32 %v4703_v10, %v4702_v9  ;;  %v4705_v11 = vpop.f32.mrb[18].mxu1 }
 0x88d   : > { %v4706_v12 = vpop.f32.mrb[19].mxu1 }
 0x88e   : > { %v3760_v13 = vadd.f32 %v4704_v19, %v4676_v62  ;;  %v4707_v14 = vadd.f32 %v4706_v12, %v4705_v11 }
 0x890   : > { %v3763_v15 = vadd.f32 %v4707_v14, %v4679_v1 }
 0x892   : > { %v4708_v16 = vpop.f32.mrb[20].mxu1 }
 0x893   : > { %v4709_v17 = vpop.f32.mrb[21].mxu1 }
 0x894   : > { %v4710_v18 = vadd.f32 %v4709_v17, %v4708_v16  ;;  %v4711_v20 = vpop.f32.mrb[22].mxu1 }
 0x895   : > { %v4712_v21 = vpop.f32.mrb[23].mxu1 }
 0x896   : > { %v3768_v22 = vadd.f32 %v4710_v18, %v4682_v4  ;;  %v4713_v23 = vadd.f32 %v4712_v21, %v4711_v20 }
 0x898   : > { %v3771_v24 = vadd.f32 %v4713_v23, %v4685_v8 }
 0x8aa   : > { %v4730_v25 = vpop.f32.mrb[24].mxu1 }
 0x8ab   : > { %v4731_v26 = vpop.f32.mrb[25].mxu1 }
 0x8ac   : > { %v4732_v27 = vadd.f32 %v4731_v26, %v4730_v25  ;;  %v4733_v28 = vpop.f32.mrb[26].mxu1 }
 0x8ad   : > { %v4734_v30 = vpop.f32.mrb[27].mxu1 }
 0x8ae   : > { %v3970_v31 = vadd.f32 %v4732_v27, %v3760_v13  ;;  %v4735_v33 = vadd.f32 %v4734_v30, %v4733_v28 }
 0x8b0   : > { %v3981_v35 = vmul.f32 %v4490_v29, %v3970_v31  ;;  %v3971_v36 = vadd.f32 %v4735_v33, %v3763_v15 }
 0x8b2   : > { %v3992_v37 = vadd.f32 %v4491_v34, %v3981_v35  ;;  %v3982_v38 = vmul.f32 %v4490_v29, %v3971_v36  ;;  %v4736_v39 = vpop.f32.mrb[28].mxu1 }
 0x8b3   : > { %v4737_v5 = vpop.f32.mrb[29].mxu1 }
 0x8b4   : > { %v4000_v40 = vmin.f32 %v3992_v37, 0.0  ;;  %v3993_v41 = vadd.f32 %v4491_v34, %v3982_v38  ;;  %v4738_v42 = vadd.f32 %v4737_v5, %v4736_v39  ;;  %v4739_v43 = vpop.f32.mrb[30].mxu1  ;;  %vm3996_vm3 = vcmp.gt.f32.partialorder %v3992_v37, 0.0 }
 0x8b5   : > { %v4740_v44 = vpop.f32.mrb[31].mxu1 }
 0x8b6   : > { %v4004_v47 = vmul.f32 1.442695, %v4000_v40  ;;  %v4001_v45 = vmin.f32 %v3993_v41, 0.0  ;;  %v3972_v46 = vadd.f32 %v4738_v42, %v3768_v22  ;;  %v4741_v48 = vadd.f32 %v4740_v44, %v4739_v43 }
 0x8b7   : > { %vm3997_vm7 = vcmp.gt.f32.partialorder %v3993_v41, 0.0 }
 0x8b8   : > { %5411 = vpow2.f32 %v4004_v47  ;;  %v4006_v49 = vmul.f32 1.442695, %v4001_v45  ;;  %v3983_v50 = vmul.f32 %v4490_v29, %v3972_v46  ;;  %v3973_v51 = vadd.f32 %v4741_v48, %v3771_v24 }
 0x8ba   : > { %5413 = vpow2.f32 %v4006_v49  ;;  %v3994_v52 = vadd.f32 %v4491_v34, %v3983_v50  ;;  %v3984_v53 = vmul.f32 %v4490_v29, %v3973_v51 }
 0x8bc   : > { %v4002_v54 = vmin.f32 %v3994_v52, 0.0  ;;  %v3995_v32 = vadd.f32 %v4491_v34, %v3984_v53  ;;  %vm3998_vm12 = vcmp.gt.f32.partialorder %v3994_v52, 0.0 }
 0x8be   : > { %v4008_v55 = vmul.f32 1.442695, %v4002_v54  ;;  %v4003_v56 = vmin.f32 %v3995_v32, 0.0  ;;  %vm3999_vm13 = vcmp.gt.f32.partialorder %v3995_v32, 0.0 }
 0x8c0   : > { %5415 = vpow2.f32 %v4008_v55  ;;  %v4010_v57 = vmul.f32 1.442695, %v4003_v56 }
 0x8c2   : > { %v5412_v58 = vpop.eup %5411  ;;  %5417 = vpow2.f32 %v4010_v57 }
 0x8c3   : > { %v4492_v59 = vadd.f32 -1.0, %v5412_v58 }
 0x8c4   : > { %v5414_v60 = vpop.eup %5413 }
 0x8c5   : > { %v4016_v61 = vmul.f32 0.3, %v4492_v59  ;;  %v4493_v62 = vadd.f32 -1.0, %v5414_v60 }
 0x8c7   : > { %v4017_v63 = vmul.f32 0.3, %v4493_v62  ;;  %v4020_v0 = vsel %vm3996_vm3, %v3992_v37, %v4016_v61 }
 0x8c9   : > { %v4021_v1 = vsel %vm3997_vm7, %v3993_v41, %v4017_v63 }
 0x8ca   : > { %v5416_v2 = vpop.eup %5415  ;;  %v4024_v3 = vadd.f32 %v4021_v1, %v4020_v0 }
 0x8cb   : > { %v4494_v4 = vadd.f32 -1.0, %v5416_v2 }
 0x8cc   : > { %v5418_v6 = vpop.eup %5417 }
 0x8cd   : > { %v4018_v7 = vmul.f32 0.3, %v4494_v4  ;;  %v4495_v8 = vadd.f32 -1.0, %v5418_v6 }
 0x8cf   : > { %v4022_v9 = vsel %vm3998_vm12, %v3994_v52, %v4018_v7  ;;  %v4019_v19 = vmul.f32 0.3, %v4495_v8 }
 0x8d0   : > { %v4025_v10 = vadd.f32 %v4024_v3, %v4022_v9 }
 0x8d1   : > { %v4023_v11 = vsel %vm3999_vm13, %v3995_v32, %v4019_v19 }
 0x8d2   : > { %v4026_v12 = vadd.f32 %v4025_v10, %v4023_v11 }
 0x8d4   : > { %v4027_v13 = vrot.slane %v4026_v12, 4 }
 0x8d6   : > { %v4028_v14 = vadd.f32 %v4027_v13, %v4026_v12 }
 0x8d8   : > { %v4029_v15 = vrot.slane %v4028_v14, 2 }
 0x8da   : > { %v4030_v16 = vadd.f32 %v4029_v15, %v4028_v14 }
 0x8dc   : > { %v4031_v17 = vrot.slane %v4030_v16, 1 }
 0x8de   : > { %v4032_v18 = vadd.f32 %v4031_v17, %v4030_v16 }
 0x8e0   : > { %v4034_v20 = vmul.f32 0.03125, %v4032_v18 }
 0x8e2   : > { %4035 = vst [vmem:[%s570_s20] sm:$0x1] %v4034_v20 }
 0x8e3 PF: > { %s6537_s18 = sld [smem:[#allocation20_spill]] }
 0x8e9   : > { %s29_s29 = sadd.s32 1, %s6537_s18  }
 0x8ea   : > { %p26_p11 = scmp.ge.s32.totalorder %s29_s29, 4  }
 0x8ec   :  { %28 = sbr.rel (!%p26_p11) target bundleno = 9 (0x9), region = 157 }
 0x8f3   :  { %4053 = vsyncpa [#allocation3], 1 }
 0x8f4   :  { %4055 = vsyncpa [#allocation3 + $0x1], 1 }
 0x8f5   :  { %4056 = vsyncpa [#allocation5], 1 }
 0x8f6   :  { %4057 = vsyncpa [#allocation8], 1 }
 0x8f7   :  { %4058 = vsyncpa [#allocation11], 1 }
 0x8f8   :  { %4059 = vsyncpa [#allocation14], 1 }

// kernel: wavelet2_rescnn_forward.7
= control target key start
LH: loop header
LB: loop body
LE: loop exit
PB: predicated region body
PF: predicated region fallthrough
CT: control target
= control target key end

     0   :  { %s5586_s29 = smov 0   ;;  %s6512_s0 = inlined_call_operand.vmem [shape: bf16[4,64,16], index: 0, kind: input, shape index: {}]   ;;  %s6513_s1 = inlined_call_operand.vmem [shape: bf16[7,64,128], index: 1, kind: input, shape index: {}]   ;;  %s6514_s2 = inlined_call_operand.vmem [shape: bf16[5,128,128], index: 2, kind: input, shape index: {}]   ;;  %s6515_s3 = inlined_call_operand.vmem [shape: bf16[3,128,64], index: 3, kind: input, shape index: {}]   ;;  %s6516_s4 = inlined_call_operand.vmem [shape: f32[1,1,64], index: 4, kind: input, shape index: {}]   ;;  %s6517_s5 = inlined_call_operand.vmem [shape: bf16[3,64,128], index: 5, kind: input, shape index: {}]   ;;  %s6518_s6 = inlined_call_operand.vmem [shape: f32[1,1,128], index: 6, kind: input, shape index: {}]   ;;  %s6519_s7 = inlined_call_operand.vmem [shape: f32[1,1,128], index: 7, kind: input, shape index: {}]   ;;  %s6520_s8 = inlined_call_operand.vmem [shape: bf16[3,128,256], index: 8, kind: input, shape index: {}]   ;;  %s6521_s9 = inlined_call_operand.vmem [shape: f32[1,1,256], index: 9, kind: input, shape index: {}]   ;;  %s6522_s10 = inlined_call_operand.vmem [shape: f32[1,1,256], index: 10, kind: input, shape index: {}]   ;;  %s6523_s11 = inlined_call_operand.vmem [shape: bf16[3,256,128], index: 11, kind: input, shape index: {}]   ;;  %s6524_s12 = inlined_call_operand.vmem [shape: f32[1,1,128], index: 12, kind: input, shape index: {}]   ;;  %s6525_s13 = inlined_call_operand.vmem [shape: f32[1,1,128], index: 13, kind: input, shape index: {}]   ;;  %s6526_s14 = inlined_call_operand.vmem [shape: f32[4,1,128], index: 14, kind: output, shape index: {}]  }
   0x1 LB: > { %s4118_s30 = sadd.s32 4294967295, %s5508_s29   ;;  %p4122_p0 = scmp.ge.s32.totalorder %s5508_s29, 1  ;;  %s5508_s29 = sphi %s5586_s29, %s24_s29  }
   0x2   : > { %p414_p1 = scmp.lt.s32.totalorder %s5508_s29, 3 }
   0x4   : > { %p415_p2 = pnand %p4122_p0, %p414_p1 }
   0x5   : > { %s4123_s15 = sshll.u32 (!%p415_p2), %s4118_s30, 1  ;;  %v5270_v17 = vld [vmem:[%s6513_s1 + $0x20] sm:$0xff] (!%p415_p2)   ;;  %v5271_v21 = vld [vmem:[%s6513_s1 + $0x28] sm:$0xff] (!%p415_p2)   ;;  %v5272_v27 = vld [vmem:[%s6513_s1 + $0x30] sm:$0xff] (!%p415_p2)   ;;  %vm589_vm0 = vcmask (!%p415_p2), 1041408   ;;  %vm662_vm4 = vcmask (!%p415_p2), 523264  }
   0x6   : > { %418 = sbr.rel (%p415_p2) target bundleno = 2064 (0x810), region = 76  ;;  %p461_p3 = scmp.lt.s32.totalorder (!%p415_p2), %s4123_s15, 3  ;;  %4882 = vmatprep.subr.bf16.mxu0 (!%p415_p2), %v5270_v17  ;;  %v5273_v28 = vld [vmem:[%s6513_s1 + $0x38] sm:$0xff] (!%p415_p2)   ;;  %v5615_v35 = vld [vmem:[%s6513_s1] sm:$0xff] (!%p415_p2)   ;;  %v5299_v38 = vld [vmem:[%s6514_s2 + $0x48] sm:$0xff] (!%p415_p2)   ;;  %vm1018_vm5 = vcmask (!%p415_p2), 1045504  }
   0x7   : > { %4883 = vmatpush3.bf16.msra.mxu0 (!%p415_p2), %v5270_v17  ;;  %v5298_v37 = vld [vmem:[%s6514_s2 + $0x40] sm:$0xff] (!%p415_p2)   ;;  %v5300_v39 = vld [vmem:[%s6514_s2 + $0x50] sm:$0xff] (!%p415_p2)   ;;  %v5301_v41 = vld [vmem:[%s6514_s2 + $0x58] sm:$0xff] (!%p415_p2)   ;;  %vm590_vm1 = vsmask.f32 (!%p415_p2), 1280  ;;  %vm1224_vm7 = vcmask (!%p415_p2), 1044480  }
   0x8   : > { %4884 = vmatprep.subr.bf16.mxu0 (!%p415_p2), %v5271_v21  ;;  %4966 = vmatprep.subr.bf16.mxu1 (!%p415_p2), %v5298_v37  ;;  %vm591_vm2 = vmand (!%p415_p2), %vm589_vm0, %vm590_vm1  ;;  %vm613_vm3 = vsmask.f32 (!%p415_p2), 7424  ;;  %vm1117_vm6 = vsmask.f32 (!%p415_p2), 5376  ;;  %vm808_vm8 = vcmask (!%p415_p2), 1046528   ;;  %vm1320_vm10 = vcmask (!%p415_p2), 1040384  }
   0x9   : > { %4967 = vmatpush3.bf16.msra.mxu1 (!%p415_p2), %v5298_v37  ;;  %vm907_vm9 = vsmask.f32 (!%p415_p2), 6400  ;;  %vm5840_vm11 = vmneg (!%p415_p2), %vm1320_vm10  ;;  %vm1994_vm12 = vsmask.f32 (!%p415_p2), 256 }
   0xa   : > { %4968 = vmatprep.subr.bf16.mxu1 (!%p415_p2), %v5299_v38  ;;  %vm5989_vm13 = vmand (!%p415_p2), %vm1320_vm10, %vm1994_vm12 }
   0xb   : > { %4885 = vmatpush3.bf16.msra.mxu0 (!%p415_p2), %v5271_v21  ;;  %v5276_v21 = vld [vmem:[%s6513_s1 + $0x10] sm:$0xff] (!%p415_p2)  }
   0xc   : > { %4886 = vmatprep.subr.bf16.mxu0 (!%p415_p2), %v5272_v27 }
   0xd   : > { %s6532_s15 = smov (!%p461_p3, %s4123_s15), 3  ;;  %4969 = vmatpush3.bf16.msra.mxu1 %v5299_v38 }
   0xe   : > { %s4618_s16 = sshll.u32 %s6532_s15, 5  ;;  %4970 = vmatprep.subr.bf16.mxu1 %v5300_v39 }
   0xf   : > { %s465_s19 = scalar_lea.vmem %s6512_s0, %s4618_s16  ;;  %4887 = vmatpush3.bf16.msra.mxu0 %v5272_v27  ;;  %s470_s16 = scalar_lea.vmem %s6526_s14, %s6532_s15 }
  0x10   : > { %v4620_v0 = vld [vmem:[%s465_s19] sm:$0xff]   ;;  %v4651_v6 = vld [vmem:[%s465_s19 + $0x8] sm:$0xff]   ;;  %v4652_v12 = vld [vmem:[%s465_s19 + $0x10] sm:$0xff]   ;;  %4888 = vmatprep.subr.bf16.mxu0 %v5273_v28 }
  0x11   : > { %v4654_v1 = vld [vmem:[%s465_s19 + $0x20] sm:$0xff]   ;;  %v4621_v2 = vunpack.c.l.bf16 %v4620_v0  ;;  %v4622_v4 = vunpack.c.h.bf16 %v4620_v0  ;;  %v4655_v7 = vld [vmem:[%s465_s19 + $0x28] sm:$0xff]   ;;  %v4625_v10 = vunpack.c.l.bf16 %v4651_v6  ;;  %v4656_v13 = vld [vmem:[%s465_s19 + $0x30] sm:$0xff]   ;;  %v4626_v15 = vunpack.c.h.bf16 %v4651_v6  ;;  %4971 = vmatpush3.bf16.msra.mxu1 %v5300_v39 }
  0x12   : > { %v4637_v3 = vunpack.c.l.bf16 %v4654_v1  ;;  %v4638_v5 = vunpack.c.h.bf16 %v4654_v1  ;;  %v4641_v11 = vunpack.c.l.bf16 %v4655_v7  ;;  %v4642_v16 = vunpack.c.h.bf16 %v4655_v7  ;;  %v4653_v22 = vld [vmem:[%s465_s19 + $0x18] sm:$0xff]   ;;  %4972 = vmatprep.subr.bf16.mxu1 %v5301_v41 }
  0x13   : > { %v4629_v19 = vunpack.c.l.bf16 %v4652_v12  ;;  %v4645_v20 = vunpack.c.l.bf16 %v4656_v13  ;;  %v4657_v23 = vld [vmem:[%s465_s19 + $0x38] sm:$0xff]   ;;  %v4630_v25 = vunpack.c.h.bf16 %v4652_v12  ;;  %v4646_v26 = vunpack.c.h.bf16 %v4656_v13  ;;  %4889 = vmatpush3.bf16.msra.mxu0 %v5273_v28  ;;  %v5275_v13 = vld [vmem:[%s6513_s1 + $0x8] sm:$0xff]  }
  0x14   : > { %v5244_v8 = vpack.i.bf16 %v4637_v3, %v4621_v2  ;;  %v5246_v9 = vpack.i.bf16 %v4638_v5, %v4622_v4  ;;  %v5248_v14 = vpack.i.bf16 %v4641_v11, %v4625_v10  ;;  %v5250_v18 = vpack.i.bf16 %v4642_v16, %v4626_v15  ;;  %4894 = vmatprep.subr.bf16.mxu0 %v5615_v35 }
  0x15   : > { %v5252_v24 = vpack.i.bf16 %v4645_v20, %v4629_v19  ;;  %v5254_v29 = vpack.i.bf16 %v4646_v26, %v4630_v25  ;;  %v4633_v30 = vunpack.c.l.bf16 %v4653_v22  ;;  %v4649_v31 = vunpack.c.l.bf16 %v4657_v23  ;;  %4973 = vmatpush3.bf16.msra.mxu1 %v5301_v41  ;;  %v5278_v41 = vld [vmem:[%s6513_s1 + $0x40] sm:$0xff]  }
  0x16   : > { %5245 = vxpose.xlu0.b32.start [1/8] (short) (narrow) %v5244_v8, 16  ;;  %v4634_v33 = vunpack.c.h.bf16 %v4653_v22  ;;  %v4650_v34 = vunpack.c.h.bf16 %v4657_v23 }
  0x17   : > { %v5256_v32 = vpack.i.bf16 %v4649_v31, %v4633_v30 }
  0x18   : > { %v5258_v36 = vpack.i.bf16 %v4650_v34, %v4634_v33  ;;  %v5277_v34 = vld [vmem:[%s6513_s1 + $0x18] sm:$0xff]  }
  0x1a   : > { %5247 = vxpose.xlu0.b32.cont [2/8] (short) (narrow) %v5246_v9, 16 }
  0x1e   : > { %5249 = vxpose.xlu0.b32.cont [3/8] (short) (narrow) %v5248_v14, 16 }
  0x22   : > { %5251 = vxpose.xlu0.b32.cont [4/8] (short) (narrow) %v5250_v18, 16 }
  0x26   : > { %5253 = vxpose.xlu0.b32.cont [5/8] (short) (narrow) %v5252_v24, 16 }
  0x2a   : > { %5255 = vxpose.xlu0.b32.cont [6/8] (short) (narrow) %v5254_v29, 16 }
  0x2e   : > { %5257 = vxpose.xlu0.b32.cont [7/8] (short) (narrow) %v5256_v32, 16 }
  0x32   : > { %5259 = vxpose.xlu0.b32.end [8/8] (short) (narrow) %v5258_v36, 16 }
  0x96   : > { %v5260_v40 = vpop.trf.xlu0 }
  0x97   : > { %v5264_v42 = vunpack.i.h.bf16 %v5260_v40  ;;  %v5261_v43 = vunpack.i.l.bf16 %v5260_v40 }
  0x9a   : > { %v5265_v44 = vpop.trf.xlu0 }
  0x9b   : > { %v5269_v45 = vunpack.i.h.bf16 %v5265_v44  ;;  %v5266_v46 = vunpack.i.l.bf16 %v5265_v44  ;;  %v5279_v44 = vld [vmem:[%s6513_s1 + $0x48] sm:$0xff]  }
  0x9d   : > { %v569_v47 = vpack.c.bf16 %v5266_v46, %v5261_v43  ;;  %v570_v48 = vpack.c.bf16 %v5269_v45, %v5264_v42  ;;  %v5280_v46 = vld [vmem:[%s6513_s1 + $0x50] sm:$0xff]  }
  0x9f   : > { %v572_v49 = vshrl.u32 %v569_v47, 16  ;;  %v575_v50 = vshll.u32 %v569_v47, 16  ;;  %v580_v51 = vshrl.u32 %v570_v48, 16  ;;  %v583_v52 = vshll.u32 %v570_v48, 16  ;;  %v5281_v47 = vld [vmem:[%s6513_s1 + $0x58] sm:$0xff]  }
  0xa1   : > { %v574_v53 = vrot.slane %v572_v49, 6  ;;  %v577_v54 = vrot.slane %v575_v50, 7  ;;  %v582_v55 = vrot.slane %v580_v51, 6  ;;  %v585_v56 = vrot.slane %v583_v52, 7  ;;  %v5282_v52 = vld [vmem:[%s6513_s1 + $0x60] sm:$0xff]  }
  0xa3   : > { %v578_v57 = vor.u32 %v577_v54, %v574_v53  ;;  %v586_v58 = vor.u32 %v585_v56, %v582_v55 }
  0xa5   : > { %v5630_v59 = vsel %vm591_vm2, 0, %v578_v57  ;;  %v5632_v60 = vsel %vm591_vm2, 0, %v586_v58  ;;  %v5634_v61 = vsel %vm591_vm2, %v578_v57, 0  ;;  %v5636_v62 = vsel %vm591_vm2, %v586_v58, 0  ;;  %v5283_v57 = vld [vmem:[%s6513_s1 + $0x68] sm:$0xff]  }
  0xa6   : > { %v5639_v63 = vshll.u32 %v5630_v59, 16  ;;  %v5642_v0 = vshll.u32 %v5634_v61, 16  ;;  %v5645_v1 = vshll.u32 %v5632_v60, 16  ;;  %v5648_v2 = vshll.u32 %v5636_v62, 16 }
  0xa7   : > { %v5651_v3 = vshrl.u32 %v5630_v59, 16  ;;  %v5655_v5 = vshrl.u32 %v5632_v60, 16  ;;  %v911_v11 = vshrl.u32 %v5634_v61, 16  ;;  %v920_v15 = vshrl.u32 %v5636_v62, 16 }
  0xa8   : > { %v619_v4 = vrot.slane %v5639_v63, 1  ;;  %v631_v6 = vrot.slane %v5645_v1, 1  ;;  %v624_v8 = vrot.slane %v5642_v0, 1  ;;  %v636_v10 = vrot.slane %v5648_v2, 1 }
  0xa9   : > { %v1022_v16 = vrot.slane %v5632_v60, 2  ;;  %v1023_v17 = vrot.slane %v5636_v62, 2  ;;  %v1118_v18 = vrot.slane %v5651_v3, 2  ;;  %v1119_v19 = vrot.slane %v5639_v63, 3 }
  0xaa   : > { %v620_v7 = vor.u32 %v619_v4, %v5651_v3  ;;  %v632_v9 = vor.u32 %v631_v6, %v5655_v5  ;;  %v1121_v20 = vrot.slane %v911_v11, 2  ;;  %v1122_v22 = vrot.slane %v5642_v0, 3 }
  0xab   : > { %v5683_v23 = vsel %vm1018_vm5, %v1022_v16, %v1023_v17  ;;  %v1120_v24 = vor.u32 %v1119_v19, %v1118_v18  ;;  %v1125_v25 = vrot.slane %v5655_v5, 2  ;;  %v1126_v26 = vrot.slane %v5645_v1, 3  ;;  %v5294_v16 = vld [vmem:[%s6513_s1 + $0xc0] sm:$0xff]   ;;  %v5295_v17 = vld [vmem:[%s6513_s1 + $0xc8] sm:$0xff]   ;;  %v5296_v18 = vld [vmem:[%s6513_s1 + $0xd0] sm:$0xff]  }
  0xac   : > { %v625_v12 = vsel %vm613_vm3, %v620_v7, %v624_v8  ;;  %v637_v14 = vsel %vm613_vm3, %v632_v9, %v636_v10  ;;  %v1123_v27 = vor.u32 %v1122_v22, %v1121_v20  ;;  %v1128_v28 = vrot.slane %v920_v15, 2  ;;  %v5286_v8 = vld [vmem:[%s6513_s1 + $0x80] sm:$0xff]   ;;  %v5297_v19 = vld [vmem:[%s6513_s1 + $0xd8] sm:$0xff]   ;;  %v5304_v22 = vld [vmem:[%s6514_s2 + $0x70] sm:$0xff]  }
  0xad   : > { %4890 = vmatprep.mubr.msk.bf16.mxu0 %vm662_vm4, %v625_v12  ;;  %v1129_v29 = vrot.slane %v5648_v2, 3  ;;  %v1127_v30 = vor.u32 %v1126_v26, %v1125_v25  ;;  %v1225_v31 = vrot.slane %v5630_v59, 3  ;;  %v1226_v32 = vrot.slane %v5634_v61, 3  ;;  %v5302_v20 = vld [vmem:[%s6514_s2 + $0x60] sm:$0xff]  }
  0xae   : > { %4891 = vmatmul.mubr.msk.bf16.vlgmr.msra.gmra.mrb[0].mxu0 %vm662_vm4, %v637_v14  ;;  %v1228_v33 = vrot.slane %v5632_v60, 3  ;;  %v1229_v37 = vrot.slane %v5636_v62, 3  ;;  %v809_v42 = vrot.slane %v5630_v59, 1  ;;  %v810_v43 = vrot.slane %v5634_v61, 1  ;;  %v5292_v14 = vld [vmem:[%s6513_s1 + $0xb0] sm:$0xff]   ;;  %4974 = vmatprep.subr.bf16.mxu1 %v5302_v20 }
  0xaf   : > { %4895 = vmatpush3.bf16.msra.mxu0 %v5615_v35  ;;  %4902 = vmatprep.mubr.msk.bf16.mxu0 %vm662_vm4, %v5630_v59  ;;  %v5697_v35 = vsel %vm1117_vm6, %v1120_v24, %v1123_v27  ;;  %v1130_v36 = vor.u32 %v1129_v29, %v1128_v28  ;;  %v5700_v38 = vsel %vm1224_vm7, %v1225_v31, %v1226_v32  ;;  %v908_v48 = vrot.slane %v5651_v3, 1  ;;  %v5306_v24 = vld [vmem:[%s6514_s2] sm:$0xff]  }
  0xb0   : > { %4896 = vmatprep.subr.bf16.mxu0 %v5275_v13  ;;  %v5705_v40 = vsel %vm1224_vm7, %v1228_v33, %v1229_v37  ;;  %v811_v45 = vsel %vm808_vm8, %v809_v42, %v810_v43  ;;  %v909_v49 = vrot.slane %v5639_v63, 2  ;;  %v913_v50 = vrot.slane %v911_v11, 1  ;;  %4975 = vmatpush3.bf16.msra.mxu1 %v5302_v20  ;;  %v5311_v20 = vld [vmem:[%s6514_s2 + $0x28] sm:$0xff]  }
  0xb1   : > { %v5703_v39 = vsel %vm1117_vm6, %v1127_v30, %v1130_v36  ;;  %v914_v51 = vrot.slane %v5642_v0, 2  ;;  %v812_v53 = vrot.slane %v5632_v60, 1  ;;  %v813_v54 = vrot.slane %v5636_v62, 1  ;;  %v5285_v0 = vld [vmem:[%s6513_s1 + $0x78] sm:$0xff]   ;;  %v5287_v62 = vld [vmem:[%s6513_s1 + $0x88] sm:$0xff]  }
  0xb2   : > { %v910_v55 = vor.u32 %v909_v49, %v908_v48  ;;  %v917_v3 = vrot.slane %v5655_v5, 1  ;;  %v918_v4 = vrot.slane %v5645_v1, 2  ;;  %v922_v6 = vrot.slane %v920_v15, 1  ;;  %v5290_v5 = vld [vmem:[%s6513_s1 + $0xa0] sm:$0xff]   ;;  %v5293_v15 = vld [vmem:[%s6513_s1 + $0xb8] sm:$0xff]  }
  0xb3   : > { %4897 = vmatpush3.bf16.msra.mxu0 %v5275_v13  ;;  %v915_v56 = vor.u32 %v914_v51, %v913_v50  ;;  %v814_v58 = vsel %vm808_vm8, %v812_v53, %v813_v54  ;;  %v923_v7 = vrot.slane %v5648_v2, 2  ;;  %v1019_v11 = vrot.slane %v5630_v59, 2  ;;  %v5288_v59 = vld [vmem:[%s6513_s1 + $0x90] sm:$0xff]   ;;  %v5291_v13 = vld [vmem:[%s6513_s1 + $0xa8] sm:$0xff]  }
  0xb4   : > { %4898 = vmatprep.subr.bf16.mxu0 %v5276_v21  ;;  %v919_v9 = vor.u32 %v918_v4, %v917_v3  ;;  %v1020_v12 = vrot.slane %v5634_v61, 2  ;;  %v5289_v61 = vld [vmem:[%s6513_s1 + $0x98] sm:$0xff]   ;;  %v5307_v3 = vld [vmem:[%s6514_s2 + $0x8] sm:$0xff]  }
  0xb5   : > { %v916_v63 = vsel %vm907_vm9, %v910_v55, %v915_v56  ;;  %v924_v10 = vor.u32 %v923_v7, %v922_v6 }
  0xb6   : > { %v1021_v2 = vsel %vm1018_vm5, %v1019_v11, %v1020_v12 }
  0xb7   : > { %4899 = vmatpush3.bf16.msra.mxu0 %v5276_v21  ;;  %v925_v1 = vsel %vm907_vm9, %v919_v9, %v924_v10  ;;  %v5303_v21 = vld [vmem:[%s6514_s2 + $0x68] sm:$0xff]  }
  0xb8   : > { %4900 = vmatprep.subr.bf16.mxu0 %v5277_v34  ;;  %4976 = vmatprep.subr.bf16.mxu1 %v5303_v21 }
  0xb9   : > { %4977 = vmatpush3.bf16.msra.mxu1 %v5303_v21  ;;  %v5312_v21 = vld [vmem:[%s6514_s2 + $0x30] sm:$0xff]  }
  0xba   : > { %4978 = vmatprep.subr.bf16.mxu1 %v5304_v22 }
  0xbb   : > { %4901 = vmatpush3.bf16.msra.mxu0 %v5277_v34 }
  0xbc   : > { %4906 = vmatprep.subr.bf16.mxu0 %v5278_v41 }
  0xbd   : > { %4979 = vmatpush3.bf16.msra.mxu1 %v5304_v22  ;;  %v5313_v22 = vld [vmem:[%s6514_s2 + $0x38] sm:$0xff]  }
  0xbe   : > { %4903 = vmatmul.mubr.msk.bf16.vlgmr.msra.gmra.mrb[0].mxu0 %vm662_vm4, %v5632_v60  ;;  %v5284_v60 = vld [vmem:[%s6513_s1 + $0x70] sm:$0xff]  }
  0xbf   : > { %4907 = vmatpush3.bf16.msra.mxu0 %v5278_v41  ;;  %4914 = vmatprep.mubr.msk.bf16.mxu0 %vm662_vm4, %v811_v45 }
  0xc0   : > { %4908 = vmatprep.subr.bf16.mxu0 %v5279_v44 }
  0xc3   : > { %4909 = vmatpush3.bf16.msra.mxu0 %v5279_v44 }
  0xc4   : > { %4910 = vmatprep.subr.bf16.mxu0 %v5280_v46 }
  0xc7   : > { %4911 = vmatpush3.bf16.msra.mxu0 %v5280_v46 }
  0xc8   : > { %4912 = vmatprep.subr.bf16.mxu0 %v5281_v47 }
  0xcb   : > { %4913 = vmatpush3.bf16.msra.mxu0 %v5281_v47 }
  0xcc   : > { %4918 = vmatprep.subr.bf16.mxu0 %v5282_v52 }
  0xce   : > { %4915 = vmatmul.mubr.msk.bf16.vlgmr.msra.gmra.mrb[0].mxu0 %vm662_vm4, %v814_v58 }
  0xcf   : > { %4919 = vmatpush3.bf16.msra.mxu0 %v5282_v52  ;;  %4926 = vmatprep.mubr.msk.bf16.mxu0 %vm662_vm4, %v916_v63 }
  0xd0   : > { %4920 = vmatprep.subr.bf16.mxu0 %v5283_v57 }
  0xd3   : > { %4921 = vmatpush3.bf16.msra.mxu0 %v5283_v57 }
  0xd4   : > { %4922 = vmatprep.subr.bf16.mxu0 %v5284_v60 }
  0xd7   : > { %4923 = vmatpush3.bf16.msra.mxu0 %v5284_v60 }
  0xd8   : > { %4924 = vmatprep.subr.bf16.mxu0 %v5285_v0 }
  0xdb   : > { %4925 = vmatpush3.bf16.msra.mxu0 %v5285_v0 }
  0xdc   : > { %4930 = vmatprep.subr.bf16.mxu0 %v5286_v8 }
  0xde   : > { %4927 = vmatmul.mubr.msk.bf16.vlgmr.msra.gmra.mrb[0].mxu0 %vm662_vm4, %v925_v1 }
  0xdf   : > { %4931 = vmatpush3.bf16.msra.mxu0 %v5286_v8  ;;  %4938 = vmatprep.mubr.msk.bf16.mxu0 %vm662_vm4, %v1021_v2  ;;  %v5338_v2 = vld [vmem:[%s6515_s3 + $0x40] sm:$0xff]  }
  0xe0   : > { %4932 = vmatprep.subr.bf16.mxu0 %v5287_v62 }
  0xe3   : > { %4933 = vmatpush3.bf16.msra.mxu0 %v5287_v62 }
  0xe4   : > { %4934 = vmatprep.subr.bf16.mxu0 %v5288_v59 }
  0xe7   : > { %4935 = vmatpush3.bf16.msra.mxu0 %v5288_v59  ;;  %v5339_v59 = vld [vmem:[%s6515_s3 + $0x48] sm:$0xff]  }
  0xe8   : > { %4936 = vmatprep.subr.bf16.mxu0 %v5289_v61 }
  0xeb   : > { %4937 = vmatpush3.bf16.msra.mxu0 %v5289_v61 }
  0xec   : > { %4942 = vmatprep.subr.bf16.mxu0 %v5290_v5 }
  0xee   : > { %4939 = vmatmul.mubr.msk.bf16.vlgmr.msra.gmra.mrb[0].mxu0 %vm662_vm4, %v5683_v23  ;;  %v5305_v23 = vld [vmem:[%s6514_s2 + $0x78] sm:$0xff]  }
  0xef   : > { %4943 = vmatpush3.bf16.msra.mxu0 %v5290_v5  ;;  %4950 = vmatprep.mubr.msk.bf16.mxu0 %vm662_vm4, %v5697_v35 }
  0xf0   : > { %4944 = vmatprep.subr.bf16.mxu0 %v5291_v13  ;;  %4980 = vmatprep.subr.bf16.mxu1 %v5305_v23 }
  0xf1   : > { %4981 = vmatpush3.bf16.msra.mxu1 %v5305_v23  ;;  %v5314_v23 = vld [vmem:[%s6514_s2 + $0x80] sm:$0xff]  }
  0xf2   : > { %4986 = vmatprep.subr.bf16.mxu1 %v5306_v24 }
  0xf3   : > { %4945 = vmatpush3.bf16.msra.mxu0 %v5291_v13  ;;  %v5308_v13 = vld [vmem:[%s6514_s2 + $0x10] sm:$0xff]  }
  0xf4   : > { %4946 = vmatprep.subr.bf16.mxu0 %v5292_v14 }
  0xf7   : > { %4947 = vmatpush3.bf16.msra.mxu0 %v5292_v14 }
  0xf8   : > { %4948 = vmatprep.subr.bf16.mxu0 %v5293_v15 }
  0xfb   : > { %4949 = vmatpush3.bf16.msra.mxu0 %v5293_v15 }
  0xfc   : > { %4954 = vmatprep.subr.bf16.mxu0 %v5294_v16 }
  0xfe   : > { %4951 = vmatmul.mubr.msk.bf16.vlgmr.msra.gmra.mrb[0].mxu0 %vm662_vm4, %v5703_v39 }
  0xff   : > { %4955 = vmatpush3.bf16.msra.mxu0 %v5294_v16  ;;  %4962 = vmatprep.mubr.msk.bf16.mxu0 %vm662_vm4, %v5700_v38 }
 0x100   : > { %4956 = vmatprep.subr.bf16.mxu0 %v5295_v17 }
 0x103   : > { %4957 = vmatpush3.bf16.msra.mxu0 %v5295_v17  ;;  %v5340_v17 = vld [vmem:[%s6515_s3 + $0x50] sm:$0xff]  }
 0x104   : > { %4958 = vmatprep.subr.bf16.mxu0 %v5296_v18 }
 0x107   : > { %4959 = vmatpush3.bf16.msra.mxu0 %v5296_v18  ;;  %v5309_v18 = vld [vmem:[%s6514_s2 + $0x18] sm:$0xff]  }
 0x108   : > { %4960 = vmatprep.subr.bf16.mxu0 %v5297_v19 }
 0x10b   : > { %4961 = vmatpush3.bf16.msra.mxu0 %v5297_v19  ;;  %v5310_v19 = vld [vmem:[%s6514_s2 + $0x20] sm:$0xff]  }
 0x10c   : > { %5066 = vmatprep.subr.bf16.mxu0 %v5338_v2 }
 0x10e   : > { %4963 = vmatmul.mubr.msk.bf16.vlgmr.msra.gmra.mrb[0].mxu0 %vm662_vm4, %v5705_v40 }
 0x10f   : > { %5067 = vmatpush3.bf16.msra.mxu0 %v5338_v2 }
 0x110   : > { %5068 = vmatprep.subr.bf16.mxu0 %v5339_v59 }
 0x113   : > { %5069 = vmatpush3.bf16.msra.mxu0 %v5339_v59 }
 0x114   : > { %5070 = vmatprep.subr.bf16.mxu0 %v5340_v17 }
 0x117   : > { %5071 = vmatpush3.bf16.msra.mxu0 %v5340_v17 }
 0x1e1   : > { %v4964_v25 = vpop.f32.mrb[0].mxu0 }
 0x1e2   : > { %v1295_v26 = vpop.f32.mrb[1].mxu0 }
 0x1e3   : > { %v4965_v27 = vpop.f32.mrb[2].mxu0 }
 0x1e4   : > { %v1315_v28 = vpack.c.bf16 %v4965_v27, %v4964_v25  ;;  %v1298_v29 = vpop.f32.mrb[3].mxu0 }
 0x1e5   : > { %v1314_v30 = vpack.c.bf16 %v1298_v29, %v1295_v26  ;;  %v5315_v26 = vld [vmem:[%s6514_s2 + $0x88] sm:$0xff]   ;;  %v5317_v29 = vld [vmem:[%s6514_s2 + $0x98] sm:$0xff]  }
 0x1e6   : > { %v5818_v31 = vrot.slane %v1315_v28, 7  ;;  %v5316_v28 = vld [vmem:[%s6514_s2 + $0x90] sm:$0xff]  }
 0x1e7   : > { %v1318_v32 = vrot.slane %v1314_v30, 7  ;;  %v5318_v30 = vld [vmem:[%s6514_s2 + $0xa0] sm:$0xff]  }
 0x1e8   : > { %v1326_v33 = vsel %vm1320_vm10, 0, %v5818_v31  ;;  %v1329_v34 = vsel %vm1320_vm10, %v5818_v31, 0 }
 0x1e9   : > { %v1375_v35 = vshll.u32 %v1326_v33, 16  ;;  %v5825_v36 = vsel %vm1320_vm10, 0, %v1318_v32  ;;  %v5828_v37 = vsel %vm1320_vm10, %v1318_v32, 0  ;;  %v1373_v41 = vshrl.u32 %v1326_v33, 16 }
 0x1ea   : > { %v1363_v38 = vshrl.u32 %v5825_v36, 16  ;;  %v1365_v39 = vshll.u32 %v5825_v36, 16  ;;  %v1369_v40 = vshll.u32 %v5828_v37, 16  ;;  %v1379_v43 = vshll.u32 %v1329_v34, 16 }
 0x1eb   : > { %v1377_v42 = vrot.slane %v1375_v35, 1  ;;  %v1738_v44 = vshrl.u32 %v1329_v34, 16  ;;  %v1603_v46 = vrot.slane %v1326_v33, 1  ;;  %v1604_v47 = vrot.slane %v1329_v34, 1 }
 0x1ec   : > { %v1367_v45 = vrot.slane %v1365_v39, 1  ;;  %v1371_v48 = vrot.slane %v1369_v40, 1  ;;  %v1381_v50 = vrot.slane %v1379_v43, 1  ;;  %v1726_v51 = vrot.slane %v1363_v38, 1 }
 0x1ed   : > { %v1378_v49 = vor.u32 %v1377_v42, %v1373_v41  ;;  %v5834_v53 = vsel %vm808_vm8, %v1603_v46, %v1604_v47  ;;  %v1727_v54 = vrot.slane %v1365_v39, 2  ;;  %v1729_v55 = vshrl.u32 %v5828_v37, 16  ;;  %v5327_v39 = vld [vmem:[%s6514_s2 + $0xe8] sm:$0xff]   ;;  %v5330_v42 = vld [vmem:[%s6514_s2 + $0x100] sm:$0xff]  }
 0x1ee   : > { %v1368_v52 = vor.u32 %v1367_v45, %v1363_v38  ;;  %v1732_v57 = vrot.slane %v1369_v40, 2  ;;  %v1735_v58 = vrot.slane %v1373_v41, 1  ;;  %v1736_v63 = vrot.slane %v1375_v35, 2  ;;  %v5323_v35 = vld [vmem:[%s6514_s2 + $0xc8] sm:$0xff]   ;;  %v5326_v38 = vld [vmem:[%s6514_s2 + $0xe0] sm:$0xff]   ;;  %v5328_v40 = vld [vmem:[%s6514_s2 + $0xf0] sm:$0xff]  }
 0x1ef   : > { %v1382_v56 = vsel %vm613_vm3, %v1378_v49, %v1381_v50  ;;  %v1728_v4 = vor.u32 %v1727_v54, %v1726_v51  ;;  %v1731_v6 = vrot.slane %v1729_v55, 1  ;;  %v1740_v7 = vrot.slane %v1738_v44, 1  ;;  %v5329_v41 = vld [vmem:[%s6514_s2 + $0xf8] sm:$0xff]   ;;  %v5332_v44 = vld [vmem:[%s6514_s2 + $0x110] sm:$0xff]   ;;  %v5334_v46 = vld [vmem:[%s6514_s2 + $0x120] sm:$0xff]  }
 0x1f0   : > { %v1372_v60 = vsel %vm613_vm3, %v1368_v52, %v1371_v48  ;;  %v1737_v8 = vor.u32 %v1736_v63, %v1735_v58  ;;  %v1741_v9 = vrot.slane %v1379_v43, 2  ;;  %v1864_v10 = vrot.slane %v5825_v36, 2  ;;  %v5331_v43 = vld [vmem:[%s6514_s2 + $0x108] sm:$0xff]   ;;  %v5333_v45 = vld [vmem:[%s6514_s2 + $0x118] sm:$0xff]   ;;  %v5336_v48 = vld [vmem:[%s6514_s2 + $0x130] sm:$0xff]  }
 0x1f1   : > { %4982 = vmatprep.mubr.bf16.mxu1 %v1372_v60  ;;  %v1865_v11 = vrot.slane %v5828_v37, 2  ;;  %v1733_v12 = vor.u32 %v1732_v57, %v1731_v6  ;;  %v1867_v62 = vrot.slane %v1326_v33, 2  ;;  %v1868_v1 = vrot.slane %v1329_v34, 2  ;;  %v5321_v33 = vld [vmem:[%s6514_s2 + $0xb8] sm:$0xff]   ;;  %v5322_v34 = vld [vmem:[%s6514_s2 + $0xc0] sm:$0xff]   ;;  %v5335_v47 = vld [vmem:[%s6514_s2 + $0x128] sm:$0xff]  }
 0x1f2   : > { %4983 = vmatmul.mubr.bf16.vlgmr.msra.gmra.mrb[0].mxu1 %v1382_v56  ;;  %v1742_v61 = vor.u32 %v1741_v9, %v1740_v7  ;;  %v1601_v25 = vrot.slane %v5828_v37, 1  ;;  %v5325_v37 = vld [vmem:[%s6514_s2 + $0xd8] sm:$0xff]   ;;  %v5342_v51 = vld [vmem:[%s6515_s3 + $0x60] sm:$0xff]   ;;  %v5343_v52 = vld [vmem:[%s6515_s3 + $0x68] sm:$0xff]  }
 0x1f3   : > { %4987 = vmatpush3.bf16.msra.mxu1 %v5306_v24  ;;  %5002 = vmatprep.mubr.msk.bf16.mxu1 %vm5840_vm11, %v1318_v32  ;;  %v5858_v5 = vsel %vm1018_vm5, %v1864_v10, %v1865_v11  ;;  %v1734_v14 = vsel %vm907_vm9, %v1728_v4, %v1733_v12  ;;  %v5865_v15 = vsel %vm1018_vm5, %v1867_v62, %v1868_v1  ;;  %v1600_v24 = vrot.slane %v5825_v36, 1  ;;  %v5320_v32 = vld [vmem:[%s6514_s2 + $0xb0] sm:$0xff]   ;;  %v5337_v49 = vld [vmem:[%s6514_s2 + $0x138] sm:$0xff]   ;;  %v5346_v55 = vld [vmem:[%s6515_s3] sm:$0xff]  }
 0x1f4   : > { %4988 = vmatprep.subr.bf16.mxu1 %v5307_v3  ;;  %v5868_v16 = vsel %vm907_vm9, %v1737_v8, %v1742_v61  ;;  %v5324_v36 = vld [vmem:[%s6514_s2 + $0xd0] sm:$0xff]   ;;  %v5341_v50 = vld [vmem:[%s6515_s3 + $0x58] sm:$0xff]  }
 0x1f5   : > { %v1602_v27 = vsel %vm808_vm8, %v1600_v24, %v1601_v25  ;;  %5072 = vmatprep.subr.bf16.mxu0 %v5341_v50  ;;  %v5345_v54 = vld [vmem:[%s6515_s3 + $0x78] sm:$0xff]  }
 0x1f6   : > { %5073 = vmatpush3.bf16.msra.mxu0 %v5341_v50  ;;  %v5366_v50 = vld [vmem:[%s6517_s5] sm:$0xff]  }
 0x1f7   : > { %4989 = vmatpush3.bf16.msra.mxu1 %v5307_v3  ;;  %5074 = vmatprep.subr.bf16.mxu0 %v5342_v51 }
 0x1f8   : > { %4990 = vmatprep.subr.bf16.mxu1 %v5308_v13 }
 0x1fa   : > { %5075 = vmatpush3.bf16.msra.mxu0 %v5342_v51  ;;  %v5374_v51 = vld [vmem:[%s6520_s8 + $0x80] ss:$8 sps:$4 sm:$0xff]  }
 0x1fb   : > { %4991 = vmatpush3.bf16.msra.mxu1 %v5308_v13  ;;  %5076 = vmatprep.subr.bf16.mxu0 %v5343_v52 }
 0x1fc   : > { %4992 = vmatprep.subr.bf16.mxu1 %v5309_v18 }
 0x1fe   : > { %5077 = vmatpush3.bf16.msra.mxu0 %v5343_v52  ;;  %v5376_v52 = vld [vmem:[%s6520_s8 + $0x84] ss:$8 sps:$4 sm:$0xff]  }
 0x1ff   : > { %4993 = vmatpush3.bf16.msra.mxu1 %v5309_v18 }
 0x200   : > { %4994 = vmatprep.subr.bf16.mxu1 %v5310_v19 }
 0x203   : > { %4995 = vmatpush3.bf16.msra.mxu1 %v5310_v19 }
 0x204   : > { %4996 = vmatprep.subr.bf16.mxu1 %v5311_v20 }
 0x207   : > { %4997 = vmatpush3.bf16.msra.mxu1 %v5311_v20 }
 0x208   : > { %4998 = vmatprep.subr.bf16.mxu1 %v5312_v21 }
 0x20b   : > { %4999 = vmatpush3.bf16.msra.mxu1 %v5312_v21 }
 0x20c   : > { %5000 = vmatprep.subr.bf16.mxu1 %v5313_v22 }
 0x20f   : > { %5001 = vmatpush3.bf16.msra.mxu1 %v5313_v22 }
 0x210   : > { %5006 = vmatprep.subr.bf16.mxu1 %v5314_v23 }
 0x212   : > { %5003 = vmatmul.mubr.msk.bf16.vlgmr.msra.gmra.mrb[0].mxu1 %vm5840_vm11, %v5818_v31  ;;  %v5319_v31 = vld [vmem:[%s6514_s2 + $0xa8] sm:$0xff]  }
 0x213   : > { %5007 = vmatpush3.bf16.msra.mxu1 %v5314_v23  ;;  %5022 = vmatprep.mubr.bf16.mxu1 %v1602_v27  ;;  %v5347_v27 = vld [vmem:[%s6515_s3 + $0x8] sm:$0xff]  }
 0x214   : > { %5008 = vmatprep.subr.bf16.mxu1 %v5315_v26 }
 0x217   : > { %5009 = vmatpush3.bf16.msra.mxu1 %v5315_v26 }
 0x218   : > { %5010 = vmatprep.subr.bf16.mxu1 %v5316_v28 }
 0x21b   : > { %5011 = vmatpush3.bf16.msra.mxu1 %v5316_v28 }
 0x21c   : > { %5012 = vmatprep.subr.bf16.mxu1 %v5317_v29 }
 0x21f   : > { %5013 = vmatpush3.bf16.msra.mxu1 %v5317_v29  ;;  %v5348_v29 = vld [vmem:[%s6515_s3 + $0x10] sm:$0xff]  }
 0x220   : > { %5014 = vmatprep.subr.bf16.mxu1 %v5318_v30 }
 0x223   : > { %5015 = vmatpush3.bf16.msra.mxu1 %v5318_v30  ;;  %v5349_v30 = vld [vmem:[%s6515_s3 + $0x18] sm:$0xff]  }
 0x224   : > { %5016 = vmatprep.subr.bf16.mxu1 %v5319_v31 }
 0x227   : > { %5017 = vmatpush3.bf16.msra.mxu1 %v5319_v31  ;;  %v5350_v31 = vld [vmem:[%s6515_s3 + $0x20] sm:$0xff]  }
 0x228   : > { %5018 = vmatprep.subr.bf16.mxu1 %v5320_v32 }
 0x22b   : > { %5019 = vmatpush3.bf16.msra.mxu1 %v5320_v32  ;;  %v5351_v32 = vld [vmem:[%s6515_s3 + $0x28] sm:$0xff]  }
 0x22c   : > { %5020 = vmatprep.subr.bf16.mxu1 %v5321_v33 }
 0x22f   : > { %5021 = vmatpush3.bf16.msra.mxu1 %v5321_v33  ;;  %v5352_v33 = vld [vmem:[%s6515_s3 + $0x30] sm:$0xff]  }
 0x230   : > { %5026 = vmatprep.subr.bf16.mxu1 %v5322_v34 }
 0x232   : > { %5023 = vmatmul.mubr.bf16.vlgmr.msra.gmra.mrb[0].mxu1 %v5834_v53  ;;  %v5344_v53 = vld [vmem:[%s6515_s3 + $0x70] sm:$0xff]  }
 0x233   : > { %5027 = vmatpush3.bf16.msra.mxu1 %v5322_v34  ;;  %5042 = vmatprep.mubr.bf16.mxu1 %v1734_v14  ;;  %v5353_v34 = vld [vmem:[%s6515_s3 + $0x38] sm:$0xff]  }
 0x234   : > { %5028 = vmatprep.subr.bf16.mxu1 %v5323_v35  ;;  %5078 = vmatprep.subr.bf16.mxu0 %v5344_v53 }
 0x235   : > { %5079 = vmatpush3.bf16.msra.mxu0 %v5344_v53  ;;  %v5379_v53 = vld [vmem:[%s6520_s8 + $0x94] ss:$8 sps:$4 sm:$0xff]  }
 0x236   : > { %5080 = vmatprep.subr.bf16.mxu0 %v5345_v54 }
 0x237   : > { %5029 = vmatpush3.bf16.msra.mxu1 %v5323_v35  ;;  %v5354_v35 = vld [vmem:[%s6515_s3 + $0x80] sm:$0xff]  }
 0x238   : > { %5030 = vmatprep.subr.bf16.mxu1 %v5324_v36 }
 0x239   : > { %5081 = vmatpush3.bf16.msra.mxu0 %v5345_v54  ;;  %v5377_v54 = vld [vmem:[%s6520_s8 + $0x90] ss:$8 sps:$4 sm:$0xff]  }
 0x23a   : > { %5086 = vmatprep.subr.bf16.mxu0 %v5346_v55 }
 0x23b   : > { %5031 = vmatpush3.bf16.msra.mxu1 %v5324_v36 }
 0x23c   : > { %5032 = vmatprep.subr.bf16.mxu1 %v5325_v37 }
 0x23f   : > { %5033 = vmatpush3.bf16.msra.mxu1 %v5325_v37 }
 0x240   : > { %5034 = vmatprep.subr.bf16.mxu1 %v5326_v38 }
 0x243   : > { %5035 = vmatpush3.bf16.msra.mxu1 %v5326_v38  ;;  %v5355_v38 = vld [vmem:[%s6515_s3 + $0x88] sm:$0xff]  }
 0x244   : > { %5036 = vmatprep.subr.bf16.mxu1 %v5327_v39 }
 0x247   : > { %5037 = vmatpush3.bf16.msra.mxu1 %v5327_v39 }
 0x248   : > { %5038 = vmatprep.subr.bf16.mxu1 %v5328_v40 }
 0x24b   : > { %5039 = vmatpush3.bf16.msra.mxu1 %v5328_v40  ;;  %v5356_v40 = vld [vmem:[%s6515_s3 + $0x90] sm:$0xff]  }
 0x24c   : > { %5040 = vmatprep.subr.bf16.mxu1 %v5329_v41 }
 0x24f   : > { %5041 = vmatpush3.bf16.msra.mxu1 %v5329_v41  ;;  %v5357_v41 = vld [vmem:[%s6515_s3 + $0x98] sm:$0xff]  }
 0x250   : > { %5046 = vmatprep.subr.bf16.mxu1 %v5330_v42 }
 0x252   : > { %5043 = vmatmul.mubr.bf16.vlgmr.msra.gmra.mrb[0].mxu1 %v5868_v16 }
 0x253   : > { %5047 = vmatpush3.bf16.msra.mxu1 %v5330_v42  ;;  %5062 = vmatprep.mubr.bf16.mxu1 %v5858_v5  ;;  %v5358_v42 = vld [vmem:[%s6515_s3 + $0xa0] sm:$0xff]  }
 0x254   : > { %5048 = vmatprep.subr.bf16.mxu1 %v5331_v43 }
 0x257   : > { %5049 = vmatpush3.bf16.msra.mxu1 %v5331_v43  ;;  %v5359_v43 = vld [vmem:[%s6515_s3 + $0xa8] sm:$0xff]  }
 0x258   : > { %5050 = vmatprep.subr.bf16.mxu1 %v5332_v44 }
 0x25b   : > { %5051 = vmatpush3.bf16.msra.mxu1 %v5332_v44  ;;  %v5360_v44 = vld [vmem:[%s6515_s3 + $0xb0] sm:$0xff]  }
 0x25c   : > { %5052 = vmatprep.subr.bf16.mxu1 %v5333_v45 }
 0x25f   : > { %5053 = vmatpush3.bf16.msra.mxu1 %v5333_v45  ;;  %v5361_v45 = vld [vmem:[%s6515_s3 + $0xb8] sm:$0xff]  }
 0x260   : > { %5054 = vmatprep.subr.bf16.mxu1 %v5334_v46 }
 0x263   : > { %5055 = vmatpush3.bf16.msra.mxu1 %v5334_v46  ;;  %v5362_v46 = vld [vmem:[%s6517_s5 + $0x20] sm:$0xff]  }
 0x264   : > { %5056 = vmatprep.subr.bf16.mxu1 %v5335_v47 }
 0x267   : > { %5057 = vmatpush3.bf16.msra.mxu1 %v5335_v47  ;;  %v5363_v47 = vld [vmem:[%s6517_s5 + $0x28] sm:$0xff]  }
 0x268   : > { %5058 = vmatprep.subr.bf16.mxu1 %v5336_v48 }
 0x26b   : > { %5059 = vmatpush3.bf16.msra.mxu1 %v5336_v48  ;;  %v5364_v48 = vld [vmem:[%s6517_s5 + $0x30] sm:$0xff]  }
 0x26c   : > { %5060 = vmatprep.subr.bf16.mxu1 %v5337_v49 }
 0x26f   : > { %5061 = vmatpush3.bf16.msra.mxu1 %v5337_v49  ;;  %v5365_v49 = vld [vmem:[%s6517_s5 + $0x38] sm:$0xff]  }
 0x270   : > { %5126 = vmatprep.subr.bf16.mxu1 %v5362_v46 }
 0x272   : > { %5063 = vmatmul.mubr.bf16.vlgmr.msra.gmra.mrb[0].mxu1 %v5865_v15 }
 0x273   : > { %5127 = vmatpush3.bf16.msra.mxu1 %v5362_v46  ;;  %v5382_v46 = vld [vmem:[%s6520_s8 + $0xa4] ss:$8 sps:$4 sm:$0xff]  }
 0x274   : > { %5128 = vmatprep.subr.bf16.mxu1 %v5363_v47 }
 0x277   : > { %5129 = vmatpush3.bf16.msra.mxu1 %v5363_v47  ;;  %v5380_v47 = vld [vmem:[%s6520_s8 + $0xa0] ss:$8 sps:$4 sm:$0xff]  }
 0x278   : > { %5130 = vmatprep.subr.bf16.mxu1 %v5364_v48 }
 0x27b   : > { %5131 = vmatpush3.bf16.msra.mxu1 %v5364_v48  ;;  %v5385_v48 = vld [vmem:[%s6520_s8 + $0xb4] ss:$8 sps:$4 sm:$0xff]  }
 0x27c   : > { %5132 = vmatprep.subr.bf16.mxu1 %v5365_v49 }
 0x27f   : > { %5133 = vmatpush3.bf16.msra.mxu1 %v5365_v49  ;;  %v5383_v49 = vld [vmem:[%s6520_s8 + $0xb0] ss:$8 sps:$4 sm:$0xff]  }
 0x280   : > { %5138 = vmatprep.subr.bf16.mxu1 %v5366_v50 }
 0x345   : > { %v5064_v56 = vpop.f32.mrb[0].mxu1 }
 0x346   : > { %v1954_v57 = vpop.f32.mrb[1].mxu1 }
 0x347   : > { %v5065_v58 = vpop.f32.mrb[2].mxu1 }
 0x348   : > { %v1974_v63 = vpack.c.bf16 %v5065_v58, %v5064_v56  ;;  %v1957_v60 = vpop.f32.mrb[3].mxu1 }
 0x349   : > { %v1973_v0 = vpack.c.bf16 %v1957_v60, %v1954_v57 }
 0x34a   : > { %v1983_v3 = vshrl.u32 %v1974_v63, 16  ;;  %v1986_v8 = vshll.u32 %v1974_v63, 16 }
 0x34b   : > { %v1976_v4 = vshrl.u32 %v1973_v0, 16  ;;  %v1979_v10 = vshll.u32 %v1973_v0, 16 }
 0x34c   : > { %v1985_v7 = vrot.slane %v1983_v3, 7 }
 0x34d   : > { %v1978_v9 = vrot.slane %v1976_v4, 7 }
 0x34e   : > { %v1988_v11 = vor.u32 %v1986_v8, %v1985_v7  ;;  %v1999_v12 = vsel %vm5989_vm13, %v1985_v7, 0 }
 0x34f   : > { %v1981_v62 = vor.u32 %v1979_v10, %v1978_v9  ;;  %v1998_v1 = vsel %vm5989_vm13, %v1978_v9, 0  ;;  %v2053_v5 = vshll.u32 %v1999_v12, 16  ;;  %v2278_v15 = vrot.slane %v1999_v12, 1 }
 0x350   : > { %v1997_v2 = vsel %vm5989_vm13, 0, %v1988_v11  ;;  %v2041_v13 = vshll.u32 %v1998_v1, 16  ;;  %v2275_v37 = vrot.slane %v1998_v1, 1 }
 0x351   : > { %v1996_v59 = vsel %vm5989_vm13, 0, %v1981_v62  ;;  %v2048_v61 = vshll.u32 %v1997_v2, 16  ;;  %v2046_v16 = vshrl.u32 %v1997_v2, 16  ;;  %v2277_v18 = vrot.slane %v1997_v2, 1 }
 0x352   : > { %v2036_v14 = vshll.u32 %v1996_v59, 16  ;;  %v2034_v19 = vshrl.u32 %v1996_v59, 16  ;;  %v2043_v24 = vrot.slane %v2041_v13, 1  ;;  %v2055_v25 = vrot.slane %v2053_v5, 1 }
 0x353   : > { %v2050_v17 = vrot.slane %v2048_v61, 1  ;;  %v2279_v22 = vsel %vm808_vm8, %v2277_v18, %v2278_v15  ;;  %v2274_v36 = vrot.slane %v1996_v59, 1 }
 0x354   : > { %v2038_v20 = vrot.slane %v2036_v14, 1 }
 0x355   : > { %v2051_v21 = vor.u32 %v2050_v17, %v2046_v16  ;;  %v2276_v39 = vsel %vm808_vm8, %v2274_v36, %v2275_v37  ;;  %v5370_v36 = vld [vmem:[%s6517_s5 + $0x40] sm:$0xff]  }
 0x356   : > { %v2039_v23 = vor.u32 %v2038_v20, %v2034_v19 }
 0x357   : > { %v2056_v28 = vsel %vm613_vm3, %v2051_v21, %v2055_v25 }
 0x358   : > { %v2044_v26 = vsel %vm613_vm3, %v2039_v23, %v2043_v24 }
 0x359   : > { %5082 = vmatprep.mubr.bf16.mxu0 %v2044_v26 }
 0x35a   : > { %5083 = vmatmul.mubr.bf16.vlgmr.msra.gmra.mrb[4].mxu0 %v2056_v28 }
 0x35b   : > { %5087 = vmatpush3.bf16.msra.mxu0 %v5346_v55  ;;  %5102 = vmatprep.mubr.bf16.mxu0 %v1996_v59  ;;  %v4381_v55 = vld [vmem:[%s6516_s4] ss:$0 sm:$0xff] }
 0x35c   : > { %5088 = vmatprep.subr.bf16.mxu0 %v5347_v27 }
 0x35f   : > { %5089 = vmatpush3.bf16.msra.mxu0 %v5347_v27 }
 0x360   : > { %5090 = vmatprep.subr.bf16.mxu0 %v5348_v29 }
 0x363   : > { %5091 = vmatpush3.bf16.msra.mxu0 %v5348_v29 }
 0x364   : > { %5092 = vmatprep.subr.bf16.mxu0 %v5349_v30 }
 0x367   : > { %5093 = vmatpush3.bf16.msra.mxu0 %v5349_v30 }
 0x368   : > { %5094 = vmatprep.subr.bf16.mxu0 %v5350_v31 }
 0x36b   : > { %5095 = vmatpush3.bf16.msra.mxu0 %v5350_v31 }
 0x36c   : > { %5096 = vmatprep.subr.bf16.mxu0 %v5351_v32 }
 0x36f   : > { %5097 = vmatpush3.bf16.msra.mxu0 %v5351_v32  ;;  %v5367_v32 = vld [vmem:[%s6517_s5 + $0x8] sm:$0xff]  }
 0x370   : > { %5098 = vmatprep.subr.bf16.mxu0 %v5352_v33 }
 0x373   : > { %5099 = vmatpush3.bf16.msra.mxu0 %v5352_v33 }
 0x374   : > { %5100 = vmatprep.subr.bf16.mxu0 %v5353_v34 }
 0x377   : > { %5101 = vmatpush3.bf16.msra.mxu0 %v5353_v34  ;;  %v5368_v34 = vld [vmem:[%s6517_s5 + $0x10] sm:$0xff]  }
 0x378   : > { %5106 = vmatprep.subr.bf16.mxu0 %v5354_v35 }
 0x37a   : > { %5103 = vmatmul.mubr.bf16.vlgmr.msra.gmra.mrb[4].mxu0 %v1997_v2 }
 0x37b   : > { %5107 = vmatpush3.bf16.msra.mxu0 %v5354_v35  ;;  %5122 = vmatprep.mubr.bf16.mxu0 %v2276_v39  ;;  %v5369_v35 = vld [vmem:[%s6517_s5 + $0x18] sm:$0xff]   ;;  %v5371_v39 = vld [vmem:[%s6517_s5 + $0x48] sm:$0xff]  }
 0x37c   : > { %5108 = vmatprep.subr.bf16.mxu0 %v5355_v38 }
 0x37f   : > { %5109 = vmatpush3.bf16.msra.mxu0 %v5355_v38 }
 0x380   : > { %5110 = vmatprep.subr.bf16.mxu0 %v5356_v40 }
 0x383   : > { %5111 = vmatpush3.bf16.msra.mxu0 %v5356_v40 }
 0x384   : > { %5112 = vmatprep.subr.bf16.mxu0 %v5357_v41 }
 0x387   : > { %5113 = vmatpush3.bf16.msra.mxu0 %v5357_v41  ;;  %v5372_v41 = vld [vmem:[%s6517_s5 + $0x50] sm:$0xff]  }
 0x388   : > { %5114 = vmatprep.subr.bf16.mxu0 %v5358_v42 }
 0x38b   : > { %5115 = vmatpush3.bf16.msra.mxu0 %v5358_v42  ;;  %v5373_v42 = vld [vmem:[%s6517_s5 + $0x58] sm:$0xff]  }
 0x38c   : > { %5116 = vmatprep.subr.bf16.mxu0 %v5359_v43 }
 0x38f   : > { %5117 = vmatpush3.bf16.msra.mxu0 %v5359_v43 }
 0x390   : > { %5118 = vmatprep.subr.bf16.mxu0 %v5360_v44 }
 0x393   : > { %5119 = vmatpush3.bf16.msra.mxu0 %v5360_v44 }
 0x394   : > { %5120 = vmatprep.subr.bf16.mxu0 %v5361_v45 }
 0x397   : > { %5121 = vmatpush3.bf16.msra.mxu0 %v5361_v45 }
 0x398   : > { %2918 = vmatprep.subr.bf16.mxu0 %v5376_v52  ;;  %v5391_v52 = vld [vmem:[%s6520_s8 + $0xd4] ss:$8 sps:$4 sm:$0xff]  }
 0x39a   : > { %5123 = vmatmul.mubr.bf16.vlgmr.msra.gmra.mrb[4].mxu0 %v2279_v22 }
 0x39b   : > { %2919 = vmatpush1.bf16.msra.mxu0 %v5374_v51  ;;  %v5388_v51 = vld [vmem:[%s6520_s8 + $0xc4] ss:$8 sps:$4 sm:$0xff]  }
 0x39c   : > { %2920 = vmatprep.subr.bf16.mxu0 %v5379_v53  ;;  %v5510_v53 = vmov 0  }
 0x39d   : > { %2950 = vmatprep.mubr.bf16.mxu0 %v5510_v53 }
 0x39f   : > { %2921 = vmatpush1.bf16.msra.mxu0 %v5377_v54  ;;  %v5389_v54 = vld [vmem:[%s6520_s8 + $0xd0] ss:$8 sps:$4 sm:$0xff]  }
 0x3a0   : > { %2922 = vmatprep.subr.bf16.mxu0 %v5382_v46 }
 0x3a3   : > { %2923 = vmatpush1.bf16.msra.mxu0 %v5380_v47  ;;  %v5398_v47 = vld [vmem:[%s6520_s8] ss:$8 sps:$4 sm:$0xff]  }
 0x3a4   : > { %2924 = vmatprep.subr.bf16.mxu0 %v5385_v48 }
 0x3a7   : > { %2925 = vmatpush1.bf16.msra.mxu0 %v5383_v49 }
 0x3a8   : > { %2926 = vmatprep.subr.bf16.mxu0 %v5388_v51 }
 0x46d   : > { %v5124_v56 = vpop.f32.mrb[4].mxu0 }
 0x46e   : > { %v2392_v57 = vadd.f32 %v5124_v56, %v4381_v55  ;;  %v2364_v58 = vpop.f32.mrb[5].mxu0  ;;  %v5392_v56 = vld [vmem:[%s6520_s8 + $0xe0] ss:$8 sps:$4 sm:$0xff]  }
 0x46f   : > { %v2390_v63 = vadd.f32 %v4381_v55, %v2364_v58  ;;  %v5125_v60 = vpop.f32.mrb[6].mxu0  ;;  %v5395_v58 = vld [vmem:[%s6520_s8 + $0xf0] ss:$8 sps:$4 sm:$0xff]  }
 0x470   : > { %v2393_v0 = vadd.f32 %v5125_v60, %v4381_v55  ;;  %v2367_v3 = vpop.f32.mrb[7].mxu0  ;;  %v2396_v7 = vmax.f32 %v2392_v57, 0.0  ;;  %v5397_v57 = vld [vmem:[%s6520_s8 + $0xf4] ss:$8 sps:$4 sm:$0xff]   ;;  %v5446_v60 = vld [vmem:[%s6523_s11 + $0xc0] sm:$0xff]  }
 0x471   : > { %v2391_v4 = vadd.f32 %v4381_v55, %v2367_v3  ;;  %v2394_v9 = vmax.f32 %v2390_v63, 0.0  ;;  %v5394_v55 = vld [vmem:[%s6520_s8 + $0xe4] ss:$8 sps:$4 sm:$0xff]  }
 0x472   : > { %v2397_v8 = vmax.f32 %v2393_v0, 0.0  ;;  %v5400_v63 = vld [vmem:[%s6520_s8 + $0x4] ss:$8 sps:$4 sm:$0xff]  }
 0x473   : > { %v2395_v10 = vmax.f32 %v2391_v4, 0.0  ;;  %v5447_v0 = vld [vmem:[%s6523_s11 + $0x80] sm:$0xff]   ;;  %v5448_v3 = vld [vmem:[%s6523_s11 + $0xc8] sm:$0xff]  }
 0x474   : > { %v2399_v11 = vpack.c.bf16 %v2397_v8, %v2396_v7  ;;  %v4416_v4 = vld [vmem:[%s6518_s6] ss:$0 sm:$0xff] }
 0x475   : > { %v2398_v12 = vpack.c.bf16 %v2395_v10, %v2394_v9  ;;  %v4417_v8 = vld [vmem:[%s6519_s7] ss:$0 sm:$0xff] }
 0x476   : > { %v2408_v62 = vshrl.u32 %v2399_v11, 16  ;;  %v2411_v59 = vshll.u32 %v2399_v11, 16 }
 0x477   : > { %v2401_v1 = vshrl.u32 %v2398_v12, 16  ;;  %v2404_v5 = vshll.u32 %v2398_v12, 16 }
 0x478   : > { %v2410_v2 = vrot.slane %v2408_v62, 7 }
 0x479   : > { %v2403_v61 = vrot.slane %v2401_v1, 7 }
 0x47a   : > { %v2413_v13 = vor.u32 %v2411_v59, %v2410_v2  ;;  %v2421_v17 = vsel %vm5989_vm13, %v2410_v2, 0 }
 0x47b   : > { %v2406_v14 = vor.u32 %v2404_v5, %v2403_v61  ;;  %v2420_v15 = vsel %vm5989_vm13, %v2403_v61, 0  ;;  %v2459_v22 = vshll.u32 %v2421_v17, 16  ;;  %v2636_v44 = vrot.slane %v2421_v17, 1 }
 0x47c   : > { %v2419_v16 = vsel %vm5989_vm13, 0, %v2413_v13  ;;  %v2447_v21 = vshll.u32 %v2420_v15, 16  ;;  %v2633_v38 = vrot.slane %v2420_v15, 1 }
 0x47d   : > { %v2418_v18 = vsel %vm5989_vm13, 0, %v2406_v14  ;;  %v2454_v19 = vshll.u32 %v2419_v16, 16  ;;  %v2452_v23 = vshrl.u32 %v2419_v16, 16  ;;  %v2461_v30 = vrot.slane %v2459_v22, 1 }
 0x47e   : > { %v2442_v20 = vshll.u32 %v2418_v18, 16  ;;  %v2440_v25 = vshrl.u32 %v2418_v18, 16  ;;  %v2449_v29 = vrot.slane %v2447_v21, 1  ;;  %v2632_v37 = vrot.slane %v2418_v18, 1 }
 0x47f   : > { %v2456_v24 = vrot.slane %v2454_v19, 1  ;;  %v2635_v43 = vrot.slane %v2419_v16, 1 }
 0x480   : > { %v2444_v26 = vrot.slane %v2442_v20, 1  ;;  %v2634_v40 = vsel %vm808_vm8, %v2632_v37, %v2633_v38 }
 0x481   : > { %v2457_v27 = vor.u32 %v2456_v24, %v2452_v23  ;;  %v2637_v45 = vsel %vm808_vm8, %v2635_v43, %v2636_v44 }
 0x482   : > { %v2445_v28 = vor.u32 %v2444_v26, %v2440_v25 }
 0x483   : > { %v2462_v33 = vsel %vm613_vm3, %v2457_v27, %v2461_v30 }
 0x484   : > { %v2450_v31 = vsel %vm613_vm3, %v2445_v28, %v2449_v29 }
 0x485   : > { %5134 = vmatprep.mubr.msk.bf16.mxu1 %vm662_vm4, %v2450_v31 }
 0x486   : > { %5135 = vmatmul.mubr.msk.bf16.vlgmr.msra.gmra.mrb[4].mxu1 %vm662_vm4, %v2462_v33 }
 0x487   : > { %5139 = vmatpush3.bf16.msra.mxu1 %v5366_v50  ;;  %5146 = vmatprep.mubr.msk.bf16.mxu1 %vm662_vm4, %v2418_v18  ;;  %v5386_v50 = vld [vmem:[%s6520_s8 + $0xc0] ss:$8 sps:$4 sm:$0xff]  }
 0x488   : > { %5140 = vmatprep.subr.bf16.mxu1 %v5367_v32  ;;  %2927 = vmatpush1.bf16.msra.mxu0 %v5386_v50  ;;  %v5403_v50 = vld [vmem:[%s6520_s8 + $0x14] ss:$8 sps:$4 sm:$0xff]  }
 0x489   : > { %2928 = vmatprep.subr.bf16.mxu0 %v5391_v52 }
 0x48b   : > { %5141 = vmatpush3.bf16.msra.mxu1 %v5367_v32 }
 0x48c   : > { %5142 = vmatprep.subr.bf16.mxu1 %v5368_v34  ;;  %2929 = vmatpush1.bf16.msra.mxu0 %v5389_v54  ;;  %v5401_v54 = vld [vmem:[%s6520_s8 + $0x10] ss:$8 sps:$4 sm:$0xff]  }
 0x48d   : > { %2930 = vmatprep.subr.bf16.mxu0 %v5394_v55 }
 0x48f   : > { %5143 = vmatpush3.bf16.msra.mxu1 %v5368_v34 }
 0x490   : > { %5144 = vmatprep.subr.bf16.mxu1 %v5369_v35  ;;  %2931 = vmatpush1.bf16.msra.mxu0 %v5392_v56 }
 0x491   : > { %2932 = vmatprep.subr.bf16.mxu0 %v5397_v57  ;;  %v5406_v57 = vld [vmem:[%s6520_s8 + $0x24] ss:$8 sps:$4 sm:$0xff]  }
 0x493   : > { %5145 = vmatpush3.bf16.msra.mxu1 %v5369_v35 }
 0x494   : > { %5150 = vmatprep.subr.bf16.mxu1 %v5370_v36  ;;  %2933 = vmatpush1.bf16.msra.mxu0 %v5395_v58 }
 0x495   : > { %3051 = vmatprep.subr.bf16.mxu0 %v5400_v63  ;;  %v5404_v63 = vld [vmem:[%s6520_s8 + $0x20] ss:$8 sps:$4 sm:$0xff]  }
 0x496   : > { %5147 = vmatmul.mubr.msk.bf16.vlgmr.msra.gmra.mrb[4].mxu1 %vm662_vm4, %v2419_v16 }
 0x497   : > { %5151 = vmatpush3.bf16.msra.mxu1 %v5370_v36  ;;  %5158 = vmatprep.mubr.msk.bf16.mxu1 %vm662_vm4, %v2634_v40 }
 0x498   : > { %5152 = vmatprep.subr.bf16.mxu1 %v5371_v39 }
 0x49b   : > { %5153 = vmatpush3.bf16.msra.mxu1 %v5371_v39 }
 0x49c   : > { %5154 = vmatprep.subr.bf16.mxu1 %v5372_v41 }
 0x49f   : > { %5155 = vmatpush3.bf16.msra.mxu1 %v5372_v41 }
 0x4a0   : > { %5156 = vmatprep.subr.bf16.mxu1 %v5373_v42 }
 0x4a3   : > { %5157 = vmatpush3.bf16.msra.mxu1 %v5373_v42 }
 0x4a4   : > { %4798 = vmatprep.subr.bf16.mxu1 %v5446_v60 }
 0x4a6   : > { %5159 = vmatmul.mubr.msk.bf16.vlgmr.msra.gmra.mrb[4].mxu1 %vm662_vm4, %v2637_v45 }
 0x4a7   : > { %4799 = vmatpush3.bf16.msra.mxu1 %v5447_v0  ;;  %v5409_v0 = vld [vmem:[%s6520_s8 + $0x34] ss:$8 sps:$4 sm:$0xff]  }
 0x4a8   : > { %4800 = vmatprep.subr.bf16.mxu1 %v5448_v3 }
 0x579   : > { %v5160_v7 = vpop.f32.mrb[4].mxu1 }
 0x57a   : > { %v2730_v9 = vmul.f32 %v5160_v7, %v4416_v4  ;;  %v2702_v10 = vpop.f32.mrb[5].mxu1  ;;  %v5412_v7 = vld [vmem:[%s6520_s8 + $0x44] ss:$8 sps:$4 sm:$0xff]  }
 0x57b   : > { %v2728_v11 = vmul.f32 %v4416_v4, %v2702_v10  ;;  %v5161_v12 = vpop.f32.mrb[6].mxu1  ;;  %v5413_v10 = vld [vmem:[%s6520_s8 + $0x50] ss:$8 sps:$4 sm:$0xff]  }
 0x57c   : > { %v2741_v62 = vadd.f32 %v4417_v8, %v2730_v9  ;;  %v2731_v1 = vmul.f32 %v5161_v12, %v4416_v4  ;;  %v2705_v2 = vpop.f32.mrb[7].mxu1  ;;  %v5415_v9 = vld [vmem:[%s6520_s8 + $0x54] ss:$8 sps:$4 sm:$0xff]   ;;  %v5416_v12 = vld [vmem:[%s6520_s8 + $0x60] ss:$8 sps:$4 sm:$0xff]  }
 0x57d   : > { %v2739_v59 = vadd.f32 %v4417_v8, %v2728_v11  ;;  %v2729_v61 = vmul.f32 %v4416_v4, %v2705_v2  ;;  %v5407_v4 = vld [vmem:[%s6520_s8 + $0x30] ss:$8 sps:$4 sm:$0xff]   ;;  %v5418_v11 = vld [vmem:[%s6520_s8 + $0x64] ss:$8 sps:$4 sm:$0xff]  }
 0x57e   : > { %v2749_v5 = vmul.f32 0.2, %v2741_v62  ;;  %v2742_v13 = vadd.f32 %v4417_v8, %v2731_v1  ;;  %vm2745_vm14 = vcmp.gt.f32.partialorder %v2741_v62, 0.0  ;;  %v5419_v1 = vld [vmem:[%s6520_s8 + $0x70] ss:$8 sps:$4 sm:$0xff]  }
 0x57f   : > { %v2747_v14 = vmul.f32 0.2, %v2739_v59  ;;  %v2740_v15 = vadd.f32 %v4417_v8, %v2729_v61  ;;  %vm2743_vm15 = vcmp.gt.f32.partialorder %v2739_v59, 0.0  ;;  %v5410_v8 = vld [vmem:[%s6520_s8 + $0x40] ss:$8 sps:$4 sm:$0xff]  }
 0x580   : > { %vm2746_vm0 = vcmp.gt.f32.partialorder %v2742_v13, 0.0  ;;  %v2750_v16 = vmul.f32 0.2, %v2742_v13  ;;  %v2753_v18 = vsel %vm2745_vm14, %v2741_v62, %v2749_v5  ;;  %v5421_v62 = vld [vmem:[%s6520_s8 + $0x74] ss:$8 sps:$4 sm:$0xff]  }
 0x581   : > { %vm2744_vm1 = vcmp.gt.f32.partialorder %v2740_v15, 0.0  ;;  %v2748_v17 = vmul.f32 0.2, %v2740_v15  ;;  %v2751_v20 = vsel %vm2743_vm15, %v2739_v59, %v2747_v14  ;;  %v5424_v2 = vld [vmem:[%s6520_s8 + $0x104] ss:$8 sps:$4 sm:$0xff]  }
 0x582   : > { %v2754_v19 = vsel %vm2746_vm0, %v2742_v13, %v2750_v16  ;;  %v5422_v59 = vld [vmem:[%s6520_s8 + $0x100] ss:$8 sps:$4 sm:$0xff]   ;;  %v5427_v61 = vld [vmem:[%s6520_s8 + $0x114] ss:$8 sps:$4 sm:$0xff]   ;;  %v5425_v5 = vld [vmem:[%s6520_s8 + $0x110] ss:$8 sps:$4 sm:$0xff]  }
 0x583   : > { %v2756_v21 = vpack.c.bf16 %v2754_v19, %v2753_v18  ;;  %v2752_v22 = vsel %vm2744_vm1, %v2740_v15, %v2748_v17  ;;  %v5430_v13 = vld [vmem:[%s6520_s8 + $0x124] ss:$8 sps:$4 sm:$0xff]   ;;  %v5428_v14 = vld [vmem:[%s6520_s8 + $0x120] ss:$8 sps:$4 sm:$0xff]   ;;  %v5433_v15 = vld [vmem:[%s6520_s8 + $0x134] ss:$8 sps:$4 sm:$0xff]  }
 0x584   : > { %v2755_v23 = vpack.c.bf16 %v2752_v22, %v2751_v20  ;;  %v5431_v16 = vld [vmem:[%s6520_s8 + $0x130] ss:$8 sps:$4 sm:$0xff]   ;;  %v5436_v17 = vld [vmem:[%s6520_s8 + $0x144] ss:$8 sps:$4 sm:$0xff]   ;;  %v5434_v18 = vld [vmem:[%s6520_s8 + $0x140] ss:$8 sps:$4 sm:$0xff]  }
 0x585   : > { %v2765_v24 = vshrl.u32 %v2756_v21, 16  ;;  %v2768_v26 = vshll.u32 %v2756_v21, 16  ;;  %v5439_v19 = vld [vmem:[%s6520_s8 + $0x154] ss:$8 sps:$4 sm:$0xff]   ;;  %v5437_v20 = vld [vmem:[%s6520_s8 + $0x150] ss:$8 sps:$4 sm:$0xff]  }
 0x586   : > { %v2758_v25 = vshrl.u32 %v2755_v23, 16  ;;  %v2761_v29 = vshll.u32 %v2755_v23, 16  ;;  %v5442_v21 = vld [vmem:[%s6520_s8 + $0x164] ss:$8 sps:$4 sm:$0xff]   ;;  %v5440_v22 = vld [vmem:[%s6520_s8 + $0x160] ss:$8 sps:$4 sm:$0xff]  }
 0x587   : > { %v2767_v27 = vrot.slane %v2765_v24, 7  ;;  %v5445_v23 = vld [vmem:[%s6520_s8 + $0x174] ss:$8 sps:$4 sm:$0xff]   ;;  %v5443_v24 = vld [vmem:[%s6520_s8 + $0x170] ss:$8 sps:$4 sm:$0xff]  }
 0x588   : > { %v2760_v28 = vrot.slane %v2758_v25, 7  ;;  %v5449_v25 = vld [vmem:[%s6523_s11 + $0x88] sm:$0xff]  }
 0x589   : > { %v2770_v30 = vor.u32 %v2768_v26, %v2767_v27  ;;  %v2778_v34 = vsel %vm5989_vm13, %v2767_v27, 0  ;;  %4801 = vmatpush3.bf16.msra.mxu1 %v5449_v25  ;;  %v5450_v26 = vld [vmem:[%s6523_s11 + $0xd0] sm:$0xff]  }
 0x58a   : > { %v2763_v31 = vor.u32 %v2761_v29, %v2760_v28  ;;  %v2777_v32 = vsel %vm5989_vm13, %v2760_v28, 0  ;;  %v3129_v41 = vrot.slane %v2778_v34, 1  ;;  %v2832_v56 = vshll.u32 %v2778_v34, 16  ;;  %v5451_v27 = vld [vmem:[%s6523_s11 + $0x90] sm:$0xff]   ;;  %4802 = vmatprep.subr.bf16.mxu1 %v5450_v26  ;;  %v5453_v28 = vld [vmem:[%s6523_s11 + $0x98] sm:$0xff]   ;;  %v5454_v29 = vld [vmem:[%s6523_s11 + $0xe0] sm:$0xff]  }
 0x58b   : > { %v6178_v33 = vsel %vm5989_vm13, 0, %v2770_v30  ;;  %v2820_v37 = vshll.u32 %v2777_v32, 16  ;;  %v3126_v39 = vrot.slane %v2777_v32, 1  ;;  %v5455_v30 = vld [vmem:[%s6523_s11 + $0xa0] sm:$0xff]   ;;  %v5457_v32 = vld [vmem:[%s6523_s11 + $0xa8] sm:$0xff]   ;;  %v5459_v34 = vld [vmem:[%s6523_s11 + $0xb0] sm:$0xff]  }
 0x58c   : > { %v2775_v35 = vsel %vm5989_vm13, 0, %v2763_v31  ;;  %v3128_v40 = vrot.slane %v6178_v33, 1  ;;  %v2827_v44 = vshll.u32 %v6178_v33, 16  ;;  %v2825_v55 = vshrl.u32 %v6178_v33, 16  ;;  %v5456_v31 = vld [vmem:[%s6523_s11 + $0xe8] sm:$0xff]  }
 0x58d   : > { %v2815_v36 = vshll.u32 %v2775_v35, 16  ;;  %v3125_v38 = vrot.slane %v2775_v35, 1  ;;  %v2813_v42 = vshrl.u32 %v2775_v35, 16  ;;  %v2822_v49 = vrot.slane %v2820_v37, 1  ;;  %4803 = vmatpush3.bf16.msra.mxu1 %v5451_v27  ;;  %v5462_v37 = vld [vmem:[%s6523_s11 + $0x40] sm:$0xff]  }
 0x58e   : > { %v6190_v46 = vsel %vm808_vm8, %v3128_v40, %v3129_v41  ;;  %v2829_v52 = vrot.slane %v2827_v44, 1  ;;  %v2834_v60 = vrot.slane %v2832_v56, 1  ;;  %v3274_v41 = vld [vmem:[%s6521_s9] sm:$0x3] }
 0x58f   : > { %v2817_v43 = vrot.slane %v2815_v36, 1  ;;  %v6187_v45 = vsel %vm808_vm8, %v3125_v38, %v3126_v39  ;;  %v5461_v36 = vld [vmem:[%s6523_s11 + $0xb8] sm:$0xff]   ;;  %v3276_v38 = vlaneseq }
 0x590   : > { %v2830_v58 = vor.u32 %v2829_v52, %v2825_v55 }
 0x591   : > { %v2818_v48 = vor.u32 %v2817_v43, %v2813_v42  ;;  %v3277_v39 = vshrl.u32 %v3276_v38, 7  ;;  %v3294_v43 = vld [vmem:[%s6522_s10] sm:$0x3] }
 0x592   : > { %v2835_v3 = vsel %vm613_vm3, %v2830_v58, %v2834_v60 }
 0x593   : > { %v2823_v51 = vsel %vm613_vm3, %v2818_v48, %v2822_v49  ;;  %v3278_v40 = vsub.s32 0, %v3277_v39  ;;  %v3282_v42 = vsub.s32 1, %v3277_v39 }
 0x594   : > { %2951 = vmatmul.mubr.bf16.vlgmr.msra.gmra.mrb[8].mxu0 %v2823_v51 }
 0x595   : > { %3052 = vmatpush1.bf16.msra.mxu0 %v5398_v47  ;;  %2960 = vmatprep.mubr.bf16.mxu0 %v5510_v53  ;;  %v3279_v44 = vrot.slane %v3274_v41, %v3278_v40  ;;  %v3303_v48 = vrot.slane %v3294_v43, %v3282_v42 }
 0x596   : > { %3053 = vmatprep.subr.bf16.mxu0 %v5403_v50 }
 0x599   : > { %3054 = vmatpush1.bf16.msra.mxu0 %v5401_v54 }
 0x59a   : > { %3055 = vmatprep.subr.bf16.mxu0 %v5406_v57 }
 0x59c   : > { %2961 = vmatmul.mubr.bf16.gmra.mrb[12].mxu0 %v2835_v3 }
 0x59d   : > { %3056 = vmatpush1.bf16.msra.mxu0 %v5404_v63  ;;  %3083 = vmatprep.mubr.bf16.mxu0 %v5510_v53 }
 0x59e   : > { %3057 = vmatprep.subr.bf16.mxu0 %v5409_v0 }
 0x5a1   : > { %3058 = vmatpush1.bf16.msra.mxu0 %v5407_v4 }
 0x5a2   : > { %3059 = vmatprep.subr.bf16.mxu0 %v5412_v7 }
 0x5a5   : > { %3060 = vmatpush1.bf16.msra.mxu0 %v5410_v8 }
 0x5a6   : > { %3061 = vmatprep.subr.bf16.mxu0 %v5415_v9 }
 0x5a9   : > { %3062 = vmatpush1.bf16.msra.mxu0 %v5413_v10 }
 0x5aa   : > { %3063 = vmatprep.subr.bf16.mxu0 %v5418_v11 }
 0x5ad   : > { %3064 = vmatpush1.bf16.msra.mxu0 %v5416_v12 }
 0x5ae   : > { %3065 = vmatprep.subr.bf16.mxu0 %v5421_v62 }
 0x5b1   : > { %3066 = vmatpush1.bf16.msra.mxu0 %v5419_v1 }
 0x5b2   : > { %3213 = vmatprep.subr.bf16.mxu0 %v5424_v2 }
 0x5b4   : > { %3084 = vmatmul.mubr.bf16.vlgmr.msra.gmra.mrb[8].mxu0 %v2775_v35  ;;  %v5460_v35 = vld [vmem:[%s6523_s11 + $0xf8] sm:$0xff]  }
 0x5b5   : > { %3214 = vmatpush1.bf16.msra.mxu0 %v5422_v59  ;;  %3093 = vmatprep.mubr.bf16.mxu0 %v5510_v53 }
 0x5b6   : > { %3215 = vmatprep.subr.bf16.mxu0 %v5427_v61 }
 0x5b9   : > { %3216 = vmatpush1.bf16.msra.mxu0 %v5425_v5 }
 0x5ba   : > { %3217 = vmatprep.subr.bf16.mxu0 %v5430_v13 }
 0x5bc   : > { %3094 = vmatmul.mubr.bf16.gmra.mrb[12].mxu0 %v6178_v33  ;;  %v5458_v33 = vld [vmem:[%s6523_s11 + $0xf0] sm:$0xff]  }
 0x5bd   : > { %3218 = vmatpush1.bf16.msra.mxu0 %v5428_v14  ;;  %3245 = vmatprep.mubr.bf16.mxu0 %v5510_v53 }
 0x5be   : > { %3219 = vmatprep.subr.bf16.mxu0 %v5433_v15 }
 0x5c1   : > { %3220 = vmatpush1.bf16.msra.mxu0 %v5431_v16 }
 0x5c2   : > { %3221 = vmatprep.subr.bf16.mxu0 %v5436_v17 }
 0x5c5   : > { %3222 = vmatpush1.bf16.msra.mxu0 %v5434_v18 }
 0x5c6   : > { %3223 = vmatprep.subr.bf16.mxu0 %v5439_v19 }
 0x5c9   : > { %3224 = vmatpush1.bf16.msra.mxu0 %v5437_v20 }
 0x5ca   : > { %3225 = vmatprep.subr.bf16.mxu0 %v5442_v21 }
 0x5cd   : > { %3226 = vmatpush1.bf16.msra.mxu0 %v5440_v22 }
 0x5ce   : > { %3227 = vmatprep.subr.bf16.mxu0 %v5445_v23 }
 0x5d1   : > { %3228 = vmatpush1.bf16.msra.mxu0 %v5443_v24 }
 0x5d4   : > { %3246 = vmatmul.mubr.bf16.vlgmr.msra.gmra.mrb[8].mxu0 %v6187_v45  ;;  %v3283_v45 = vrot.slane %v3274_v41, %v3282_v42 }
 0x5d5   : > { %3255 = vmatprep.mubr.bf16.mxu0 %v5510_v53  ;;  %v5452_v53 = vld [vmem:[%s6523_s11 + $0xd8] sm:$0xff]  }
 0x5d6   : > { %4804 = vmatprep.subr.bf16.mxu1 %v5452_v53 }
 0x5d7   : > { %4805 = vmatpush3.bf16.msra.mxu1 %v5453_v28 }
 0x5d8   : > { %4806 = vmatprep.subr.bf16.mxu1 %v5454_v29 }
 0x5db   : > { %4807 = vmatpush3.bf16.msra.mxu1 %v5455_v30 }
 0x5dc   : > { %3256 = vmatmul.mubr.bf16.gmra.mrb[12].mxu0 %v6190_v46  ;;  %4808 = vmatprep.subr.bf16.mxu1 %v5456_v31  ;;  %v3299_v46 = vrot.slane %v3294_v43, %v3278_v40 }
 0x5df   : > { %4809 = vmatpush3.bf16.msra.mxu1 %v5457_v32 }
 0x5e0   : > { %4810 = vmatprep.subr.bf16.mxu1 %v5458_v33 }
 0x5e3   : > { %4811 = vmatpush3.bf16.msra.mxu1 %v5459_v34 }
 0x5e4   : > { %4812 = vmatprep.subr.bf16.mxu1 %v5460_v35 }
 0x5e7   : > { %4813 = vmatpush3.bf16.msra.mxu1 %v5461_v36 }
 0x5e8   : > { %4826 = vmatprep.subr.bf16.mxu1 %v5462_v37 }
 0x6a7   : > { %v3247_v47 = vpop.f32.mrb[8].mxu0 }
 0x6a8   : > { %v3286_v49 = vmul.f32 %v3279_v44, %v3247_v47  ;;  %v3249_v50 = vpop.f32.mrb[9].mxu0 }
 0x6a9   : > { %v3287_v51 = vmul.f32 %v3283_v45, %v3249_v50  ;;  %v3251_v52 = vpop.f32.mrb[10].mxu0 }
 0x6aa   : > { %v3306_v54 = vadd.f32 %v3299_v46, %v3286_v49  ;;  %v3288_v55 = vmul.f32 %v3279_v44, %v3251_v52  ;;  %v3253_v56 = vpop.f32.mrb[11].mxu0 }
 0x6ab   : > { %v3307_v57 = vadd.f32 %v3303_v48, %v3287_v51  ;;  %v3289_v58 = vmul.f32 %v3283_v45, %v3253_v56 }
 0x6ac   : > { %v3322_v63 = vmul.f32 0.25, %v3306_v54  ;;  %v3308_v60 = vadd.f32 %v3299_v46, %v3288_v55  ;;  %vm3314_vm2 = vcmp.gt.f32.partialorder %v3306_v54, 0.0 }
 0x6ad   : > { %v3323_v0 = vmul.f32 0.25, %v3307_v57  ;;  %v3309_v3 = vadd.f32 %v3303_v48, %v3289_v58  ;;  %vm3315_vm4 = vcmp.gt.f32.partialorder %v3307_v57, 0.0 }
 0x6ae   : > { %vm3316_vm5 = vcmp.gt.f32.partialorder %v3308_v60, 0.0  ;;  %v3324_v4 = vmul.f32 0.25, %v3308_v60  ;;  %v3330_v9 = vsel %vm3314_vm2, %v3306_v54, %v3322_v63 }
 0x6af   : > { %vm3317_vm6 = vcmp.gt.f32.partialorder %v3309_v3, 0.0  ;;  %v3325_v7 = vmul.f32 0.25, %v3309_v3  ;;  %v3257_v8 = vpop.f32.mrb[12].mxu0  ;;  %v3331_v62 = vsel %vm3315_vm4, %v3307_v57, %v3323_v0  ;;  %v5463_v0 = vld [vmem:[%s6523_s11] sm:$0xff]  }
 0x6b0   : > { %v3332_v10 = vsel %vm3316_vm5, %v3308_v60, %v3324_v4  ;;  %v3290_v11 = vmul.f32 %v3279_v44, %v3257_v8  ;;  %v3259_v12 = vpop.f32.mrb[13].mxu0  ;;  %v5464_v8 = vld [vmem:[%s6523_s11 + $0x48] sm:$0xff]  }
 0x6b1   : > { %v3338_v1 = vpack.c.bf16 %v3332_v10, %v3330_v9  ;;  %v3333_v2 = vsel %vm3317_vm6, %v3309_v3, %v3325_v7  ;;  %v3291_v59 = vmul.f32 %v3283_v45, %v3259_v12  ;;  %v3261_v61 = vpop.f32.mrb[14].mxu0 }
 0x6b2   : > { %v3339_v5 = vpack.c.bf16 %v3333_v2, %v3331_v62  ;;  %v3310_v13 = vadd.f32 %v3299_v46, %v3290_v11  ;;  %v3292_v14 = vmul.f32 %v3279_v44, %v3261_v61  ;;  %v3263_v15 = vpop.f32.mrb[15].mxu0  ;;  %v5465_v61 = vld [vmem:[%s6523_s11 + $0x8] sm:$0xff]  }
 0x6b3   : > { %v3343_v16 = vshrl.u32 %v3338_v1, 16  ;;  %v3311_v17 = vadd.f32 %v3303_v48, %v3291_v59  ;;  %v3293_v18 = vmul.f32 %v3283_v45, %v3263_v15  ;;  %v3346_v22 = vshll.u32 %v3338_v1, 16  ;;  %v5466_v15 = vld [vmem:[%s6523_s11 + $0x50] sm:$0xff]  }
 0x6b4   : > { %v3350_v19 = vshrl.u32 %v3339_v5, 16  ;;  %vm3318_vm7 = vcmp.gt.f32.partialorder %v3310_v13, 0.0  ;;  %v3326_v20 = vmul.f32 0.25, %v3310_v13  ;;  %v3312_v24 = vadd.f32 %v3299_v46, %v3292_v14 }
 0x6b5   : > { %v3345_v21 = vrot.slane %v3343_v16, 7  ;;  %v3327_v23 = vmul.f32 0.25, %v3311_v17  ;;  %v3353_v25 = vshll.u32 %v3339_v5, 16  ;;  %vm3319_vm9 = vcmp.gt.f32.partialorder %v3311_v17, 0.0 }
 0x6b6   : > { %v3313_v26 = vadd.f32 %v3303_v48, %v3293_v18  ;;  %v3352_v27 = vrot.slane %v3350_v19, 7  ;;  %v3334_v28 = vsel %vm3318_vm7, %v3310_v13, %v3326_v20  ;;  %vm3320_vm10 = vcmp.gt.f32.partialorder %v3312_v24, 0.0 }
 0x6b7   : > { %v3348_v53 = vor.u32 %v3346_v22, %v3345_v21  ;;  %v3328_v29 = vmul.f32 0.25, %v3312_v24  ;;  %v3335_v33 = vsel %vm3319_vm9, %v3311_v17, %v3327_v23  ;;  %v3382_v36 = vsel %vm5989_vm13, %v3345_v21, 0 }
 0x6b8   : > { %vm3321_vm11 = vcmp.gt.f32.partialorder %v3313_v26, 0.0  ;;  %v3329_v30 = vmul.f32 0.25, %v3313_v26  ;;  %v3355_v31 = vor.u32 %v3353_v25, %v3352_v27  ;;  %v6346_v32 = vsel %vm5989_vm13, %v3352_v27, 0 }
 0x6b9   : > { %v3336_v34 = vsel %vm3320_vm10, %v3312_v24, %v3328_v29  ;;  %v6350_v35 = vsel %vm5989_vm13, 0, %v3348_v53  ;;  %v3471_v40 = vshll.u32 %v6346_v32, 16  ;;  %v3459_v45 = vshll.u32 %v3382_v36, 16  ;;  %v5468_v53 = vld [vmem:[%s6523_s11 + $0x58] sm:$0xff]  }
 0x6ba   : > { %v3340_v37 = vpack.c.bf16 %v3336_v34, %v3334_v28  ;;  %v3337_v38 = vsel %vm3321_vm11, %v3313_v26, %v3329_v30  ;;  %v6356_v39 = vsel %vm5989_vm13, 0, %v3355_v31  ;;  %v3454_v44 = vshll.u32 %v6350_v35, 16  ;;  %v5467_v26 = vld [vmem:[%s6523_s11 + $0x10] sm:$0xff]   ;;  %v5469_v29 = vld [vmem:[%s6523_s11 + $0x18] sm:$0xff]   ;;  %v5470_v30 = vld [vmem:[%s6523_s11 + $0x60] sm:$0xff]  }
 0x6bb   : > { %v3341_v41 = vpack.c.bf16 %v3337_v38, %v3335_v33  ;;  %v3466_v42 = vshll.u32 %v6356_v39, 16  ;;  %v3464_v47 = vshrl.u32 %v6356_v39, 16  ;;  %v3452_v49 = vshrl.u32 %v6350_v35, 16  ;;  %v5471_v31 = vld [vmem:[%s6523_s11 + $0x20] sm:$0xff]   ;;  %v5472_v33 = vld [vmem:[%s6523_s11 + $0x68] sm:$0xff]   ;;  %v5476_v38 = vld [vmem:[%s6523_s11 + $0x78] sm:$0xff]  }
 0x6bc   : > { %v3357_v43 = vshrl.u32 %v3340_v37, 16  ;;  %v3360_v50 = vshll.u32 %v3340_v37, 16  ;;  %v3473_v51 = vrot.slane %v3471_v40, 1  ;;  %v3456_v52 = vrot.slane %v3454_v44, 1  ;;  %v5473_v34 = vld [vmem:[%s6523_s11 + $0x28] sm:$0xff]   ;;  %v5475_v37 = vld [vmem:[%s6523_s11 + $0x30] sm:$0xff]  }
 0x6bd   : > { %v3364_v46 = vshrl.u32 %v3341_v41, 16  ;;  %v3468_v48 = vrot.slane %v3466_v42, 1  ;;  %v3367_v55 = vshll.u32 %v3341_v41, 16  ;;  %v3834_v58 = vrot.slane %v6350_v35, 1  ;;  %v5477_v40 = vld [vmem:[%s6523_s11 + $0x38] sm:$0xff]   ;;  %v5478_v41 = vld [vmem:[%s6523_s11 + $0x140] sm:$0xff]  }
 0x6be   : > { %v3359_v54 = vrot.slane %v3357_v43, 7  ;;  %v3457_v63 = vor.u32 %v3456_v52, %v3452_v49  ;;  %v3461_v60 = vrot.slane %v3459_v45, 1  ;;  %v3835_v4 = vrot.slane %v3382_v36, 1  ;;  %v5474_v36 = vld [vmem:[%s6523_s11 + $0x70] sm:$0xff]   ;;  %v5479_v42 = vld [vmem:[%s6523_s11 + $0x100] sm:$0xff]   ;;  %v5480_v43 = vld [vmem:[%s6523_s11 + $0x148] sm:$0xff]  }
 0x6bf   : > { %v3469_v56 = vor.u32 %v3468_v48, %v3464_v47  ;;  %v3366_v57 = vrot.slane %v3364_v46, 7  ;;  %v5481_v44 = vld [vmem:[%s6523_s11 + $0x108] sm:$0xff]   ;;  %v5482_v45 = vld [vmem:[%s6523_s11 + $0x150] sm:$0xff]   ;;  %v3837_v46 = vrot.slane %v6356_v39, 1  ;;  %v5484_v48 = vld [vmem:[%s6523_s11 + $0x158] sm:$0xff]  }
 0x6c0   : > { %v3362_v3 = vor.u32 %v3360_v50, %v3359_v54  ;;  %v3384_v11 = vsel %vm5989_vm13, %v3359_v54, 0  ;;  %v3462_v12 = vsel %vm613_vm3, %v3457_v63, %v3461_v60  ;;  %v6383_v1 = vsel %vm808_vm8, %v3834_v58, %v3835_v4  ;;  %v5483_v47 = vld [vmem:[%s6523_s11 + $0x110] sm:$0xff]   ;;  %v5486_v50 = vld [vmem:[%s6523_s11 + $0x160] sm:$0xff]   ;;  %v5489_v52 = vld [vmem:[%s6523_s11 + $0x128] sm:$0xff]  }
 0x6c1   : > { %v3474_v7 = vsel %vm613_vm3, %v3469_v56, %v3473_v51  ;;  %v3369_v9 = vor.u32 %v3367_v55, %v3366_v57  ;;  %v6373_v10 = vsel %vm5989_vm13, %v3366_v57, 0  ;;  %v3483_v14 = vshll.u32 %v3384_v11, 16  ;;  %v5488_v51 = vld [vmem:[%s6523_s11 + $0x168] sm:$0xff]   ;;  %v5490_v54 = vld [vmem:[%s6523_s11 + $0x170] sm:$0xff]   ;;  %v5492_v56 = vld [vmem:[%s6523_s11 + $0x178] sm:$0xff]  }
 0x6c2   : > { %3631 = vmatprep.mubr.bf16.mxu1 %v3474_v7  ;;  %v6380_v62 = vsel %vm5989_vm13, 0, %v3362_v3  ;;  %v3495_v13 = vshll.u32 %v6373_v10, 16  ;;  %v3841_v18 = vrot.slane %v3384_v11, 1  ;;  %v5491_v55 = vld [vmem:[%s6523_s11 + $0x130] sm:$0xff]   ;;  %v5493_v57 = vld [vmem:[%s6523_s11 + $0x138] sm:$0xff]   ;;  %v3844_v63 = vrot.slane %v6373_v10, 1 }
 0x6c3   : > { %3632 = vmatmul.mubr.bf16.vlgmr.msra.gmra.mrb[8].mxu1 %v3462_v12  ;;  %v6387_v2 = vsel %vm5989_vm13, 0, %v3369_v9  ;;  %v3478_v59 = vshll.u32 %v6380_v62, 16  ;;  %v3476_v6 = vshrl.u32 %v6380_v62, 16  ;;  %v3840_v17 = vrot.slane %v6380_v62, 1 }
 0x6c4   : > { %4827 = vmatpush3.bf16.msra.mxu1 %v5463_v0  ;;  %v3490_v5 = vshll.u32 %v6387_v2, 16  ;;  %v3488_v19 = vshrl.u32 %v6387_v2, 16  ;;  %v3497_v24 = vrot.slane %v3495_v13, 1  ;;  %v3485_v25 = vrot.slane %v3483_v14, 1 }
 0x6c5   : > { %4828 = vmatprep.subr.bf16.mxu1 %v5464_v8  ;;  %v3480_v16 = vrot.slane %v3478_v59, 1  ;;  %v6402_v22 = vsel %vm808_vm8, %v3840_v17, %v3841_v18  ;;  %v3843_v58 = vrot.slane %v6387_v2, 1 }
 0x6c6   : > { %v3492_v20 = vrot.slane %v3490_v5, 1 }
 0x6c7   : > { %v3481_v21 = vor.u32 %v3480_v16, %v3476_v6  ;;  %v3845_v60 = vsel %vm808_vm8, %v3843_v58, %v3844_v63 }
 0x6c8   : > { %4829 = vmatpush3.bf16.msra.mxu1 %v5465_v61  ;;  %v3493_v23 = vor.u32 %v3492_v20, %v3488_v19 }
 0x6c9   : > { %4830 = vmatprep.subr.bf16.mxu1 %v5466_v15  ;;  %v3486_v28 = vsel %vm613_vm3, %v3481_v21, %v3485_v25 }
 0x6ca   : > { %v3498_v27 = vsel %vm613_vm3, %v3493_v23, %v3497_v24 }
 0x6cb   : > { %3639 = vmatprep.mubr.bf16.mxu1 %v3498_v27 }
 0x6cc   : > { %3640 = vmatmul.mubr.bf16.gmra.mrb[12].mxu1 %v3486_v28  ;;  %v4610_v28 = vld [vmem:[%s6524_s12] ss:$0 sm:$0xff] }
 0x6cd   : > { %4831 = vmatpush3.bf16.msra.mxu1 %v5467_v26  ;;  %3776 = vmatprep.mubr.bf16.mxu1 %v6356_v39  ;;  %v5485_v39 = vld [vmem:[%s6523_s11 + $0x118] sm:$0xff]  }
 0x6ce   : > { %4832 = vmatprep.subr.bf16.mxu1 %v5468_v53 }
 0x6d1   : > { %4833 = vmatpush3.bf16.msra.mxu1 %v5469_v29 }
 0x6d2   : > { %4834 = vmatprep.subr.bf16.mxu1 %v5470_v30 }
 0x6d5   : > { %4835 = vmatpush3.bf16.msra.mxu1 %v5471_v31 }
 0x6d6   : > { %4836 = vmatprep.subr.bf16.mxu1 %v5472_v33  ;;  %v4611_v33 = vld [vmem:[%s6525_s13] ss:$0 sm:$0xff] }
 0x6d9   : > { %4837 = vmatpush3.bf16.msra.mxu1 %v5473_v34 }
 0x6da   : > { %4838 = vmatprep.subr.bf16.mxu1 %v5474_v36 }
 0x6dd   : > { %4839 = vmatpush3.bf16.msra.mxu1 %v5475_v37 }
 0x6de   : > { %4840 = vmatprep.subr.bf16.mxu1 %v5476_v38 }
 0x6e1   : > { %4841 = vmatpush3.bf16.msra.mxu1 %v5477_v40 }
 0x6e2   : > { %4854 = vmatprep.subr.bf16.mxu1 %v5478_v41 }
 0x6e4   : > { %3777 = vmatmul.mubr.bf16.vlgmr.msra.gmra.mrb[16].mxu1 %v6350_v35  ;;  %v3838_v35 = vrot.slane %v6346_v32, 1  ;;  %v5487_v32 = vld [vmem:[%s6523_s11 + $0x120] sm:$0xff]  }
 0x6e5   : > { %3784 = vmatprep.mubr.bf16.mxu1 %v6387_v2  ;;  %4855 = vmatpush3.bf16.msra.mxu1 %v5479_v42 }
 0x6e6   : > { %4856 = vmatprep.subr.bf16.mxu1 %v5480_v43  ;;  %v3839_v49 = vsel %vm808_vm8, %v3837_v46, %v3838_v35 }
 0x6e9   : > { %4857 = vmatpush3.bf16.msra.mxu1 %v5481_v44 }
 0x6ea   : > { %4858 = vmatprep.subr.bf16.mxu1 %v5482_v45 }
 0x6ec   : > { %3785 = vmatmul.mubr.bf16.gmra.mrb[20].mxu1 %v6380_v62 }
 0x6ed   : > { %4859 = vmatpush3.bf16.msra.mxu1 %v5483_v47  ;;  %3978 = vmatprep.mubr.bf16.mxu1 %v3839_v49 }
 0x6ee   : > { %4860 = vmatprep.subr.bf16.mxu1 %v5484_v48 }
 0x6f1   : > { %4861 = vmatpush3.bf16.msra.mxu1 %v5485_v39 }
 0x6f2   : > { %4862 = vmatprep.subr.bf16.mxu1 %v5486_v50 }
 0x6f5   : > { %4863 = vmatpush3.bf16.msra.mxu1 %v5487_v32 }
 0x6f6   : > { %4864 = vmatprep.subr.bf16.mxu1 %v5488_v51 }
 0x6f9   : > { %4865 = vmatpush3.bf16.msra.mxu1 %v5489_v52 }
 0x6fa   : > { %4866 = vmatprep.subr.bf16.mxu1 %v5490_v54 }
 0x6fd   : > { %4867 = vmatpush3.bf16.msra.mxu1 %v5491_v55 }
 0x6fe   : > { %4868 = vmatprep.subr.bf16.mxu1 %v5492_v56 }
 0x701   : > { %4869 = vmatpush3.bf16.msra.mxu1 %v5493_v57 }
 0x704   : > { %3979 = vmatmul.mubr.bf16.vlgmr.msra.gmra.mrb[24].mxu1 %v6383_v1 }
 0x705   : > { %3986 = vmatprep.mubr.bf16.mxu1 %v3845_v60 }
 0x70c   : > { %3987 = vmatmul.mubr.bf16.gmra.mrb[28].mxu1 %v6402_v22 }
 0x796   : > { %v4814_v0 = vpop.f32.mrb[8].mxu1 }
 0x797   : > { %v4815_v3 = vpop.f32.mrb[9].mxu1 }
 0x798   : > { %v4816_v4 = vadd.f32 %v4815_v3, %v4814_v0  ;;  %v4817_v7 = vpop.f32.mrb[10].mxu1 }
 0x799   : > { %v4818_v8 = vpop.f32.mrb[11].mxu1 }
 0x79a   : > { %v4819_v9 = vadd.f32 %v4818_v8, %v4817_v7 }
 0x79f   : > { %v4820_v11 = vpop.f32.mrb[12].mxu1 }
 0x7a0   : > { %v4821_v12 = vpop.f32.mrb[13].mxu1 }
 0x7a1   : > { %v4822_v62 = vadd.f32 %v4821_v12, %v4820_v11  ;;  %v4823_v2 = vpop.f32.mrb[14].mxu1 }
 0x7a2   : > { %v4824_v59 = vpop.f32.mrb[15].mxu1 }
 0x7a3   : > { %v4825_v61 = vadd.f32 %v4824_v59, %v4823_v2 }
 0x7b7   : > { %v4842_v10 = vpop.f32.mrb[16].mxu1 }
 0x7b8   : > { %v4843_v5 = vpop.f32.mrb[17].mxu1 }
 0x7b9   : > { %v4844_v1 = vadd.f32 %v4843_v5, %v4842_v10  ;;  %v4845_v13 = vpop.f32.mrb[18].mxu1 }
 0x7ba   : > { %v4846_v14 = vpop.f32.mrb[19].mxu1 }
 0x7bb   : > { %v3779_v15 = vadd.f32 %v4844_v1, %v4816_v4  ;;  %v4847_v6 = vadd.f32 %v4846_v14, %v4845_v13 }
 0x7bd   : > { %v3782_v16 = vadd.f32 %v4847_v6, %v4819_v9 }
 0x7bf   : > { %v4848_v17 = vpop.f32.mrb[20].mxu1 }
 0x7c0   : > { %v4849_v18 = vpop.f32.mrb[21].mxu1 }
 0x7c1   : > { %v4850_v19 = vadd.f32 %v4849_v18, %v4848_v17  ;;  %v4851_v20 = vpop.f32.mrb[22].mxu1 }
 0x7c2   : > { %v4852_v21 = vpop.f32.mrb[23].mxu1 }
 0x7c3   : > { %v3787_v22 = vadd.f32 %v4850_v19, %v4822_v62  ;;  %v4853_v23 = vadd.f32 %v4852_v21, %v4851_v20 }
 0x7c5   : > { %v3790_v24 = vadd.f32 %v4853_v23, %v4825_v61 }
 0x7d7   : > { %v4870_v25 = vpop.f32.mrb[24].mxu1 }
 0x7d8   : > { %v4871_v26 = vpop.f32.mrb[25].mxu1 }
 0x7d9   : > { %v4872_v27 = vadd.f32 %v4871_v26, %v4870_v25  ;;  %v4873_v53 = vpop.f32.mrb[26].mxu1 }
 0x7da   : > { %v4874_v29 = vpop.f32.mrb[27].mxu1 }
 0x7db   : > { %v3995_v30 = vadd.f32 %v4872_v27, %v3779_v15  ;;  %v4875_v31 = vadd.f32 %v4874_v29, %v4873_v53 }
 0x7dd   : > { %v4006_v34 = vmul.f32 %v4610_v28, %v3995_v30  ;;  %v3996_v36 = vadd.f32 %v4875_v31, %v3782_v16 }
 0x7df   : > { %v4017_v37 = vadd.f32 %v4611_v33, %v4006_v34  ;;  %v4007_v38 = vmul.f32 %v4610_v28, %v3996_v36  ;;  %v4876_v40 = vpop.f32.mrb[28].mxu1 }
 0x7e0   : > { %v4877_v41 = vpop.f32.mrb[29].mxu1 }
 0x7e1   : > { %v4025_v42 = vmin.f32 %v4017_v37, 0.0  ;;  %v4018_v43 = vadd.f32 %v4611_v33, %v4007_v38  ;;  %v4878_v44 = vadd.f32 %v4877_v41, %v4876_v40  ;;  %v4879_v45 = vpop.f32.mrb[30].mxu1  ;;  %vm4021_vm3 = vcmp.gt.f32.partialorder %v4017_v37, 0.0 }
 0x7e2   : > { %v4880_v46 = vpop.f32.mrb[31].mxu1 }
 0x7e3   : > { %v4029_v47 = vmul.f32 1.442695, %v4025_v42  ;;  %v4026_v35 = vmin.f32 %v4018_v43, 0.0  ;;  %v3997_v48 = vadd.f32 %v4878_v44, %v3787_v22  ;;  %v4881_v49 = vadd.f32 %v4880_v46, %v4879_v45 }
 0x7e4   : > { %vm4022_vm8 = vcmp.gt.f32.partialorder %v4018_v43, 0.0 }
 0x7e5   : > { %5494 = vpow2.f32 %v4029_v47  ;;  %v4031_v39 = vmul.f32 1.442695, %v4026_v35  ;;  %v4008_v50 = vmul.f32 %v4610_v28, %v3997_v48  ;;  %v3998_v32 = vadd.f32 %v4881_v49, %v3790_v24 }
 0x7e7   : > { %5496 = vpow2.f32 %v4031_v39  ;;  %v4019_v51 = vadd.f32 %v4611_v33, %v4008_v50  ;;  %v4009_v52 = vmul.f32 %v4610_v28, %v3998_v32 }
 0x7e9   : > { %v4027_v54 = vmin.f32 %v4019_v51, 0.0  ;;  %v4020_v55 = vadd.f32 %v4611_v33, %v4009_v52  ;;  %vm4023_vm12 = vcmp.gt.f32.partialorder %v4019_v51, 0.0 }
 0x7eb   : > { %v4033_v56 = vmul.f32 1.442695, %v4027_v54  ;;  %v4028_v57 = vmin.f32 %v4020_v55, 0.0  ;;  %vm4024_vm13 = vcmp.gt.f32.partialorder %v4020_v55, 0.0 }
 0x7ed   : > { %5498 = vpow2.f32 %v4033_v56  ;;  %v4035_v58 = vmul.f32 1.442695, %v4028_v57 }
 0x7ef   : > { %v5495_v63 = vpop.eup %5494  ;;  %5500 = vpow2.f32 %v4035_v58 }
 0x7f0   : > { %v4612_v60 = vadd.f32 -1.0, %v5495_v63 }
 0x7f1   : > { %v5497_v0 = vpop.eup %5496 }
 0x7f2   : > { %v4041_v3 = vmul.f32 0.3, %v4612_v60  ;;  %v4613_v4 = vadd.f32 -1.0, %v5497_v0 }
 0x7f4   : > { %v4042_v7 = vmul.f32 0.3, %v4613_v4  ;;  %v4045_v8 = vsel %vm4021_vm3, %v4017_v37, %v4041_v3 }
 0x7f6   : > { %v4046_v9 = vsel %vm4022_vm8, %v4018_v43, %v4042_v7 }
 0x7f7   : > { %v5499_v11 = vpop.eup %5498  ;;  %v4049_v12 = vadd.f32 %v4046_v9, %v4045_v8 }
 0x7f8   : > { %v4614_v62 = vadd.f32 -1.0, %v5499_v11 }
 0x7f9   : > { %v4050_v2 = vrot.slane %v4049_v12, 4  ;;  %v5501_v59 = vpop.eup %5500 }
 0x7fa   : > { %v4043_v10 = vmul.f32 0.3, %v4614_v62  ;;  %v4615_v5 = vadd.f32 -1.0, %v5501_v59 }
 0x7fb   : > { %v4051_v61 = vadd.f32 %v4050_v2, %v4049_v12 }
 0x7fc   : > { %v4044_v13 = vmul.f32 0.3, %v4615_v5  ;;  %v4047_v15 = vsel %vm4023_vm12, %v4019_v51, %v4043_v10 }
 0x7fd   : > { %v4052_v1 = vrot.slane %v4051_v61, 2 }
 0x7fe   : > { %v4048_v6 = vsel %vm4024_vm13, %v4020_v55, %v4044_v13 }
 0x7ff   : > { %v4053_v14 = vadd.f32 %v4052_v1, %v4051_v61  ;;  %v4056_v16 = vadd.f32 %v4048_v6, %v4047_v15 }
 0x801   : > { %v4054_v17 = vrot.slane %v4053_v14, 1  ;;  %v4057_v18 = vrot.slane %v4056_v16, 4 }
 0x803   : > { %v4055_v19 = vadd.f32 %v4054_v17, %v4053_v14  ;;  %v4058_v20 = vadd.f32 %v4057_v18, %v4056_v16 }
 0x805   : > { %v4064_v21 = vmul.f32 0.0625, %v4055_v19  ;;  %v4059_v22 = vrot.slane %v4058_v20, 2 }
 0x807   : > { %4066 = vst [vmem:[%s470_s16] sm:$0x1] %v4064_v21  ;;  %v4060_v23 = vadd.f32 %v4059_v22, %v4058_v20 }
 0x809   : > { %v4061_v24 = vrot.slane %v4060_v23, 1 }
 0x80b   : > { %v4062_v25 = vadd.f32 %v4061_v24, %v4060_v23 }
 0x80d   : > { %v4065_v26 = vmul.f32 0.0625, %v4062_v25 }
 0x80f   : > { %4067 = vst [vmem:[%s470_s16 + $0x1] sm:$0x1] %v4065_v26 }
 0x810 PF: > { %s24_s29 = sadd.s32 1, %s5508_s29  }
 0x811   : > { %p21_p4 = scmp.ge.s32.totalorder %s24_s29, 4  }
 0x813   :  { %23 = sbr.rel (!%p21_p4) target bundleno = 1 (0x1), region = 124 }

// kernel: wavelet2_rescnn_forward.8
= control target key start
LH: loop header
LB: loop body
LE: loop exit
PB: predicated region body
PF: predicated region fallthrough
CT: control target
= control target key end

     0   :  { %s5399_s29 = smov 0   ;;  %s6509_s0 = inlined_call_operand.vmem [shape: bf16[4,64,8], index: 0, kind: input, shape index: {}]   ;;  %s6510_s1 = inlined_call_operand.vmem [shape: bf16[7,64,128], index: 1, kind: input, shape index: {}]   ;;  %s6511_s2 = inlined_call_operand.vmem [shape: bf16[5,128,128], index: 2, kind: input, shape index: {}]   ;;  %s6512_s3 = inlined_call_operand.vmem [shape: bf16[3,128,64], index: 3, kind: input, shape index: {}]   ;;  %s6513_s4 = inlined_call_operand.vmem [shape: f32[1,1,64], index: 4, kind: input, shape index: {}]   ;;  %s6514_s5 = inlined_call_operand.vmem [shape: bf16[3,64,128], index: 5, kind: input, shape index: {}]   ;;  %s6515_s6 = inlined_call_operand.vmem [shape: f32[1,1,128], index: 6, kind: input, shape index: {}]   ;;  %s6516_s7 = inlined_call_operand.vmem [shape: f32[1,1,128], index: 7, kind: input, shape index: {}]   ;;  %s6517_s8 = inlined_call_operand.vmem [shape: bf16[3,128,256], index: 8, kind: input, shape index: {}]   ;;  %s6518_s9 = inlined_call_operand.vmem [shape: f32[1,1,256], index: 9, kind: input, shape index: {}]   ;;  %s6519_s10 = inlined_call_operand.vmem [shape: f32[1,1,256], index: 10, kind: input, shape index: {}]   ;;  %s6520_s11 = inlined_call_operand.vmem [shape: bf16[3,256,128], index: 11, kind: input, shape index: {}]   ;;  %s6521_s12 = inlined_call_operand.vmem [shape: f32[1,1,128], index: 12, kind: input, shape index: {}]   ;;  %s6522_s13 = inlined_call_operand.vmem [shape: f32[1,1,128], index: 13, kind: input, shape index: {}]   ;;  %s6523_s14 = inlined_call_operand.vmem [shape: f32[4,1,128], index: 14, kind: output, shape index: {}]  }
   0x1 LB: > { %s3938_s30 = sadd.s32 4294967295, %s5319_s29   ;;  %p3942_p0 = scmp.ge.s32.totalorder %s5319_s29, 1  ;;  %s5319_s29 = sphi %s5399_s29, %s24_s29  }
   0x2   : > { %p414_p1 = scmp.lt.s32.totalorder %s5319_s29, 3 }
   0x4   : > { %p415_p2 = pnand %p3942_p0, %p414_p1 }
   0x5   : > { %s3943_s15 = sshll.u32 (!%p415_p2), %s3938_s30, 1  ;;  %v5321_v0 = vmov (!%p415_p2), 0.0   ;;  %v5085_v1 = vld [vmem:[%s6510_s1] sm:$0xff] (!%p415_p2)   ;;  %v5086_v14 = vld [vmem:[%s6510_s1 + $0x8] sm:$0xff] (!%p415_p2)   ;;  %v5087_v20 = vld [vmem:[%s6510_s1 + $0x10] sm:$0xff] (!%p415_p2)   ;;  %vm5322_vm0 = vmmov (!%p415_p2), 0  }
   0x6   : > { %418 = sbr.rel (%p415_p2) target bundleno = 2032 (0x7f0), region = 76  ;;  %p461_p3 = scmp.lt.s32.totalorder (!%p415_p2), %s3943_s15, 3  ;;  %4731 = vmatprep.subr.bf16.mxu0 (!%p415_p2), %v5321_v0  ;;  %4719 = vmatprep.subr.bf16.mxu1 (!%p415_p2), %v5321_v0  ;;  %v5088_v24 = vld [vmem:[%s6510_s1 + $0x20] sm:$0xff] (!%p415_p2)   ;;  %v5089_v25 = vld [vmem:[%s6510_s1 + $0x18] sm:$0xff] (!%p415_p2)   ;;  %v5090_v28 = vld [vmem:[%s6510_s1 + $0x28] sm:$0xff] (!%p415_p2)   ;;  %vm589_vm1 = vcmask (!%p415_p2), 1041408  }
   0x7   : > { %4732 = vmatpush3.bf16.msra.mxu0 (!%p415_p2), %v5085_v1  ;;  %4720 = vmatpush3.bf16.msra.mxu1 (!%p415_p2), %v5088_v24  ;;  %v5092_v35 = vld [vmem:[%s6510_s1 + $0x30] sm:$0xff] (!%p415_p2)   ;;  %v5094_v39 = vld [vmem:[%s6510_s1 + $0x38] sm:$0xff] (!%p415_p2)   ;;  %vm590_vm2 = vsmask.f32 (!%p415_p2), 1280  ;;  %vm594_vm3 = vcmask (!%p415_p2), 1045504   ;;  %vm684_vm7 = vcmask (!%p415_p2), 523264  }
   0x8   : > { %4733 = vmatprep.subr.bf16.mxu0 (!%p415_p2), %v5321_v0  ;;  %4721 = vmatprep.subr.bf16.mxu1 (!%p415_p2), %v5321_v0  ;;  %vm595_vm4 = vsmask.f32 (!%p415_p2), 5376  ;;  %vm591_vm5 = vmand (!%p415_p2), %vm589_vm1, %vm590_vm2  ;;  %v5091_v63 = vld [vmem:[%s6510_s1 + $0x40] sm:$0xff] (!%p415_p2)   ;;  %vm626_vm8 = vsmask.f32 (!%p415_p2), 3328  ;;  %vm807_vm11 = vcmask (!%p415_p2), 1042432  }
   0x9   : > { %4739 = vmatprep.mubr.msk.bf16.mxu0 (!%p415_p2), %vm5322_vm0, %v5321_v0  ;;  %4727 = vmatprep.mubr.msk.bf16.mxu1 (!%p415_p2), %vm5322_vm0, %v5321_v0  ;;  %vm596_vm6 = vmand (!%p415_p2), %vm594_vm3, %vm595_vm4  ;;  %vm627_vm9 = vsmask.f32 (!%p415_p2), 7440  ;;  %vm808_vm12 = vcmask (!%p415_p2), 1046532   ;;  %vm1197_vm14 = vcmask (!%p415_p2), 1040384   ;;  %vm1198_vm15 = vcmask (!%p415_p2), 1044484  }
   0xa   : > { %vm5503_vm10 = vmor (!%p415_p2), %vm626_vm8, %vm627_vm9  ;;  %vm900_vm4 = vsmask.f32 (!%p415_p2), 2304  ;;  %vm1005_vm8 = vcmask (!%p415_p2), 1045508  }
   0xb   : > { %4734 = vmatpush3.bf16.msra.mxu0 (!%p415_p2), %v5086_v14  ;;  %4722 = vmatpush3.bf16.msra.mxu1 (!%p415_p2), %v5090_v28  ;;  %vm5521_vm13 = vmor (!%p415_p2), %vm807_vm11, %vm808_vm12  ;;  %vm1941_vm12 = vsmask.f32 (!%p415_p2), 256  ;;  %v5278_v28 = vld [vmem:[%s6520_s11] sm:$0xff] (!%p415_p2)  }
   0xc   : > { %4735 = vmatprep.subr.bf16.mxu0 (!%p415_p2), %v5321_v0  ;;  %4723 = vmatprep.subr.bf16.mxu1 (!%p415_p2), %v5321_v0  ;;  %vm1199_vm3 = vmor (!%p415_p2), %vm1197_vm14, %vm1198_vm15  ;;  %vm1946_vm15 = vsmask.f32 (!%p415_p2), 4352 }
   0xd   : > { %s6537_s15 = smov (!%p461_p3, %s3943_s15), 3  ;;  %vm5606_vm9 = vmor %vm589_vm1, %vm1005_vm8  ;;  %vm1097_vm1 = vsmask.f32 5392 }
   0xe   : > { %s4491_s18 = sshll.u32 %s6537_s15, 5  ;;  %vm1098_vm11 = vmor %vm590_vm2, %vm1097_vm1  ;;  %vm1293_vm2 = vcmask 1044480   ;;  %s470_s16 = scalar_lea.vmem %s6523_s14, %s6537_s15 }
   0xf   : > { %s5419_s21 = scalar_lea.vmem %s6509_s0, %s4491_s18  ;;  %4736 = vmatpush3.bf16.msra.mxu0 %v5087_v20  ;;  %4724 = vmatpush3.bf16.msra.mxu1 %v5092_v35 }
  0x10   : > { %v4493_v2 = vld [vmem:[%s5419_s21] sm:$0xff]   ;;  %v4524_v8 = vld [vmem:[%s5419_s21 + $0x8] sm:$0xff]   ;;  %v4525_v15 = vld [vmem:[%s5419_s21 + $0x10] sm:$0xff]   ;;  %4737 = vmatprep.subr.bf16.mxu0 %v5321_v0  ;;  %4725 = vmatprep.subr.bf16.mxu1 %v5321_v0 }
  0x11   : > { %v4527_v3 = vld [vmem:[%s5419_s21 + $0x20] sm:$0xff]   ;;  %v4494_v4 = vunpack.c.l.bf16 %v4493_v2  ;;  %v4495_v6 = vunpack.c.h.bf16 %v4493_v2  ;;  %v4528_v9 = vld [vmem:[%s5419_s21 + $0x28] sm:$0xff]   ;;  %v4498_v12 = vunpack.c.l.bf16 %v4524_v8  ;;  %v4529_v16 = vld [vmem:[%s5419_s21 + $0x30] sm:$0xff]   ;;  %v4499_v18 = vunpack.c.h.bf16 %v4524_v8 }
  0x12   : > { %v4510_v5 = vunpack.c.l.bf16 %v4527_v3  ;;  %v4511_v7 = vunpack.c.h.bf16 %v4527_v3  ;;  %v4514_v13 = vunpack.c.l.bf16 %v4528_v9  ;;  %v4515_v19 = vunpack.c.h.bf16 %v4528_v9  ;;  %v4526_v26 = vld [vmem:[%s5419_s21 + $0x18] sm:$0xff]  }
  0x13   : > { %v4502_v22 = vunpack.c.l.bf16 %v4525_v15  ;;  %v4518_v23 = vunpack.c.l.bf16 %v4529_v16  ;;  %v4530_v27 = vld [vmem:[%s5419_s21 + $0x38] sm:$0xff]   ;;  %4738 = vmatpush3.bf16.msra.mxu0 %v5089_v25  ;;  %v4503_v30 = vunpack.c.h.bf16 %v4525_v15  ;;  %v4519_v31 = vunpack.c.h.bf16 %v4529_v16  ;;  %4726 = vmatpush3.bf16.msra.mxu1 %v5094_v39  ;;  %v5281_v15 = vld [vmem:[%s6520_s11 + $0x50] sm:$0xff]  }
  0x14   : > { %v5064_v10 = vpack.i.bf16 %v4510_v5, %v4494_v4  ;;  %v5066_v11 = vpack.i.bf16 %v4511_v7, %v4495_v6  ;;  %v5068_v17 = vpack.i.bf16 %v4514_v13, %v4498_v12  ;;  %v5070_v21 = vpack.i.bf16 %v4515_v19, %v4499_v18  ;;  %4743 = vmatprep.subr.bf16.mxu0 %v5321_v0  ;;  %v5093_v7 = vld [vmem:[%s6510_s1 + $0x48] sm:$0xff]  }
  0x15   : > { %v5072_v29 = vpack.i.bf16 %v4518_v23, %v4502_v22  ;;  %v5074_v32 = vpack.i.bf16 %v4519_v31, %v4503_v30  ;;  %v4506_v33 = vunpack.c.l.bf16 %v4526_v26  ;;  %v4522_v34 = vunpack.c.l.bf16 %v4530_v27  ;;  %4803 = vmatprep.subr.bf16.mxu1 %v5321_v0  ;;  %v5096_v30 = vld [vmem:[%s6510_s1 + $0x58] sm:$0xff]  }
  0x16   : > { %5065 = vxpose.xlu0.b32.start [1/8] (short) (narrow) %v5064_v10, 8  ;;  %v4507_v37 = vunpack.c.h.bf16 %v4526_v26  ;;  %v4523_v38 = vunpack.c.h.bf16 %v4530_v27 }
  0x17   : > { %v5076_v36 = vpack.i.bf16 %v4522_v34, %v4506_v33  ;;  %v5097_v33 = vld [vmem:[%s6510_s1 + $0x60] sm:$0xff]  }
  0x18   : > { %v5078_v40 = vpack.i.bf16 %v4523_v38, %v4507_v37 }
  0x1a   : > { %5067 = vxpose.xlu0.b32.cont [2/8] (short) (narrow) %v5066_v11, 8 }
  0x1e   : > { %5069 = vxpose.xlu0.b32.cont [3/8] (short) (narrow) %v5068_v17, 8  ;;  %v5095_v17 = vld [vmem:[%s6510_s1 + $0x50] sm:$0xff]  }
  0x22   : > { %5071 = vxpose.xlu0.b32.cont [4/8] (short) (narrow) %v5070_v21, 8 }
  0x26   : > { %5073 = vxpose.xlu0.b32.cont [5/8] (short) (narrow) %v5072_v29, 8 }
  0x2a   : > { %5075 = vxpose.xlu0.b32.cont [6/8] (short) (narrow) %v5074_v32, 8 }
  0x2e   : > { %5077 = vxpose.xlu0.b32.cont [7/8] (short) (narrow) %v5076_v36, 8 }
  0x32   : > { %5079 = vxpose.xlu0.b32.end [8/8] (short) (narrow) %v5078_v40, 8 }
  0x96   : > { %v5080_v41 = vpop.trf.xlu0 }
  0x97   : > { %v5084_v42 = vunpack.i.h.bf16 %v5080_v41  ;;  %v5081_v43 = vunpack.i.l.bf16 %v5080_v41 }
  0x99   : > { %v570_v44 = vpack.c.bf16 %v5084_v42, %v5084_v42  ;;  %v569_v45 = vpack.c.bf16 %v5081_v43, %v5081_v43  ;;  %v5098_v43 = vld [vmem:[%s6510_s1 + $0x68] sm:$0xff]  }
  0x9b   : > { %v580_v46 = vshrl.u32 %v570_v44, 16  ;;  %v583_v47 = vshll.u32 %v570_v44, 16  ;;  %v572_v48 = vshrl.u32 %v569_v45, 16  ;;  %v575_v49 = vshll.u32 %v569_v45, 16 }
  0x9d   : > { %v582_v50 = vrot.slane %v580_v46, 6  ;;  %v585_v51 = vrot.slane %v583_v47, 7  ;;  %v574_v52 = vrot.slane %v572_v48, 6  ;;  %v577_v53 = vrot.slane %v575_v49, 7 }
  0x9f   : > { %v586_v54 = vor.u32 %v585_v51, %v582_v50  ;;  %v578_v55 = vor.u32 %v577_v53, %v574_v52  ;;  %v5099_v51 = vld [vmem:[%s6510_s1 + $0x70] sm:$0xff]  }
  0xa1   : > { %v593_v56 = vsel %vm591_vm5, 0, %v586_v54  ;;  %v592_v57 = vsel %vm591_vm5, 0, %v578_v55  ;;  %vm901_vm5 = vsmask.f32 6416 }
  0xa2   : > { %v597_v58 = vsel %vm596_vm6, %v592_v57, 0  ;;  %v598_v59 = vsel %vm596_vm6, %v593_v56, 0  ;;  %vm5574_vm6 = vmor %vm900_vm4, %vm901_vm5 }
  0xa3   : > { %v5463_v60 = vcombine.low %v597_v58, %v597_v58  ;;  %v5465_v61 = vcombine.high %v597_v58, %v597_v58  ;;  %v5467_v62 = vcombine.low %v598_v59, %v598_v59  ;;  %v5472_v1 = vcombine.high %v598_v59, %v598_v59  ;;  %vm5977_vm4 = vmand %vm1293_vm2, %vm1946_vm15 }
  0xa4   : > { %v3965_v2 = vcombine.low %v597_v58, %v598_v59  ;;  %v5100_v59 = vld [vmem:[%s6510_s1 + $0x78] sm:$0xff]   ;;  %v5123_v58 = vld [vmem:[%s6511_s2 + $0x10] sm:$0xff]  }
  0xa5   : > { %v5475_v3 = vshrl.u32 %v5463_v60, 16  ;;  %v5478_v4 = vshll.u32 %v5463_v60, 16  ;;  %v5481_v5 = vshrl.u32 %v5467_v62, 16  ;;  %v5485_v6 = vshll.u32 %v5467_v62, 16 }
  0xa6   : > { %4740 = vmatmul.mubr.msk.bf16.vlgmr.msra.gmra.mrb[0].mxu0 %vm684_vm7, %v3965_v2  ;;  %v5493_v10 = vshll.u32 %v5465_v61, 16  ;;  %v5501_v13 = vshll.u32 %v5472_v1, 16  ;;  %v3979_v22 = vrot.slane %v5463_v60, 9  ;;  %v812_v24 = vrot.slane %v5465_v61, 5 }
  0xa7   : > { %4744 = vmatpush3.bf16.msra.mxu0 %v5091_v63  ;;  %v632_v8 = vrot.slane %v5475_v3, 4  ;;  %v635_v9 = vrot.slane %v5478_v4, 5  ;;  %v646_v11 = vrot.slane %v5481_v5, 4  ;;  %4751 = vmatprep.mubr.msk.bf16.mxu0 %vm5322_vm0, %v5321_v0  ;;  %v649_v12 = vrot.slane %v5485_v6, 5 }
  0xa8   : > { %4745 = vmatprep.subr.bf16.mxu0 %v5321_v0  ;;  %v641_v19 = vrot.slane %v5493_v10, 5  ;;  %v655_v21 = vrot.slane %v5501_v13, 5  ;;  %v3980_v25 = vrot.slane %v5467_v62, 9  ;;  %v816_v26 = vrot.slane %v5472_v1, 5 }
  0xa9   : > { %v636_v14 = vor.u32 %v635_v9, %v632_v8  ;;  %v650_v16 = vor.u32 %v649_v12, %v646_v11  ;;  %v813_v31 = vsel %vm5521_vm13, %v3979_v22, %v812_v24  ;;  %v903_v34 = vrot.slane %v5475_v3, 5  ;;  %v5101_v9 = vld [vmem:[%s6510_s1 + $0x80] sm:$0xff]   ;;  %v5102_v12 = vld [vmem:[%s6510_s1 + $0x88] sm:$0xff]  }
  0xaa   : > { %v817_v32 = vsel %vm5521_vm13, %v3980_v25, %v816_v26  ;;  %v904_v36 = vrot.slane %v5478_v4, 6  ;;  %v913_v37 = vrot.slane %v5481_v5, 5  ;;  %v4039_v38 = vrot.slane %v5463_v60, 11  ;;  %v5105_v22 = vld [vmem:[%s6510_s1 + $0xa0] sm:$0xff]  }
  0xab   : > { %4746 = vmatpush3.bf16.msra.mxu0 %v5093_v7  ;;  %v637_v18 = vrot.slane %v636_v14, 4  ;;  %v651_v20 = vrot.slane %v650_v16, 4  ;;  %v3981_v35 = vcombine.low %v813_v31, %v817_v32  ;;  %v914_v39 = vrot.slane %v5485_v6, 6  ;;  %v5103_v14 = vld [vmem:[%s6510_s1 + $0x90] sm:$0xff]  }
  0xac   : > { %4747 = vmatprep.subr.bf16.mxu0 %v5321_v0  ;;  %v1202_v40 = vrot.slane %v5465_v61, 7  ;;  %v4040_v41 = vrot.slane %v5467_v62, 11  ;;  %v1206_v42 = vrot.slane %v5472_v1, 7  ;;  %v907_v44 = vshrl.u32 %v5465_v61, 16 }
  0xad   : > { %v642_v23 = vsel %vm5503_vm10, %v637_v18, %v641_v19  ;;  %v656_v27 = vsel %vm5503_vm10, %v651_v20, %v655_v21  ;;  %v917_v45 = vshrl.u32 %v5472_v1, 16  ;;  %v905_v49 = vor.u32 %v904_v36, %v903_v34  ;;  %v5104_v21 = vld [vmem:[%s6510_s1 + $0x98] sm:$0xff]  }
  0xae   : > { %v3959_v29 = vcombine.low %v642_v23, %v656_v27  ;;  %v5557_v46 = vsel %vm1199_vm3, %v4039_v38, %v1202_v40  ;;  %v5559_v47 = vsel %vm1199_vm3, %v4040_v41, %v1206_v42  ;;  %v915_v50 = vor.u32 %v914_v39, %v913_v37  ;;  %v5110_v38 = vld [vmem:[%s6510_s1 + $0xc8] sm:$0xff]   ;;  %v5111_v39 = vld [vmem:[%s6510_s1 + $0xd0] sm:$0xff]   ;;  %v5112_v40 = vld [vmem:[%s6510_s1 + $0xd8] sm:$0xff]  }
  0xaf   : > { %4748 = vmatpush3.bf16.msra.mxu0 %v5095_v17  ;;  %v4041_v48 = vcombine.low %v5557_v46, %v5559_v47  ;;  %v909_v52 = vrot.slane %v907_v44, 5  ;;  %v910_v53 = vrot.slane %v5493_v10, 6  ;;  %v919_v54 = vrot.slane %v917_v45, 5  ;;  %v5113_v41 = vld [vmem:[%s6511_s2 + $0x40] sm:$0xff]   ;;  %v5114_v42 = vld [vmem:[%s6511_s2 + $0x48] sm:$0xff]   ;;  %v5119_v47 = vld [vmem:[%s6511_s2 + $0x70] sm:$0xff]  }
  0xb0   : > { %4749 = vmatprep.subr.bf16.mxu0 %v5321_v0  ;;  %4728 = vmatmul.mubr.msk.bf16.vlgmr.msra.gmra.mrb[0].mxu1 %vm684_vm7, %v3959_v29  ;;  %v920_v55 = vrot.slane %v5501_v13, 6  ;;  %v906_v56 = vrot.slane %v905_v49, 4  ;;  %v916_v57 = vrot.slane %v915_v50, 4  ;;  %v4009_v16 = vrot.slane %v5463_v60, 10  ;;  %v5106_v29 = vld [vmem:[%s6510_s1 + $0xa8] sm:$0xff]   ;;  %vm5972_vm3 = vmand %vm1197_vm14, %vm1941_vm12 }
  0xb1   : > { %4819 = vmatprep.mubr.msk.bf16.mxu1 %vm5322_vm0, %v5321_v0  ;;  %v911_v63 = vor.u32 %v910_v53, %v909_v52  ;;  %v1009_v17 = vrot.slane %v5465_v61, 6  ;;  %v4010_v18 = vrot.slane %v5467_v62, 10  ;;  %v1013_v19 = vrot.slane %v5472_v1, 6  ;;  %4804 = vmatpush3.bf16.msra.mxu1 %v5113_v41  ;;  %v5118_v46 = vld [vmem:[%s6511_s2 + $0x68] sm:$0xff]  }
  0xb2   : > { %v921_v2 = vor.u32 %v920_v55, %v919_v54  ;;  %v1099_v24 = vrot.slane %v5475_v3, 6  ;;  %v1100_v25 = vrot.slane %v5478_v4, 7  ;;  %v1107_v26 = vrot.slane %v5481_v5, 6  ;;  %v5107_v4 = vld [vmem:[%s6510_s1 + $0xb0] sm:$0xff]   ;;  %4805 = vmatprep.subr.bf16.mxu1 %v5321_v0 }
  0xb3   : > { %4750 = vmatpush3.bf16.msra.mxu0 %v5096_v30  ;;  %v912_v7 = vsel %vm5574_vm6, %v906_v56, %v911_v63  ;;  %v1010_v60 = vsel %vm5606_vm9, %v4009_v16, %v1009_v17  ;;  %v1014_v62 = vsel %vm5606_vm9, %v4010_v18, %v1013_v19  ;;  %v1108_v27 = vrot.slane %v5485_v6, 7 }
  0xb4   : > { %4755 = vmatprep.subr.bf16.mxu0 %v5321_v0  ;;  %v922_v8 = vsel %vm5574_vm6, %v916_v57, %v921_v2  ;;  %v4011_v23 = vcombine.low %v1010_v60, %v1014_v62  ;;  %v1101_v30 = vor.u32 %v1100_v25, %v1099_v24  ;;  %v1103_v5 = vrot.slane %v907_v44, 6  ;;  %v5116_v44 = vld [vmem:[%s6511_s2 + $0x58] sm:$0xff]  }
  0xb5   : > { %v3995_v11 = vcombine.low %v912_v7, %v922_v8  ;;  %v1109_v3 = vor.u32 %v1108_v27, %v1107_v26  ;;  %v1104_v6 = vrot.slane %v5493_v10, 7  ;;  %v1111_v31 = vrot.slane %v917_v45, 6  ;;  %4806 = vmatpush3.bf16.msra.mxu1 %v5114_v42  ;;  %v5117_v45 = vld [vmem:[%s6511_s2 + $0x60] sm:$0xff]  }
  0xb6   : > { %4752 = vmatmul.mubr.msk.bf16.vlgmr.msra.gmra.mrb[0].mxu0 %vm684_vm7, %v3981_v35  ;;  %v1112_v32 = vrot.slane %v5501_v13, 7  ;;  %v5108_v35 = vld [vmem:[%s6510_s1 + $0xb8] sm:$0xff]   ;;  %v5109_v13 = vld [vmem:[%s6510_s1 + $0xc0] sm:$0xff]   ;;  %4807 = vmatprep.subr.bf16.mxu1 %v5321_v0 }
  0xb7   : > { %4756 = vmatpush3.bf16.msra.mxu0 %v5097_v33  ;;  %4763 = vmatprep.mubr.msk.bf16.mxu0 %vm5322_vm0, %v5321_v0  ;;  %v1102_v33 = vrot.slane %v1101_v30, 4  ;;  %v1110_v34 = vrot.slane %v1109_v3, 4  ;;  %v1105_v61 = vor.u32 %v1104_v6, %v1103_v5 }
  0xb8   : > { %4757 = vmatprep.subr.bf16.mxu0 %v5321_v0  ;;  %v1113_v36 = vor.u32 %v1112_v32, %v1111_v31 }
  0xb9   : > { %v1106_v10 = vsel %vm1098_vm11, %v1102_v33, %v1105_v61 }
  0xba   : > { %v1114_v1 = vsel %vm1098_vm11, %v1110_v34, %v1113_v36 }
  0xbb   : > { %4758 = vmatpush3.bf16.msra.mxu0 %v5098_v43  ;;  %v4025_v37 = vcombine.low %v1106_v10, %v1114_v1  ;;  %v5115_v43 = vld [vmem:[%s6511_s2 + $0x50] sm:$0xff]  }
  0xbc   : > { %4759 = vmatprep.subr.bf16.mxu0 %v5321_v0  ;;  %4808 = vmatpush3.bf16.msra.mxu1 %v5115_v43 }
  0xbd   : > { %4809 = vmatprep.subr.bf16.mxu1 %v5321_v0 }
  0xbf   : > { %4760 = vmatpush3.bf16.msra.mxu0 %v5099_v51 }
  0xc0   : > { %4761 = vmatprep.subr.bf16.mxu0 %v5321_v0  ;;  %4810 = vmatpush3.bf16.msra.mxu1 %v5116_v44 }
  0xc1   : > { %4811 = vmatprep.subr.bf16.mxu1 %v5321_v0 }
  0xc3   : > { %4762 = vmatpush3.bf16.msra.mxu0 %v5100_v59 }
  0xc4   : > { %4767 = vmatprep.subr.bf16.mxu0 %v5321_v0  ;;  %4812 = vmatpush3.bf16.msra.mxu1 %v5117_v45 }
  0xc5   : > { %4813 = vmatprep.subr.bf16.mxu1 %v5321_v0 }
  0xc6   : > { %4764 = vmatmul.mubr.msk.bf16.vlgmr.msra.gmra.mrb[0].mxu0 %vm684_vm7, %v3995_v11 }
  0xc7   : > { %4768 = vmatpush3.bf16.msra.mxu0 %v5101_v9  ;;  %4775 = vmatprep.mubr.msk.bf16.mxu0 %vm5322_vm0, %v5321_v0 }
  0xc8   : > { %4769 = vmatprep.subr.bf16.mxu0 %v5321_v0  ;;  %4814 = vmatpush3.bf16.msra.mxu1 %v5118_v46 }
  0xc9   : > { %4815 = vmatprep.subr.bf16.mxu1 %v5321_v0 }
  0xcb   : > { %4770 = vmatpush3.bf16.msra.mxu0 %v5102_v12 }
  0xcc   : > { %4771 = vmatprep.subr.bf16.mxu0 %v5321_v0  ;;  %4816 = vmatpush3.bf16.msra.mxu1 %v5119_v47 }
  0xcd   : > { %4817 = vmatprep.subr.bf16.mxu1 %v5321_v0 }
  0xcf   : > { %4772 = vmatpush3.bf16.msra.mxu0 %v5103_v14 }
  0xd0   : > { %4773 = vmatprep.subr.bf16.mxu0 %v5321_v0 }
  0xd3   : > { %4774 = vmatpush3.bf16.msra.mxu0 %v5104_v21 }
  0xd4   : > { %4779 = vmatprep.subr.bf16.mxu0 %v5321_v0 }
  0xd6   : > { %4776 = vmatmul.mubr.msk.bf16.vlgmr.msra.gmra.mrb[0].mxu0 %vm684_vm7, %v4011_v23 }
  0xd7   : > { %4780 = vmatpush3.bf16.msra.mxu0 %v5105_v22  ;;  %4787 = vmatprep.mubr.msk.bf16.mxu0 %vm5322_vm0, %v5321_v0 }
  0xd8   : > { %4781 = vmatprep.subr.bf16.mxu0 %v5321_v0 }
  0xdb   : > { %4782 = vmatpush3.bf16.msra.mxu0 %v5106_v29 }
  0xdc   : > { %4783 = vmatprep.subr.bf16.mxu0 %v5321_v0 }
  0xdf   : > { %4784 = vmatpush3.bf16.msra.mxu0 %v5107_v4 }
  0xe0   : > { %4785 = vmatprep.subr.bf16.mxu0 %v5321_v0 }
  0xe3   : > { %4786 = vmatpush3.bf16.msra.mxu0 %v5108_v35 }
  0xe4   : > { %4791 = vmatprep.subr.bf16.mxu0 %v5321_v0 }
  0xe6   : > { %4788 = vmatmul.mubr.msk.bf16.vlgmr.msra.gmra.mrb[0].mxu0 %vm684_vm7, %v4025_v37 }
  0xe7   : > { %4792 = vmatpush3.bf16.msra.mxu0 %v5109_v13  ;;  %4799 = vmatprep.mubr.msk.bf16.mxu0 %vm5322_vm0, %v5321_v0 }
  0xe8   : > { %4793 = vmatprep.subr.bf16.mxu0 %v5321_v0 }
  0xeb   : > { %4794 = vmatpush3.bf16.msra.mxu0 %v5110_v38 }
  0xec   : > { %4795 = vmatprep.subr.bf16.mxu0 %v5321_v0 }
  0xef   : > { %4796 = vmatpush3.bf16.msra.mxu0 %v5111_v39 }
  0xf0   : > { %4797 = vmatprep.subr.bf16.mxu0 %v5321_v0 }
  0xf3   : > { %4798 = vmatpush3.bf16.msra.mxu0 %v5112_v40 }
  0xf4   : > { %4903 = vmatprep.subr.bf16.mxu0 %v5321_v0 }
  0xf6   : > { %4800 = vmatmul.mubr.msk.bf16.vlgmr.msra.gmra.mrb[0].mxu0 %vm684_vm7, %v4041_v48  ;;  %v5120_v48 = vld [vmem:[%s6511_s2 + $0x78] sm:$0xff]  }
  0xf7   : > { %4919 = vmatprep.mubr.msk.bf16.mxu0 %vm5322_vm0, %v5321_v0  ;;  %4818 = vmatpush3.bf16.msra.mxu1 %v5120_v48 }
  0xf8   : > { %4823 = vmatprep.subr.bf16.mxu1 %v5321_v0 }
 0x183   : > { %v722_v49 = vpop.f32.mrb[0].mxu1 }
 0x184   : > { %v4729_v50 = vpop.f32.mrb[1].mxu1 }
 0x185   : > { %v725_v51 = vpop.f32.mrb[2].mxu1 }
 0x186   : > { %v4730_v52 = vpop.f32.mrb[3].mxu1 }
 0x1c9   : > { %v1272_v53 = vpop.f32.mrb[0].mxu0 }
 0x1ca   : > { %v4999_v54 = vadd.f32 %v1272_v53, %v722_v49  ;;  %v4801_v55 = vpop.f32.mrb[1].mxu0 }
 0x1cb   : > { %v1275_v56 = vpop.f32.mrb[2].mxu0  ;;  %v5121_v55 = vld [vmem:[%s6511_s2] sm:$0xff]  }
 0x1cc   : > { %v1281_v57 = vpack.c.bf16 %v4999_v54, %v4999_v54  ;;  %v5000_v59 = vadd.f32 %v1275_v56, %v725_v51  ;;  %v4802_v63 = vpop.f32.mrb[3].mxu0 }
 0x1ce   : > { %v1285_v2 = vrot.slane %v1281_v57, 7  ;;  %v1282_v7 = vpack.c.bf16 %v5000_v59, %v5000_v59 }
 0x1d0   : > { %v1290_v8 = vsel %vm1197_vm14, 0, %v1285_v2  ;;  %v1286_v9 = vrot.slane %v1282_v7, 7 }
 0x1d1   : > { %v5708_v11 = vsel %vm1293_vm2, %v1290_v8, 0 }
 0x1d2   : > { %v4063_v12 = vcombine.low %v5708_v11, %v5708_v11  ;;  %v4064_v14 = vcombine.high %v5708_v11, %v5708_v11  ;;  %v1292_v16 = vsel %vm1197_vm14, 0, %v1286_v9 }
 0x1d3   : > { %v5716_v17 = vsel %vm1293_vm2, %v1292_v16, 0  ;;  %v5155_v16 = vld [vmem:[%s6512_s3 + $0x40] sm:$0xff]  }
 0x1d4   : > { %v1340_v18 = vshrl.u32 %v4063_v12, 16  ;;  %v1343_v19 = vshll.u32 %v4063_v12, 16  ;;  %v1349_v21 = vshll.u32 %v4064_v14, 16  ;;  %v4065_v60 = vcombine.low %v5716_v17, %v5716_v17  ;;  %4904 = vmatpush3.bf16.msra.mxu0 %v5155_v16 }
 0x1d5   : > { %v4066_v62 = vcombine.high %v5716_v17, %v5716_v17  ;;  %v4076_v22 = vcombine.low %v5708_v11, %v5716_v17  ;;  %v4101_v23 = vrot.slane %v4063_v12, 9  ;;  %v1692_v24 = vshrl.u32 %v4064_v14, 16  ;;  %4905 = vmatprep.subr.bf16.mxu0 %v5321_v0  ;;  %v5132_v11 = vld [vmem:[%s6511_s2 + $0x98] sm:$0xff]   ;;  %v5133_v17 = vld [vmem:[%s6511_s2 + $0xa0] sm:$0xff]  }
 0x1d6   : > { %v1342_v25 = vrot.slane %v1340_v18, 4  ;;  %v1345_v26 = vrot.slane %v1343_v19, 5  ;;  %v1570_v27 = vrot.slane %v4064_v14, 5  ;;  %v1354_v29 = vshrl.u32 %v4065_v60, 16 }
 0x1d7   : > { %v1357_v30 = vshll.u32 %v4065_v60, 16  ;;  %v1363_v3 = vshll.u32 %v4066_v62, 16  ;;  %v1702_v4 = vshrl.u32 %v4066_v62, 16  ;;  %v4102_v31 = vrot.slane %v4065_v60, 9 }
 0x1d8   : > { %v1346_v5 = vor.u32 %v1345_v26, %v1342_v25  ;;  %v5726_v6 = vsel %vm5521_vm13, %v4101_v23, %v1570_v27  ;;  %v1574_v32 = vrot.slane %v4066_v62, 5  ;;  %v1351_v33 = vrot.slane %v1349_v21, 5  ;;  %v5128_v23 = vld [vmem:[%s6511_s2 + $0x38] sm:$0xff]   ;;  %v5130_v25 = vld [vmem:[%s6511_s2 + $0x88] sm:$0xff]   ;;  %v5131_v26 = vld [vmem:[%s6511_s2 + $0x90] sm:$0xff]  }
 0x1d9   : > { %v1356_v34 = vrot.slane %v1354_v29, 4  ;;  %v1359_v35 = vrot.slane %v1357_v30, 5  ;;  %v1688_v61 = vrot.slane %v1340_v18, 5  ;;  %v1689_v1 = vrot.slane %v1343_v19, 6  ;;  %v5124_v18 = vld [vmem:[%s6511_s2 + $0x18] sm:$0xff]   ;;  %v5157_v19 = vld [vmem:[%s6512_s3 + $0x48] sm:$0xff]  }
 0x1da   : > { %v1347_v36 = vrot.slane %v1346_v5, 4  ;;  %v5730_v10 = vsel %vm5521_vm13, %v4102_v31, %v1574_v32  ;;  %v1694_v13 = vrot.slane %v1692_v24, 5  ;;  %v1695_v39 = vrot.slane %v1349_v21, 6  ;;  %4906 = vmatpush3.bf16.msra.mxu0 %v5157_v19  ;;  %v5125_v21 = vld [vmem:[%s6511_s2 + $0x20] sm:$0xff]   ;;  %v5135_v27 = vld [vmem:[%s6511_s2 + $0xb0] sm:$0xff]   ;;  %v5140_v5 = vld [vmem:[%s6511_s2 + $0xd8] sm:$0xff]  }
 0x1db   : > { %v1360_v37 = vor.u32 %v1359_v35, %v1356_v34  ;;  %v4103_v38 = vcombine.low %v5726_v6, %v5730_v10  ;;  %v1698_v40 = vrot.slane %v1354_v29, 5  ;;  %v1365_v41 = vrot.slane %v1363_v3, 5  ;;  %4907 = vmatprep.subr.bf16.mxu0 %v5321_v0  ;;  %v5129_v24 = vld [vmem:[%s6511_s2 + $0x80] sm:$0xff]   ;;  %v5136_v29 = vld [vmem:[%s6511_s2 + $0xb8] sm:$0xff]   ;;  %v5142_v31 = vld [vmem:[%s6511_s2 + $0xe8] sm:$0xff]  }
 0x1dc   : > { %v1690_v42 = vor.u32 %v1689_v1, %v1688_v61  ;;  %v1699_v43 = vrot.slane %v1357_v30, 6  ;;  %v1704_v44 = vrot.slane %v1702_v4, 5  ;;  %v1696_v46 = vor.u32 %v1695_v39, %v1694_v13  ;;  %v5137_v30 = vld [vmem:[%s6511_s2 + $0xc0] sm:$0xff]   ;;  %v5139_v4 = vld [vmem:[%s6511_s2 + $0xd0] sm:$0xff]   ;;  %v5146_v35 = vld [vmem:[%s6511_s2 + $0x108] sm:$0xff]  }
 0x1dd   : > { %v1361_v45 = vrot.slane %v1360_v37, 4  ;;  %v1705_v47 = vrot.slane %v1363_v3, 6  ;;  %v4153_v48 = vrot.slane %v4063_v12, 10  ;;  %v1822_v51 = vrot.slane %v4064_v14, 6  ;;  %v5122_v14 = vld [vmem:[%s6511_s2 + $0x8] sm:$0xff]   ;;  %v5141_v6 = vld [vmem:[%s6511_s2 + $0xe0] sm:$0xff]  }
 0x1de   : > { %v1691_v49 = vrot.slane %v1690_v42, 4  ;;  %v1700_v50 = vor.u32 %v1699_v43, %v1698_v40  ;;  %v4154_v52 = vrot.slane %v4065_v60, 10  ;;  %v1352_v53 = vsel %vm5503_vm10, %v1347_v36, %v1351_v33  ;;  %v5126_v60 = vld [vmem:[%s6511_s2 + $0x28] sm:$0xff]   ;;  %v5143_v32 = vld [vmem:[%s6511_s2 + $0xf0] sm:$0xff]   ;;  %v5144_v33 = vld [vmem:[%s6511_s2 + $0xf8] sm:$0xff]  }
 0x1df   : > { %v1366_v54 = vsel %vm5503_vm10, %v1361_v45, %v1365_v41  ;;  %v1706_v56 = vor.u32 %v1705_v47, %v1704_v44  ;;  %v1826_v57 = vrot.slane %v4066_v62, 6  ;;  %v5747_v7 = vsel %vm5606_vm9, %v4153_v48, %v1822_v51  ;;  %v5127_v62 = vld [vmem:[%s6511_s2 + $0x30] sm:$0xff]   ;;  %v5138_v3 = vld [vmem:[%s6511_s2 + $0xc8] sm:$0xff]   ;;  %v5145_v34 = vld [vmem:[%s6511_s2 + $0x100] sm:$0xff]  }
 0x1e0   : > { %v4067_v59 = vcombine.low %v1352_v53, %v1366_v54  ;;  %v5743_v63 = vsel %vm5574_vm6, %v1691_v49, %v1696_v46  ;;  %v1701_v2 = vrot.slane %v1700_v50, 4  ;;  %v5147_v61 = vld [vmem:[%s6511_s2 + $0x110] sm:$0xff]   ;;  %v5148_v36 = vld [vmem:[%s6511_s2 + $0x118] sm:$0xff]   ;;  %v5149_v10 = vld [vmem:[%s6511_s2 + $0x120] sm:$0xff]  }
 0x1e1   : > { %v5751_v8 = vsel %vm5606_vm9, %v4154_v52, %v1826_v57  ;;  %v5150_v1 = vld [vmem:[%s6511_s2 + $0x128] sm:$0xff]   ;;  %v5151_v13 = vld [vmem:[%s6511_s2 + $0x130] sm:$0xff]   ;;  %v5152_v37 = vld [vmem:[%s6511_s2 + $0x138] sm:$0xff]  }
 0x1e2   : > { %4820 = vmatmul.mubr.bf16.vlgmr.msra.gmra.mrb[4].mxu1 %v4067_v59  ;;  %v5755_v9 = vsel %vm5574_vm6, %v1701_v2, %v1706_v56  ;;  %v4155_v12 = vcombine.low %v5747_v7, %v5751_v8  ;;  %v5154_v39 = vld [vmem:[%s6512_s3 + $0x88] sm:$0xff]   ;;  %v5156_v40 = vld [vmem:[%s6512_s3 + $0x90] sm:$0xff]   ;;  %v5158_v41 = vld [vmem:[%s6512_s3 + $0x98] sm:$0xff]  }
 0x1e3   : > { %4824 = vmatpush3.bf16.msra.mxu1 %v5121_v55  ;;  %4839 = vmatprep.mubr.msk.bf16.mxu1 %vm5322_vm0, %v5321_v0  ;;  %v4128_v20 = vcombine.low %v5743_v63, %v5755_v9  ;;  %v5159_v42 = vld [vmem:[%s6512_s3 + $0x50] sm:$0xff]   ;;  %v5160_v43 = vld [vmem:[%s6512_s3 + $0xa0] sm:$0xff]   ;;  %v5161_v44 = vld [vmem:[%s6512_s3 + $0x58] sm:$0xff]  }
 0x1e4   : > { %4825 = vmatprep.subr.bf16.mxu1 %v5321_v0  ;;  %4908 = vmatpush3.bf16.msra.mxu0 %v5159_v42  ;;  %v5162_v45 = vld [vmem:[%s6512_s3 + $0xa8] sm:$0xff]   ;;  %v5163_v46 = vld [vmem:[%s6512_s3 + $0x60] sm:$0xff]   ;;  %v5164_v47 = vld [vmem:[%s6512_s3 + $0xb0] sm:$0xff]  }
 0x1e5   : > { %4909 = vmatprep.subr.bf16.mxu0 %v5321_v0  ;;  %v5165_v48 = vld [vmem:[%s6512_s3 + $0x68] sm:$0xff]   ;;  %v5166_v49 = vld [vmem:[%s6512_s3 + $0xb8] sm:$0xff]   ;;  %v5167_v50 = vld [vmem:[%s6512_s3 + $0x70] sm:$0xff]  }
 0x1e6   : > { %v5168_v51 = vld [vmem:[%s6512_s3 + $0x78] sm:$0xff]  }
 0x1e7   : > { %4826 = vmatpush3.bf16.msra.mxu1 %v5122_v14 }
 0x1e8   : > { %4827 = vmatprep.subr.bf16.mxu1 %v5321_v0  ;;  %4910 = vmatpush3.bf16.msra.mxu0 %v5161_v44  ;;  %v5171_v44 = vld [vmem:[%s6512_s3 + $0x10] sm:$0xff]  }
 0x1e9   : > { %4911 = vmatprep.subr.bf16.mxu0 %v5321_v0 }
 0x1eb   : > { %4828 = vmatpush3.bf16.msra.mxu1 %v5123_v58 }
 0x1ec   : > { %4829 = vmatprep.subr.bf16.mxu1 %v5321_v0  ;;  %4912 = vmatpush3.bf16.msra.mxu0 %v5163_v46  ;;  %v5173_v46 = vld [vmem:[%s6512_s3 + $0x20] sm:$0xff]  }
 0x1ed   : > { %4913 = vmatprep.subr.bf16.mxu0 %v5321_v0 }
 0x1ef   : > { %4830 = vmatpush3.bf16.msra.mxu1 %v5124_v18 }
 0x1f0   : > { %4831 = vmatprep.subr.bf16.mxu1 %v5321_v0  ;;  %4914 = vmatpush3.bf16.msra.mxu0 %v5165_v48  ;;  %v5175_v48 = vld [vmem:[%s6512_s3 + $0x30] sm:$0xff]  }
 0x1f1   : > { %4915 = vmatprep.subr.bf16.mxu0 %v5321_v0 }
 0x1f3   : > { %4832 = vmatpush3.bf16.msra.mxu1 %v5125_v21 }
 0x1f4   : > { %4833 = vmatprep.subr.bf16.mxu1 %v5321_v0  ;;  %4916 = vmatpush3.bf16.msra.mxu0 %v5167_v50  ;;  %v5177_v50 = vld [vmem:[%s6514_s5 + $0x20] sm:$0xff]  }
 0x1f5   : > { %4917 = vmatprep.subr.bf16.mxu0 %v5321_v0 }
 0x1f7   : > { %4834 = vmatpush3.bf16.msra.mxu1 %v5126_v60 }
 0x1f8   : > { %4835 = vmatprep.subr.bf16.mxu1 %v5321_v0  ;;  %4918 = vmatpush3.bf16.msra.mxu0 %v5168_v51  ;;  %v5178_v51 = vld [vmem:[%s6514_s5 + $0x28] sm:$0xff]  }
 0x1f9   : > { %4923 = vmatprep.subr.bf16.mxu0 %v5321_v0 }
 0x1fb   : > { %4836 = vmatpush3.bf16.msra.mxu1 %v5127_v62 }
 0x1fc   : > { %4837 = vmatprep.subr.bf16.mxu1 %v5321_v0 }
 0x1ff   : > { %4838 = vmatpush3.bf16.msra.mxu1 %v5128_v23 }
 0x200   : > { %4843 = vmatprep.subr.bf16.mxu1 %v5321_v0 }
 0x202   : > { %4840 = vmatmul.mubr.bf16.vlgmr.msra.gmra.mrb[4].mxu1 %v4076_v22  ;;  %v5134_v22 = vld [vmem:[%s6511_s2 + $0xa8] sm:$0xff]  }
 0x203   : > { %4844 = vmatpush3.bf16.msra.mxu1 %v5129_v24  ;;  %4859 = vmatprep.mubr.msk.bf16.mxu1 %vm5322_vm0, %v5321_v0 }
 0x204   : > { %4845 = vmatprep.subr.bf16.mxu1 %v5321_v0 }
 0x207   : > { %4846 = vmatpush3.bf16.msra.mxu1 %v5130_v25 }
 0x208   : > { %4847 = vmatprep.subr.bf16.mxu1 %v5321_v0 }
 0x20b   : > { %4848 = vmatpush3.bf16.msra.mxu1 %v5131_v26 }
 0x20c   : > { %4849 = vmatprep.subr.bf16.mxu1 %v5321_v0 }
 0x20f   : > { %4850 = vmatpush3.bf16.msra.mxu1 %v5132_v11 }
 0x210   : > { %4851 = vmatprep.subr.bf16.mxu1 %v5321_v0 }
 0x213   : > { %4852 = vmatpush3.bf16.msra.mxu1 %v5133_v17 }
 0x214   : > { %4853 = vmatprep.subr.bf16.mxu1 %v5321_v0 }
 0x217   : > { %4854 = vmatpush3.bf16.msra.mxu1 %v5134_v22 }
 0x218   : > { %4855 = vmatprep.subr.bf16.mxu1 %v5321_v0 }
 0x21b   : > { %4856 = vmatpush3.bf16.msra.mxu1 %v5135_v27 }
 0x21c   : > { %4857 = vmatprep.subr.bf16.mxu1 %v5321_v0 }
 0x21f   : > { %4858 = vmatpush3.bf16.msra.mxu1 %v5136_v29 }
 0x220   : > { %4863 = vmatprep.subr.bf16.mxu1 %v5321_v0 }
 0x222   : > { %4860 = vmatmul.mubr.bf16.vlgmr.msra.gmra.mrb[4].mxu1 %v4103_v38  ;;  %v5153_v38 = vld [vmem:[%s6512_s3 + $0x80] sm:$0xff]  }
 0x223   : > { %4864 = vmatpush3.bf16.msra.mxu1 %v5137_v30  ;;  %4879 = vmatprep.mubr.msk.bf16.mxu1 %vm5322_vm0, %v5321_v0 }
 0x224   : > { %4865 = vmatprep.subr.bf16.mxu1 %v5321_v0 }
 0x227   : > { %4866 = vmatpush3.bf16.msra.mxu1 %v5138_v3 }
 0x228   : > { %4867 = vmatprep.subr.bf16.mxu1 %v5321_v0 }
 0x22b   : > { %4868 = vmatpush3.bf16.msra.mxu1 %v5139_v4 }
 0x22c   : > { %4869 = vmatprep.subr.bf16.mxu1 %v5321_v0 }
 0x22f   : > { %4870 = vmatpush3.bf16.msra.mxu1 %v5140_v5 }
 0x230   : > { %4871 = vmatprep.subr.bf16.mxu1 %v5321_v0 }
 0x233   : > { %4872 = vmatpush3.bf16.msra.mxu1 %v5141_v6 }
 0x234   : > { %4873 = vmatprep.subr.bf16.mxu1 %v5321_v0 }
 0x237   : > { %4874 = vmatpush3.bf16.msra.mxu1 %v5142_v31 }
 0x238   : > { %4875 = vmatprep.subr.bf16.mxu1 %v5321_v0 }
 0x23b   : > { %4876 = vmatpush3.bf16.msra.mxu1 %v5143_v32 }
 0x23c   : > { %4877 = vmatprep.subr.bf16.mxu1 %v5321_v0 }
 0x23f   : > { %4878 = vmatpush3.bf16.msra.mxu1 %v5144_v33 }
 0x240   : > { %4883 = vmatprep.subr.bf16.mxu1 %v5321_v0 }
 0x242   : > { %4880 = vmatmul.mubr.bf16.vlgmr.msra.gmra.mrb[4].mxu1 %v4128_v20 }
 0x243   : > { %4884 = vmatpush3.bf16.msra.mxu1 %v5145_v34  ;;  %4899 = vmatprep.mubr.msk.bf16.mxu1 %vm5322_vm0, %v5321_v0 }
 0x244   : > { %4885 = vmatprep.subr.bf16.mxu1 %v5321_v0 }
 0x247   : > { %4886 = vmatpush3.bf16.msra.mxu1 %v5146_v35 }
 0x248   : > { %4887 = vmatprep.subr.bf16.mxu1 %v5321_v0 }
 0x24b   : > { %4888 = vmatpush3.bf16.msra.mxu1 %v5147_v61 }
 0x24c   : > { %4889 = vmatprep.subr.bf16.mxu1 %v5321_v0 }
 0x24f   : > { %4890 = vmatpush3.bf16.msra.mxu1 %v5148_v36 }
 0x250   : > { %4891 = vmatprep.subr.bf16.mxu1 %v5321_v0 }
 0x253   : > { %4892 = vmatpush3.bf16.msra.mxu1 %v5149_v10 }
 0x254   : > { %4893 = vmatprep.subr.bf16.mxu1 %v5321_v0 }
 0x257   : > { %4894 = vmatpush3.bf16.msra.mxu1 %v5150_v1 }
 0x258   : > { %4895 = vmatprep.subr.bf16.mxu1 %v5321_v0 }
 0x25b   : > { %4896 = vmatpush3.bf16.msra.mxu1 %v5151_v13 }
 0x25c   : > { %4897 = vmatprep.subr.bf16.mxu1 %v5321_v0 }
 0x25f   : > { %4898 = vmatpush3.bf16.msra.mxu1 %v5152_v37 }
 0x260   : > { %4943 = vmatprep.subr.bf16.mxu1 %v5321_v0 }
 0x262   : > { %4900 = vmatmul.mubr.bf16.vlgmr.msra.gmra.mrb[4].mxu1 %v4155_v12 }
 0x263   : > { %4944 = vmatpush3.bf16.msra.mxu1 %v5153_v38  ;;  %4959 = vmatprep.mubr.msk.bf16.mxu1 %vm5322_vm0, %v5321_v0 }
 0x264   : > { %4945 = vmatprep.subr.bf16.mxu1 %v5321_v0 }
 0x267   : > { %4946 = vmatpush3.bf16.msra.mxu1 %v5154_v39 }
 0x268   : > { %4947 = vmatprep.subr.bf16.mxu1 %v5321_v0 }
 0x26b   : > { %4948 = vmatpush3.bf16.msra.mxu1 %v5156_v40 }
 0x26c   : > { %4949 = vmatprep.subr.bf16.mxu1 %v5321_v0 }
 0x26f   : > { %4950 = vmatpush3.bf16.msra.mxu1 %v5158_v41  ;;  %v5169_v41 = vld [vmem:[%s6512_s3] sm:$0xff]  }
 0x270   : > { %4951 = vmatprep.subr.bf16.mxu1 %v5321_v0 }
 0x273   : > { %4952 = vmatpush3.bf16.msra.mxu1 %v5160_v43  ;;  %v5170_v43 = vld [vmem:[%s6512_s3 + $0x8] sm:$0xff]  }
 0x274   : > { %4953 = vmatprep.subr.bf16.mxu1 %v5321_v0 }
 0x277   : > { %4954 = vmatpush3.bf16.msra.mxu1 %v5162_v45  ;;  %v5172_v45 = vld [vmem:[%s6512_s3 + $0x18] sm:$0xff]  }
 0x278   : > { %4955 = vmatprep.subr.bf16.mxu1 %v5321_v0 }
 0x27b   : > { %4956 = vmatpush3.bf16.msra.mxu1 %v5164_v47  ;;  %v5174_v47 = vld [vmem:[%s6512_s3 + $0x28] sm:$0xff]  }
 0x27c   : > { %4957 = vmatprep.subr.bf16.mxu1 %v5321_v0 }
 0x27f   : > { %4958 = vmatpush3.bf16.msra.mxu1 %v5166_v49  ;;  %v5176_v49 = vld [vmem:[%s6512_s3 + $0x38] sm:$0xff]  }
 0x335   : > { %v1914_v52 = vpop.f32.mrb[4].mxu1 }
 0x336   : > { %v1923_v53 = vpack.c.bf16 %v1914_v52, %v1914_v52  ;;  %v4901_v54 = vpop.f32.mrb[5].mxu1  ;;  %v5179_v52 = vld [vmem:[%s6514_s5 + $0x30] sm:$0xff]  }
 0x337   : > { %v1917_v55 = vpop.f32.mrb[6].mxu1 }
 0x338   : > { %v1926_v56 = vshrl.u32 %v1923_v53, 16  ;;  %v1924_v57 = vpack.c.bf16 %v1917_v55, %v1917_v55  ;;  %v4902_v59 = vpop.f32.mrb[7].mxu1  ;;  %v1929_v2 = vshll.u32 %v1923_v53, 16  ;;  %v5180_v53 = vld [vmem:[%s6514_s5 + $0x38] sm:$0xff]  }
 0x33a   : > { %v1928_v63 = vrot.slane %v1926_v56, 7  ;;  %v1933_v7 = vshrl.u32 %v1924_v57, 16  ;;  %v1936_v20 = vshll.u32 %v1924_v57, 16 }
 0x33c   : > { %v1931_v12 = vor.u32 %v1929_v2, %v1928_v63  ;;  %v1935_v14 = vrot.slane %v1933_v7, 7 }
 0x33e   : > { %v1943_v58 = vsel %vm5972_vm3, 0, %v1931_v12  ;;  %v1938_v16 = vor.u32 %v1936_v20, %v1935_v14 }
 0x33f   : > { %v1948_v18 = vsel %vm5977_vm4, %v1943_v58, 0  ;;  %v4229_v58 = vld [vmem:[%s6513_s4] ss:$0 sm:$0xff] }
 0x340   : > { %v4180_v19 = vcombine.low %v1948_v18, %v1948_v18  ;;  %v4181_v21 = vcombine.high %v1948_v18, %v1948_v18  ;;  %v1944_v60 = vsel %vm5972_vm3, 0, %v1938_v16 }
 0x341   : > { %v1949_v62 = vsel %vm5977_vm4, %v1944_v60, 0 }
 0x342   : > { %v1994_v23 = vshrl.u32 %v4180_v19, 16  ;;  %v1997_v24 = vshll.u32 %v4180_v19, 16  ;;  %v4182_v25 = vcombine.low %v1949_v62, %v1949_v62  ;;  %v4183_v26 = vcombine.high %v1949_v62, %v1949_v62 }
 0x343   : > { %v4193_v11 = vcombine.low %v1948_v18, %v1949_v62  ;;  %v2224_v27 = vrot.slane %v4181_v21, 5  ;;  %v4218_v29 = vrot.slane %v4180_v19, 9  ;;  %v2003_v31 = vshll.u32 %v4181_v21, 16 }
 0x344   : > { %v1996_v17 = vrot.slane %v1994_v23, 4  ;;  %v1999_v22 = vrot.slane %v1997_v24, 5  ;;  %v2008_v30 = vshrl.u32 %v4182_v25, 16  ;;  %v2011_v3 = vshll.u32 %v4182_v25, 16 }
 0x345   : > { %v2228_v4 = vrot.slane %v4183_v26, 5  ;;  %v4219_v5 = vrot.slane %v4182_v25, 9  ;;  %v2017_v34 = vshll.u32 %v4183_v26, 16  ;;  %v2225_v35 = vsel %vm5521_vm13, %v4218_v29, %v2224_v27 }
 0x346   : > { %v2000_v6 = vor.u32 %v1999_v22, %v1996_v17  ;;  %v2010_v32 = vrot.slane %v2008_v30, 4  ;;  %v2013_v33 = vrot.slane %v2011_v3, 5  ;;  %v2005_v13 = vrot.slane %v2003_v31, 5 }
 0x347   : > { %v2229_v61 = vsel %vm5521_vm13, %v4219_v5, %v2228_v4  ;;  %v2019_v37 = vrot.slane %v2017_v34, 5 }
 0x348   : > { %v4220_v36 = vcombine.low %v2225_v35, %v2229_v61  ;;  %v2001_v10 = vrot.slane %v2000_v6, 4  ;;  %v2014_v1 = vor.u32 %v2013_v33, %v2010_v32 }
 0x34a   : > { %4960 = vmatmul.mubr.bf16.vlgmr.msra.gmra.mrb[8].mxu1 %v4220_v36  ;;  %v2015_v38 = vrot.slane %v2014_v1, 4  ;;  %v2006_v39 = vsel %vm5503_vm10, %v2001_v10, %v2005_v13 }
 0x34c   : > { %v2020_v40 = vsel %vm5503_vm10, %v2015_v38, %v2019_v37 }
 0x34d   : > { %v4184_v42 = vcombine.low %v2006_v39, %v2020_v40 }
 0x34f   : > { %4920 = vmatmul.mubr.bf16.vlgmr.msra.gmra.mrb[4].mxu0 %v4184_v42 }
 0x350   : > { %4924 = vmatpush3.bf16.msra.mxu0 %v5169_v41  ;;  %4939 = vmatprep.mubr.msk.bf16.mxu0 %vm5322_vm0, %v5321_v0 }
 0x351   : > { %4925 = vmatprep.subr.bf16.mxu0 %v5321_v0 }
 0x354   : > { %4926 = vmatpush3.bf16.msra.mxu0 %v5170_v43 }
 0x355   : > { %4927 = vmatprep.subr.bf16.mxu0 %v5321_v0 }
 0x358   : > { %4928 = vmatpush3.bf16.msra.mxu0 %v5171_v44 }
 0x359   : > { %4929 = vmatprep.subr.bf16.mxu0 %v5321_v0 }
 0x35c   : > { %4930 = vmatpush3.bf16.msra.mxu0 %v5172_v45 }
 0x35d   : > { %4931 = vmatprep.subr.bf16.mxu0 %v5321_v0 }
 0x360   : > { %4932 = vmatpush3.bf16.msra.mxu0 %v5173_v46 }
 0x361   : > { %4933 = vmatprep.subr.bf16.mxu0 %v5321_v0 }
 0x364   : > { %4934 = vmatpush3.bf16.msra.mxu0 %v5174_v47 }
 0x365   : > { %4935 = vmatprep.subr.bf16.mxu0 %v5321_v0 }
 0x368   : > { %4936 = vmatpush3.bf16.msra.mxu0 %v5175_v48 }
 0x369   : > { %4937 = vmatprep.subr.bf16.mxu0 %v5321_v0 }
 0x36c   : > { %4938 = vmatpush3.bf16.msra.mxu0 %v5176_v49 }
 0x36d   : > { %4963 = vmatprep.subr.bf16.mxu0 %v5321_v0 }
 0x36f   : > { %4940 = vmatmul.mubr.bf16.vlgmr.msra.gmra.mrb[8].mxu0 %v4193_v11 }
 0x370   : > { %4971 = vmatprep.mubr.msk.bf16.mxu0 %vm5322_vm0, %v5321_v0  ;;  %4964 = vmatpush3.bf16.msra.mxu0 %v5177_v50 }
 0x371   : > { %4965 = vmatprep.subr.bf16.mxu0 %v5321_v0 }
 0x374   : > { %4966 = vmatpush3.bf16.msra.mxu0 %v5178_v51 }
 0x375   : > { %4967 = vmatprep.subr.bf16.mxu0 %v5321_v0 }
 0x378   : > { %4968 = vmatpush3.bf16.msra.mxu0 %v5179_v52 }
 0x379   : > { %4969 = vmatprep.subr.bf16.mxu0 %v5321_v0 }
 0x37c   : > { %4970 = vmatpush3.bf16.msra.mxu0 %v5180_v53 }
 0x37d   : > { %4975 = vmatprep.subr.bf16.mxu0 %v5321_v0 }
 0x41d   : > { %v2316_v54 = vpop.f32.mrb[8].mxu1 }
 0x41e   : > { %v4961_v55 = vpop.f32.mrb[9].mxu1 }
 0x41f   : > { %v2319_v56 = vpop.f32.mrb[10].mxu1 }
 0x420   : > { %v4962_v57 = vpop.f32.mrb[11].mxu1 }
 0x422   : > { %v2107_v59 = vpop.f32.mrb[4].mxu0 }
 0x423   : > { %v4921_v63 = vpop.f32.mrb[5].mxu0 }
 0x424   : > { %v2110_v2 = vpop.f32.mrb[6].mxu0 }
 0x425   : > { %v4922_v7 = vpop.f32.mrb[7].mxu0 }
 0x442   : > { %v2198_v12 = vpop.f32.mrb[8].mxu0 }
 0x443   : > { %v2199_v14 = vadd.f32 %v2198_v12, %v2107_v59  ;;  %v4941_v20 = vpop.f32.mrb[9].mxu0  ;;  %v5182_v12 = vld [vmem:[%s6514_s5 + $0x8] sm:$0xff]  }
 0x444   : > { %v2201_v16 = vpop.f32.mrb[10].mxu0  ;;  %v5184_v20 = vld [vmem:[%s6514_s5 + $0x18] sm:$0xff]  }
 0x445   : > { %v2323_v18 = vadd.f32 %v2316_v54, %v2199_v14  ;;  %v2202_v19 = vadd.f32 %v2201_v16, %v2110_v2  ;;  %v4942_v21 = vpop.f32.mrb[11].mxu0  ;;  %v5181_v2 = vld [vmem:[%s6514_s5] sm:$0xff]   ;;  %v5183_v14 = vld [vmem:[%s6514_s5 + $0x10] sm:$0xff]   ;;  %v5186_v16 = vld [vmem:[%s6514_s5 + $0x48] sm:$0xff]  }
 0x446   : > { %v5191_v21 = vld [vmem:[%s6517_s8 + $0x84] ss:$8 sps:$4 sm:$0xff]  }
 0x447   : > { %v2332_v60 = vadd.f32 %v4229_v58, %v2323_v18  ;;  %v2324_v62 = vadd.f32 %v2319_v56, %v2202_v19  ;;  %v5187_v18 = vld [vmem:[%s6514_s5 + $0x50] sm:$0xff]   ;;  %v5188_v19 = vld [vmem:[%s6514_s5 + $0x58] sm:$0xff]   ;;  %2844 = vmatprep.subr.bf16.mxu1 %v5191_v21 }
 0x449   : > { %v2334_v23 = vmax.f32 %v2332_v60, 0.0  ;;  %v2333_v24 = vadd.f32 %v4229_v58, %v2324_v62  ;;  %v5185_v58 = vld [vmem:[%s6514_s5 + $0x40] sm:$0xff]   ;;  %v5194_v62 = vld [vmem:[%s6517_s8 + $0x94] ss:$8 sps:$4 sm:$0xff]  }
 0x44a   : > { %v5189_v60 = vld [vmem:[%s6517_s8 + $0x80] ss:$8 sps:$4 sm:$0xff]  }
 0x44b   : > { %v2336_v25 = vpack.c.bf16 %v2334_v23, %v2334_v23  ;;  %v2335_v26 = vmax.f32 %v2333_v24, 0.0  ;;  %2845 = vmatpush1.bf16.msra.mxu1 %v5189_v60  ;;  %v5197_v23 = vld [vmem:[%s6517_s8 + $0xa4] ss:$8 sps:$4 sm:$0xff]   ;;  %v5195_v24 = vld [vmem:[%s6517_s8 + $0xa0] ss:$8 sps:$4 sm:$0xff]  }
 0x44c   : > { %2846 = vmatprep.subr.bf16.mxu1 %v5194_v62 }
 0x44d   : > { %v2339_v11 = vshrl.u32 %v2336_v25, 16  ;;  %v2337_v17 = vpack.c.bf16 %v2335_v26, %v2335_v26  ;;  %v2342_v27 = vshll.u32 %v2336_v25, 16  ;;  %v5200_v25 = vld [vmem:[%s6517_s8 + $0xb4] ss:$8 sps:$4 sm:$0xff]   ;;  %v5198_v26 = vld [vmem:[%s6517_s8 + $0xb0] ss:$8 sps:$4 sm:$0xff]  }
 0x44f   : > { %v2341_v22 = vrot.slane %v2339_v11, 7  ;;  %v2346_v29 = vshrl.u32 %v2337_v17, 16  ;;  %v2349_v4 = vshll.u32 %v2337_v17, 16  ;;  %v5203_v11 = vld [vmem:[%s6517_s8 + $0xc4] ss:$8 sps:$4 sm:$0xff]  }
 0x450   : > { %v5201_v17 = vld [vmem:[%s6517_s8 + $0xc0] ss:$8 sps:$4 sm:$0xff]  }
 0x451   : > { %v2344_v30 = vor.u32 %v2342_v27, %v2341_v22  ;;  %v2348_v3 = vrot.slane %v2346_v29, 7  ;;  %v5206_v22 = vld [vmem:[%s6517_s8 + $0xd4] ss:$8 sps:$4 sm:$0xff]   ;;  %v5323_v27 = vmov 0   ;;  %v5204_v29 = vld [vmem:[%s6517_s8 + $0xd0] ss:$8 sps:$4 sm:$0xff]  }
 0x452   : > { %2876 = vmatprep.mubr.bf16.mxu1 %v5323_v27 }
 0x453   : > { %v2354_v5 = vsel %vm5972_vm3, 0, %v2344_v30  ;;  %v2351_v6 = vor.u32 %v2349_v4, %v2348_v3  ;;  %v5209_v30 = vld [vmem:[%s6517_s8 + $0xe4] ss:$8 sps:$4 sm:$0xff]   ;;  %v5207_v3 = vld [vmem:[%s6517_s8 + $0xe0] ss:$8 sps:$4 sm:$0xff]  }
 0x454   : > { %v2356_v31 = vsel %vm5977_vm4, %v2354_v5, 0  ;;  %v5212_v4 = vld [vmem:[%s6517_s8 + $0xf4] ss:$8 sps:$4 sm:$0xff]   ;;  %v5210_v5 = vld [vmem:[%s6517_s8 + $0xf0] ss:$8 sps:$4 sm:$0xff]  }
 0x455   : > { %v4238_v32 = vcombine.low %v2356_v31, %v2356_v31  ;;  %v4239_v33 = vcombine.high %v2356_v31, %v2356_v31  ;;  %v2355_v34 = vsel %vm5972_vm3, 0, %v2351_v6  ;;  %v5215_v6 = vld [vmem:[%s6517_s8 + $0x4] ss:$8 sps:$4 sm:$0xff]  }
 0x456   : > { %v2357_v35 = vsel %vm5977_vm4, %v2355_v34, 0 }
 0x457   : > { %v2386_v61 = vshrl.u32 %v4238_v32, 16  ;;  %v2389_v36 = vshll.u32 %v4238_v32, 16  ;;  %v4240_v10 = vcombine.low %v2357_v35, %v2357_v35  ;;  %v4241_v1 = vcombine.high %v2357_v35, %v2357_v35 }
 0x458   : > { %v4248_v13 = vcombine.low %v2356_v31, %v2357_v35  ;;  %v2564_v39 = vrot.slane %v4239_v33, 5  ;;  %v4262_v40 = vrot.slane %v4238_v32, 9  ;;  %v2395_v46 = vshll.u32 %v4239_v33, 16  ;;  %v4270_v31 = vld [vmem:[%s6515_s6] ss:$0 sm:$0xff] }
 0x459   : > { %v2388_v37 = vrot.slane %v2386_v61, 4  ;;  %v2391_v38 = vrot.slane %v2389_v36, 5  ;;  %v2400_v41 = vshrl.u32 %v4240_v10, 16  ;;  %v2403_v42 = vshll.u32 %v4240_v10, 16  ;;  %v4271_v33 = vld [vmem:[%s6516_s7] ss:$0 sm:$0xff] }
 0x45a   : > { %v2568_v43 = vrot.slane %v4241_v1, 5  ;;  %v4263_v45 = vrot.slane %v4240_v10, 9  ;;  %v2409_v49 = vshll.u32 %v4241_v1, 16  ;;  %v2565_v50 = vsel %vm5521_vm13, %v4262_v40, %v2564_v39 }
 0x45b   : > { %v2392_v44 = vor.u32 %v2391_v38, %v2388_v37  ;;  %v2402_v47 = vrot.slane %v2400_v41, 4  ;;  %v2405_v48 = vrot.slane %v2403_v42, 5  ;;  %v2397_v55 = vrot.slane %v2395_v46, 5 }
 0x45c   : > { %v2569_v51 = vsel %vm5521_vm13, %v4263_v45, %v2568_v43  ;;  %v2411_v56 = vrot.slane %v2409_v49, 5 }
 0x45d   : > { %v2393_v52 = vrot.slane %v2392_v44, 4  ;;  %v2406_v53 = vor.u32 %v2405_v48, %v2402_v47  ;;  %v4264_v54 = vcombine.low %v2565_v50, %v2569_v51 }
 0x45f   : > { %v2407_v57 = vrot.slane %v2406_v53, 4  ;;  %v2398_v59 = vsel %vm5503_vm10, %v2393_v52, %v2397_v55 }
 0x461   : > { %v2412_v63 = vsel %vm5503_vm10, %v2407_v57, %v2411_v56 }
 0x462   : > { %v4242_v7 = vcombine.low %v2398_v59, %v2412_v63 }
 0x464   : > { %4972 = vmatmul.mubr.msk.bf16.vlgmr.msra.gmra.mrb[12].mxu0 %vm684_vm7, %v4242_v7 }
 0x465   : > { %4976 = vmatpush3.bf16.msra.mxu0 %v5181_v2  ;;  %4983 = vmatprep.mubr.msk.bf16.mxu0 %vm5322_vm0, %v5321_v0 }
 0x466   : > { %4977 = vmatprep.subr.bf16.mxu0 %v5321_v0 }
 0x469   : > { %4978 = vmatpush3.bf16.msra.mxu0 %v5182_v12 }
 0x46a   : > { %4979 = vmatprep.subr.bf16.mxu0 %v5321_v0 }
 0x46d   : > { %4980 = vmatpush3.bf16.msra.mxu0 %v5183_v14 }
 0x46e   : > { %4981 = vmatprep.subr.bf16.mxu0 %v5321_v0 }
 0x471   : > { %4982 = vmatpush3.bf16.msra.mxu0 %v5184_v20 }
 0x472   : > { %4987 = vmatprep.subr.bf16.mxu0 %v5321_v0 }
 0x474   : > { %4984 = vmatmul.mubr.msk.bf16.vlgmr.msra.gmra.mrb[12].mxu0 %vm684_vm7, %v4248_v13 }
 0x475   : > { %4988 = vmatpush3.bf16.msra.mxu0 %v5185_v58  ;;  %4995 = vmatprep.mubr.msk.bf16.mxu0 %vm5322_vm0, %v5321_v0 }
 0x476   : > { %4989 = vmatprep.subr.bf16.mxu0 %v5321_v0 }
 0x479   : > { %4990 = vmatpush3.bf16.msra.mxu0 %v5186_v16 }
 0x47a   : > { %4991 = vmatprep.subr.bf16.mxu0 %v5321_v0 }
 0x47d   : > { %4992 = vmatpush3.bf16.msra.mxu0 %v5187_v18 }
 0x47e   : > { %4993 = vmatprep.subr.bf16.mxu0 %v5321_v0  ;;  %v5192_v0 = vld [vmem:[%s6517_s8 + $0x90] ss:$8 sps:$4 sm:$0xff]  }
 0x47f   : > { %2847 = vmatpush1.bf16.msra.mxu1 %v5192_v0 }
 0x480   : > { %2848 = vmatprep.subr.bf16.mxu1 %v5197_v23 }
 0x481   : > { %4994 = vmatpush3.bf16.msra.mxu0 %v5188_v19 }
 0x483   : > { %2849 = vmatpush1.bf16.msra.mxu1 %v5195_v24 }
 0x484   : > { %4996 = vmatmul.mubr.msk.bf16.vlgmr.msra.gmra.mrb[12].mxu0 %vm684_vm7, %v4264_v54  ;;  %2850 = vmatprep.subr.bf16.mxu1 %v5200_v25 }
 0x487   : > { %2851 = vmatpush1.bf16.msra.mxu1 %v5198_v26 }
 0x488   : > { %2852 = vmatprep.subr.bf16.mxu1 %v5203_v11 }
 0x48b   : > { %2853 = vmatpush1.bf16.msra.mxu1 %v5201_v17 }
 0x48c   : > { %2854 = vmatprep.subr.bf16.mxu1 %v5206_v22 }
 0x48f   : > { %2855 = vmatpush1.bf16.msra.mxu1 %v5204_v29 }
 0x490   : > { %2856 = vmatprep.subr.bf16.mxu1 %v5209_v30 }
 0x493   : > { %2857 = vmatpush1.bf16.msra.mxu1 %v5207_v3 }
 0x494   : > { %2858 = vmatprep.subr.bf16.mxu1 %v5212_v4  ;;  %v5213_v4 = vld [vmem:[%s6517_s8] ss:$8 sps:$4 sm:$0xff]  }
 0x497   : > { %2859 = vmatpush1.bf16.msra.mxu1 %v5210_v5 }
 0x498   : > { %2969 = vmatprep.subr.bf16.mxu1 %v5215_v6 }
 0x557   : > { %v2634_v32 = vpop.f32.mrb[12].mxu0 }
 0x558   : > { %v2650_v34 = vmul.f32 %v4270_v31, %v2634_v32  ;;  %v4997_v35 = vpop.f32.mrb[13].mxu0  ;;  %v5218_v32 = vld [vmem:[%s6517_s8 + $0x14] ss:$8 sps:$4 sm:$0xff]  }
 0x559   : > { %v2637_v61 = vpop.f32.mrb[14].mxu0  ;;  %v5219_v35 = vld [vmem:[%s6517_s8 + $0x20] ss:$8 sps:$4 sm:$0xff]  }
 0x55a   : > { %v2659_v36 = vadd.f32 %v4271_v33, %v2650_v34  ;;  %v2651_v10 = vmul.f32 %v4270_v31, %v2637_v61  ;;  %v4998_v1 = vpop.f32.mrb[15].mxu0  ;;  %v5221_v34 = vld [vmem:[%s6517_s8 + $0x24] ss:$8 sps:$4 sm:$0xff]   ;;  %v5224_v61 = vld [vmem:[%s6517_s8 + $0x34] ss:$8 sps:$4 sm:$0xff]  }
 0x55b   : > { %v5225_v1 = vld [vmem:[%s6517_s8 + $0x40] ss:$8 sps:$4 sm:$0xff]  }
 0x55c   : > { %vm2661_vm0 = vcmp.gt.f32.partialorder %v2659_v36, 0.0  ;;  %v2663_v13 = vmul.f32 0.2, %v2659_v36  ;;  %v2660_v37 = vadd.f32 %v4271_v33, %v2651_v10  ;;  %v5216_v33 = vld [vmem:[%s6517_s8 + $0x10] ss:$8 sps:$4 sm:$0xff]  }
 0x55d   : > { %v5227_v10 = vld [vmem:[%s6517_s8 + $0x44] ss:$8 sps:$4 sm:$0xff]  }
 0x55e   : > { %v2665_v38 = vsel %vm2661_vm0, %v2659_v36, %v2663_v13  ;;  %vm2662_vm7 = vcmp.gt.f32.partialorder %v2660_v37, 0.0  ;;  %v2664_v39 = vmul.f32 0.2, %v2660_v37  ;;  %v5222_v36 = vld [vmem:[%s6517_s8 + $0x30] ss:$8 sps:$4 sm:$0xff]  }
 0x55f   : > { %v2667_v40 = vpack.c.bf16 %v2665_v38, %v2665_v38  ;;  %v5230_v13 = vld [vmem:[%s6517_s8 + $0x54] ss:$8 sps:$4 sm:$0xff]   ;;  %v5233_v38 = vld [vmem:[%s6517_s8 + $0x64] ss:$8 sps:$4 sm:$0xff]  }
 0x560   : > { %v2666_v41 = vsel %vm2662_vm7, %v2660_v37, %v2664_v39  ;;  %v5228_v37 = vld [vmem:[%s6517_s8 + $0x50] ss:$8 sps:$4 sm:$0xff]   ;;  %v5231_v39 = vld [vmem:[%s6517_s8 + $0x60] ss:$8 sps:$4 sm:$0xff]  }
 0x561   : > { %v2670_v42 = vshrl.u32 %v2667_v40, 16  ;;  %v2668_v43 = vpack.c.bf16 %v2666_v41, %v2666_v41  ;;  %v2673_v45 = vshll.u32 %v2667_v40, 16  ;;  %v5236_v40 = vld [vmem:[%s6517_s8 + $0x74] ss:$8 sps:$4 sm:$0xff]   ;;  %v5234_v41 = vld [vmem:[%s6517_s8 + $0x70] ss:$8 sps:$4 sm:$0xff]  }
 0x563   : > { %v2672_v44 = vrot.slane %v2670_v42, 7  ;;  %v2677_v46 = vshrl.u32 %v2668_v43, 16  ;;  %v2680_v49 = vshll.u32 %v2668_v43, 16  ;;  %v5239_v42 = vld [vmem:[%s6517_s8 + $0x104] ss:$8 sps:$4 sm:$0xff]  }
 0x564   : > { %v5237_v43 = vld [vmem:[%s6517_s8 + $0x100] ss:$8 sps:$4 sm:$0xff]  }
 0x565   : > { %v2675_v47 = vor.u32 %v2673_v45, %v2672_v44  ;;  %v2679_v48 = vrot.slane %v2677_v46, 7  ;;  %v5242_v44 = vld [vmem:[%s6517_s8 + $0x114] ss:$8 sps:$4 sm:$0xff]   ;;  %v5240_v45 = vld [vmem:[%s6517_s8 + $0x110] ss:$8 sps:$4 sm:$0xff]  }
 0x566   : > { %v5245_v46 = vld [vmem:[%s6517_s8 + $0x124] ss:$8 sps:$4 sm:$0xff]  }
 0x567   : > { %v2685_v50 = vsel %vm5972_vm3, 0, %v2675_v47  ;;  %v2682_v51 = vor.u32 %v2680_v49, %v2679_v48  ;;  %v5243_v47 = vld [vmem:[%s6517_s8 + $0x120] ss:$8 sps:$4 sm:$0xff]   ;;  %v5248_v48 = vld [vmem:[%s6517_s8 + $0x134] ss:$8 sps:$4 sm:$0xff]  }
 0x568   : > { %v6168_v52 = vsel %vm5977_vm4, %v2685_v50, 0  ;;  %v5251_v49 = vld [vmem:[%s6517_s8 + $0x144] ss:$8 sps:$4 sm:$0xff]   ;;  %v5249_v50 = vld [vmem:[%s6517_s8 + $0x140] ss:$8 sps:$4 sm:$0xff]  }
 0x569   : > { %v4288_v53 = vcombine.low %v6168_v52, %v6168_v52  ;;  %v2686_v54 = vsel %vm5972_vm3, 0, %v2682_v51  ;;  %v4289_v55 = vcombine.high %v6168_v52, %v6168_v52  ;;  %v5254_v51 = vld [vmem:[%s6517_s8 + $0x154] ss:$8 sps:$4 sm:$0xff]  }
 0x56a   : > { %v6178_v56 = vsel %vm5977_vm4, %v2686_v54, 0  ;;  %v5255_v54 = vld [vmem:[%s6517_s8 + $0x160] ss:$8 sps:$4 sm:$0xff]  }
 0x56b   : > { %v4290_v57 = vcombine.low %v6178_v56, %v6178_v56  ;;  %v4291_v59 = vcombine.high %v6178_v56, %v6178_v56  ;;  %v2733_v63 = vshrl.u32 %v4288_v53, 16  ;;  %v2736_v2 = vshll.u32 %v4288_v53, 16 }
 0x56c   : > { %v4309_v7 = vcombine.low %v6168_v52, %v6178_v56  ;;  %v4342_v12 = vrot.slane %v4288_v53, 9  ;;  %v3031_v14 = vrot.slane %v4289_v55, 5  ;;  %v2742_v19 = vshll.u32 %v4289_v55, 16  ;;  %v5252_v52 = vld [vmem:[%s6517_s8 + $0x150] ss:$8 sps:$4 sm:$0xff]  }
 0x56d   : > { %v2735_v20 = vrot.slane %v2733_v63, 4  ;;  %v2738_v58 = vrot.slane %v2736_v2, 5  ;;  %v2747_v16 = vshrl.u32 %v4290_v57, 16  ;;  %v2750_v18 = vshll.u32 %v4290_v57, 16  ;;  %v5257_v53 = vld [vmem:[%s6517_s8 + $0x164] ss:$8 sps:$4 sm:$0xff]  }
 0x56e   : > { %v2756_v21 = vshll.u32 %v4291_v59, 16  ;;  %v6188_v60 = vsel %vm5521_vm13, %v4342_v12, %v3031_v14  ;;  %v4343_v62 = vrot.slane %v4290_v57, 9  ;;  %v3035_v25 = vrot.slane %v4291_v59, 5  ;;  %v5260_v55 = vld [vmem:[%s6517_s8 + $0x174] ss:$8 sps:$4 sm:$0xff]   ;;  %v5261_v57 = vld [vmem:[%s6520_s11 + $0xc0] sm:$0xff]  }
 0x56f   : > { %v2739_v0 = vor.u32 %v2738_v58, %v2735_v20  ;;  %v2749_v23 = vrot.slane %v2747_v16, 4  ;;  %v2752_v24 = vrot.slane %v2750_v18, 5  ;;  %v2744_v29 = vrot.slane %v2742_v19, 5  ;;  %v5258_v56 = vld [vmem:[%s6517_s8 + $0x170] ss:$8 sps:$4 sm:$0xff]   ;;  %v5262_v59 = vld [vmem:[%s6520_s11 + $0x80] sm:$0xff]   ;;  %4653 = vmatprep.subr.bf16.mxu0 %v5261_v57 }
 0x570   : > { %v6192_v17 = vsel %vm5521_vm13, %v4343_v62, %v3035_v25  ;;  %v2758_v3 = vrot.slane %v2756_v21, 5  ;;  %4654 = vmatpush3.bf16.msra.mxu0 %v5262_v59  ;;  %v5263_v63 = vld [vmem:[%s6520_s11 + $0xc8] sm:$0xff]   ;;  %v5266_v12 = vld [vmem:[%s6520_s11 + $0x90] sm:$0xff]   ;;  %v5267_v14 = vld [vmem:[%s6520_s11 + $0xd8] sm:$0xff]  }
 0x571   : > { %v2740_v26 = vrot.slane %v2739_v0, 4  ;;  %v2753_v11 = vor.u32 %v2752_v24, %v2749_v23  ;;  %v4344_v22 = vcombine.low %v6188_v60, %v6192_v17  ;;  %v5264_v2 = vld [vmem:[%s6520_s11 + $0x88] sm:$0xff]   ;;  %4655 = vmatprep.subr.bf16.mxu0 %v5263_v63  ;;  %v5268_v20 = vld [vmem:[%s6520_s11 + $0x98] sm:$0xff]   ;;  %v5269_v58 = vld [vmem:[%s6520_s11 + $0xe0] sm:$0xff]   ;;  %v3170_v24 = vlaneseq }
 0x572   : > { %v5270_v16 = vld [vmem:[%s6520_s11 + $0xa0] sm:$0xff]   ;;  %v5271_v18 = vld [vmem:[%s6520_s11 + $0xe8] sm:$0xff]   ;;  %v5273_v21 = vld [vmem:[%s6520_s11 + $0xf0] sm:$0xff]  }
 0x573   : > { %v2754_v30 = vrot.slane %v2753_v11, 4  ;;  %v2745_v5 = vsel %vm5503_vm10, %v2740_v26, %v2744_v29  ;;  %v5272_v19 = vld [vmem:[%s6520_s11 + $0xa8] sm:$0xff]   ;;  %v5274_v60 = vld [vmem:[%s6520_s11 + $0xb0] sm:$0xff]   ;;  %v5275_v62 = vld [vmem:[%s6520_s11 + $0xf8] sm:$0xff]   ;;  %v3171_v25 = vshrl.u32 %v3170_v24, 7 }
 0x574   : > { %4656 = vmatpush3.bf16.msra.mxu0 %v5264_v2  ;;  %v5276_v0 = vld [vmem:[%s6520_s11 + $0xb8] sm:$0xff]   ;;  %v5277_v23 = vld [vmem:[%s6520_s11 + $0x40] sm:$0xff]  }
 0x575   : > { %v2759_v6 = vsel %vm5503_vm10, %v2754_v30, %v2758_v3  ;;  %v3172_v26 = vsub.s32 0, %v3171_v25  ;;  %v3168_v11 = vld [vmem:[%s6518_s9] sm:$0x3]  ;;  %v3176_v17 = vsub.s32 1, %v3171_v25 }
 0x576   : > { %v4292_v31 = vcombine.low %v2745_v5, %v2759_v6 }
 0x577   : > { %v3173_v29 = vrot.slane %v3168_v11, %v3172_v26  ;;  %v3177_v30 = vrot.slane %v3168_v11, %v3176_v17 }
 0x578   : > { %2877 = vmatmul.mubr.bf16.vlgmr.msra.gmra.mrb[12].mxu1 %v4292_v31 }
 0x579   : > { %2970 = vmatpush1.bf16.msra.mxu1 %v5213_v4  ;;  %3001 = vmatprep.mubr.bf16.mxu1 %v5323_v27 }
 0x57a   : > { %2971 = vmatprep.subr.bf16.mxu1 %v5218_v32 }
 0x57d   : > { %2972 = vmatpush1.bf16.msra.mxu1 %v5216_v33 }
 0x57e   : > { %2973 = vmatprep.subr.bf16.mxu1 %v5221_v34 }
 0x581   : > { %2974 = vmatpush1.bf16.msra.mxu1 %v5219_v35 }
 0x582   : > { %2975 = vmatprep.subr.bf16.mxu1 %v5224_v61 }
 0x585   : > { %2976 = vmatpush1.bf16.msra.mxu1 %v5222_v36 }
 0x586   : > { %2977 = vmatprep.subr.bf16.mxu1 %v5227_v10 }
 0x589   : > { %2978 = vmatpush1.bf16.msra.mxu1 %v5225_v1 }
 0x58a   : > { %2979 = vmatprep.subr.bf16.mxu1 %v5230_v13 }
 0x58d   : > { %2980 = vmatpush1.bf16.msra.mxu1 %v5228_v37 }
 0x58e   : > { %2981 = vmatprep.subr.bf16.mxu1 %v5233_v38 }
 0x591   : > { %2982 = vmatpush1.bf16.msra.mxu1 %v5231_v39 }
 0x592   : > { %2983 = vmatprep.subr.bf16.mxu1 %v5236_v40 }
 0x595   : > { %2984 = vmatpush1.bf16.msra.mxu1 %v5234_v41 }
 0x596   : > { %3121 = vmatprep.subr.bf16.mxu1 %v5239_v42 }
 0x598   : > { %3002 = vmatmul.mubr.bf16.vlgmr.msra.gmra.mrb[12].mxu1 %v4309_v7  ;;  %v5265_v7 = vld [vmem:[%s6520_s11 + $0xd0] sm:$0xff]  }
 0x599   : > { %3122 = vmatpush1.bf16.msra.mxu1 %v5237_v43  ;;  %3153 = vmatprep.mubr.bf16.mxu1 %v5323_v27  ;;  %v5246_v27 = vld [vmem:[%s6517_s8 + $0x130] ss:$8 sps:$4 sm:$0xff]  }
 0x59a   : > { %3123 = vmatprep.subr.bf16.mxu1 %v5242_v44  ;;  %4657 = vmatprep.subr.bf16.mxu0 %v5265_v7 }
 0x59b   : > { %4658 = vmatpush3.bf16.msra.mxu0 %v5266_v12 }
 0x59c   : > { %4659 = vmatprep.subr.bf16.mxu0 %v5267_v14 }
 0x59d   : > { %3124 = vmatpush1.bf16.msra.mxu1 %v5240_v45 }
 0x59e   : > { %3125 = vmatprep.subr.bf16.mxu1 %v5245_v46 }
 0x59f   : > { %4660 = vmatpush3.bf16.msra.mxu0 %v5268_v20 }
 0x5a0   : > { %4661 = vmatprep.subr.bf16.mxu0 %v5269_v58 }
 0x5a1   : > { %3126 = vmatpush1.bf16.msra.mxu1 %v5243_v47 }
 0x5a2   : > { %3127 = vmatprep.subr.bf16.mxu1 %v5248_v48 }
 0x5a3   : > { %4662 = vmatpush3.bf16.msra.mxu0 %v5270_v16 }
 0x5a4   : > { %4663 = vmatprep.subr.bf16.mxu0 %v5271_v18 }
 0x5a5   : > { %3128 = vmatpush1.bf16.msra.mxu1 %v5246_v27 }
 0x5a6   : > { %3129 = vmatprep.subr.bf16.mxu1 %v5251_v49 }
 0x5a7   : > { %4664 = vmatpush3.bf16.msra.mxu0 %v5272_v19 }
 0x5a8   : > { %4665 = vmatprep.subr.bf16.mxu0 %v5273_v21 }
 0x5a9   : > { %3130 = vmatpush1.bf16.msra.mxu1 %v5249_v50 }
 0x5aa   : > { %3131 = vmatprep.subr.bf16.mxu1 %v5254_v51 }
 0x5ab   : > { %4666 = vmatpush3.bf16.msra.mxu0 %v5274_v60 }
 0x5ac   : > { %4667 = vmatprep.subr.bf16.mxu0 %v5275_v62 }
 0x5ad   : > { %3132 = vmatpush1.bf16.msra.mxu1 %v5252_v52 }
 0x5ae   : > { %3133 = vmatprep.subr.bf16.mxu1 %v5257_v53 }
 0x5af   : > { %4668 = vmatpush3.bf16.msra.mxu0 %v5276_v0 }
 0x5b0   : > { %4675 = vmatprep.subr.bf16.mxu0 %v5277_v23 }
 0x5b1   : > { %3134 = vmatpush1.bf16.msra.mxu1 %v5255_v54 }
 0x5b2   : > { %3135 = vmatprep.subr.bf16.mxu1 %v5260_v55 }
 0x5b5   : > { %3136 = vmatpush1.bf16.msra.mxu1 %v5258_v56 }
 0x5b8   : > { %3154 = vmatmul.mubr.bf16.vlgmr.msra.gmra.mrb[12].mxu1 %v4344_v22  ;;  %v3184_v22 = vld [vmem:[%s6519_s10] sm:$0x3] }
 0x5b9   : > { %v3189_v3 = vrot.slane %v3184_v22, %v3172_v26  ;;  %v3193_v5 = vrot.slane %v3184_v22, %v3176_v17 }
 0x68b   : > { %v3155_v4 = vpop.f32.mrb[12].mxu1 }
 0x68c   : > { %v3180_v6 = vmul.f32 %v3173_v29, %v3155_v4  ;;  %v3157_v31 = vpop.f32.mrb[13].mxu1 }
 0x68d   : > { %v3181_v32 = vmul.f32 %v3177_v30, %v3157_v31  ;;  %v3159_v33 = vpop.f32.mrb[14].mxu1 }
 0x68e   : > { %v3196_v34 = vadd.f32 %v3189_v3, %v3180_v6  ;;  %v3182_v35 = vmul.f32 %v3173_v29, %v3159_v33  ;;  %v3161_v61 = vpop.f32.mrb[15].mxu1 }
 0x68f   : > { %v3197_v36 = vadd.f32 %v3193_v5, %v3181_v32  ;;  %v3183_v10 = vmul.f32 %v3177_v30, %v3161_v61 }
 0x690   : > { %vm3200_vm14 = vcmp.gt.f32.partialorder %v3196_v34, 0.0  ;;  %v3204_v1 = vmul.f32 0.25, %v3196_v34  ;;  %v3198_v13 = vadd.f32 %v3189_v3, %v3182_v35 }
 0x691   : > { %vm3201_vm5 = vcmp.gt.f32.partialorder %v3197_v36, 0.0  ;;  %v3205_v37 = vmul.f32 0.25, %v3197_v36  ;;  %v3199_v38 = vadd.f32 %v3193_v5, %v3183_v10 }
 0x692   : > { %v3208_v39 = vsel %vm3200_vm14, %v3196_v34, %v3204_v1  ;;  %vm3202_vm6 = vcmp.gt.f32.partialorder %v3198_v13, 0.0  ;;  %v3206_v40 = vmul.f32 0.25, %v3198_v13 }
 0x693   : > { %v3212_v41 = vpack.c.bf16 %v3208_v39, %v3208_v39  ;;  %v3209_v42 = vsel %vm3201_vm5, %v3197_v36, %v3205_v37  ;;  %vm3203_vm8 = vcmp.gt.f32.partialorder %v3199_v38, 0.0  ;;  %v3207_v43 = vmul.f32 0.25, %v3199_v38 }
 0x694   : > { %v3213_v44 = vpack.c.bf16 %v3209_v42, %v3209_v42  ;;  %v3210_v45 = vsel %vm3202_vm6, %v3198_v13, %v3206_v40 }
 0x695   : > { %v3217_v46 = vshrl.u32 %v3212_v41, 16  ;;  %v3214_v47 = vpack.c.bf16 %v3210_v45, %v3210_v45  ;;  %v3211_v48 = vsel %vm3203_vm8, %v3199_v38, %v3207_v43  ;;  %v3220_v51 = vshll.u32 %v3212_v41, 16  ;;  %v5279_v45 = vld [vmem:[%s6520_s11 + $0x48] sm:$0xff]  }
 0x696   : > { %v3224_v27 = vshrl.u32 %v3213_v44, 16  ;;  %v3215_v49 = vpack.c.bf16 %v3211_v48, %v3211_v48  ;;  %v3227_v54 = vshll.u32 %v3213_v44, 16  ;;  %v5283_v48 = vld [vmem:[%s6520_s11 + $0x58] sm:$0xff]  }
 0x697   : > { %v3219_v50 = vrot.slane %v3217_v46, 7  ;;  %v3231_v52 = vshrl.u32 %v3214_v47, 16  ;;  %v3234_v59 = vshll.u32 %v3214_v47, 16  ;;  %v5280_v46 = vld [vmem:[%s6520_s11 + $0x8] sm:$0xff]   ;;  %v5282_v47 = vld [vmem:[%s6520_s11 + $0x10] sm:$0xff]  }
 0x698   : > { %v3226_v53 = vrot.slane %v3224_v27, 7  ;;  %v3238_v55 = vshrl.u32 %v3215_v49, 16  ;;  %v3241_v7 = vshll.u32 %v3215_v49, 16  ;;  %v5284_v27 = vld [vmem:[%s6520_s11 + $0x18] sm:$0xff]   ;;  %v5285_v49 = vld [vmem:[%s6520_s11 + $0x60] sm:$0xff]  }
 0x699   : > { %v3222_v56 = vor.u32 %v3220_v51, %v3219_v50  ;;  %v3233_v57 = vrot.slane %v3231_v52, 7  ;;  %v5286_v50 = vld [vmem:[%s6520_s11 + $0x20] sm:$0xff]   ;;  %v5287_v51 = vld [vmem:[%s6520_s11 + $0x68] sm:$0xff]  }
 0x69a   : > { %v3229_v63 = vor.u32 %v3227_v54, %v3226_v53  ;;  %v3240_v2 = vrot.slane %v3238_v55, 7  ;;  %v5288_v52 = vld [vmem:[%s6520_s11 + $0x28] sm:$0xff]   ;;  %v5289_v53 = vld [vmem:[%s6520_s11 + $0x70] sm:$0xff]   ;;  %v5291_v55 = vld [vmem:[%s6520_s11 + $0x78] sm:$0xff]  }
 0x69b   : > { %v3248_v12 = vsel %vm5972_vm3, 0, %v3222_v56  ;;  %v3236_v14 = vor.u32 %v3234_v59, %v3233_v57  ;;  %v5290_v54 = vld [vmem:[%s6520_s11 + $0x30] sm:$0xff]   ;;  %v5292_v56 = vld [vmem:[%s6520_s11 + $0x38] sm:$0xff]   ;;  %v5293_v57 = vld [vmem:[%s6520_s11 + $0x140] sm:$0xff]  }
 0x69c   : > { %v3249_v20 = vsel %vm5972_vm3, 0, %v3229_v63  ;;  %v3243_v58 = vor.u32 %v3241_v7, %v3240_v2  ;;  %v6361_v16 = vsel %vm5977_vm4, %v3248_v12, 0  ;;  %v5294_v59 = vld [vmem:[%s6520_s11 + $0x100] sm:$0xff]   ;;  %v5295_v63 = vld [vmem:[%s6520_s11 + $0x148] sm:$0xff]   ;;  %v5297_v7 = vld [vmem:[%s6520_s11 + $0x150] sm:$0xff]  }
 0x69d   : > { %v3250_v18 = vsel %vm5972_vm3, 0, %v3236_v14  ;;  %v3253_v19 = vsel %vm5977_vm4, %v3249_v20, 0  ;;  %v5296_v2 = vld [vmem:[%s6520_s11 + $0x108] sm:$0xff]   ;;  %v5298_v12 = vld [vmem:[%s6520_s11 + $0x110] sm:$0xff]   ;;  %v5299_v14 = vld [vmem:[%s6520_s11 + $0x158] sm:$0xff]  }
 0x69e   : > { %v3251_v21 = vsel %vm5972_vm3, 0, %v3243_v58  ;;  %v6371_v60 = vsel %vm5977_vm4, %v3250_v18, 0  ;;  %v4393_v62 = vcombine.low %v6361_v16, %v3253_v19  ;;  %v4394_v0 = vcombine.high %v6361_v16, %v3253_v19  ;;  %v5300_v20 = vld [vmem:[%s6520_s11 + $0x118] sm:$0xff]   ;;  %v5301_v58 = vld [vmem:[%s6520_s11 + $0x160] sm:$0xff]   ;;  %v5303_v18 = vld [vmem:[%s6520_s11 + $0x168] sm:$0xff]  }
 0x69f   : > { %v3255_v23 = vsel %vm5977_vm4, %v3251_v21, 0  ;;  %v4415_v24 = vcombine.low %v6361_v16, %v6371_v60  ;;  %v5302_v16 = vld [vmem:[%s6520_s11 + $0x120] sm:$0xff]   ;;  %v5305_v21 = vld [vmem:[%s6520_s11 + $0x170] sm:$0xff]  }
 0x6a0   : > { %v4395_v25 = vcombine.low %v6371_v60, %v3255_v23  ;;  %v4396_v26 = vcombine.high %v6371_v60, %v3255_v23  ;;  %v3338_v8 = vshrl.u32 %v4393_v62, 16  ;;  %v3341_v11 = vshll.u32 %v4393_v62, 16  ;;  %v5306_v60 = vld [vmem:[%s6520_s11 + $0x130] sm:$0xff]  }
 0x6a1   : > { %v3347_v17 = vshll.u32 %v4394_v0, 16  ;;  %v4416_v22 = vcombine.low %v3253_v19, %v3255_v23  ;;  %v4465_v29 = vrot.slane %v4393_v62, 9  ;;  %v3686_v30 = vrot.slane %v4394_v0, 5  ;;  %v5304_v19 = vld [vmem:[%s6520_s11 + $0x128] sm:$0xff]   ;;  %v5307_v62 = vld [vmem:[%s6520_s11 + $0x178] sm:$0xff]  }
 0x6a2   : > { %v3340_v3 = vrot.slane %v3338_v8, 4  ;;  %v3343_v4 = vrot.slane %v3341_v11, 5  ;;  %v3352_v5 = vshrl.u32 %v4395_v25, 16  ;;  %v3355_v6 = vshll.u32 %v4395_v25, 16  ;;  %v5308_v0 = vld [vmem:[%s6520_s11 + $0x138] sm:$0xff]  }
 0x6a3   : > { %v3361_v31 = vshll.u32 %v4396_v26, 16  ;;  %v6383_v9 = vsel %vm5521_vm13, %v4465_v29, %v3686_v30  ;;  %v4466_v32 = vrot.slane %v4395_v25, 9  ;;  %v3690_v61 = vrot.slane %v4396_v26, 5 }
 0x6a4   : > { %v3344_v33 = vor.u32 %v3343_v4, %v3340_v3  ;;  %v3354_v34 = vrot.slane %v3352_v5, 4  ;;  %v3357_v35 = vrot.slane %v3355_v6, 5  ;;  %v3349_v10 = vrot.slane %v3347_v17, 5 }
 0x6a5   : > { %v6387_v13 = vsel %vm5521_vm13, %v4466_v32, %v3690_v61  ;;  %v3363_v41 = vrot.slane %v3361_v31, 5 }
 0x6a6   : > { %v3345_v36 = vrot.slane %v3344_v33, 4  ;;  %v3358_v1 = vor.u32 %v3357_v35, %v3354_v34  ;;  %v4467_v37 = vcombine.low %v6383_v9, %v6387_v13  ;;  %v4468_v38 = vcombine.high %v6383_v9, %v6387_v13  ;;  %v4485_v9 = vld [vmem:[%s6521_s12] ss:$0 sm:$0xff] }
 0x6a8   : > { %v3350_v39 = vsel %vm5503_vm10, %v3345_v36, %v3349_v10  ;;  %v3359_v40 = vrot.slane %v3358_v1, 4  ;;  %v4486_v10 = vld [vmem:[%s6522_s13] ss:$0 sm:$0xff] }
 0x6aa   : > { %v3364_v42 = vsel %vm5503_vm10, %v3359_v40, %v3363_v41 }
 0x6ab   : > { %v4397_v43 = vcombine.low %v3350_v39, %v3364_v42  ;;  %v4398_v44 = vcombine.high %v3350_v39, %v3364_v42 }
 0x6ad   : > { %3501 = vmatprep.mubr.bf16.mxu0 %v4398_v44 }
 0x6ae   : > { %3502 = vmatmul.mubr.bf16.vlgmr.msra.gmra.mrb[16].mxu0 %v4397_v43 }
 0x6af   : > { %4676 = vmatpush3.bf16.msra.mxu0 %v5278_v28  ;;  %3642 = vmatprep.mubr.bf16.mxu0 %v4416_v22 }
 0x6b0   : > { %4677 = vmatprep.subr.bf16.mxu0 %v5279_v45 }
 0x6b3   : > { %4678 = vmatpush3.bf16.msra.mxu0 %v5280_v46 }
 0x6b4   : > { %4679 = vmatprep.subr.bf16.mxu0 %v5281_v15 }
 0x6b7   : > { %4680 = vmatpush3.bf16.msra.mxu0 %v5282_v47 }
 0x6b8   : > { %4681 = vmatprep.subr.bf16.mxu0 %v5283_v48 }
 0x6bb   : > { %4682 = vmatpush3.bf16.msra.mxu0 %v5284_v27 }
 0x6bc   : > { %4683 = vmatprep.subr.bf16.mxu0 %v5285_v49 }
 0x6bf   : > { %4684 = vmatpush3.bf16.msra.mxu0 %v5286_v50 }
 0x6c0   : > { %4685 = vmatprep.subr.bf16.mxu0 %v5287_v51 }
 0x6c3   : > { %4686 = vmatpush3.bf16.msra.mxu0 %v5288_v52 }
 0x6c4   : > { %4687 = vmatprep.subr.bf16.mxu0 %v5289_v53 }
 0x6c7   : > { %4688 = vmatpush3.bf16.msra.mxu0 %v5290_v54 }
 0x6c8   : > { %4689 = vmatprep.subr.bf16.mxu0 %v5291_v55 }
 0x6cb   : > { %4690 = vmatpush3.bf16.msra.mxu0 %v5292_v56 }
 0x6cc   : > { %4697 = vmatprep.subr.bf16.mxu0 %v5293_v57 }
 0x6ce   : > { %3643 = vmatmul.mubr.bf16.vlgmr.msra.gmra.mrb[20].mxu0 %v4415_v24 }
 0x6cf   : > { %4698 = vmatpush3.bf16.msra.mxu0 %v5294_v59  ;;  %3828 = vmatprep.mubr.bf16.mxu0 %v4468_v38 }
 0x6d0   : > { %4699 = vmatprep.subr.bf16.mxu0 %v5295_v63 }
 0x6d3   : > { %4700 = vmatpush3.bf16.msra.mxu0 %v5296_v2 }
 0x6d4   : > { %4701 = vmatprep.subr.bf16.mxu0 %v5297_v7 }
 0x6d7   : > { %4702 = vmatpush3.bf16.msra.mxu0 %v5298_v12 }
 0x6d8   : > { %4703 = vmatprep.subr.bf16.mxu0 %v5299_v14 }
 0x6db   : > { %4704 = vmatpush3.bf16.msra.mxu0 %v5300_v20 }
 0x6dc   : > { %4705 = vmatprep.subr.bf16.mxu0 %v5301_v58 }
 0x6df   : > { %4706 = vmatpush3.bf16.msra.mxu0 %v5302_v16 }
 0x6e0   : > { %4707 = vmatprep.subr.bf16.mxu0 %v5303_v18 }
 0x6e3   : > { %4708 = vmatpush3.bf16.msra.mxu0 %v5304_v19 }
 0x6e4   : > { %4709 = vmatprep.subr.bf16.mxu0 %v5305_v21 }
 0x6e7   : > { %4710 = vmatpush3.bf16.msra.mxu0 %v5306_v60 }
 0x6e8   : > { %4711 = vmatprep.subr.bf16.mxu0 %v5307_v62 }
 0x6eb   : > { %4712 = vmatpush3.bf16.msra.mxu0 %v5308_v0 }
 0x6ee   : > { %3829 = vmatmul.mubr.bf16.vlgmr.msra.gmra.mrb[24].mxu0 %v4467_v37 }
 0x781   : > { %v4669_v23 = vpop.f32.mrb[16].mxu0 }
 0x782   : > { %v4670_v24 = vpop.f32.mrb[17].mxu0 }
 0x783   : > { %v4671_v25 = vadd.f32 %v4670_v24, %v4669_v23  ;;  %v4672_v26 = vpop.f32.mrb[18].mxu0 }
 0x784   : > { %v4673_v8 = vpop.f32.mrb[19].mxu0 }
 0x785   : > { %v4674_v11 = vadd.f32 %v4673_v8, %v4672_v26 }
 0x7a1   : > { %v4691_v17 = vpop.f32.mrb[20].mxu0 }
 0x7a2   : > { %v4692_v22 = vpop.f32.mrb[21].mxu0 }
 0x7a3   : > { %v4693_v29 = vadd.f32 %v4692_v22, %v4691_v17  ;;  %v4694_v30 = vpop.f32.mrb[22].mxu0 }
 0x7a4   : > { %v4695_v3 = vpop.f32.mrb[23].mxu0 }
 0x7a5   : > { %v3645_v4 = vadd.f32 %v4693_v29, %v4671_v25  ;;  %v4696_v5 = vadd.f32 %v4695_v3, %v4694_v30 }
 0x7a7   : > { %v3648_v6 = vadd.f32 %v4696_v5, %v4674_v11 }
 0x7c1   : > { %v4713_v31 = vpop.f32.mrb[24].mxu0 }
 0x7c2   : > { %v4714_v32 = vpop.f32.mrb[25].mxu0 }
 0x7c3   : > { %v4715_v33 = vadd.f32 %v4714_v32, %v4713_v31  ;;  %v4716_v34 = vpop.f32.mrb[26].mxu0 }
 0x7c4   : > { %v4717_v35 = vpop.f32.mrb[27].mxu0 }
 0x7c5   : > { %v3837_v61 = vadd.f32 %v4715_v33, %v3645_v4  ;;  %v4718_v36 = vadd.f32 %v4717_v35, %v4716_v34 }
 0x7c7   : > { %v3846_v1 = vmul.f32 %v4485_v9, %v3837_v61  ;;  %v3838_v13 = vadd.f32 %v4718_v36, %v3648_v6 }
 0x7c9   : > { %v3855_v37 = vadd.f32 %v4486_v10, %v3846_v1  ;;  %v3847_v38 = vmul.f32 %v4485_v9, %v3838_v13 }
 0x7cb   : > { %v3859_v39 = vmin.f32 %v3855_v37, 0.0  ;;  %v3856_v40 = vadd.f32 %v4486_v10, %v3847_v38  ;;  %vm3857_vm10 = vcmp.gt.f32.partialorder %v3855_v37, 0.0 }
 0x7cd   : > { %v3861_v41 = vmul.f32 1.442695, %v3859_v39  ;;  %v3860_v42 = vmin.f32 %v3856_v40, 0.0  ;;  %vm3858_vm13 = vcmp.gt.f32.partialorder %v3856_v40, 0.0 }
 0x7cf   : > { %5309 = vpow2.f32 %v3861_v41  ;;  %v3863_v43 = vmul.f32 1.442695, %v3860_v42 }
 0x7d1   : > { %5311 = vpow2.f32 %v3863_v43 }
 0x7d9   : > { %v5310_v44 = vpop.eup %5309 }
 0x7da   : > { %v4487_v28 = vadd.f32 -1.0, %v5310_v44 }
 0x7db   : > { %v5312_v45 = vpop.eup %5311 }
 0x7dc   : > { %v3867_v46 = vmul.f32 0.3, %v4487_v28  ;;  %v4488_v15 = vadd.f32 -1.0, %v5312_v45 }
 0x7de   : > { %v3869_v47 = vsel %vm3857_vm10, %v3855_v37, %v3867_v46  ;;  %v3868_v48 = vmul.f32 0.3, %v4488_v15 }
 0x7df   : > { %v3871_v27 = vrot.slane %v3869_v47, 4 }
 0x7e0   : > { %v3870_v49 = vsel %vm3858_vm13, %v3856_v40, %v3868_v48 }
 0x7e1   : > { %v3872_v50 = vadd.f32 %v3871_v27, %v3869_v47  ;;  %v3877_v51 = vrot.slane %v3870_v49, 4 }
 0x7e3   : > { %v3873_v52 = vrot.slane %v3872_v50, 2  ;;  %v3878_v53 = vadd.f32 %v3877_v51, %v3870_v49 }
 0x7e5   : > { %v3874_v54 = vadd.f32 %v3873_v52, %v3872_v50  ;;  %v3879_v55 = vrot.slane %v3878_v53, 2 }
 0x7e7   : > { %v3875_v56 = vrot.slane %v3874_v54, 1  ;;  %v3880_v57 = vadd.f32 %v3879_v55, %v3878_v53 }
 0x7e9   : > { %v3876_v59 = vadd.f32 %v3875_v56, %v3874_v54  ;;  %v3881_v63 = vrot.slane %v3880_v57, 1 }
 0x7eb   : > { %v3884_v2 = vmul.f32 0.125, %v3876_v59  ;;  %v3882_v7 = vadd.f32 %v3881_v63, %v3880_v57 }
 0x7ed   : > { %3886 = vst [vmem:[%s470_s16] sm:$0x1] %v3884_v2  ;;  %v3885_v12 = vmul.f32 0.125, %v3882_v7 }
 0x7ef   : > { %3887 = vst [vmem:[%s470_s16 + $0x1] sm:$0x1] %v3885_v12 }
 0x7f0 PF: > { %s24_s29 = sadd.s32 1, %s5319_s29  }
 0x7f1   : > { %p21_p4 = scmp.ge.s32.totalorder %s24_s29, 4  }
 0x7f3   :  { %23 = sbr.rel (!%p21_p4) target bundleno = 1 (0x1), region = 124 }

</bundles_post_ra>
